<compile_context>
chip_gen: v7x
topology: tpu7x:2x2x1
jax: 0.10.0
libtpu: 0.0.40
codegen_flags: <defaults>
</compile_context>

<pallas_src>
import functools

import numpy as np
import jax
import jax.numpy as jnp
from jax import lax
from jax.experimental import pallas as pl
from jax.experimental.pallas import tpu as pltpu


_QUERY_SENTINEL = -1.0e18   # padded queries: far from everything
_REF_SENTINEL = 1.0e18      # padded reference points: never inside any radius


def _round_up(x, m):
    return ((x + m - 1) // m) * m


def _ball_query_kernel(flags_ref, q_ref, pt_ref, g_ref, out_ref, cnt_ref, *,
                       k, radius):
    """One (batch, query-tile, reference-tile) grid step."""
    bi = pl.program_id(0)
    qi = pl.program_id(1)
    ni = pl.program_id(2)

    @pl.when(ni == 0)
    def _init():
        cnt_ref[...] = jnp.zeros_like(cnt_ref)
        out_ref[...] = jnp.zeros_like(out_ref)

    # Tile-level AABB pruning (feedback #2): skip the whole body when the two
    # tiles' bounding boxes are farther apart than `radius` (conservative).
    @pl.when(flags_ref[bi, qi, ni] > 0)
    def _compute():
        q = q_ref[...]            # (TQ, 3)   query coordinates (f32)
        pt = pt_ref[...]          # (3, TN)   reference coordinates, lane-major (f32)
        g = g_ref[...]            # (TN, 12)  bf16 gather table
        tq = q.shape[0]
        tn = pt.shape[1]

        # Pairwise squared distances, exact f32 on the VPU (no MXU rounding so
        # the radius test matches the plain elementwise reference).
        d2 = jnp.zeros((tq, tn), jnp.float32)
        for c in range(3):
            diff = q[:, c:c + 1] - pt[c:c + 1, :]          # (TQ,1)-(1,TN)
            d2 = d2 + diff * diff
        mask = d2 <= jnp.float32(radius * radius)          # (TQ, TN)
        mb = mask.astype(jnp.bfloat16)                     # 0/1, exact in bf16

        # Exclusive prefix count along the reference (lane) axis on the MXU
        # (feedback #1): per 128-lane block, one bf16 matmul against a constant
        # strictly-upper-triangular matrix gives the in-block exclusive count
        # (<=127, exact); a tiny running offset chains blocks and carries the
        # count from previous reference tiles (cnt_ref).
        row = lax.broadcasted_iota(jnp.int32, (128, 128), 0)
        col = lax.broadcasted_iota(jnp.int32, (128, 128), 1)
        tri = (row < col).astype(jnp.bfloat16)             # U[i,l] = 1 iff i < l

        off = cnt_ref[...]                                 # (TQ, 1) carried count
        rank_parts = []
        for j in range(tn // 128):
            blk = mb[:, 128 * j:128 * (j + 1)]             # (TQ, 128)
            excl = jnp.dot(blk, tri, preferred_element_type=jnp.float32)
            rank_parts.append(excl + off)                  # global exclusive rank
            off = off + excl[:, 127:128] + blk[:, 127:128].astype(jnp.float32)
        rank = jnp.concatenate(rank_parts, axis=1)         # (TQ, TN) exact f32 ints
        cnt_ref[...] = off                                 # carry to next ref tile

        # Slot id of every in-radius pair; -1 marks out-of-radius.
        slot = jnp.where(mask, rank, jnp.float32(-1.0))

        # Gather slot s of every query with one DEFAULT-precision bf16 matmul:
        # sel has at most one nonzero per row, so the f32 accumulation is exact
        # and picks g's pre-split columns exactly (feedback #3/#4).  The same
        # RHS g is reused by every slot.
        for s in range(k):
            sel = (slot == jnp.float32(s)).astype(jnp.bfloat16)     # one-hot rows
            part = jnp.dot(sel, g, preferred_element_type=jnp.float32)  # (TQ, 12)
            cur = out_ref[:, 12 * s:12 * (s + 1)]
            out_ref[:, 12 * s:12 * (s + 1)] = cur + part


def _split3_bf16(x):
    """3-way bf16 split of an f32 array: hi + mid + lo reconstructs x (<~2^-27)."""
    hi = x.astype(jnp.bfloat16)
    r1 = x - hi.astype(jnp.float32)
    mid = r1.astype(jnp.bfloat16)
    lo = (r1 - mid.astype(jnp.float32)).astype(jnp.bfloat16)
    return hi, mid, lo


def ball_query_pallas(points1, points2, *, k, radius, tq=256, tn=512):
    """points1: (B, N1, 3) queries.  points2: (B, N2, 3) reference set."""
    points1 = points1.astype(jnp.float32)
    points2 = points2.astype(jnp.float32)
    b, n1, _ = points1.shape
    n2 = points2.shape[1]

    tq = min(tq, _round_up(n1, 8))        # query tile (sublane axis)
    tn = min(tn, _round_up(n2, 128))      # reference tile (lane axis)
    assert tq % 8 == 0 and tn % 128 == 0
    n1p = _round_up(n1, tq)
    n2p = _round_up(n2, tn)
    # Indices travel as 3 x 8-bit bf16 chunks -> exact only below 2^24 points.
    assert n2p < (1 << 24), "reference set too large for exact indexing"

    if n1p > n1:
        points1 = jnp.pad(points1, ((0, 0), (0, n1p - n1), (0, 0)),
                          constant_values=_QUERY_SENTINEL)
    if n2p > n2:
        points2 = jnp.pad(points2, ((0, 0), (0, n2p - n2), (0, 0)),
                          constant_values=_REF_SENTINEL)

    # ---- tile-pair AABB pruning flags (conservative; feedback #2) ----------
    nqt, nnt = n1p // tq, n2p // tn
    qmin = points1.reshape(b, nqt, tq, 3).min(axis=2)      # (b, nqt, 3)
    qmax = points1.reshape(b, nqt, tq, 3).max(axis=2)
    rmin = points2.reshape(b, nnt, tn, 3).min(axis=2)      # (b, nnt, 3)
    rmax = points2.reshape(b, nnt, tn, 3).max(axis=2)
    gap = jnp.maximum(
        jnp.maximum(qmin[:, :, None, :] - rmax[:, None, :, :],
                    rmin[:, None, :, :] - qmax[:, :, None, :]), 0.0)
    r2_infl = jnp.float32(radius * radius) * jnp.float32(1.0 + 1e-4)
    flags = (jnp.sum(gap * gap, axis=-1) <= r2_infl).astype(jnp.int32)  # (b,nqt,nnt)

    # ---- reference streams --------------------------------------------------
    p2t = jnp.transpose(points2, (0, 2, 1))                # (B, 3, N2p) exact f32 xyz

    idx = jnp.arange(n2p, dtype=jnp.int32)
    i0 = (idx // 65536).astype(jnp.float32)                # 8-bit chunks: exact in bf16
    i1 = ((idx // 256) % 256).astype(jnp.float32)
    i2 = (idx % 256).astype(jnp.float32)
    cols = [jnp.broadcast_to(i0[None, :], (b, n2p)),
            jnp.broadcast_to(i1[None, :], (b, n2p)),
            jnp.broadcast_to(i2[None, :], (b, n2p))]
    for c in range(3):
        hi, mid, lo = _split3_bf16(points2[..., c])
        cols += [hi, mid, lo]
    g = jnp.stack([c.astype(jnp.bfloat16) for c in cols], axis=-1)  # (B, N2p, 12)

    kernel = functools.partial(_ball_query_kernel, k=k, radius=float(radius))

    packed = pl.pallas_call(
        kernel,
        out_shape=jax.ShapeDtypeStruct((b, n1p, 12 * k), jnp.float32),
        grid_spec=pltpu.PrefetchScalarGridSpec(
            num_scalar_prefetch=1,                          # tile-pair flags in SMEM
            grid=(b, nqt, nnt),
            in_specs=[
                pl.BlockSpec((None, tq, 3), lambda bi, qi, ni, flags: (bi, qi, 0)),
                pl.BlockSpec((None, 3, tn), lambda bi, qi, ni, flags: (bi, 0, ni)),
                pl.BlockSpec((None, tn, 12), lambda bi, qi, ni, flags: (bi, ni, 0)),
            ],
            out_specs=pl.BlockSpec((None, tq, 12 * k),
                                   lambda bi, qi, ni, flags: (bi, qi, 0)),
            scratch_shapes=[pltpu.VMEM((tq, 1), jnp.float32)],  # carried count
        ),
        compiler_params=pltpu.CompilerParams(
            dimension_semantics=("parallel", "parallel", "arbitrary"),
            vmem_limit_bytes=32 * 1024 * 1024),
    )(flags, points1, p2t, g)

    # Cheap JAX glue: split slots, rebuild exact index / coordinates.
    packed = packed[:, :n1, :].reshape(b, n1, k, 12)
    mapping = jnp.round(packed[..., 0] * 65536.0
                        + packed[..., 1] * 256.0
                        + packed[..., 2]).astype(jnp.int32)
    outputs = packed[..., 3:12].reshape(b, n1, k, 3, 3).sum(axis=-1)
    return mapping, outputs


class BQWarp:
    """JAX/Pallas port of physicsnemo.models.domino.model.BQWarp (forward)."""

    def __init__(self, grid_resolution=None, radius=0.25, neighbors_in_radius=10):
        if grid_resolution is None:
            grid_resolution = [256, 96, 64]
        self.grid_resolution = grid_resolution
        self.radius = radius
        self.neighbors_in_radius = neighbors_in_radius

    def __call__(self, x, p_grid, reverse_mapping=True):
        batch_size = x.shape[0]
        nx, ny, nz = self.grid_resolution
        p_grid_flat = jnp.reshape(p_grid, (batch_size, nx * ny * nz, 3))
        x_coords = x[..., :3]      # ball query operates on xyz coordinates
        if reverse_mapping:
            mapping, outputs = ball_query_pallas(
                p_grid_flat, x_coords,
                k=self.neighbors_in_radius, radius=self.radius)
        else:
            mapping, outputs = ball_query_pallas(
                x_coords, p_grid_flat,
                k=self.neighbors_in_radius, radius=self.radius)
        return mapping, outputs


def _ball_query_ref(points1, points2, k, radius):
    """Pure-numpy reference (first-k-by-index within radius, zero-padded)."""
    points1 = np.asarray(points1, np.float32)
    points2 = np.asarray(points2, np.float32)
    b, n1, _ = points1.shape
    mapping = np.zeros((b, n1, k), np.int32)
    outputs = np.zeros((b, n1, k, 3), np.float32)
    r2 = np.float32(radius * radius)
    for bi in range(b):
        diff = points1[bi][:, None, :] - points2[bi][None, :, :]
        d2 = (diff[..., 0] * diff[..., 0]
              + diff[..., 1] * diff[..., 1]
              + diff[..., 2] * diff[..., 2])
        m = d2 <= r2
        for qi in range(n1):
            idxs = np.nonzero(m[qi])[0][:k]
            mapping[bi, qi, :len(idxs)] = idxs
            outputs[bi, qi, :len(idxs)] = points2[bi][idxs]
    return mapping, outputs


if __name__ == "__main__":
    key = jax.random.PRNGKey(0)
    k1, k2, k3, k4 = jax.random.split(key, 4)

    # ------------------------------------------------------------------ #
    # 1) BQWarp module test (small grid), both mapping directions.       #
    # ------------------------------------------------------------------ #
    B = 2
    NX, NY, NZ = 16, 4, 4            # 256 grid nodes
    NPTS = 128
    K = 8
    RADIUS = 0.25

    gx = jnp.linspace(0.0, 1.0, NX)
    gy = jnp.linspace(0.0, 1.0, NY)
    gz = jnp.linspace(0.0, 1.0, NZ)
    gxx, gyy, gzz = jnp.meshgrid(gx, gy, gz, indexing="ij")
    p_grid = jnp.stack([gxx, gyy, gzz], axis=-1).astype(jnp.float32)
    p_grid = jnp.broadcast_to(p_grid[None], (B, NX, NY, NZ, 3))

    coords = jax.random.uniform(k1, (B, NPTS, 3), dtype=jnp.float32)
    feats = jax.random.normal(k2, (B, NPTS, 2), dtype=jnp.float32)
    x = jnp.concatenate([coords, feats], axis=-1)      # (B, NPTS, 5)

    bq = BQWarp(grid_resolution=[NX, NY, NZ], radius=RADIUS, neighbors_in_radius=K)
    p_grid_flat = np.asarray(p_grid).reshape(B, NX * NY * NZ, 3)

    mapping, outputs = bq(x, p_grid, reverse_mapping=True)
    mapping, outputs = jax.block_until_ready((mapping, outputs))
    ref_map, ref_out = _ball_query_ref(p_grid_flat, np.asarray(coords), K, RADIUS)
    np.testing.assert_array_equal(np.asarray(mapping), ref_map)
    np.testing.assert_allclose(np.asarray(outputs), ref_out, atol=1e-6)

    mapping2, outputs2 = bq(x, p_grid, reverse_mapping=False)
    mapping2, outputs2 = jax.block_until_ready((mapping2, outputs2))
    ref_map2, ref_out2 = _ball_query_ref(np.asarray(coords), p_grid_flat, K, RADIUS)
    np.testing.assert_array_equal(np.asarray(mapping2), ref_map2)
    np.testing.assert_allclose(np.asarray(outputs2), ref_out2, atol=1e-6)

    # ------------------------------------------------------------------ #
    # 2) Multi-tile test: several query tiles, several reference tiles   #
    #    (exercises the carried-count path), padded inputs, and a query  #
    #    tile that the AABB flags prune entirely.                        #
    # ------------------------------------------------------------------ #
    N1, N2 = 200, 700
    K2, R2 = 6, 0.12
    q_base = jax.random.uniform(k3, (1, N1, 3), dtype=jnp.float32)
    far = jnp.where(jnp.arange(N1)[None, :, None] >= 128, 5.0, 0.0)
    pts1 = q_base + far                              # queries 128.. are far away
    pts2 = jax.random.uniform(k4, (1, N2, 3), dtype=jnp.float32)

    m2, o2 = ball_query_pallas(pts1, pts2, k=K2, radius=R2, tq=64, tn=128)
    m2, o2 = jax.block_until_ready((m2, o2))
    rm2, ro2 = _ball_query_ref(np.asarray(pts1), np.asarray(pts2), K2, R2)
    np.testing.assert_array_equal(np.asarray(m2), rm2)
    np.testing.assert_allclose(np.asarray(o2), ro2, atol=1e-6)

    print("KERNEL_OK")
</pallas_src>

<mosaic_0001>
module attributes {stable_mosaic.version = 11 : i64} {
  func.func @_ball_query_kernel(%arg0: i32, %arg1: i32, %arg2: i32, %arg3: memref<2x1x1xi32, #tpu.memory_space<smem>>, %arg4: memref<1x256x3xf32, #tpu.memory_space<vmem>>, %arg5: memref<1x3x128xf32, #tpu.memory_space<vmem>>, %arg6: memref<1x128x12xbf16, #tpu.memory_space<vmem>>, %arg7: memref<1x256x96xf32, #tpu.memory_space<vmem>>, %arg8: memref<256x1xf32, #tpu.memory_space<vmem>>) attributes {dimension_semantics = [#tpu.dimension_semantics<parallel>, #tpu.dimension_semantics<parallel>, #tpu.dimension_semantics<arbitrary>], iteration_bounds = array<i64: 2, 1, 1>, scalar_prefetch = 1 : i64, scratch_operands = 1 : i64, tpu.core_type = #tpu.core_type<tc>, window_params = [{transform_indices = @transform_0, window_bounds = array<i64: 1, 256, 3>}, {transform_indices = @transform_1, window_bounds = array<i64: 1, 3, 128>}, {transform_indices = @transform_2, window_bounds = array<i64: 1, 128, 12>}, {transform_indices = @transform_3, window_bounds = array<i64: 1, 256, 96>}]} {
    %c0_i32 = arith.constant 0 : i32
    %0 = arith.cmpi eq, %arg2, %c0_i32 : i32
    %1 = arith.extui %0 : i1 to i32
    %c0_i32_0 = arith.constant 0 : i32
    %2 = arith.cmpi ne, %1, %c0_i32_0 : i32
    scf.if %2 {
      %cst = arith.constant 0.000000e+00 : f32
      %10 = vector.broadcast %cst : f32 to vector<256x1xf32>
      %c0 = arith.constant 0 : index
      %c0_3 = arith.constant 0 : index
      %11 = vector.load %arg8[%c0, %c0_3] : memref<256x1xf32, #tpu.memory_space<vmem>>, vector<256x1xf32>
      tpu.vector_store %arg8[%c0, %c0_3], %10 {strides = array<i32>} : memref<256x1xf32, #tpu.memory_space<vmem>>, vector<256x1xf32>,
      %cst_4 = arith.constant 0.000000e+00 : f32
      %12 = vector.broadcast %cst_4 : f32 to vector<256x96xf32>
      %c0_5 = arith.constant 0 : index
      %c0_6 = arith.constant 0 : index
      %c0_7 = arith.constant 0 : index
      %13 = vector.load %arg7[%c0_5, %c0_6, %c0_7] : memref<1x256x96xf32, #tpu.memory_space<vmem>>, vector<1x256x96xf32>
      %14 = vector.shape_cast %13 : vector<1x256x96xf32> to vector<256x96xf32>
      %15 = vector.shape_cast %12 : vector<256x96xf32> to vector<1x256x96xf32>
      tpu.vector_store %arg7[%c0_5, %c0_6, %c0_7], %15 {strides = array<i32>} : memref<1x256x96xf32, #tpu.memory_space<vmem>>, vector<1x256x96xf32>,
    } else {
    }
    %3 = arith.index_cast %arg0 : i32 to index
    %4 = arith.index_cast %arg1 : i32 to index
    %5 = arith.index_cast %arg2 : i32 to index
    %6 = memref.load %arg3[%3, %4, %5] : memref<2x1x1xi32, #tpu.memory_space<smem>>
    %c0_i32_1 = arith.constant 0 : i32
    %7 = arith.cmpi sgt, %6, %c0_i32_1 : i32
    %8 = arith.extui %7 : i1 to i32
    %c0_i32_2 = arith.constant 0 : i32
    %9 = arith.cmpi ne, %8, %c0_i32_2 : i32
    scf.if %9 {
      %c0 = arith.constant 0 : index
      %c0_3 = arith.constant 0 : index
      %c0_4 = arith.constant 0 : index
      %10 = vector.load %arg4[%c0, %c0_3, %c0_4] : memref<1x256x3xf32, #tpu.memory_space<vmem>>, vector<1x256x3xf32>
      %11 = vector.shape_cast %10 : vector<1x256x3xf32> to vector<256x3xf32>
      %c0_5 = arith.constant 0 : index
      %c0_6 = arith.constant 0 : index
      %c0_7 = arith.constant 0 : index
      %12 = vector.load %arg5[%c0_5, %c0_6, %c0_7] : memref<1x3x128xf32, #tpu.memory_space<vmem>>, vector<1x3x128xf32>
      %13 = vector.shape_cast %12 : vector<1x3x128xf32> to vector<3x128xf32>
      %c0_8 = arith.constant 0 : index
      %c0_9 = arith.constant 0 : index
      %c0_10 = arith.constant 0 : index
      %14 = vector.load %arg6[%c0_8, %c0_9, %c0_10] : memref<1x128x12xbf16, #tpu.memory_space<vmem>>, vector<1x128x12xbf16>
      %15 = vector.shape_cast %14 : vector<1x128x12xbf16> to vector<128x12xbf16>
      %cst = arith.constant 0.000000e+00 : f32
      %16 = vector.broadcast %cst : f32 to vector<256x128xf32>
      %17 = vector.extract_strided_slice %11 {offsets = [0, 0], sizes = [256, 1], strides = [1, 1]} : vector<256x3xf32> to vector<256x1xf32>
      %18 = vector.extract_strided_slice %13 {offsets = [0, 0], sizes = [1, 128], strides = [1, 1]} : vector<3x128xf32> to vector<1x128xf32>
      %19 = vector.broadcast %17 : vector<256x1xf32> to vector<256x128xf32>
      %20 = vector.broadcast %18 : vector<1x128xf32> to vector<256x128xf32>
      %21 = arith.subf %19, %20 : vector<256x128xf32>
      %22 = arith.mulf %21, %21 : vector<256x128xf32>
      %23 = arith.addf %16, %22 : vector<256x128xf32>
      %24 = vector.extract_strided_slice %11 {offsets = [0, 1], sizes = [256, 1], strides = [1, 1]} : vector<256x3xf32> to vector<256x1xf32>
      %25 = vector.extract_strided_slice %13 {offsets = [1, 0], sizes = [1, 128], strides = [1, 1]} : vector<3x128xf32> to vector<1x128xf32>
      %26 = vector.broadcast %24 : vector<256x1xf32> to vector<256x128xf32>
      %27 = vector.broadcast %25 : vector<1x128xf32> to vector<256x128xf32>
      %28 = arith.subf %26, %27 : vector<256x128xf32>
      %29 = arith.mulf %28, %28 : vector<256x128xf32>
      %30 = arith.addf %23, %29 : vector<256x128xf32>
      %31 = vector.extract_strided_slice %11 {offsets = [0, 2], sizes = [256, 1], strides = [1, 1]} : vector<256x3xf32> to vector<256x1xf32>
      %32 = vector.extract_strided_slice %13 {offsets = [2, 0], sizes = [1, 128], strides = [1, 1]} : vector<3x128xf32> to vector<1x128xf32>
      %33 = vector.broadcast %31 : vector<256x1xf32> to vector<256x128xf32>
      %34 = vector.broadcast %32 : vector<1x128xf32> to vector<256x128xf32>
      %35 = arith.subf %33, %34 : vector<256x128xf32>
      %36 = arith.mulf %35, %35 : vector<256x128xf32>
      %37 = arith.addf %30, %36 : vector<256x128xf32>
      %cst_11 = arith.constant 6.250000e-02 : f32
      %38 = vector.broadcast %cst_11 : f32 to vector<256x128xf32>
      %39 = arith.cmpf ole, %37, %38 : vector<256x128xf32>
      %40 = arith.extui %39 : vector<256x128xi1> to vector<256x128xi32>
      %41 = arith.sitofp %40 : vector<256x128xi32> to vector<256x128xf32>
      %42 = arith.truncf %41 : vector<256x128xf32> to vector<256x128xbf16>
      %43 = tpu.iota {dimensions = array<i32: 0>} : vector<128x128xi32>
      %44 = tpu.iota {dimensions = array<i32: 1>} : vector<128x128xi32>
      %45 = arith.cmpi slt, %43, %44 : vector<128x128xi32>
      %46 = arith.extui %45 : vector<128x128xi1> to vector<128x128xi32>
      %47 = arith.sitofp %46 : vector<128x128xi32> to vector<128x128xf32>
      %48 = arith.truncf %47 : vector<128x128xf32> to vector<128x128xbf16>
      %c0_12 = arith.constant 0 : index
      %c0_13 = arith.constant 0 : index
      %49 = vector.load %arg8[%c0_12, %c0_13] : memref<256x1xf32, #tpu.memory_space<vmem>>, vector<256x1xf32>
      %cst_14 = arith.constant dense<0.000000e+00> : vector<256x128xf32>
      %50 = tpu.matmul %42, %48, %cst_14 {dimension_numbers = #tpu.dot_dimension_numbers<[1], [0], [0], [1], [0, 0, 1, 1], [], []>} : vector<256x128xbf16>, vector<128x128xbf16>, vector<256x128xf32> -> vector<256x128xf32>
      %51 = vector.broadcast %49 : vector<256x1xf32> to vector<256x128xf32>
      %52 = arith.addf %50, %51 : vector<256x128xf32>
      %53 = vector.extract_strided_slice %50 {offsets = [0, 127], sizes = [256, 1], strides = [1, 1]} : vector<256x128xf32> to vector<256x1xf32>
      %54 = arith.addf %49, %53 : vector<256x1xf32>
      %55 = vector.extract_strided_slice %42 {offsets = [0, 127], sizes = [256, 1], strides = [1, 1]} : vector<256x128xbf16> to vector<256x1xbf16>
      %56 = arith.extf %55 : vector<256x1xbf16> to vector<256x1xf32>
      %57 = arith.addf %54, %56 : vector<256x1xf32>
      %c0_15 = arith.constant 0 : index
      %c0_16 = arith.constant 0 : index
      %58 = vector.load %arg8[%c0_15, %c0_16] : memref<256x1xf32, #tpu.memory_space<vmem>>, vector<256x1xf32>
      tpu.vector_store %arg8[%c0_15, %c0_16], %57 {strides = array<i32>} : memref<256x1xf32, #tpu.memory_space<vmem>>, vector<256x1xf32>,
      %cst_17 = arith.constant -1.000000e+00 : f32
      %59 = vector.broadcast %cst_17 : f32 to vector<256x128xf32>
      %60 = arith.select %39, %52, %59 : vector<256x128xi1>, vector<256x128xf32>
      %cst_18 = arith.constant 0.000000e+00 : f32
      %61 = vector.broadcast %cst_18 : f32 to vector<256x128xf32>
      %62 = arith.cmpf oeq, %60, %61 : vector<256x128xf32>
      %63 = arith.extui %62 : vector<256x128xi1> to vector<256x128xi32>
      %64 = arith.sitofp %63 : vector<256x128xi32> to vector<256x128xf32>
      %65 = arith.truncf %64 : vector<256x128xf32> to vector<256x128xbf16>
      %cst_19 = arith.constant dense<0.000000e+00> : vector<256x12xf32>
      %66 = tpu.matmul %65, %15, %cst_19 {dimension_numbers = #tpu.dot_dimension_numbers<[1], [0], [0], [1], [0, 0, 1, 1], [], []>} : vector<256x128xbf16>, vector<128x12xbf16>, vector<256x12xf32> -> vector<256x12xf32>
      %c0_20 = arith.constant 0 : index
      %c0_21 = arith.constant 0 : index
      %c0_22 = arith.constant 0 : index
      %67 = vector.load %arg7[%c0_20, %c0_21, %c0_22] : memref<1x256x96xf32, #tpu.memory_space<vmem>>, vector<1x256x12xf32>
      %68 = vector.shape_cast %67 : vector<1x256x12xf32> to vector<256x12xf32>
      %69 = arith.addf %68, %66 : vector<256x12xf32>
      %c0_23 = arith.constant 0 : index
      %c0_24 = arith.constant 0 : index
      %c0_25 = arith.constant 0 : index
      %70 = vector.load %arg7[%c0_23, %c0_24, %c0_25] : memref<1x256x96xf32, #tpu.memory_space<vmem>>, vector<1x256x12xf32>
      %71 = vector.shape_cast %70 : vector<1x256x12xf32> to vector<256x12xf32>
      %72 = vector.shape_cast %69 : vector<256x12xf32> to vector<1x256x12xf32>
      tpu.vector_store %arg7[%c0_23, %c0_24, %c0_25], %72 {strides = array<i32>} : memref<1x256x96xf32, #tpu.memory_space<vmem>>, vector<1x256x12xf32>,
      %cst_26 = arith.constant 1.000000e+00 : f32
      %73 = vector.broadcast %cst_26 : f32 to vector<256x128xf32>
      %74 = arith.cmpf oeq, %60, %73 : vector<256x128xf32>
      %75 = arith.extui %74 : vector<256x128xi1> to vector<256x128xi32>
      %76 = arith.sitofp %75 : vector<256x128xi32> to vector<256x128xf32>
      %77 = arith.truncf %76 : vector<256x128xf32> to vector<256x128xbf16>
      %cst_27 = arith.constant dense<0.000000e+00> : vector<256x12xf32>
      %78 = tpu.matmul %77, %15, %cst_27 {dimension_numbers = #tpu.dot_dimension_numbers<[1], [0], [0], [1], [0, 0, 1, 1], [], []>} : vector<256x128xbf16>, vector<128x12xbf16>, vector<256x12xf32> -> vector<256x12xf32>
      %c0_28 = arith.constant 0 : index
      %c0_29 = arith.constant 0 : index
      %c12 = arith.constant 12 : index
      %79 = vector.load %arg7[%c0_28, %c0_29, %c12] : memref<1x256x96xf32, #tpu.memory_space<vmem>>, vector<1x256x12xf32>
      %80 = vector.shape_cast %79 : vector<1x256x12xf32> to vector<256x12xf32>
      %81 = arith.addf %80, %78 : vector<256x12xf32>
      %c0_30 = arith.constant 0 : index
      %c0_31 = arith.constant 0 : index
      %c12_32 = arith.constant 12 : index
      %82 = vector.load %arg7[%c0_30, %c0_31, %c12_32] : memref<1x256x96xf32, #tpu.memory_space<vmem>>, vector<1x256x12xf32>
      %83 = vector.shape_cast %82 : vector<1x256x12xf32> to vector<256x12xf32>
      %84 = vector.shape_cast %81 : vector<256x12xf32> to vector<1x256x12xf32>
      tpu.vector_store %arg7[%c0_30, %c0_31, %c12_32], %84 {strides = array<i32>} : memref<1x256x96xf32, #tpu.memory_space<vmem>>, vector<1x256x12xf32>,
      %cst_33 = arith.constant 2.000000e+00 : f32
      %85 = vector.broadcast %cst_33 : f32 to vector<256x128xf32>
      %86 = arith.cmpf oeq, %60, %85 : vector<256x128xf32>
      %87 = arith.extui %86 : vector<256x128xi1> to vector<256x128xi32>
      %88 = arith.sitofp %87 : vector<256x128xi32> to vector<256x128xf32>
      %89 = arith.truncf %88 : vector<256x128xf32> to vector<256x128xbf16>
      %cst_34 = arith.constant dense<0.000000e+00> : vector<256x12xf32>
      %90 = tpu.matmul %89, %15, %cst_34 {dimension_numbers = #tpu.dot_dimension_numbers<[1], [0], [0], [1], [0, 0, 1, 1], [], []>} : vector<256x128xbf16>, vector<128x12xbf16>, vector<256x12xf32> -> vector<256x12xf32>
      %c0_35 = arith.constant 0 : index
      %c0_36 = arith.constant 0 : index
      %c24 = arith.constant 24 : index
      %91 = vector.load %arg7[%c0_35, %c0_36, %c24] : memref<1x256x96xf32, #tpu.memory_space<vmem>>, vector<1x256x12xf32>
      %92 = vector.shape_cast %91 : vector<1x256x12xf32> to vector<256x12xf32>
      %93 = arith.addf %92, %90 : vector<256x12xf32>
      %c0_37 = arith.constant 0 : index
      %c0_38 = arith.constant 0 : index
      %c24_39 = arith.constant 24 : index
      %94 = vector.load %arg7[%c0_37, %c0_38, %c24_39] : memref<1x256x96xf32, #tpu.memory_space<vmem>>, vector<1x256x12xf32>
      %95 = vector.shape_cast %94 : vector<1x256x12xf32> to vector<256x12xf32>
      %96 = vector.shape_cast %93 : vector<256x12xf32> to vector<1x256x12xf32>
      tpu.vector_store %arg7[%c0_37, %c0_38, %c24_39], %96 {strides = array<i32>} : memref<1x256x96xf32, #tpu.memory_space<vmem>>, vector<1x256x12xf32>,
      %cst_40 = arith.constant 3.000000e+00 : f32
      %97 = vector.broadcast %cst_40 : f32 to vector<256x128xf32>
      %98 = arith.cmpf oeq, %60, %97 : vector<256x128xf32>
      %99 = arith.extui %98 : vector<256x128xi1> to vector<256x128xi32>
      %100 = arith.sitofp %99 : vector<256x128xi32> to vector<256x128xf32>
      %101 = arith.truncf %100 : vector<256x128xf32> to vector<256x128xbf16>
      %cst_41 = arith.constant dense<0.000000e+00> : vector<256x12xf32>
      %102 = tpu.matmul %101, %15, %cst_41 {dimension_numbers = #tpu.dot_dimension_numbers<[1], [0], [0], [1], [0, 0, 1, 1], [], []>} : vector<256x128xbf16>, vector<128x12xbf16>, vector<256x12xf32> -> vector<256x12xf32>
      %c0_42 = arith.constant 0 : index
      %c0_43 = arith.constant 0 : index
      %c36 = arith.constant 36 : index
      %103 = vector.load %arg7[%c0_42, %c0_43, %c36] : memref<1x256x96xf32, #tpu.memory_space<vmem>>, vector<1x256x12xf32>
      %104 = vector.shape_cast %103 : vector<1x256x12xf32> to vector<256x12xf32>
      %105 = arith.addf %104, %102 : vector<256x12xf32>
      %c0_44 = arith.constant 0 : index
      %c0_45 = arith.constant 0 : index
      %c36_46 = arith.constant 36 : index
      %106 = vector.load %arg7[%c0_44, %c0_45, %c36_46] : memref<1x256x96xf32, #tpu.memory_space<vmem>>, vector<1x256x12xf32>
      %107 = vector.shape_cast %106 : vector<1x256x12xf32> to vector<256x12xf32>
      %108 = vector.shape_cast %105 : vector<256x12xf32> to vector<1x256x12xf32>
      tpu.vector_store %arg7[%c0_44, %c0_45, %c36_46], %108 {strides = array<i32>} : memref<1x256x96xf32, #tpu.memory_space<vmem>>, vector<1x256x12xf32>,
      %cst_47 = arith.constant 4.000000e+00 : f32
      %109 = vector.broadcast %cst_47 : f32 to vector<256x128xf32>
      %110 = arith.cmpf oeq, %60, %109 : vector<256x128xf32>
      %111 = arith.extui %110 : vector<256x128xi1> to vector<256x128xi32>
      %112 = arith.sitofp %111 : vector<256x128xi32> to vector<256x128xf32>
      %113 = arith.truncf %112 : vector<256x128xf32> to vector<256x128xbf16>
      %cst_48 = arith.constant dense<0.000000e+00> : vector<256x12xf32>
      %114 = tpu.matmul %113, %15, %cst_48 {dimension_numbers = #tpu.dot_dimension_numbers<[1], [0], [0], [1], [0, 0, 1, 1], [], []>} : vector<256x128xbf16>, vector<128x12xbf16>, vector<256x12xf32> -> vector<256x12xf32>
      %c0_49 = arith.constant 0 : index
      %c0_50 = arith.constant 0 : index
      %c48 = arith.constant 48 : index
      %115 = vector.load %arg7[%c0_49, %c0_50, %c48] : memref<1x256x96xf32, #tpu.memory_space<vmem>>, vector<1x256x12xf32>
      %116 = vector.shape_cast %115 : vector<1x256x12xf32> to vector<256x12xf32>
      %117 = arith.addf %116, %114 : vector<256x12xf32>
      %c0_51 = arith.constant 0 : index
      %c0_52 = arith.constant 0 : index
      %c48_53 = arith.constant 48 : index
      %118 = vector.load %arg7[%c0_51, %c0_52, %c48_53] : memref<1x256x96xf32, #tpu.memory_space<vmem>>, vector<1x256x12xf32>
      %119 = vector.shape_cast %118 : vector<1x256x12xf32> to vector<256x12xf32>
      %120 = vector.shape_cast %117 : vector<256x12xf32> to vector<1x256x12xf32>
      tpu.vector_store %arg7[%c0_51, %c0_52, %c48_53], %120 {strides = array<i32>} : memref<1x256x96xf32, #tpu.memory_space<vmem>>, vector<1x256x12xf32>,
      %cst_54 = arith.constant 5.000000e+00 : f32
      %121 = vector.broadcast %cst_54 : f32 to vector<256x128xf32>
      %122 = arith.cmpf oeq, %60, %121 : vector<256x128xf32>
      %123 = arith.extui %122 : vector<256x128xi1> to vector<256x128xi32>
      %124 = arith.sitofp %123 : vector<256x128xi32> to vector<256x128xf32>
      %125 = arith.truncf %124 : vector<256x128xf32> to vector<256x128xbf16>
      %cst_55 = arith.constant dense<0.000000e+00> : vector<256x12xf32>
      %126 = tpu.matmul %125, %15, %cst_55 {dimension_numbers = #tpu.dot_dimension_numbers<[1], [0], [0], [1], [0, 0, 1, 1], [], []>} : vector<256x128xbf16>, vector<128x12xbf16>, vector<256x12xf32> -> vector<256x12xf32>
      %c0_56 = arith.constant 0 : index
      %c0_57 = arith.constant 0 : index
      %c60 = arith.constant 60 : index
      %127 = vector.load %arg7[%c0_56, %c0_57, %c60] : memref<1x256x96xf32, #tpu.memory_space<vmem>>, vector<1x256x12xf32>
      %128 = vector.shape_cast %127 : vector<1x256x12xf32> to vector<256x12xf32>
      %129 = arith.addf %128, %126 : vector<256x12xf32>
      %c0_58 = arith.constant 0 : index
      %c0_59 = arith.constant 0 : index
      %c60_60 = arith.constant 60 : index
      %130 = vector.load %arg7[%c0_58, %c0_59, %c60_60] : memref<1x256x96xf32, #tpu.memory_space<vmem>>, vector<1x256x12xf32>
      %131 = vector.shape_cast %130 : vector<1x256x12xf32> to vector<256x12xf32>
      %132 = vector.shape_cast %129 : vector<256x12xf32> to vector<1x256x12xf32>
      tpu.vector_store %arg7[%c0_58, %c0_59, %c60_60], %132 {strides = array<i32>} : memref<1x256x96xf32, #tpu.memory_space<vmem>>, vector<1x256x12xf32>,
      %cst_61 = arith.constant 6.000000e+00 : f32
      %133 = vector.broadcast %cst_61 : f32 to vector<256x128xf32>
      %134 = arith.cmpf oeq, %60, %133 : vector<256x128xf32>
      %135 = arith.extui %134 : vector<256x128xi1> to vector<256x128xi32>
      %136 = arith.sitofp %135 : vector<256x128xi32> to vector<256x128xf32>
      %137 = arith.truncf %136 : vector<256x128xf32> to vector<256x128xbf16>
      %cst_62 = arith.constant dense<0.000000e+00> : vector<256x12xf32>
      %138 = tpu.matmul %137, %15, %cst_62 {dimension_numbers = #tpu.dot_dimension_numbers<[1], [0], [0], [1], [0, 0, 1, 1], [], []>} : vector<256x128xbf16>, vector<128x12xbf16>, vector<256x12xf32> -> vector<256x12xf32>
      %c0_63 = arith.constant 0 : index
      %c0_64 = arith.constant 0 : index
      %c72 = arith.constant 72 : index
      %139 = vector.load %arg7[%c0_63, %c0_64, %c72] : memref<1x256x96xf32, #tpu.memory_space<vmem>>, vector<1x256x12xf32>
      %140 = vector.shape_cast %139 : vector<1x256x12xf32> to vector<256x12xf32>
      %141 = arith.addf %140, %138 : vector<256x12xf32>
      %c0_65 = arith.constant 0 : index
      %c0_66 = arith.constant 0 : index
      %c72_67 = arith.constant 72 : index
      %142 = vector.load %arg7[%c0_65, %c0_66, %c72_67] : memref<1x256x96xf32, #tpu.memory_space<vmem>>, vector<1x256x12xf32>
      %143 = vector.shape_cast %142 : vector<1x256x12xf32> to vector<256x12xf32>
      %144 = vector.shape_cast %141 : vector<256x12xf32> to vector<1x256x12xf32>
      tpu.vector_store %arg7[%c0_65, %c0_66, %c72_67], %144 {strides = array<i32>} : memref<1x256x96xf32, #tpu.memory_space<vmem>>, vector<1x256x12xf32>,
      %cst_68 = arith.constant 7.000000e+00 : f32
      %145 = vector.broadcast %cst_68 : f32 to vector<256x128xf32>
      %146 = arith.cmpf oeq, %60, %145 : vector<256x128xf32>
      %147 = arith.extui %146 : vector<256x128xi1> to vector<256x128xi32>
      %148 = arith.sitofp %147 : vector<256x128xi32> to vector<256x128xf32>
      %149 = arith.truncf %148 : vector<256x128xf32> to vector<256x128xbf16>
      %cst_69 = arith.constant dense<0.000000e+00> : vector<256x12xf32>
      %150 = tpu.matmul %149, %15, %cst_69 {dimension_numbers = #tpu.dot_dimension_numbers<[1], [0], [0], [1], [0, 0, 1, 1], [], []>} : vector<256x128xbf16>, vector<128x12xbf16>, vector<256x12xf32> -> vector<256x12xf32>
      %c0_70 = arith.constant 0 : index
      %c0_71 = arith.constant 0 : index
      %c84 = arith.constant 84 : index
      %151 = vector.load %arg7[%c0_70, %c0_71, %c84] : memref<1x256x96xf32, #tpu.memory_space<vmem>>, vector<1x256x12xf32>
      %152 = vector.shape_cast %151 : vector<1x256x12xf32> to vector<256x12xf32>
      %153 = arith.addf %152, %150 : vector<256x12xf32>
      %c0_72 = arith.constant 0 : index
      %c0_73 = arith.constant 0 : index
      %c84_74 = arith.constant 84 : index
      %154 = vector.load %arg7[%c0_72, %c0_73, %c84_74] : memref<1x256x96xf32, #tpu.memory_space<vmem>>, vector<1x256x12xf32>
      %155 = vector.shape_cast %154 : vector<1x256x12xf32> to vector<256x12xf32>
      %156 = vector.shape_cast %153 : vector<256x12xf32> to vector<1x256x12xf32>
      tpu.vector_store %arg7[%c0_72, %c0_73, %c84_74], %156 {strides = array<i32>} : memref<1x256x96xf32, #tpu.memory_space<vmem>>, vector<1x256x12xf32>,
    } else {
    }
    return
  }
  func.func @transform_0(%arg0: i32, %arg1: i32, %arg2: i32, %arg3: memref<2x1x1xi32, #tpu.memory_space<smem>>) -> (i32, i32, i32) {
    %c0_i32 = arith.constant 0 : i32
    %c0_i32_0 = arith.constant 0 : i32
    return %arg0, %arg1, %c0_i32 : i32, i32, i32
  }
  func.func @transform_1(%arg0: i32, %arg1: i32, %arg2: i32, %arg3: memref<2x1x1xi32, #tpu.memory_space<smem>>) -> (i32, i32, i32) {
    %c0_i32 = arith.constant 0 : i32
    %c0_i32_0 = arith.constant 0 : i32
    return %arg0, %c0_i32, %arg2 : i32, i32, i32
  }
  func.func @transform_2(%arg0: i32, %arg1: i32, %arg2: i32, %arg3: memref<2x1x1xi32, #tpu.memory_space<smem>>) -> (i32, i32, i32) {
    %c0_i32 = arith.constant 0 : i32
    %c0_i32_0 = arith.constant 0 : i32
    return %arg0, %arg2, %c0_i32 : i32, i32, i32
  }
  func.func @transform_3(%arg0: i32, %arg1: i32, %arg2: i32, %arg3: memref<2x1x1xi32, #tpu.memory_space<smem>>) -> (i32, i32, i32) {
    %c0_i32 = arith.constant 0 : i32
    %c0_i32_0 = arith.constant 0 : i32
    return %arg0, %arg1, %c0_i32 : i32, i32, i32
  }
}

</mosaic_0001>

<bundles_post_ra>
// kernel: tpu_custom_call.1
= control target key start
LH: loop header
LB: loop body
LE: loop exit
PB: predicated region body
PF: predicated region fallthrough
CT: control target
= control target key end

     0   :  { %s12059_s0 = inlined_call_operand.vmem [shape: s32[2,1,1], index: 0, kind: input, shape index: {}]   ;;  %s12060_s1 = inlined_call_operand.vmem [shape: f32[2,256,3], index: 1, kind: input, shape index: {}]   ;;  %s12061_s2 = inlined_call_operand.vmem [shape: f32[2,3,128], index: 2, kind: input, shape index: {}]   ;;  %s12062_s3 = inlined_call_operand.vmem [shape: bf16[2,128,12], index: 3, kind: input, shape index: {}]   ;;  %s12063_s4 = inlined_call_operand.vmem [shape: f32[2,256,96], index: 4, kind: output, shape index: {}]  }
   0x1   :  { %s9_s17 = sshll.u32 %s12059_s0, 4  ;;  %s10_s17 = int_to_ptr.vmem [resolvable:$true] %s9_s17 }
   0x2   :  { %s7659_s18 = scalar_lea.vmem %s10_s17, 32  ;;  %p7664_p1 = scmp.lt.s32.totalorder %s10_s17, %s10_s17 }
   0x3   :  { %p7660_p0 = scmp.ne.s32.totalorder %s10_s17, %s7659_s18  ;;  %p7665_p2 = scmp.lt.s32.totalorder %s7659_s18, %s7659_s18 }
   0x5   :  { %p7666_p3 = por %p7665_p2, %p7664_p1 }
   0x7   :  { %p7667_p4 = pnand %p7666_p3, %p7660_p0 }
   0x9   :  { %7670 = shalt.err (!%p7667_p4)  }
   0xa   :  { %s7697_s19 = smov [#allocation4]  }
   0xb   :  { %12 = dma.vmem_to_smem %s10_s17, 32, %s7697_s19, [#allocation3] }
   0xc   :  { %7683 = dma.done.wait [#allocation3], 32 }
   0xd   :  { %7684 = vsyncadd [#allocation3], 4294967264 }
   0xe   :  { %14 = sfence }
   0xf   :  { %s7740_s20 = smov 0   ;;  %s7742_s21 = smov 0  }
  0x10   :  { %s7744_s22 = smov 0  }
  0x11 LB: > { %s39_s0 = sadd.s32 1, %s7691_s21  ;;  %p6157_p5 = scmp.ge.s32.totalorder %s7695_s22, 1  ;;  %s7695_s22 = sphi %s7744_s22, %s20_s22   ;;  %s7691_s21 = sphi %s7742_s21, %s12744_s21   ;;  %s7687_s20 = sphi %s7740_s20, %s12743_s20  }
  0x12   : > { %p41_p6 = scmp.ge.s32.totalorder %s39_s0, 2  ;;  %p203_p7 = scmp.lt.s32.totalorder %s7695_s22, 3 }
  0x14   : > { %s12746_s0 = smov (%p41_p6, %s39_s0), 0  ;;  %p204_p8 = pnand %p6157_p5, %p203_p7 }
  0x15   : > { %vm12068_vm0 = vcmask (!%p204_p8), 7168   ;;  %s6165_s23 = sshll.u32 (!%p204_p8), %s7687_s20, 7  ;;  %p252_p9 = scmp.lt.s32.totalorder (!%p204_p8), %s7687_s20, 1  ;;  %v7698_v0 = vmov (!%p204_p8), 0.0   ;;  %vm326_vm1 = vcmask (!%p204_p8), 785408  }
  0x16   : > { %207 = sbr.rel (%p204_p8) target bundleno = 1341 (0x53d), region = 32  ;;  %294 = vst.msk [vmem:[#allocation2] sm:$0xff] (!%p204_p8), %vm12068_vm0, %v7698_v0  ;;  %295 = vst.msk [vmem:[#allocation2 + $0x8] sm:$0xff] (!%p204_p8), %vm12068_vm0, %v7698_v0  ;;  %s7828_s24 = sld [smem:[#allocation4 + %s6165_s23]] (!%p204_p8) }
  0x17   : > { %296 = vst.msk [vmem:[#allocation2 + $0x10] sm:$0xff] (!%p204_p8), %vm12068_vm0, %v7698_v0  ;;  %297 = vst.msk [vmem:[#allocation2 + $0x18] sm:$0xff] (!%p204_p8), %vm12068_vm0, %v7698_v0 }
  0x18   : > { %298 = vst.msk [vmem:[#allocation2 + $0x20] sm:$0xff] (!%p204_p8), %vm12068_vm0, %v7698_v0  ;;  %299 = vst.msk [vmem:[#allocation2 + $0x28] sm:$0xff] (!%p204_p8), %vm12068_vm0, %v7698_v0 }
  0x19   : > { %300 = vst.msk [vmem:[#allocation2 + $0x30] sm:$0xff] (!%p204_p8), %vm12068_vm0, %v7698_v0  ;;  %301 = vst.msk [vmem:[#allocation2 + $0x38] sm:$0xff] (!%p204_p8), %vm12068_vm0, %v7698_v0 }
  0x1a   : > { %302 = vst.msk [vmem:[#allocation2 + $0x40] sm:$0xff] (!%p204_p8), %vm12068_vm0, %v7698_v0  ;;  %303 = vst.msk [vmem:[#allocation2 + $0x48] sm:$0xff] (!%p204_p8), %vm12068_vm0, %v7698_v0 }
  0x1b   : > { %304 = vst.msk [vmem:[#allocation2 + $0x50] sm:$0xff] (!%p204_p8), %vm12068_vm0, %v7698_v0  ;;  %305 = vst.msk [vmem:[#allocation2 + $0x58] sm:$0xff] (!%p204_p8), %vm12068_vm0, %v7698_v0 }
  0x1c   : > { %306 = vst.msk [vmem:[#allocation2 + $0x60] sm:$0xff] (!%p204_p8), %vm12068_vm0, %v7698_v0  ;;  %307 = vst.msk [vmem:[#allocation2 + $0x68] sm:$0xff] (!%p204_p8), %vm12068_vm0, %v7698_v0  ;;  %p6166_p10 = scmp.le.s32.totalorder (!%p204_p8), %s7828_s24, 0 }
  0x1d   : > { %308 = vst.msk [vmem:[#allocation2 + $0x70] sm:$0xff] %vm12068_vm0, %v7698_v0  ;;  %309 = vst.msk [vmem:[#allocation2 + $0x78] sm:$0xff] %vm12068_vm0, %v7698_v0  ;;  %s12748_s20 = smov (!%p252_p9, %s7687_s20), 1 }
  0x1e   : > { %310 = vst.msk [vmem:[#allocation2 + $0x80] sm:$0xff] %vm12068_vm0, %v7698_v0  ;;  %311 = vst.msk [vmem:[#allocation2 + $0x88] sm:$0xff] %vm12068_vm0, %v7698_v0  ;;  %s6785_s25 = sshll.u32 %s12748_s20, 8  ;;  %s6160_s26 = sshll.u32 %s12748_s20, 2 }
  0x1f   : > { %312 = vst.msk [vmem:[#allocation2 + $0x90] sm:$0xff] %vm12068_vm0, %v7698_v0  ;;  %313 = vst.msk [vmem:[#allocation2 + $0x98] sm:$0xff] %vm12068_vm0, %v7698_v0  ;;  %s7836_s29 = scalar_lea.vmem %s12060_s1, %s6785_s25  ;;  %s7841_s6 = scalar_lea.vmem %s12061_s2, %s6160_s26 }
  0x20   : > { %314 = vst.msk [vmem:[#allocation2 + $0xa0] sm:$0xff] %vm12068_vm0, %v7698_v0  ;;  %315 = vst.msk [vmem:[#allocation2 + $0xa8] sm:$0xff] %vm12068_vm0, %v7698_v0  ;;  %s6786_s7 = sshll.u32 %s12748_s20, 6  ;;  %s7846_s10 = scalar_lea.vmem %s12063_s4, %s6785_s25 }
  0x21   : > { %316 = vst.msk [vmem:[#allocation2 + $0xb0] sm:$0xff] %vm12068_vm0, %v7698_v0  ;;  %317 = vst.msk [vmem:[#allocation2 + $0xb8] sm:$0xff] %vm12068_vm0, %v7698_v0  ;;  %s7851_s13 = scalar_lea.vmem %s12062_s3, %s6786_s7 }
  0x22   : > { %318 = vst.msk [vmem:[#allocation2 + $0xc0] sm:$0xff] %vm12068_vm0, %v7698_v0  ;;  %319 = vst.msk [vmem:[#allocation2 + $0xc8] sm:$0xff] %vm12068_vm0, %v7698_v0 }
  0x23   : > { %320 = vst.msk [vmem:[#allocation2 + $0xd0] sm:$0xff] %vm12068_vm0, %v7698_v0  ;;  %321 = vst.msk [vmem:[#allocation2 + $0xd8] sm:$0xff] %vm12068_vm0, %v7698_v0 }
  0x24   : > { %322 = vst.msk [vmem:[#allocation2 + $0xe0] sm:$0xff] %vm12068_vm0, %v7698_v0  ;;  %323 = vst.msk [vmem:[#allocation2 + $0xe8] sm:$0xff] %vm12068_vm0, %v7698_v0 }
  0x25   : > { %324 = vst.msk [vmem:[#allocation2 + $0xf0] sm:$0xff] %vm12068_vm0, %v7698_v0  ;;  %325 = vst.msk [vmem:[#allocation2 + $0xf8] sm:$0xff] %vm12068_vm0, %v7698_v0 }
  0x26   : > { %327 = vst.msk [vmem:[%s7846_s10] sm:$0xff] %vm326_vm1, %v7698_v0  ;;  %328 = vst.msk [vmem:[%s7846_s10 + $0x8] sm:$0xff] %vm326_vm1, %v7698_v0 }
  0x27   : > { %329 = vst.msk [vmem:[%s7846_s10 + $0x10] sm:$0xff] %vm326_vm1, %v7698_v0  ;;  %330 = vst.msk [vmem:[%s7846_s10 + $0x18] sm:$0xff] %vm326_vm1, %v7698_v0 }
  0x28   : > { %331 = vst.msk [vmem:[%s7846_s10 + $0x20] sm:$0xff] %vm326_vm1, %v7698_v0  ;;  %332 = vst.msk [vmem:[%s7846_s10 + $0x28] sm:$0xff] %vm326_vm1, %v7698_v0 }
  0x29   : > { %333 = vst.msk [vmem:[%s7846_s10 + $0x30] sm:$0xff] %vm326_vm1, %v7698_v0  ;;  %334 = vst.msk [vmem:[%s7846_s10 + $0x38] sm:$0xff] %vm326_vm1, %v7698_v0 }
  0x2a   : > { %335 = vst.msk [vmem:[%s7846_s10 + $0x40] sm:$0xff] %vm326_vm1, %v7698_v0  ;;  %336 = vst.msk [vmem:[%s7846_s10 + $0x48] sm:$0xff] %vm326_vm1, %v7698_v0 }
  0x2b   : > { %337 = vst.msk [vmem:[%s7846_s10 + $0x50] sm:$0xff] %vm326_vm1, %v7698_v0  ;;  %338 = vst.msk [vmem:[%s7846_s10 + $0x58] sm:$0xff] %vm326_vm1, %v7698_v0 }
  0x2c   : > { %339 = vst.msk [vmem:[%s7846_s10 + $0x60] sm:$0xff] %vm326_vm1, %v7698_v0  ;;  %340 = vst.msk [vmem:[%s7846_s10 + $0x68] sm:$0xff] %vm326_vm1, %v7698_v0 }
  0x2d   : > { %341 = vst.msk [vmem:[%s7846_s10 + $0x70] sm:$0xff] %vm326_vm1, %v7698_v0  ;;  %342 = vst.msk [vmem:[%s7846_s10 + $0x78] sm:$0xff] %vm326_vm1, %v7698_v0 }
  0x2e   : > { %343 = vst.msk [vmem:[%s7846_s10 + $0x80] sm:$0xff] %vm326_vm1, %v7698_v0  ;;  %344 = vst.msk [vmem:[%s7846_s10 + $0x88] sm:$0xff] %vm326_vm1, %v7698_v0 }
  0x2f   : > { %345 = vst.msk [vmem:[%s7846_s10 + $0x90] sm:$0xff] %vm326_vm1, %v7698_v0  ;;  %346 = vst.msk [vmem:[%s7846_s10 + $0x98] sm:$0xff] %vm326_vm1, %v7698_v0  ;;  %371 = sbr.rel (%p6166_p10) target bundleno = 1341 (0x53d), region = 40 }
  0x30   : > { %347 = vst.msk [vmem:[%s7846_s10 + $0xa0] sm:$0xff] %vm326_vm1, %v7698_v0  ;;  %348 = vst.msk [vmem:[%s7846_s10 + $0xa8] sm:$0xff] %vm326_vm1, %v7698_v0 }
  0x31   : > { %349 = vst.msk [vmem:[%s7846_s10 + $0xb0] sm:$0xff] %vm326_vm1, %v7698_v0  ;;  %350 = vst.msk [vmem:[%s7846_s10 + $0xb8] sm:$0xff] %vm326_vm1, %v7698_v0 }
  0x32   : > { %351 = vst.msk [vmem:[%s7846_s10 + $0xc0] sm:$0xff] %vm326_vm1, %v7698_v0  ;;  %352 = vst.msk [vmem:[%s7846_s10 + $0xc8] sm:$0xff] %vm326_vm1, %v7698_v0 }
  0x33   : > { %353 = vst.msk [vmem:[%s7846_s10 + $0xd0] sm:$0xff] %vm326_vm1, %v7698_v0  ;;  %354 = vst.msk [vmem:[%s7846_s10 + $0xd8] sm:$0xff] %vm326_vm1, %v7698_v0 }
  0x34   : > { %355 = vst.msk [vmem:[%s7846_s10 + $0xe0] sm:$0xff] %vm326_vm1, %v7698_v0  ;;  %356 = vst.msk [vmem:[%s7846_s10 + $0xe8] sm:$0xff] %vm326_vm1, %v7698_v0 }
  0x35   : > { %357 = vst.msk [vmem:[%s7846_s10 + $0xf0] sm:$0xff] %vm326_vm1, %v7698_v0  ;;  %358 = vst.msk [vmem:[%s7846_s10 + $0xf8] sm:$0xff] %vm326_vm1, %v7698_v0 }
  0x36   : > { %v7951_v1 = vld [vmem:[%s7836_s29 + $0x10] sm:$0xff]  ;;  %v7954_v2 = vld [vmem:[%s7836_s29] sm:$0xff]  ;;  %v7699_v3 = vmov 0   ;;  %v7961_v4 = vld [vmem:[%s7836_s29 + $0x18] sm:$0xff]  ;;  %v7700_v34 = vmov 1   ;;  %v581_v35 = vlaneseq  ;;  %v7702_v50 = vmov 2  }
  0x37   : > { %7492 = vset.pattern.permute.xlu1 %v7699_v3  ;;  %7491 = vset.pattern.permute.xlu0 %v7699_v3  ;;  %v7964_v5 = vld [vmem:[%s7836_s29 + $0x8] sm:$0xff]  ;;  %v7972_v7 = vld [vmem:[%s7836_s29 + $0x20] sm:$0xff]  ;;  %v7977_v8 = vld [vmem:[%s7836_s29 + $0x38] sm:$0xff]  ;;  %v12064_v39 = vmov 1.0|1.0   ;;  %s7704_s14 = smov 1  }
  0x38   : > { %433 = vperm.xlu1 %7492, %v7951_v1   ;;  %423 = vperm.xlu0 %7491, %v7954_v2   ;;  %v7969_v6 = vld [vmem:[%s7836_s29 + $0x28] sm:$0xff]  ;;  %v7980_v9 = vld [vmem:[%s7836_s29 + $0x30] sm:$0xff]  ;;  %v7986_v11 = vld [vmem:[%s7836_s29 + $0x40] sm:$0xff]  ;;  %v8102_v36 = vshrl.u32 %v581_v35, 7  ;;  %v8107_v38 = vand.u32 127, %v581_v35  ;;  %s7705_s15 = smov 12  }
  0x39   : > { %v7983_v10 = vld [vmem:[%s7836_s29 + $0x48] sm:$0xff]  ;;  %v7993_v12 = vld [vmem:[%s7836_s29 + $0x58] sm:$0xff]  ;;  %v7996_v13 = vld [vmem:[%s7836_s29 + $0x50] sm:$0xff]  ;;  %s7706_s16 = smov 24   ;;  %s7707_s17 = smov 36  }
  0x3a   : > { %v8001_v14 = vld [vmem:[%s7836_s29 + $0x68] sm:$0xff]  ;;  %v8004_v15 = vld [vmem:[%s7836_s29 + $0x60] sm:$0xff]  ;;  %v8009_v16 = vld [vmem:[%s7836_s29 + $0x78] sm:$0xff]  ;;  %v1251_v37 = vadd.s32 8, %v8102_v36  ;;  %vm1268_vm2 = vcmp.lt.s32.totalorder %v8102_v36, %v8107_v38  ;;  %v1252_v40 = vadd.s32 16, %v8102_v36  ;;  %v1253_v41 = vadd.s32 24, %v8102_v36 }
  0x3b   : > { %v8012_v17 = vld [vmem:[%s7836_s29 + $0x70] sm:$0xff]  ;;  %v8017_v18 = vld [vmem:[%s7836_s29 + $0x88] sm:$0xff]  ;;  %v8020_v19 = vld [vmem:[%s7836_s29 + $0x80] sm:$0xff]  ;;  %v1254_v42 = vadd.s32 32, %v8102_v36  ;;  %v1255_v43 = vadd.s32 40, %v8102_v36  ;;  %v1256_v44 = vadd.s32 48, %v8102_v36 }
  0x3c   : > { %438 = vperm.xlu1 %7492, %v7961_v4   ;;  %428 = vperm.xlu0 %7491, %v7964_v5   ;;  %v8025_v20 = vld [vmem:[%s7836_s29 + $0x98] sm:$0xff]  ;;  %v8028_v21 = vld [vmem:[%s7836_s29 + $0x90] sm:$0xff]  ;;  %v8033_v22 = vld [vmem:[%s7836_s29 + $0xa8] sm:$0xff]  ;;  %vm1269_vm3 = vcmp.lt.s32.totalorder %v1251_v37, %v8107_v38  ;;  %vm1270_vm5 = vcmp.lt.s32.totalorder %v1252_v40, %v8107_v38  ;;  %vm1271_vm6 = vcmp.lt.s32.totalorder %v1253_v41, %v8107_v38  ;;  %v1257_v45 = vadd.s32 56, %v8102_v36  ;;  %s7708_s18 = smov 48   ;;  %s7709_s19 = smov 60  }
  0x3d   : > { %v8036_v23 = vld [vmem:[%s7836_s29 + $0xa0] sm:$0xff]  ;;  %v8041_v24 = vld [vmem:[%s7836_s29 + $0xb8] sm:$0xff]  ;;  %v8044_v25 = vld [vmem:[%s7836_s29 + $0xb0] sm:$0xff]  ;;  %vm1272_vm8 = vcmp.lt.s32.totalorder %v1254_v42, %v8107_v38  ;;  %vm1273_vm9 = vcmp.lt.s32.totalorder %v1255_v43, %v8107_v38  ;;  %vm1274_vm11 = vcmp.lt.s32.totalorder %v1256_v44, %v8107_v38  ;;  %v1258_v46 = vadd.s32 64, %v8102_v36  ;;  %s7710_s20 = smov 72   ;;  %s7711_s23 = smov 84  }
  0x3e   : > { %v8049_v26 = vld [vmem:[%s7836_s29 + $0xc8] sm:$0xff]  ;;  %v8052_v27 = vld [vmem:[%s7836_s29 + $0xc0] sm:$0xff]  ;;  %v8057_v28 = vld [vmem:[%s7836_s29 + $0xd8] sm:$0xff]  ;;  %vm1275_vm12 = vcmp.lt.s32.totalorder %v1257_v45, %v8107_v38  ;;  %v1259_v47 = vadd.s32 72, %v8102_v36  ;;  %v1260_v51 = vadd.s32 80, %v8102_v36  ;;  %v1261_v52 = vadd.s32 88, %v8102_v36 }
  0x3f   : > { %v8060_v29 = vld [vmem:[%s7836_s29 + $0xd0] sm:$0xff]  ;;  %v8065_v30 = vld [vmem:[%s7836_s29 + $0xe8] sm:$0xff]  ;;  %v8068_v31 = vld [vmem:[%s7836_s29 + $0xe0] sm:$0xff]  ;;  %vm1276_vm14 = vcmp.lt.s32.totalorder %v1258_v46, %v8107_v38  ;;  %v1262_v55 = vadd.s32 96, %v8102_v36  ;;  %v1263_v56 = vadd.s32 104, %v8102_v36  ;;  %v1264_v61 = vadd.s32 112, %v8102_v36 }
  0x40   : > { %448 = vperm.xlu1 %7492, %v7969_v6   ;;  %443 = vperm.xlu0 %7491, %v7972_v7   ;;  %v8073_v32 = vld [vmem:[%s7836_s29 + $0xf8] sm:$0xff]  ;;  %v8076_v33 = vld [vmem:[%s7836_s29 + $0xf0] sm:$0xff]  ;;  %vm6215_vm4 = vmpackc.low %vm1269_vm3, %vm1268_vm2  ;;  %vm1277_vm15 = vcmp.lt.s32.totalorder %v1259_v47, %v8107_v38  ;;  %vm1278_vm2 = vcmp.lt.s32.totalorder %v1260_v51, %v8107_v38  ;;  %vm1279_vm3 = vcmp.lt.s32.totalorder %v1261_v52, %v8107_v38  ;;  %v1265_v62 = vadd.s32 120, %v8102_v36 }
  0x41   : > { %7004 = vmatprep.subr.msk.bf16.mxu0 %vm6215_vm4, %v12064_v39  ;;  %7436 = vmatprep.subr.msk.bf16.mxu1 %vm6215_vm4, %v12064_v39  ;;  %vm6217_vm7 = vmpackc.low %vm1271_vm6, %vm1270_vm5  ;;  %vm1280_vm5 = vcmp.lt.s32.totalorder %v1262_v55, %v8107_v38  ;;  %vm1281_vm6 = vcmp.lt.s32.totalorder %v1263_v56, %v8107_v38  ;;  %v1326_v35 = vld [vmem:[#allocation2 + $0x10] sm:$0xff]  ;;  %v1331_v37 = vld [vmem:[#allocation2 + $0x38] sm:$0xff] }
  0x42   : > { %7005 = vmatpush3.bf16.msk.msra.mxu0 %vm6215_vm4, %v12064_v39  ;;  %7444 = vmatpush3.bf16.msk.msra.mxu1 %vm6215_vm4, %v12064_v39  ;;  %vm6219_vm10 = vmpackc.low %vm1273_vm9, %vm1272_vm8  ;;  %vm1282_vm8 = vcmp.lt.s32.totalorder %v1264_v61, %v8107_v38  ;;  %vm1283_vm9 = vcmp.lt.s32.totalorder %v1265_v62, %v8107_v38  ;;  %v1328_v40 = vld [vmem:[#allocation2 + $0x20] sm:$0xff]  ;;  %v1333_v41 = vld [vmem:[#allocation2 + $0x48] sm:$0xff] }
  0x43   : > { %7006 = vmatprep.subr.msk.bf16.mxu0 %vm6217_vm7, %v12064_v39  ;;  %7437 = vmatprep.subr.msk.bf16.mxu1 %vm6217_vm7, %v12064_v39  ;;  %vm6221_vm13 = vmpackc.low %vm1275_vm12, %vm1274_vm11  ;;  %v1330_v43 = vld [vmem:[#allocation2 + $0x30] sm:$0xff]  ;;  %v1335_v44 = vld [vmem:[#allocation2 + $0x58] sm:$0xff] }
  0x44   : > { %458 = vperm.xlu1 %7492, %v7977_v8   ;;  %453 = vperm.xlu0 %7491, %v7980_v9   ;;  %vm6223_vm1 = vmpackc.low %vm1277_vm15, %vm1276_vm14  ;;  %v1332_v47 = vld [vmem:[#allocation2 + $0x40] sm:$0xff]  ;;  %v1334_v55 = vld [vmem:[#allocation2 + $0x50] sm:$0xff] }
  0x45   : > { %vm6225_vm4 = vmpackc.low %vm1279_vm3, %vm1278_vm2  ;;  %v1339_v56 = vld [vmem:[#allocation2 + $0x78] sm:$0xff] }
  0x46   : > { %7007 = vmatpush3.bf16.msk.msra.mxu0 %vm6217_vm7, %v12064_v39  ;;  %7445 = vmatpush3.bf16.msk.msra.mxu1 %vm6217_vm7, %v12064_v39  ;;  %vm6227_vm7 = vmpackc.low %vm1281_vm6, %vm1280_vm5 }
  0x47   : > { %7008 = vmatprep.subr.msk.bf16.mxu0 %vm6219_vm10, %v12064_v39  ;;  %7438 = vmatprep.subr.msk.bf16.mxu1 %vm6219_vm10, %v12064_v39 }
  0x48   : > { %468 = vperm.xlu1 %7492, %v7983_v10   ;;  %463 = vperm.xlu0 %7491, %v7986_v11  }
  0x4a   : > { %7009 = vmatpush3.bf16.msk.msra.mxu0 %vm6219_vm10, %v12064_v39  ;;  %7446 = vmatpush3.bf16.msk.msra.mxu1 %vm6219_vm10, %v12064_v39  ;;  %vm6229_vm10 = vmpackc.low %vm1283_vm9, %vm1282_vm8 }
  0x4b   : > { %7010 = vmatprep.subr.msk.bf16.mxu0 %vm6221_vm13, %v12064_v39  ;;  %7439 = vmatprep.subr.msk.bf16.mxu1 %vm6221_vm13, %v12064_v39 }
  0x4c   : > { %478 = vperm.xlu1 %7492, %v7993_v12   ;;  %473 = vperm.xlu0 %7491, %v7996_v13  }
  0x4e   : > { %7011 = vmatpush3.bf16.msk.msra.mxu0 %vm6221_vm13, %v12064_v39  ;;  %7447 = vmatpush3.bf16.msk.msra.mxu1 %vm6221_vm13, %v12064_v39 }
  0x4f   : > { %7012 = vmatprep.subr.msk.bf16.mxu0 %vm6223_vm1, %v12064_v39  ;;  %7440 = vmatprep.subr.msk.bf16.mxu1 %vm6223_vm1, %v12064_v39 }
  0x50   : > { %488 = vperm.xlu1 %7492, %v8001_v14   ;;  %483 = vperm.xlu0 %7491, %v8004_v15  }
  0x52   : > { %7013 = vmatpush3.bf16.msk.msra.mxu0 %vm6223_vm1, %v12064_v39  ;;  %7448 = vmatpush3.bf16.msk.msra.mxu1 %vm6223_vm1, %v12064_v39 }
  0x53   : > { %7014 = vmatprep.subr.msk.bf16.mxu0 %vm6225_vm4, %v12064_v39  ;;  %7441 = vmatprep.subr.msk.bf16.mxu1 %vm6225_vm4, %v12064_v39 }
  0x54   : > { %498 = vperm.xlu1 %7492, %v8009_v16   ;;  %493 = vperm.xlu0 %7491, %v8012_v17  }
  0x56   : > { %7015 = vmatpush3.bf16.msk.msra.mxu0 %vm6225_vm4, %v12064_v39  ;;  %7449 = vmatpush3.bf16.msk.msra.mxu1 %vm6225_vm4, %v12064_v39 }
  0x57   : > { %7016 = vmatprep.subr.msk.bf16.mxu0 %vm6227_vm7, %v12064_v39  ;;  %7442 = vmatprep.subr.msk.bf16.mxu1 %vm6227_vm7, %v12064_v39 }
  0x58   : > { %508 = vperm.xlu1 %7492, %v8017_v18   ;;  %503 = vperm.xlu0 %7491, %v8020_v19  }
  0x5a   : > { %7017 = vmatpush3.bf16.msk.msra.mxu0 %vm6227_vm7, %v12064_v39  ;;  %7450 = vmatpush3.bf16.msk.msra.mxu1 %vm6227_vm7, %v12064_v39 }
  0x5b   : > { %7018 = vmatprep.subr.msk.bf16.mxu0 %vm6229_vm10, %v12064_v39  ;;  %7443 = vmatprep.subr.msk.bf16.mxu1 %vm6229_vm10, %v12064_v39 }
  0x5c   : > { %518 = vperm.xlu1 %7492, %v8025_v20   ;;  %513 = vperm.xlu0 %7491, %v8028_v21  }
  0x5e   : > { %7019 = vmatpush3.bf16.msk.msra.mxu0 %vm6229_vm10, %v12064_v39  ;;  %7451 = vmatpush3.bf16.msk.msra.mxu1 %vm6229_vm10, %v12064_v39  ;;  %v811_v39 = vsub.s32 1, %v8102_v36 }
  0x60   : > { %528 = vperm.xlu1 %7492, %v8033_v22   ;;  %523 = vperm.xlu0 %7491, %v8036_v23  }
  0x64   : > { %538 = vperm.xlu1 %7492, %v8041_v24   ;;  %533 = vperm.xlu0 %7491, %v8044_v25  }
  0x68   : > { %548 = vperm.xlu1 %7492, %v8049_v26   ;;  %543 = vperm.xlu0 %7491, %v8052_v27  }
  0x6c   : > { %558 = vperm.xlu1 %7492, %v8057_v28   ;;  %553 = vperm.xlu0 %7491, %v8060_v29  }
  0x70   : > { %568 = vperm.xlu1 %7492, %v8065_v30   ;;  %563 = vperm.xlu0 %7491, %v8068_v31  }
  0x74   : > { %578 = vperm.xlu1 %7492, %v8073_v32   ;;  %573 = vperm.xlu0 %7491, %v8076_v33  }
  0x78   : > { %7494 = vset.pattern.permute.xlu1 %v7700_v34  ;;  %7493 = vset.pattern.permute.xlu0 %v7700_v34 }
  0x79   : > { %686 = vperm.xlu1 %7494, %v7964_v5   ;;  %682 = vperm.xlu0 %7493, %v7954_v2  }
  0x7d   : > { %690 = vperm.xlu1 %7494, %v7951_v1   ;;  %694 = vperm.xlu0 %7493, %v7961_v4  }
  0x81   : > { %698 = vperm.xlu1 %7494, %v7972_v7   ;;  %702 = vperm.xlu0 %7493, %v7969_v6  }
  0x85   : > { %706 = vperm.xlu1 %7494, %v7980_v9   ;;  %710 = vperm.xlu0 %7493, %v7977_v8  }
  0x89   : > { %714 = vperm.xlu1 %7494, %v7986_v11   ;;  %718 = vperm.xlu0 %7493, %v7983_v10  }
  0x8d   : > { %722 = vperm.xlu1 %7494, %v7996_v13   ;;  %726 = vperm.xlu0 %7493, %v7993_v12  }
  0x91   : > { %730 = vperm.xlu1 %7494, %v8004_v15   ;;  %734 = vperm.xlu0 %7493, %v8001_v14  }
  0x95   : > { %738 = vperm.xlu1 %7494, %v8012_v17   ;;  %742 = vperm.xlu0 %7493, %v8009_v16  }
  0x99   : > { %746 = vperm.xlu1 %7494, %v8020_v19   ;;  %750 = vperm.xlu0 %7493, %v8017_v18  }
  0x9d   : > { %754 = vperm.xlu1 %7494, %v8028_v21   ;;  %758 = vperm.xlu0 %7493, %v8025_v20  }
  0xa1   : > { %762 = vperm.xlu1 %7494, %v8036_v23   ;;  %766 = vperm.xlu0 %7493, %v8033_v22  }
  0xa5   : > { %770 = vperm.xlu1 %7494, %v8044_v25   ;;  %774 = vperm.xlu0 %7493, %v8041_v24  }
  0xa9   : > { %778 = vperm.xlu1 %7494, %v8052_v27   ;;  %782 = vperm.xlu0 %7493, %v8049_v26  }
  0xad   : > { %786 = vperm.xlu1 %7494, %v8060_v29   ;;  %790 = vperm.xlu0 %7493, %v8057_v28  }
  0xb1   : > { %794 = vperm.xlu1 %7494, %v8068_v31   ;;  %798 = vperm.xlu0 %7493, %v8065_v30  }
  0xb5   : > { %802 = vperm.xlu1 %7494, %v8076_v33   ;;  %806 = vperm.xlu0 %7493, %v8073_v32  }
  0xb7   : > { %v8148_v48 = vpop.permute.xlu1 %433  ;;  %v8150_v49 = vpop.permute.xlu0 %423 }
  0xb9   : > { %7495 = vset.pattern.permute.xlu1 %v7702_v50  ;;  %7496 = vset.pattern.permute.xlu0 %v7702_v50  ;;  %v1337_v50 = vld [vmem:[#allocation2 + $0x68] sm:$0xff] }
  0xba   : > { %910 = vperm.xlu1 %7495, %v7954_v2   ;;  %914 = vperm.xlu0 %7496, %v7964_v5  }
  0xbb   : > { %v8160_v53 = vpop.permute.xlu1 %438  ;;  %v8162_v54 = vpop.permute.xlu0 %428 }
  0xbe   : > { %918 = vperm.xlu1 %7495, %v7951_v1   ;;  %926 = vperm.xlu0 %7496, %v7972_v7  }
  0xbf   : > { %v8174_v57 = vpop.permute.xlu1 %448  ;;  %v8176_v58 = vpop.permute.xlu0 %443 }
  0xc2   : > { %922 = vperm.xlu1 %7495, %v7961_v4   ;;  %934 = vperm.xlu0 %7496, %v7980_v9  }
  0xc3   : > { %v8186_v59 = vpop.permute.xlu1 %458  ;;  %v8188_v60 = vpop.permute.xlu0 %453 }
  0xc6   : > { %930 = vperm.xlu1 %7495, %v7969_v6   ;;  %942 = vperm.xlu0 %7496, %v7986_v11  }
  0xc7   : > { %v8200_v63 = vpop.permute.xlu1 %468  ;;  %v8202_v0 = vpop.permute.xlu0 %463 }
  0xca   : > { %938 = vperm.xlu1 %7495, %v7977_v8   ;;  %950 = vperm.xlu0 %7496, %v7996_v13  }
  0xcb   : > { %v8210_v1 = vpop.permute.xlu1 %478  ;;  %v8212_v2 = vpop.permute.xlu0 %473 }
  0xce   : > { %946 = vperm.xlu1 %7495, %v7983_v10   ;;  %958 = vperm.xlu0 %7496, %v8004_v15  }
  0xcf   : > { %v8216_v4 = vpop.permute.xlu1 %488  ;;  %v8218_v5 = vpop.permute.xlu0 %483 }
  0xd2   : > { %954 = vperm.xlu1 %7495, %v7993_v12   ;;  %966 = vperm.xlu0 %7496, %v8012_v17  }
  0xd3   : > { %v8222_v6 = vpop.permute.xlu1 %498  ;;  %v8224_v7 = vpop.permute.xlu0 %493 }
  0xd6   : > { %962 = vperm.xlu1 %7495, %v8001_v14   ;;  %974 = vperm.xlu0 %7496, %v8020_v19  }
  0xd7   : > { %v8228_v8 = vpop.permute.xlu1 %508  ;;  %v8230_v9 = vpop.permute.xlu0 %503 }
  0xda   : > { %970 = vperm.xlu1 %7495, %v8009_v16   ;;  %982 = vperm.xlu0 %7496, %v8028_v21  }
  0xdb   : > { %v8234_v10 = vpop.permute.xlu1 %518  ;;  %v8236_v11 = vpop.permute.xlu0 %513 }
  0xde   : > { %978 = vperm.xlu1 %7495, %v8017_v18   ;;  %990 = vperm.xlu0 %7496, %v8036_v23  }
  0xdf   : > { %v8240_v12 = vpop.permute.xlu1 %528  ;;  %v8242_v13 = vpop.permute.xlu0 %523 }
  0xe2   : > { %986 = vperm.xlu1 %7495, %v8025_v20   ;;  %998 = vperm.xlu0 %7496, %v8044_v25  }
  0xe3   : > { %v8246_v14 = vpop.permute.xlu1 %538  ;;  %v8248_v15 = vpop.permute.xlu0 %533 }
  0xe6   : > { %994 = vperm.xlu1 %7495, %v8033_v22   ;;  %1006 = vperm.xlu0 %7496, %v8052_v27   ;;  %v1327_v27 = vld [vmem:[#allocation2 + $0x18] sm:$0xff] }
  0xe7   : > { %v8252_v16 = vpop.permute.xlu1 %548  ;;  %v8254_v17 = vpop.permute.xlu0 %543 }
  0xea   : > { %1002 = vperm.xlu1 %7495, %v8041_v24   ;;  %1014 = vperm.xlu0 %7496, %v8060_v29   ;;  %v1324_v24 = vld [vmem:[#allocation2] sm:$0xff] }
  0xeb   : > { %v8258_v18 = vpop.permute.xlu1 %558  ;;  %v8260_v19 = vpop.permute.xlu0 %553 }
  0xee   : > { %1010 = vperm.xlu1 %7495, %v8049_v26   ;;  %1022 = vperm.xlu0 %7496, %v8068_v31   ;;  %v1325_v31 = vld [vmem:[#allocation2 + $0x8] sm:$0xff] }
  0xef   : > { %v8264_v20 = vpop.permute.xlu1 %568  ;;  %v8266_v21 = vpop.permute.xlu0 %563 }
  0xf2   : > { %1018 = vperm.xlu1 %7495, %v8057_v28   ;;  %1030 = vperm.xlu0 %7496, %v8076_v33   ;;  %v1329_v33 = vld [vmem:[#allocation2 + $0x28] sm:$0xff] }
  0xf3   : > { %v8270_v22 = vpop.permute.xlu1 %578  ;;  %v8272_v23 = vpop.permute.xlu0 %573 }
  0xf6   : > { %1026 = vperm.xlu1 %7495, %v8065_v30   ;;  %7497 = vset.pattern.permute.xlu0 %v7699_v3 }
  0xf7   : > { %1519 = vperm.xlu0 %7497, %v1324_v24   ;;  %v1336_v24 = vld [vmem:[#allocation2 + $0x60] sm:$0xff] }
  0xf8   : > { %v8276_v25 = vpop.permute.xlu1 %686  ;;  %v8278_v26 = vpop.permute.xlu0 %682 }
  0xfa   : > { %1034 = vperm.xlu1 %7495, %v8073_v32  }
  0xfb   : > { %1534 = vperm.xlu0 %7497, %v1327_v27   ;;  %v1341_v27 = vld [vmem:[#allocation2 + $0x88] sm:$0xff] }
  0xfc   : > { %v8281_v28 = vpop.permute.xlu1 %690  ;;  %v8283_v29 = vpop.permute.xlu0 %694 }
  0xfe   : > { %7498 = vset.pattern.permute.xlu1 %v7699_v3 }
  0xff   : > { %1524 = vperm.xlu1 %7498, %v1325_v31   ;;  %1544 = vperm.xlu0 %7497, %v1329_v33  }
 0x100   : > { %v8286_v30 = vpop.permute.xlu1 %698  ;;  %v8288_v34 = vpop.permute.xlu0 %702 }
 0x103   : > { %1529 = vperm.xlu1 %7498, %v1326_v35   ;;  %1554 = vperm.xlu0 %7497, %v1331_v37   ;;  %v1338_v35 = vld [vmem:[#allocation2 + $0x70] sm:$0xff]  ;;  %v1343_v37 = vld [vmem:[#allocation2 + $0x98] sm:$0xff] }
 0x104   : > { %v8290_v32 = vpop.permute.xlu1 %706  ;;  %v8292_v38 = vpop.permute.xlu0 %710 }
 0x107   : > { %1539 = vperm.xlu1 %7498, %v1328_v40   ;;  %1564 = vperm.xlu0 %7497, %v1333_v41   ;;  %v583_v40 = vsub.s32 0, %v8102_v36 }
 0x108   : > { %v8294_v42 = vpop.permute.xlu1 %714  ;;  %v8296_v3 = vpop.permute.xlu0 %718 }
 0x10b   : > { %1549 = vperm.xlu1 %7498, %v1330_v43   ;;  %1574 = vperm.xlu0 %7497, %v1335_v44   ;;  %v1340_v44 = vld [vmem:[#allocation2 + $0x80] sm:$0xff] }
 0x10c   : > { %v8298_v45 = vpop.permute.xlu1 %722  ;;  %v8300_v46 = vpop.permute.xlu0 %726 }
 0x10f   : > { %1559 = vperm.xlu1 %7498, %v1332_v47   ;;  %1584 = vperm.xlu0 %7497, %v1337_v50   ;;  %v1345_v47 = vld [vmem:[#allocation2 + $0xa8] sm:$0xff]  ;;  %v404_v50 = vld [vmem:[%s7841_s6] sm:$0x7] }
 0x110   : > { %v8302_v51 = vpop.permute.xlu1 %730  ;;  %v8304_v52 = vpop.permute.xlu0 %734 }
 0x113   : > { %1569 = vperm.xlu1 %7498, %v1334_v55   ;;  %1594 = vperm.xlu0 %7497, %v1339_v56   ;;  %v8320_v55 = vrot.slane %v404_v50, %v583_v40  ;;  %v1039_v40 = vsub.s32 2, %v8102_v36  ;;  %v8346_v36 = vrot.slane %v404_v50, %v811_v39 }
 0x114   : > { %v8306_v61 = vpop.permute.xlu1 %738  ;;  %v8308_v62 = vpop.permute.xlu0 %742 }
 0x117   : > { %1579 = vperm.xlu1 %7498, %v1336_v24   ;;  %1604 = vperm.xlu0 %7497, %v1341_v27   ;;  %v1342_v27 = vld [vmem:[#allocation2 + $0x90] sm:$0xff] }
 0x118   : > { %v8310_v31 = vpop.permute.xlu1 %746  ;;  %v8312_v33 = vpop.permute.xlu0 %750 }
 0x119   : > { %12150 = vst [vmem:[#allocation6_spill] sm:$0xff] %v8310_v31  ;;  %12151 = vst [vmem:[#allocation7_spill] sm:$0xff] %v8312_v33  ;;  %v1346_v33 = vld [vmem:[#allocation2 + $0xb0] sm:$0xff] }
 0x11b   : > { %1589 = vperm.xlu1 %7498, %v1338_v35   ;;  %1614 = vperm.xlu0 %7497, %v1343_v37   ;;  %v1347_v35 = vld [vmem:[#allocation2 + $0xb8] sm:$0xff]  ;;  %v587_v37 = vsub.f32 %v8148_v48, %v8320_v55  ;;  %v590_v48 = vsub.f32 %v8174_v57, %v8320_v55 }
 0x11c   : > { %v8315_v41 = vpop.permute.xlu1 %754  ;;  %v8317_v43 = vpop.permute.xlu0 %758 }
 0x11d   : > { %12152 = vst [vmem:[#allocation8_spill] sm:$0xff] %v8315_v41  ;;  %12153 = vst [vmem:[#allocation9_spill] sm:$0xff] %v8317_v43 }
 0x11f   : > { %1599 = vperm.xlu1 %7498, %v1340_v44   ;;  %1624 = vperm.xlu0 %7497, %v1345_v47   ;;  %v1344_v44 = vld [vmem:[#allocation2 + $0xa0] sm:$0xff]  ;;  %v1349_v47 = vld [vmem:[#allocation2 + $0xc8] sm:$0xff] }
 0x120   : > { %v8322_v56 = vpop.permute.xlu1 %762  ;;  %v8324_v24 = vpop.permute.xlu0 %766 }
 0x121   : > { %12154 = vst [vmem:[#allocation10_spill] sm:$0xff] %v8322_v56  ;;  %12155 = vst [vmem:[#allocation11_spill] sm:$0xff] %v8324_v24  ;;  %v585_v24 = vsub.f32 %v8150_v49, %v8320_v55 }
 0x123   : > { %1609 = vperm.xlu1 %7498, %v1342_v27   ;;  %1634 = vperm.xlu0 %7497, %v1347_v35   ;;  %v588_v27 = vsub.f32 %v8160_v53, %v8320_v55  ;;  %v586_v35 = vsub.f32 %v8162_v54, %v8320_v55  ;;  %v8352_v53 = vrot.slane %v404_v50, %v1039_v40  ;;  %v1351_v54 = vld [vmem:[#allocation2 + $0xd8] sm:$0xff] }
 0x124   : > { %v8329_v43 = vpop.permute.xlu1 %770  ;;  %v8331_v41 = vpop.permute.xlu0 %774  ;;  %v8354_v31 = vmul.f32 %v585_v24, %v585_v24  ;;  %v593_v50 = vsub.f32 %v8202_v0, %v8320_v55  ;;  %v596_v24 = vsub.f32 %v8210_v1, %v8320_v55  ;;  %v8370_v40 = vmul.f32 %v590_v48, %v590_v48 }
 0x125   : > { %12156 = vst [vmem:[#allocation12_spill] sm:$0xff] %v8329_v43  ;;  %12157 = vst [vmem:[#allocation13_spill] sm:$0xff] %v8331_v41  ;;  %v589_v43 = vsub.f32 %v8176_v58, %v8320_v55  ;;  %v8344_v41 = vmul.f32 %v587_v37, %v587_v37  ;;  %v8356_v57 = vmul.f32 %v588_v27, %v588_v27 }
 0x126   : > { %v592_v58 = vsub.f32 %v8186_v59, %v8320_v55  ;;  %v591_v37 = vsub.f32 %v8188_v60, %v8320_v55  ;;  %v8362_v39 = vmul.f32 %v586_v35, %v586_v35  ;;  %v595_v59 = vsub.f32 %v8212_v2, %v8320_v55  ;;  %v1348_v35 = vld [vmem:[#allocation2 + $0xc0] sm:$0xff]  ;;  %v1353_v2 = vld [vmem:[#allocation2 + $0xe8] sm:$0xff] }
 0x127   : > { %1619 = vperm.xlu1 %7498, %v1344_v44   ;;  %1644 = vperm.xlu0 %7497, %v1349_v47   ;;  %v594_v44 = vsub.f32 %v8200_v63, %v8320_v55  ;;  %v8372_v47 = vmul.f32 %v589_v43, %v589_v43  ;;  %v598_v60 = vsub.f32 %v8216_v4, %v8320_v55 }
 0x128   : > { %v8348_v56 = vpop.permute.xlu1 %778  ;;  %v8350_v49 = vpop.permute.xlu0 %782  ;;  %v597_v63 = vsub.f32 %v8218_v5, %v8320_v55  ;;  %v600_v0 = vsub.f32 %v8222_v6, %v8320_v55  ;;  %v599_v1 = vsub.f32 %v8224_v7, %v8320_v55  ;;  %v8390_v48 = vmul.f32 %v591_v37, %v591_v37 }
 0x129   : > { %12158 = vst [vmem:[#allocation14_spill] sm:$0xff] %v8348_v56  ;;  %12159 = vst [vmem:[#allocation15_spill] sm:$0xff] %v8350_v49  ;;  %v602_v4 = vsub.f32 %v8228_v8, %v8320_v55  ;;  %v601_v5 = vsub.f32 %v8230_v9, %v8320_v55  ;;  %v8396_v6 = vmul.f32 %v594_v44, %v594_v44  ;;  %v1355_v49 = vld [vmem:[#allocation2 + $0xf8] sm:$0xff] }
 0x12a   : > { %v8400_v7 = vmul.f32 %v596_v24, %v596_v24  ;;  %v606_v8 = vsub.f32 %v8240_v12, %v8320_v55  ;;  %v8410_v9 = vmul.f32 %v598_v60, %v598_v60  ;;  %v8412_v37 = vmul.f32 %v597_v63, %v597_v63 }
 0x12b   : > { %1629 = vperm.xlu1 %7498, %v1346_v33   ;;  %1654 = vperm.xlu0 %7497, %v1351_v54   ;;  %v8388_v33 = vmul.f32 %v592_v58, %v592_v58  ;;  %v8398_v54 = vmul.f32 %v593_v50, %v593_v50  ;;  %v603_v58 = vsub.f32 %v8236_v11, %v8320_v55 }
 0x12c   : > { %v8384_v27 = vpop.permute.xlu1 %786  ;;  %v8386_v43 = vpop.permute.xlu0 %790  ;;  %v8414_v44 = vmul.f32 %v600_v0, %v600_v0  ;;  %v8416_v50 = vmul.f32 %v599_v1, %v599_v1  ;;  %v8422_v11 = vmul.f32 %v602_v4, %v602_v4  ;;  %v8424_v56 = vmul.f32 %v601_v5, %v601_v5 }
 0x12d   : > { %12160 = vst [vmem:[#allocation16_spill] sm:$0xff] %v8384_v27  ;;  %12161 = vst [vmem:[#allocation17_spill] sm:$0xff] %v8386_v43  ;;  %v604_v43 = vsub.f32 %v8234_v10, %v8320_v55  ;;  %v8404_v27 = vmul.f32 %v595_v59, %v595_v59  ;;  %v1350_v59 = vld [vmem:[#allocation2 + $0xd0] sm:$0xff]  ;;  %v605_v12 = vsub.f32 %v8242_v13, %v8320_v55 }
 0x12e   : > { %v608_v60 = vsub.f32 %v8246_v14, %v8320_v55  ;;  %v607_v0 = vsub.f32 %v8248_v15, %v8320_v55  ;;  %v610_v1 = vsub.f32 %v8252_v16, %v8320_v55  ;;  %v8440_v4 = vmul.f32 %v606_v8, %v606_v8 }
 0x12f   : > { %1639 = vperm.xlu1 %7498, %v1348_v35   ;;  %1664 = vperm.xlu0 %7497, %v1353_v2   ;;  %v8430_v63 = vmul.f32 %v604_v43, %v604_v43  ;;  %v616_v35 = vsub.f32 %v8270_v22, %v8320_v55  ;;  %v8438_v2 = vmul.f32 %v603_v58, %v603_v58  ;;  %v1352_v58 = vld [vmem:[#allocation2 + $0xe0] sm:$0xff] }
 0x130   : > { %v8418_v24 = vpop.permute.xlu1 %794  ;;  %v8420_v10 = vpop.permute.xlu0 %798  ;;  %12164 = vst [vmem:[#allocation20_spill] sm:$0xff] %v8440_v4  ;;  %v615_v13 = vsub.f32 %v8272_v23, %v8320_v55  ;;  %v609_v14 = vsub.f32 %v8254_v17, %v8320_v55  ;;  %v612_v15 = vsub.f32 %v8258_v18, %v8320_v55  ;;  %v814_v16 = vsub.f32 %v8276_v25, %v8346_v36 }
 0x131   : > { %12162 = vst [vmem:[#allocation18_spill] sm:$0xff] %v8418_v24  ;;  %12163 = vst [vmem:[#allocation19_spill] sm:$0xff] %v8420_v10  ;;  %v813_v22 = vsub.f32 %v8278_v26, %v8346_v36  ;;  %v8452_v8 = vmul.f32 %v605_v12, %v605_v12  ;;  %v8454_v23 = vmul.f32 %v608_v60, %v608_v60 }
 0x132   : > { %v8460_v18 = vmul.f32 %v610_v1, %v610_v1  ;;  %v611_v25 = vsub.f32 %v8260_v19, %v8320_v55  ;;  %v648_v10 = vmul.f32 %v616_v35, %v616_v35  ;;  %v647_v26 = vmul.f32 %v615_v13, %v615_v13 }
 0x133   : > { %1649 = vperm.xlu1 %7498, %v1350_v59   ;;  %1674 = vperm.xlu0 %7497, %v1355_v49   ;;  %12165 = vst [vmem:[#allocation21_spill] sm:$0xff] %v8454_v23  ;;  %v8458_v59 = vmul.f32 %v607_v0, %v607_v0  ;;  %v815_v24 = vsub.f32 %v8281_v28, %v8346_v36  ;;  %v1354_v23 = vld [vmem:[#allocation2 + $0xf0] sm:$0xff] }
 0x134   : > { %v803_v43 = vpop.permute.xlu1 %802  ;;  %v807_v5 = vpop.permute.xlu0 %806  ;;  %v8466_v60 = vmul.f32 %v609_v14, %v609_v14  ;;  %v845_v0 = vmul.f32 %v813_v22, %v813_v22  ;;  %v613_v1 = vsub.f32 %v8266_v21, %v8320_v55  ;;  %v816_v19 = vsub.f32 %v8283_v29, %v8346_v36 }
 0x135   : > { %v843_v49 = vsub.f32 %v803_v43, %v8346_v36  ;;  %v844_v17 = vsub.f32 %v807_v5, %v8346_v36  ;;  %v8468_v43 = vmul.f32 %v612_v15, %v612_v15  ;;  %v846_v5 = vmul.f32 %v814_v16, %v814_v16 }
 0x136   : > { %v8482_v14 = vsub.f32 %v8264_v20, %v8320_v55  ;;  %v847_v21 = vmul.f32 %v815_v24, %v815_v24  ;;  %v817_v29 = vsub.f32 %v8286_v30, %v8346_v36  ;;  %v877_v20 = vadd.f32 %v845_v0, %v8354_v31 }
 0x137   : > { %v875_v12 = vmul.f32 %v843_v49, %v843_v49  ;;  %v876_v4 = vmul.f32 %v844_v17, %v844_v17  ;;  %1659 = vperm.xlu1 %7498, %v1352_v58   ;;  %v8478_v58 = vmul.f32 %v611_v25, %v611_v25  ;;  %v878_v22 = vadd.f32 %v846_v5, %v8362_v39 }
 0x138   : > { %v8494_v25 = vmul.f32 %v613_v1, %v613_v1  ;;  %v820_v24 = vsub.f32 %v8292_v38, %v8346_v36  ;;  %v821_v30 = vsub.f32 %v8294_v42, %v8346_v36  ;;  %v879_v5 = vadd.f32 %v847_v21, %v8344_v41 }
 0x139   : > { %v8474_v35 = vadd.f32 %v875_v12, %v647_v26  ;;  %v8476_v13 = vadd.f32 %v876_v4, %v648_v10  ;;  %v911_v28 = vpop.permute.xlu1 %910  ;;  %v915_v49 = vpop.permute.xlu0 %914  ;;  %v818_v10 = vsub.f32 %v8288_v34, %v8346_v36  ;;  %v819_v4 = vsub.f32 %v8290_v32, %v8346_v36 }
 0x13a   : > { %v1041_v15 = vsub.f32 %v911_v28, %v8352_v53  ;;  %v1042_v16 = vsub.f32 %v915_v49, %v8352_v53  ;;  %v848_v26 = vmul.f32 %v816_v19, %v816_v19  ;;  %v849_v0 = vmul.f32 %v817_v29, %v817_v29 }
 0x13b   : > { %1669 = vperm.xlu1 %7498, %v1354_v23   ;;  %v850_v1 = vmul.f32 %v818_v10, %v818_v10  ;;  %v851_v19 = vmul.f32 %v819_v4, %v819_v4  ;;  %v822_v38 = vsub.f32 %v8296_v3, %v8346_v36  ;;  %v823_v42 = vsub.f32 %v8298_v45, %v8346_v36 }
 0x13c   : > { %v1073_v55 = vmul.f32 %v1041_v15, %v1041_v15  ;;  %v1074_v17 = vmul.f32 %v1042_v16, %v1042_v16  ;;  %v852_v21 = vmul.f32 %v820_v24, %v820_v24  ;;  %v853_v29 = vmul.f32 %v821_v30, %v821_v30 }
 0x13d   : > { %v919_v34 = vpop.permute.xlu1 %918  ;;  %v927_v12 = vpop.permute.xlu0 %926  ;;  %v12166_v4 = vmov 1.0|1.0   ;;  %v854_v24 = vmul.f32 %v822_v38, %v822_v38  ;;  %v826_v38 = vsub.f32 %v8304_v52, %v8346_v36 }
 0x13e   : > { %v1043_v32 = vsub.f32 %v919_v34, %v8352_v53  ;;  %v1045_v23 = vsub.f32 %v927_v12, %v8352_v53  ;;  %v8502_v39 = vadd.f32 %v1073_v55, %v877_v20  ;;  %v8504_v31 = vadd.f32 %v1074_v17, %v878_v22 }
 0x13f   : > { %v12066_v22 = vmov 0.0   ;;  %v881_v20 = vadd.f32 %v849_v0, %v8372_v47  ;;  %v824_v55 = vsub.f32 %v8300_v46, %v8346_v36  ;;  %v880_v12 = vadd.f32 %v848_v26, %v8356_v57 }
 0x140   : > { %v1075_v28 = vmul.f32 %v1043_v32, %v1043_v32  ;;  %vm1137_vm11 = vcmp.le.f32.partialorder %v8502_v39, 0.0625  ;;  %vm1138_vm12 = vcmp.le.f32.partialorder %v8504_v31, 0.0625  ;;  %v1077_v49 = vmul.f32 %v1045_v23, %v1045_v23 }
 0x141   : > { %v923_v15 = vpop.permute.xlu1 %922  ;;  %v935_v16 = vpop.permute.xlu0 %934  ;;  %v6167_v41 = vsel %vm1137_vm11, 1.0, %v12066_v22  ;;  %v6168_v3 = vsel %vm1138_vm12, 1.0, %v12066_v22  ;;  %vm6231_vm13 = vmpackc.low %vm1138_vm12, %vm1137_vm11  ;;  %v882_v32 = vadd.f32 %v850_v1, %v8370_v40  ;;  %v883_v23 = vadd.f32 %v851_v19, %v8390_v48 }
 0x142   : > { %v1044_v45 = vsub.f32 %v923_v15, %v8352_v53  ;;  %v1047_v10 = vsub.f32 %v935_v16, %v8352_v53  ;;  %7020 = vmatprep.mubr.msk.bf16.mxu0 %vm6231_vm13, %v12166_v4  ;;  %v8529_v17 = vadd.f32 %v1075_v28, %v879_v5  ;;  %v7499_v34 = vpack.i.bf16 %v6168_v3, %v6167_v41 }
 0x143   : > { %v855_v15 = vmul.f32 %v823_v42, %v823_v42  ;;  %v8534_v16 = vadd.f32 %v1077_v49, %v881_v20  ;;  %v884_v5 = vadd.f32 %v852_v21, %v8388_v33  ;;  %v885_v0 = vadd.f32 %v853_v29, %v8398_v54 }
 0x144   : > { %v1076_v30 = vmul.f32 %v1044_v45, %v1044_v45  ;;  %v1079_v22 = vmul.f32 %v1047_v10, %v1047_v10  ;;  %7500 = vrot.lane.b32.xlu1 %v7499_v34, %s7704_s14  ;;  %v856_v26 = vmul.f32 %v824_v55, %v824_v55  ;;  %v825_v48 = vsub.f32 %v8302_v51, %v8346_v36 }
 0x145   : > { %v931_v47 = vpop.permute.xlu1 %930  ;;  %v943_v46 = vpop.permute.xlu0 %942  ;;  %vm1139_vm14 = vcmp.le.f32.partialorder %v8529_v17, 0.0625  ;;  %v886_v19 = vadd.f32 %v854_v24, %v8396_v6  ;;  %v887_v54 = vadd.f32 %v855_v15, %v8404_v27  ;;  %vm1141_vm1 = vcmp.le.f32.partialorder %v8534_v16, 0.0625 }
 0x146   : > { %v8539_v57 = vadd.f32 %v1076_v30, %v880_v12  ;;  %v1046_v40 = vsub.f32 %v931_v47, %v8352_v53  ;;  %v1049_v1 = vsub.f32 %v943_v46, %v8352_v53  ;;  %v12167_v28 = vmov 0.0   ;;  %v12168_v47 = vld [vmem:[#allocation6_spill] sm:$0xff] }
 0x147   : > { %v8555_v42 = vadd.f32 %v1079_v22, %v883_v23  ;;  %v6169_v52 = vsel %vm1139_vm14, 1.0, %v12167_v28  ;;  %v888_v22 = vadd.f32 %v856_v26, %v8400_v7  ;;  %v857_v21 = vmul.f32 %v825_v48, %v825_v48 }
 0x148   : > { %vm1140_vm15 = vcmp.le.f32.partialorder %v8539_v57, 0.0625  ;;  %v1078_v33 = vmul.f32 %v1046_v40, %v1046_v40  ;;  %v1081_v29 = vmul.f32 %v1049_v1, %v1049_v1  ;;  %v858_v10 = vmul.f32 %v826_v38, %v826_v38  ;;  %v12169_v1 = vld [vmem:[#allocation7_spill] sm:$0xff] }
 0x149   : > { %v6170_v51 = vsel %vm1140_vm15, 1.0, %v12167_v28  ;;  %v939_v49 = vpop.permute.xlu1 %938  ;;  %v951_v41 = vpop.permute.xlu0 %950  ;;  %vm6233_vm2 = vmpackc.low %vm1140_vm15, %vm1139_vm14  ;;  %v827_v20 = vsub.f32 %v8306_v61, %v8346_v36  ;;  %v828_v34 = vsub.f32 %v8308_v62, %v8346_v36  ;;  %v6171_v12 = vsel %vm1141_vm1, 1.0, %v12167_v28 }
 0x14a   : > { %v8564_v27 = vadd.f32 %v1078_v33, %v882_v32  ;;  %v1048_v6 = vsub.f32 %v939_v49, %v8352_v53  ;;  %v1051_v3 = vsub.f32 %v951_v41, %v8352_v53  ;;  %7021 = vmatmul.mubr.msk.bf16.vlgmr.msra.gmra.mrb[0].mxu0 %vm6233_vm2, %v12166_v4  ;;  %v7504_v45 = vpack.i.bf16 %v6170_v51, %v6169_v52 }
 0x14b   : > { %vm1143_vm4 = vcmp.le.f32.partialorder %v8555_v42, 0.0625  ;;  %v889_v15 = vadd.f32 %v857_v21, %v8412_v37  ;;  %v829_v46 = vsub.f32 %v12168_v47, %v8346_v36  ;;  %v8595_v40 = vadd.f32 %v1081_v29, %v885_v0 }
 0x14c   : > { %vm1142_vm3 = vcmp.le.f32.partialorder %v8564_v27, 0.0625  ;;  %v1080_v55 = vmul.f32 %v1048_v6, %v1048_v6  ;;  %7505 = vrot.lane.b32.xlu0 %v7504_v45, %s7704_s14  ;;  %v1083_v24 = vmul.f32 %v1051_v3, %v1051_v3  ;;  %v859_v48 = vmul.f32 %v827_v20, %v827_v20 }
 0x14d   : > { %v6172_v7 = vsel %vm1142_vm3, 1.0, %v12167_v28  ;;  %v947_v32 = vpop.permute.xlu1 %946  ;;  %v959_v61 = vpop.permute.xlu0 %958  ;;  %vm6235_vm5 = vmpackc.low %vm1142_vm3, %vm1141_vm1  ;;  %v860_v33 = vmul.f32 %v828_v34, %v828_v34  ;;  %v6173_v51 = vsel %vm1143_vm4, 1.0, %v12167_v28  ;;  %v890_v29 = vadd.f32 %v858_v10, %v8410_v9 }
 0x14e   : > { %v8587_v62 = vadd.f32 %v1080_v55, %v884_v5  ;;  %v1050_v30 = vsub.f32 %v947_v32, %v8352_v53  ;;  %v1053_v23 = vsub.f32 %v959_v61, %v8352_v53  ;;  %7024 = vmatprep.mubr.msk.bf16.mxu0 %vm6235_vm5, %v12166_v4  ;;  %v7509_v26 = vpack.i.bf16 %v6172_v7, %v6171_v12 }
 0x14f   : > { %v830_v5 = vsub.f32 %v12169_v1, %v8346_v36  ;;  %v8611_v52 = vadd.f32 %v1083_v24, %v887_v54  ;;  %v861_v45 = vmul.f32 %v829_v46, %v829_v46  ;;  %vm12091_vm8 = vcmp.le.f32.partialorder %v8595_v40, 0.0625 }
 0x150   : > { %vm1144_vm6 = vcmp.le.f32.partialorder %v8587_v62, 0.0625  ;;  %v1082_v38 = vmul.f32 %v1050_v30, %v1050_v30  ;;  %v1085_v49 = vmul.f32 %v1053_v23, %v1053_v23  ;;  %7510 = vrot.lane.b32.xlu1 %v7509_v26, %s7704_s14  ;;  %v891_v55 = vadd.f32 %v859_v48, %v8416_v50  ;;  %v12170_v30 = vld [vmem:[#allocation8_spill] sm:$0xff] }
 0x151   : > { %v6174_v37 = vsel %vm1144_vm6, 1.0, %v12167_v28  ;;  %v955_v0 = vpop.permute.xlu1 %954  ;;  %v967_v41 = vpop.permute.xlu0 %966  ;;  %vm6237_vm7 = vmpackc.low %vm1144_vm6, %vm1143_vm4  ;;  %v862_v34 = vmul.f32 %v830_v5, %v830_v5  ;;  %vm1147_vm13 = vcmp.le.f32.partialorder %v8611_v52, 0.0625  ;;  %v893_v24 = vadd.f32 %v861_v45, %v8424_v56  ;;  %v12173_v45 = vld [vmem:[#allocation11_spill] sm:$0xff] }
 0x152   : > { %v8613_v6 = vadd.f32 %v1082_v38, %v886_v19  ;;  %v1052_v3 = vsub.f32 %v955_v0, %v8352_v53  ;;  %v1055_v21 = vsub.f32 %v967_v41, %v8352_v53  ;;  %7025 = vmatmul.mubr.msk.bf16.gmra.mrb[4].mxu0 %vm6237_vm7, %v12166_v4  ;;  %v7514_v20 = vpack.i.bf16 %v6174_v37, %v6173_v51 }
 0x153   : > { %v892_v19 = vadd.f32 %v860_v33, %v8414_v44  ;;  %v8626_v7 = vadd.f32 %v1085_v49, %v889_v15  ;;  %v6175_v44 = vsel %vm12091_vm8, 1.0, %v12167_v28  ;;  %v831_v23 = vsub.f32 %v12170_v30, %v8346_v36  ;;  %v12171_v15 = vld [vmem:[#allocation9_spill] sm:$0xff] }
 0x154   : > { %vm12069_vm9 = vcmp.le.f32.partialorder %v8613_v6, 0.0625  ;;  %v1084_v54 = vmul.f32 %v1052_v3, %v1052_v3  ;;  %v1087_v32 = vmul.f32 %v1055_v21, %v1055_v21  ;;  %7515 = vrot.lane.b32.xlu0 %v7514_v20, %s7704_s14  ;;  %v832_v47 = vsub.f32 %v12171_v15, %v8346_v36  ;;  %v12172_v3 = vld [vmem:[#allocation10_spill] sm:$0xff] }
 0x155   : > { %v6176_v12 = vsel %vm12069_vm9, 1.0, %v12167_v28  ;;  %v963_v9 = vpop.permute.xlu1 %962  ;;  %v975_v10 = vpop.permute.xlu0 %974  ;;  %vm6239_vm10 = vmpackc.low %vm12069_vm9, %vm12091_vm8  ;;  %v894_v26 = vadd.f32 %v862_v34, %v8422_v11  ;;  %v6177_v1 = vsel %vm1147_vm13, 1.0, %v12167_v28  ;;  %vm12072_vm5 = vcmp.le.f32.partialorder %v8626_v7, 0.0625 }
 0x156   : > { %v8637_v50 = vadd.f32 %v1084_v54, %v888_v22  ;;  %v1054_v61 = vsub.f32 %v963_v9, %v8352_v53  ;;  %7028 = vmatprep.mubr.msk.bf16.mxu0 %vm6239_vm10, %v12166_v4  ;;  %v7519_v46 = vpack.i.bf16 %v6176_v12, %v6175_v44  ;;  %v1057_v22 = vsub.f32 %v975_v10, %v8352_v53  ;;  %v12175_v12 = vld [vmem:[#allocation13_spill] sm:$0xff] }
 0x157   : > { %v8656_v5 = vadd.f32 %v1087_v32, %v891_v55  ;;  %v863_v0 = vmul.f32 %v831_v23, %v831_v23  ;;  %v864_v41 = vmul.f32 %v832_v47, %v832_v47  ;;  %v833_v21 = vsub.f32 %v12172_v3, %v8346_v36  ;;  %v12174_v55 = vld [vmem:[#allocation12_spill] sm:$0xff] }
 0x158   : > { %vm12074_vm2 = vcmp.le.f32.partialorder %v8637_v50, 0.0625  ;;  %v1086_v48 = vmul.f32 %v1054_v61, %v1054_v61  ;;  %7520 = vrot.lane.b32.xlu1 %v7519_v46, %s7704_s14  ;;  %v834_v20 = vsub.f32 %v12173_v45, %v8346_v36  ;;  %v835_v34 = vsub.f32 %v12174_v55, %v8346_v36 }
 0x159   : > { %v6178_v56 = vsel %vm12074_vm2, 1.0, %v12167_v28  ;;  %v971_v11 = vpop.permute.xlu1 %970  ;;  %v983_v38 = vpop.permute.xlu0 %982  ;;  %vm6241_vm7 = vmpackc.low %vm12074_vm2, %vm1147_vm13  ;;  %v836_v32 = vsub.f32 %v12175_v12, %v8346_v36  ;;  %v6179_v9 = vsel %vm12072_vm5, 1.0, %v12167_v28  ;;  %vm12073_vm0 = vcmp.le.f32.partialorder %v8656_v5, 0.0625  ;;  %v12177_v12 = vld [vmem:[#allocation20_spill] sm:$0xff] }
 0x15a   : > { %v8663_v33 = vadd.f32 %v1086_v48, %v890_v29  ;;  %v1056_v51 = vsub.f32 %v971_v11, %v8352_v53  ;;  %v1059_v37 = vsub.f32 %v983_v38, %v8352_v53  ;;  %7029 = vmatmul.mubr.msk.bf16.gmra.mrb[8].mxu0 %vm6241_vm7, %v12166_v4  ;;  %v7524_v49 = vpack.i.bf16 %v6178_v56, %v6177_v1 }
 0x15b   : > { %v1089_v29 = vmul.f32 %v1057_v22, %v1057_v22  ;;  %v895_v46 = vadd.f32 %v863_v0, %v8438_v2  ;;  %v865_v48 = vmul.f32 %v833_v21, %v833_v21  ;;  %v866_v22 = vmul.f32 %v834_v20, %v834_v20 }
 0x15c   : > { %vm12070_vm10 = vcmp.le.f32.partialorder %v8663_v33, 0.0625  ;;  %v1088_v54 = vmul.f32 %v1056_v51, %v1056_v51  ;;  %7525 = vrot.lane.b32.xlu0 %v7524_v49, %s7704_s14  ;;  %v1091_v44 = vmul.f32 %v1059_v37, %v1059_v37  ;;  %v867_v56 = vmul.f32 %v835_v34, %v835_v34  ;;  %v12176_v34 = vld [vmem:[#allocation14_spill] sm:$0xff] }
 0x15d   : > { %v6180_v10 = vsel %vm12070_vm10, 1.0, %v12167_v28  ;;  %v979_v61 = vpop.permute.xlu1 %978  ;;  %v991_v30 = vpop.permute.xlu0 %990  ;;  %vm6243_vm7 = vmpackc.low %vm12070_vm10, %vm12072_vm5  ;;  %v8696_v38 = vadd.f32 %v1089_v29, %v893_v24  ;;  %v868_v24 = vmul.f32 %v836_v32, %v836_v32  ;;  %v896_v20 = vadd.f32 %v864_v41, %v8430_v63 }
 0x15e   : > { %v8689_v23 = vadd.f32 %v1088_v54, %v892_v19  ;;  %v1058_v15 = vsub.f32 %v979_v61, %v8352_v53  ;;  %v1061_v47 = vsub.f32 %v991_v30, %v8352_v53  ;;  %7032 = vmatprep.mubr.msk.bf16.mxu0 %vm6243_vm7, %v12166_v4  ;;  %v7529_v1 = vpack.i.bf16 %v6180_v10, %v6179_v9 }
 0x15f   : > { %v6181_v19 = vsel %vm12073_vm0, 1.0, %v12167_v28  ;;  %v8704_v37 = vadd.f32 %v1091_v44, %v895_v46  ;;  %v897_v55 = vadd.f32 %v865_v48, %v8452_v8  ;;  %v837_v29 = vsub.f32 %v12176_v34, %v8346_v36  ;;  %v12179_v46 = vld [vmem:[#allocation15_spill] sm:$0xff] }
 0x160   : > { %vm12071_vm9 = vcmp.le.f32.partialorder %v8689_v23, 0.0625  ;;  %v1090_v11 = vmul.f32 %v1058_v15, %v1058_v15  ;;  %v1093_v2 = vmul.f32 %v1061_v47, %v1061_v47  ;;  %7530 = vrot.lane.b32.xlu1 %v7529_v1, %s7704_s14  ;;  %v898_v9 = vadd.f32 %v866_v22, %v12177_v12  ;;  %v12180_v22 = vld [vmem:[#allocation16_spill] sm:$0xff] }
 0x161   : > { %v6182_v51 = vsel %vm12071_vm9, 1.0, %v12167_v28  ;;  %v987_v49 = vpop.permute.xlu1 %986  ;;  %v999_v0 = vpop.permute.xlu0 %998  ;;  %vm6245_vm7 = vmpackc.low %vm12071_vm9, %vm12073_vm0  ;;  %v899_v32 = vadd.f32 %v867_v56, %v8458_v59  ;;  %vm12081_vm10 = vcmp.le.f32.partialorder %v8696_v38, 0.0625  ;;  %v869_v47 = vmul.f32 %v837_v29, %v837_v29  ;;  %v12181_v29 = vld [vmem:[#allocation17_spill] sm:$0xff] }
 0x162   : > { %v1060_v3 = vsub.f32 %v987_v49, %v8352_v53  ;;  %v1063_v21 = vsub.f32 %v999_v0, %v8352_v53  ;;  %7033 = vmatmul.mubr.msk.bf16.gmra.mrb[12].mxu0 %vm6245_vm7, %v12166_v4  ;;  %v7534_v45 = vpack.i.bf16 %v6182_v51, %v6181_v19  ;;  %v8718_v54 = vadd.f32 %v1090_v11, %v894_v26  ;;  %v12178_v26 = vld [vmem:[#allocation21_spill] sm:$0xff] }
 0x163   : > { %vm12090_vm7 = vcmp.le.f32.partialorder %v8704_v37, 0.0625  ;;  %v8725_v44 = vadd.f32 %v1093_v2, %v897_v55  ;;  %v900_v61 = vadd.f32 %v868_v24, %v12178_v26  ;;  %v838_v48 = vsub.f32 %v12179_v46, %v8346_v36 }
 0x164   : > { %v1092_v10 = vmul.f32 %v1060_v3, %v1060_v3  ;;  %7535 = vrot.lane.b32.xlu0 %v7534_v45, %s7704_s14  ;;  %v1095_v63 = vmul.f32 %v1063_v21, %v1063_v21  ;;  %vm12075_vm9 = vcmp.le.f32.partialorder %v8718_v54, 0.0625  ;;  %v839_v1 = vsub.f32 %v12180_v22, %v8346_v36 }
 0x165   : > { %v995_v8 = vpop.permute.xlu1 %994  ;;  %v1007_v41 = vpop.permute.xlu0 %1006  ;;  %vm6247_vm5 = vmpackc.low %vm12075_vm9, %vm12081_vm10  ;;  %v6184_v56 = vsel %vm12075_vm9, 1.0, %v12167_v28  ;;  %v6185_v11 = vsel %vm12090_vm7, 1.0, %v12167_v28  ;;  %v6183_v51 = vsel %vm12081_vm10, 1.0, %v12167_v28  ;;  %vm12078_vm2 = vcmp.le.f32.partialorder %v8725_v44, 0.0625 }
 0x166   : > { %v8729_v30 = vadd.f32 %v1092_v10, %v896_v20  ;;  %v1062_v59 = vsub.f32 %v995_v8, %v8352_v53  ;;  %v1065_v15 = vsub.f32 %v1007_v41, %v8352_v53  ;;  %7036 = vmatprep.mubr.msk.bf16.mxu1 %vm6247_vm5, %v12166_v4  ;;  %v8756_v49 = vadd.f32 %v1095_v63, %v899_v32  ;;  %v12182_v32 = vld [vmem:[#allocation18_spill] sm:$0xff] }
 0x167   : > { %v7539_v0 = vpack.i.bf16 %v6184_v56, %v6183_v51  ;;  %v871_v34 = vmul.f32 %v839_v1, %v839_v1  ;;  %v840_v12 = vsub.f32 %v12181_v29, %v8346_v36  ;;  %v841_v10 = vsub.f32 %v12182_v32, %v8346_v36 }
 0x168   : > { %vm12076_vm0 = vcmp.le.f32.partialorder %v8729_v30, 0.0625  ;;  %v1094_v19 = vmul.f32 %v1062_v59, %v1062_v59  ;;  %v1097_v45 = vmul.f32 %v1065_v15, %v1065_v15  ;;  %v870_v8 = vmul.f32 %v838_v48, %v838_v48 }
 0x169   : > { %v6186_v2 = vsel %vm12076_vm0, 1.0, %v12167_v28  ;;  %v1003_v24 = vpop.permute.xlu1 %1002  ;;  %v1015_v3 = vpop.permute.xlu0 %1014  ;;  %vm6249_vm5 = vmpackc.low %vm12076_vm0, %vm12090_vm7  ;;  %7540 = vrot.lane.b32.xlu1 %v7539_v0, %s7704_s14  ;;  %v6187_v26 = vsel %vm12078_vm2, 1.0, %v12167_v28  ;;  %v903_v56 = vadd.f32 %v871_v34, %v8478_v58  ;;  %v12183_v0 = vld [vmem:[#allocation19_spill] sm:$0xff]  ;;  %v12192_v16 = vmov 0 }
 0x16a   : > { %v8762_v21 = vadd.f32 %v1094_v19, %v898_v9  ;;  %v1064_v20 = vsub.f32 %v1003_v24, %v8352_v53  ;;  %v1067_v55 = vsub.f32 %v1015_v3, %v8352_v53  ;;  %7037 = vmatmul.mubr.msk.bf16.vlgmr.msra.gmra.mrb[0].mxu1 %vm6249_vm5, %v12166_v4  ;;  %v7544_v63 = vpack.i.bf16 %v6186_v2, %v6185_v11 }
 0x16b   : > { %v901_v9 = vadd.f32 %v869_v47, %v8466_v60  ;;  %vm12080_vm5 = vcmp.le.f32.partialorder %v8756_v49, 0.0625  ;;  %v872_v11 = vmul.f32 %v840_v12, %v840_v12  ;;  %v873_v19 = vmul.f32 %v841_v10, %v841_v10 }
 0x16c   : > { %vm12077_vm9 = vcmp.le.f32.partialorder %v8762_v21, 0.0625  ;;  %v1096_v41 = vmul.f32 %v1064_v20, %v1064_v20  ;;  %v1099_v15 = vmul.f32 %v1067_v55, %v1067_v55  ;;  %7545 = vrot.lane.b32.xlu0 %v7544_v63, %s7704_s14  ;;  %v902_v2 = vadd.f32 %v870_v8, %v8460_v18 }
 0x16d   : > { %v6188_v59 = vsel %vm12077_vm9, 1.0, %v12167_v28  ;;  %v1011_v46 = vpop.permute.xlu1 %1010  ;;  %v1023_v22 = vpop.permute.xlu0 %1022  ;;  %vm6251_vm0 = vmpackc.low %vm12077_vm9, %vm12078_vm2  ;;  %v8786_v60 = vadd.f32 %v1097_v45, %v901_v9  ;;  %v842_v24 = vsub.f32 %v12183_v0, %v8346_v36  ;;  %v6189_v3 = vsel %vm12080_vm5, 1.0, %v12167_v28 }
 0x16e   : > { %v8788_v47 = vadd.f32 %v1096_v41, %v900_v61  ;;  %v1066_v48 = vsub.f32 %v1011_v46, %v8352_v53  ;;  %v1069_v1 = vsub.f32 %v1023_v22, %v8352_v53  ;;  %7040 = vmatprep.mubr.msk.bf16.mxu1 %vm6251_vm0, %v12166_v4  ;;  %v7549_v51 = vpack.i.bf16 %v6188_v59, %v6187_v26 }
 0x16f   : > { %v8804_v58 = vadd.f32 %v1099_v15, %v903_v56  ;;  %vm12084_vm2 = vcmp.le.f32.partialorder %v8786_v60, 0.0625  ;;  %v646_v12 = vmul.f32 %v8482_v14, %v8482_v14  ;;  %v904_v32 = vadd.f32 %v872_v11, %v8468_v43 }
 0x170   : > { %vm12079_vm9 = vcmp.le.f32.partialorder %v8788_v47, 0.0625  ;;  %v1098_v61 = vmul.f32 %v1066_v48, %v1066_v48  ;;  %v1101_v20 = vmul.f32 %v1069_v1, %v1069_v1  ;;  %7550 = vrot.lane.b32.xlu1 %v7549_v51, %s7704_s14  ;;  %v905_v10 = vadd.f32 %v873_v19, %v8494_v25  ;;  %v8844_v48 = vld [vmem:[%s7851_s13] sm:$0xff]   ;;  %v8847_v1 = vld [vmem:[%s7851_s13 + $0x8] sm:$0xff]  }
 0x171   : > { %v6190_v45 = vsel %vm12079_vm9, 1.0, %v12167_v28  ;;  %v1019_v18 = vpop.permute.xlu1 %1018  ;;  %v1031_v55 = vpop.permute.xlu0 %1030  ;;  %vm6253_vm0 = vmpackc.low %vm12079_vm9, %vm12080_vm5  ;;  %v874_v9 = vmul.f32 %v842_v24, %v842_v24  ;;  %v6191_v26 = vsel %vm12084_vm2, 1.0, %v12167_v28  ;;  %7052 = vmatprep.subr.bf16.mxu1 %v8844_v48  ;;  %7100 = vmatprep.subr.bf16.mxu0 %v8844_v48  ;;  %v12195_v62 = vmov 0 }
 0x172   : > { %v8812_v36 = vadd.f32 %v1098_v61, %v902_v2  ;;  %v1068_v34 = vsub.f32 %v1019_v18, %v8352_v53  ;;  %v1071_v29 = vsub.f32 %v1031_v55, %v8352_v53  ;;  %7041 = vmatmul.mubr.msk.bf16.gmra.mrb[4].mxu1 %vm6253_vm0, %v12166_v4  ;;  %v7554_v63 = vpack.i.bf16 %v6190_v45, %v6189_v3  ;;  %v8872_v61 = vld [vmem:[%s7851_s13 + $0x10] sm:$0xff]   ;;  %v8896_v55 = vld [vmem:[%s7851_s13 + $0x18] sm:$0xff]  }
 0x173   : > { %vm12085_vm0 = vcmp.le.f32.partialorder %v8804_v58, 0.0625  ;;  %v8829_v14 = vadd.f32 %v1101_v20, %v905_v10  ;;  %v906_v56 = vadd.f32 %v874_v9, %v646_v12  ;;  %7101 = vmatpush3.bf16.msra.mxu0 %v8844_v48  ;;  %7053 = vmatpush3.bf16.msra.mxu1 %v8844_v48  ;;  %v8916_v12 = vld [vmem:[%s7851_s13 + $0x20] sm:$0xff]   ;;  %v8941_v10 = vld [vmem:[%s7851_s13 + $0x38] sm:$0xff]   ;;  %v12200_v27 = vmov 0 }
 0x174   : > { %vm12082_vm9 = vcmp.le.f32.partialorder %v8812_v36, 0.0625  ;;  %v1100_v8 = vmul.f32 %v1068_v34, %v1068_v34  ;;  %v1103_v41 = vmul.f32 %v1071_v29, %v1071_v29  ;;  %7555 = vrot.lane.b32.xlu0 %v7554_v63, %s7704_s14  ;;  %7102 = vmatprep.subr.bf16.mxu0 %v8847_v1 }
 0x175   : > { %v6192_v43 = vsel %vm12082_vm9, 1.0, %v12167_v28  ;;  %v1027_v25 = vpop.permute.xlu1 %1026  ;;  %vm6255_vm5 = vmpackc.low %vm12082_vm9, %vm12084_vm2  ;;  %vm12088_vm9 = vcmp.le.f32.partialorder %v8829_v14, 0.0625  ;;  %7054 = vmatprep.subr.bf16.mxu1 %v8847_v1 }
 0x176   : > { %v8836_v59 = vadd.f32 %v1100_v8, %v904_v32  ;;  %v8839_v15 = vadd.f32 %v1103_v41, %v8474_v35  ;;  %v1070_v46 = vsub.f32 %v1027_v25, %v8352_v53  ;;  %7044 = vmatprep.mubr.msk.bf16.mxu1 %vm6255_vm5, %v12166_v4  ;;  %v7559_v22 = vpack.i.bf16 %v6192_v43, %v6191_v26  ;;  %v8934_v32 = vld [vmem:[%s7851_s13 + $0x30] sm:$0xff]   ;;  %v1520_v9 = vpop.permute.xlu0 %1519 }
 0x177   : > { %v6193_v35 = vsel %vm12085_vm0, 1.0, %v12167_v28  ;;  %7103 = vmatpush3.bf16.msra.mxu0 %v8847_v1  ;;  %7055 = vmatpush3.bf16.msra.mxu1 %v8847_v1 }
 0x178   : > { %vm12083_vm10 = vcmp.le.f32.partialorder %v8836_v59, 0.0625  ;;  %v1102_v11 = vmul.f32 %v1070_v46, %v1070_v46  ;;  %7560 = vrot.lane.b32.xlu1 %v7559_v22, %s7704_s14  ;;  %vm12089_vm2 = vcmp.le.f32.partialorder %v8839_v15, 0.0625  ;;  %7104 = vmatprep.subr.bf16.mxu0 %v8872_v61 }
 0x179   : > { %v6194_v19 = vsel %vm12083_vm10, 1.0, %v12167_v28  ;;  %v1035_v51 = vpop.permute.xlu1 %1034  ;;  %vm6257_vm5 = vmpackc.low %vm12083_vm10, %vm12085_vm0  ;;  %7056 = vmatprep.subr.bf16.mxu1 %v8872_v61 }
 0x17a   : > { %v8864_v2 = vadd.f32 %v1102_v11, %v906_v56  ;;  %v1072_v0 = vsub.f32 %v1035_v51, %v8352_v53  ;;  %7045 = vmatmul.mubr.msk.bf16.gmra.mrb[8].mxu1 %vm6257_vm5, %v12166_v4  ;;  %v7564_v24 = vpack.i.bf16 %v6194_v19, %v6193_v35  ;;  %v6195_v53 = vsel %vm12088_vm9, 1.0, %v12167_v28  ;;  %v1535_v41 = vpop.permute.xlu0 %1534 }
 0x17b   : > { %7105 = vmatpush3.bf16.msra.mxu0 %v8872_v61  ;;  %7057 = vmatpush3.bf16.msra.mxu1 %v8872_v61 }
 0x17c   : > { %vm12086_vm10 = vcmp.le.f32.partialorder %v8864_v2, 0.0625  ;;  %v1104_v3 = vmul.f32 %v1072_v0, %v1072_v0  ;;  %7565 = vrot.lane.b32.xlu0 %v7564_v24, %s7704_s14  ;;  %7106 = vmatprep.subr.bf16.mxu0 %v8896_v55 }
 0x17d   : > { %v6196_v45 = vsel %vm12086_vm10, 1.0, %v12167_v28  ;;  %vm6259_vm5 = vmpackc.low %vm12086_vm10, %vm12088_vm9  ;;  %7058 = vmatprep.subr.bf16.mxu1 %v8896_v55 }
 0x17e   : > { %v8889_v20 = vadd.f32 %v1104_v3, %v8476_v13  ;;  %7048 = vmatprep.mubr.msk.bf16.mxu1 %vm6259_vm5, %v12166_v4  ;;  %v7569_v18 = vpack.i.bf16 %v6196_v45, %v6195_v53  ;;  %v6197_v13 = vsel %vm12089_vm2, 1.0, %v12167_v28  ;;  %v1525_v63 = vpop.permute.xlu1 %1524  ;;  %v1545_v43 = vpop.permute.xlu0 %1544 }
 0x17f   : > { %7107 = vmatpush3.bf16.msra.mxu0 %v8896_v55  ;;  %7059 = vmatpush3.bf16.msra.mxu1 %v8896_v55 }
 0x180   : > { %vm12087_vm0 = vcmp.le.f32.partialorder %v8889_v20, 0.0625  ;;  %7570 = vrot.lane.b32.xlu1 %v7569_v18, %s7704_s14  ;;  %7108 = vmatprep.subr.bf16.mxu0 %v8916_v12 }
 0x181   : > { %v6198_v34 = vsel %vm12087_vm0, 1.0, %v12167_v28  ;;  %vm6261_vm5 = vmpackc.low %vm12087_vm0, %vm12089_vm2  ;;  %v8924_v28 = vld [vmem:[%s7851_s13 + $0x28] sm:$0xff]   ;;  %7060 = vmatprep.subr.bf16.mxu1 %v8916_v12 }
 0x182   : > { %7049 = vmatmul.mubr.msk.bf16.gmra.mrb[12].mxu1 %vm6261_vm5, %v12166_v4  ;;  %v7574_v29 = vpack.i.bf16 %v6198_v34, %v6197_v13  ;;  %v1530_v8 = vpop.permute.xlu1 %1529  ;;  %v1555_v46 = vpop.permute.xlu0 %1554 }
 0x183   : > { %7109 = vmatpush3.bf16.msra.mxu0 %v8916_v12  ;;  %7061 = vmatpush3.bf16.msra.mxu1 %v8916_v12 }
 0x184   : > { %7575 = vrot.lane.b32.xlu0 %v7574_v29, %s7704_s14  ;;  %7110 = vmatprep.subr.bf16.mxu0 %v8924_v28 }
 0x185   : > { %7062 = vmatprep.subr.bf16.mxu1 %v8924_v28 }
 0x186   : > { %v1540_v26 = vpop.permute.xlu1 %1539  ;;  %v8951_v56 = vpop.permute.xlu0 %1564 }
 0x187   : > { %7111 = vmatpush3.bf16.msra.mxu0 %v8924_v28  ;;  %7063 = vmatpush3.bf16.msra.mxu1 %v8924_v28 }
 0x188   : > { %7064 = vmatprep.subr.bf16.mxu1 %v8934_v32  ;;  %7112 = vmatprep.subr.bf16.mxu0 %v8934_v32 }
 0x18a   : > { %v1550_v25 = vpop.permute.xlu1 %1549  ;;  %v8955_v35 = vpop.permute.xlu0 %1574 }
 0x18b   : > { %7065 = vmatpush3.bf16.msra.mxu1 %v8934_v32  ;;  %7113 = vmatpush3.bf16.msra.mxu0 %v8934_v32 }
 0x18c   : > { %7066 = vmatprep.subr.bf16.mxu1 %v8941_v10  ;;  %7114 = vmatprep.subr.bf16.mxu0 %v8941_v10 }
 0x18e   : > { %v8949_v22 = vpop.permute.xlu1 %1559  ;;  %v8970_v34 = vpop.permute.xlu0 %1584 }
 0x18f   : > { %7067 = vmatpush3.bf16.msra.mxu1 %v8941_v10  ;;  %7115 = vmatpush3.bf16.msra.mxu0 %v8941_v10 }
 0x190   : > { %7148 = vmatprep.subr.bf16.mxu1 %v8844_v48  ;;  %7196 = vmatprep.subr.bf16.mxu0 %v8844_v48 }
 0x192   : > { %v8953_v11 = vpop.permute.xlu1 %1569 }
 0x196   : > { %v8960_v24 = vpop.permute.xlu1 %1579 }
 0x19a   : > { %v8995_v57 = vpop.permute.xlu1 %1589 }
 0x21d   : > { %v7022_v19 = vpop.f32.mrb[0].mxu0 }
 0x21e   : > { %v1679_v51 = vadd.f32 %v7022_v19, %v1530_v8  ;;  %v8957_v0 = vpop.f32.mrb[1].mxu0  ;;  %1745 = vrot.lane.b32.xlu1 %v7022_v19, %s7704_s14  ;;  %v9007_v19 = vpop.permute.xlu0 %1594 }
 0x21f   : > { %v1677_v3 = vadd.f32 %v1520_v9, %v8957_v0  ;;  %v7023_v53 = vpop.f32.mrb[2].mxu0 }
 0x220   : > { %v8965_v45 = vsel %vm1139_vm14, %v1679_v51, -1.0  ;;  %v1680_v18 = vadd.f32 %v7023_v53, %v1535_v41  ;;  %v8967_v13 = vpop.f32.mrb[3].mxu0  ;;  %1747 = vrot.lane.b32.xlu0 %v7023_v53, %s7704_s14 }
 0x221   : > { %12184 = vst [vmem:[#allocation6_spill] sm:$0xff] %v8965_v45  ;;  %v8974_v29 = vsel %vm1137_vm11, %v1677_v3, -1.0  ;;  %v1678_v8 = vadd.f32 %v1525_v63, %v8967_v13  ;;  %vm2128_vm14 = vcmp.eq.f32.partialorder %v8965_v45, 0.0 }
 0x222   : > { %v8979_v9 = vsel %vm1140_vm15, %v1680_v18, -1.0  ;;  %vm2126_vm10 = vcmp.eq.f32.partialorder %v8974_v29, 0.0  ;;  %vm2544_vm2 = vcmp.eq.f32.partialorder %v8974_v29, 1.0 }
 0x223   : > { %v8983_v17 = vsel %vm1138_vm12, %v1678_v8, -1.0  ;;  %vm2129_vm5 = vcmp.eq.f32.partialorder %v8979_v9, 0.0  ;;  %vm2547_vm15 = vcmp.eq.f32.partialorder %v8979_v9, 1.0  ;;  %v12307_v8 = vmov 0 }
 0x224   : > { %vm2127_vm0 = vcmp.eq.f32.partialorder %v8983_v17, 0.0  ;;  %vm2545_vm11 = vcmp.eq.f32.partialorder %v8983_v17, 1.0  ;;  %vm8990_vm9 = vmpackc.low %vm2129_vm5, %vm2128_vm14  ;;  %vm3043_vm7 = vcmp.eq.f32.partialorder %v8983_v17, 2.0  ;;  %vm2546_vm5 = vcmp.eq.f32.partialorder %v8965_v45, 1.0 }
 0x225   : > { %v8997_v31 = vpop.f32.mrb[4].mxu0  ;;  %vm6303_vm12 = vmpackc.low %vm2127_vm0, %vm2126_vm10  ;;  %vm3541_vm8 = vcmp.eq.f32.partialorder %v8983_v17, 3.0  ;;  %vm3045_vm0 = vcmp.eq.f32.partialorder %v8979_v9, 2.0 }
 0x226   : > { %v1683_v63 = vadd.f32 %v8997_v31, %v1550_v25  ;;  %v9002_v41 = vpop.f32.mrb[5].mxu0  ;;  %7068 = vmatprep.mubr.msk.bf16.mxu1 %vm6303_vm12, %v12166_v4  ;;  %vm6367_vm14 = vmpackc.low %vm2545_vm11, %vm2544_vm2  ;;  %vm3042_vm2 = vcmp.eq.f32.partialorder %v8974_v29, 2.0  ;;  %vm3540_vm11 = vcmp.eq.f32.partialorder %v8974_v29, 3.0  ;;  %vm3542_vm12 = vcmp.eq.f32.partialorder %v8965_v45, 3.0 }
 0x227   : > { %v1681_v51 = vadd.f32 %v1540_v26, %v9002_v41  ;;  %7116 = vmatprep.mubr.msk.bf16.mxu0 %vm6367_vm14, %v12166_v4  ;;  %v9011_v3 = vpop.f32.mrb[6].mxu0  ;;  %7069 = vmatmul.mubr.msk.bf16.vlgmr.msra.gmra.mrb[16].mxu1 %vm8990_vm9, %v12166_v4  ;;  %vm6369_vm10 = vmpackc.low %vm2547_vm15, %vm2546_vm5  ;;  %vm3543_vm15 = vcmp.eq.f32.partialorder %v8979_v9, 3.0 }
 0x228   : > { %v9022_v25 = vsel %vm1143_vm4, %v1683_v63, -1.0  ;;  %v1684_v26 = vadd.f32 %v9011_v3, %v1555_v46  ;;  %7117 = vmatmul.mubr.msk.bf16.vlgmr.msra.gmra.mrb[16].mxu0 %vm6369_vm10, %v12166_v4  ;;  %7149 = vmatpush3.bf16.msra.mxu1 %v8844_v48  ;;  %v9027_v53 = vpop.f32.mrb[7].mxu0  ;;  %vm9031_vm9 = vmpackc.low %vm3043_vm7, %vm3042_vm2  ;;  %vm3044_vm7 = vcmp.eq.f32.partialorder %v8965_v45, 2.0 }
 0x229   : > { %12187 = vst [vmem:[#allocation7_spill] sm:$0xff] %v9022_v25  ;;  %v9039_v42 = vsel %vm1141_vm1, %v1681_v51, -1.0  ;;  %v1682_v46 = vadd.f32 %v1545_v43, %v9027_v53  ;;  %7197 = vmatpush3.bf16.msra.mxu0 %v8844_v48  ;;  %7150 = vmatprep.subr.bf16.mxu1 %v8847_v1  ;;  %vm9046_vm4 = vmpackc.low %vm3541_vm8, %vm3540_vm11  ;;  %v9063_v43 = vpop.permute.xlu1 %1599  ;;  %vm2132_vm8 = vcmp.eq.f32.partialorder %v9022_v25, 0.0  ;;  %v9086_v51 = vpop.permute.xlu0 %1604 }
 0x22a   : > { %v9053_v39 = vsel %vm1144_vm6, %v1684_v26, -1.0  ;;  %7198 = vmatprep.subr.bf16.mxu0 %v8847_v1  ;;  %vm9058_vm1 = vmpackc.low %vm3045_vm0, %vm3044_vm7  ;;  %vm2130_vm5 = vcmp.eq.f32.partialorder %v9039_v42, 0.0 }
 0x22b   : > { %v12193_v16 = vsel %vm9058_vm1, 4294967295, %v12192_v16  ;;  %v9067_v63 = vsel %vm1142_vm3, %v1682_v46, -1.0  ;;  %vm2133_vm6 = vcmp.eq.f32.partialorder %v9053_v39, 0.0  ;;  %vm9073_vm14 = vmpackc.low %vm3543_vm15, %vm3542_vm12  ;;  %vm2551_vm3 = vcmp.eq.f32.partialorder %v9053_v39, 1.0 }
 0x22c   : > { %12194 = vst [vmem:[#allocation8_spill] sm:$0xff] %v12193_v16  ;;  %v12196_v62 = vsel %vm9073_vm14, 4294967295, %v12195_v62  ;;  %vm2131_vm10 = vcmp.eq.f32.partialorder %v9067_v63, 0.0  ;;  %vm2549_vm2 = vcmp.eq.f32.partialorder %v9067_v63, 1.0  ;;  %vm9080_vm0 = vmpackc.low %vm2133_vm6, %vm2132_vm8  ;;  %7151 = vmatpush3.bf16.msra.mxu1 %v8847_v1  ;;  %vm2548_vm15 = vcmp.eq.f32.partialorder %v9039_v42, 1.0 }
 0x22d   : > { %12197 = vst [vmem:[#allocation9_spill] sm:$0xff] %v12196_v62  ;;  %v9088_v26 = vpop.f32.mrb[8].mxu0  ;;  %vm6307_vm11 = vmpackc.low %vm2131_vm10, %vm2130_vm5  ;;  %7199 = vmatpush3.bf16.msra.mxu0 %v8847_v1  ;;  %7152 = vmatprep.subr.bf16.mxu1 %v8872_v61  ;;  %vm3047_vm7 = vcmp.eq.f32.partialorder %v9067_v63, 2.0  ;;  %vm2550_vm8 = vcmp.eq.f32.partialorder %v9022_v25, 1.0  ;;  %vm3545_vm6 = vcmp.eq.f32.partialorder %v9067_v63, 3.0  ;;  %vm3046_vm10 = vcmp.eq.f32.partialorder %v9039_v42, 2.0  ;;  %v9132_v52 = vpop.permute.xlu1 %1609 }
 0x22e   : > { %v1687_v46 = vadd.f32 %v9088_v26, %v8953_v11  ;;  %v9096_v62 = vpop.f32.mrb[9].mxu0  ;;  %7072 = vmatprep.mubr.msk.bf16.mxu1 %vm6307_vm11, %v12166_v4  ;;  %vm6371_vm12 = vmpackc.low %vm2549_vm2, %vm2548_vm15  ;;  %7200 = vmatprep.subr.bf16.mxu0 %v8872_v61  ;;  %vm3049_vm2 = vcmp.eq.f32.partialorder %v9053_v39, 2.0  ;;  %vm12203_vm11 = vcmp.le.f32.partialorder %v8595_v40, 0.0625 }
 0x22f   : > { %v1685_v1 = vadd.f32 %v8949_v22, %v9096_v62  ;;  %7120 = vmatprep.mubr.msk.bf16.mxu0 %vm6371_vm12, %v12166_v4  ;;  %v9105_v16 = vpop.f32.mrb[10].mxu0  ;;  %7073 = vmatmul.mubr.msk.bf16.gmra.mrb[20].mxu1 %vm9080_vm0, %v12166_v4  ;;  %vm6373_vm5 = vmpackc.low %vm2551_vm3, %vm2550_vm8  ;;  %vm3544_vm3 = vcmp.eq.f32.partialorder %v9039_v42, 3.0  ;;  %vm12206_vm12 = vcmp.le.f32.partialorder %v8637_v50, 0.0625  ;;  %v12211_v50 = vmov 0 }
 0x230   : > { %v9116_v11 = vsel %vm1147_vm13, %v1687_v46, -1.0  ;;  %v1688_v22 = vadd.f32 %v9105_v16, %v8955_v35  ;;  %7121 = vmatmul.mubr.msk.bf16.gmra.mrb[20].mxu0 %vm6373_vm5, %v12166_v4  ;;  %v9121_v45 = vpop.f32.mrb[11].mxu0  ;;  %7153 = vmatpush3.bf16.msra.mxu1 %v8872_v61  ;;  %vm9126_vm0 = vmpackc.low %vm3047_vm7, %vm3046_vm10  ;;  %vm3547_vm13 = vcmp.eq.f32.partialorder %v9053_v39, 3.0  ;;  %vm3048_vm7 = vcmp.eq.f32.partialorder %v9022_v25, 2.0 }
 0x231   : > { %v12201_v27 = vsel %vm9126_vm0, 4294967295, %v12200_v27  ;;  %v9136_v35 = vsel %vm12203_vm11, %v1685_v1, -1.0  ;;  %v1686_v46 = vadd.f32 %v8951_v56, %v9121_v45  ;;  %7201 = vmatpush3.bf16.msra.mxu0 %v8872_v61  ;;  %7154 = vmatprep.subr.bf16.mxu1 %v8896_v55  ;;  %vm9144_vm15 = vmpackc.low %vm3545_vm6, %vm3544_vm3  ;;  %v12207_v61 = vmov 0  ;;  %v9161_v56 = vpop.permute.xlu0 %1614 }
 0x232   : > { %12202 = vst [vmem:[#allocation10_spill] sm:$0xff] %v12201_v27  ;;  %v12204_v27 = vmov 0  ;;  %v9151_v40 = vsel %vm12206_vm12, %v1688_v22, -1.0  ;;  %7202 = vmatprep.subr.bf16.mxu0 %v8896_v55  ;;  %vm9156_vm8 = vmpackc.low %vm3049_vm2, %vm3048_vm7  ;;  %vm3546_vm5 = vcmp.eq.f32.partialorder %v9022_v25, 3.0  ;;  %vm12210_vm6 = vcmp.le.f32.partialorder %v8613_v6, 0.0625 }
 0x233   : > { %v12205_v27 = vsel %vm9144_vm15, 4294967295, %v12204_v27  ;;  %v12208_v61 = vsel %vm9156_vm8, 4294967295, %v12207_v61  ;;  %v9165_v1 = vsel %vm12210_vm6, %v1686_v46, -1.0  ;;  %vm2136_vm10 = vcmp.eq.f32.partialorder %v9116_v11, 0.0  ;;  %vm9171_vm11 = vmpackc.low %vm3547_vm13, %vm3546_vm5 }
 0x234   : > { %12209 = vst [vmem:[#allocation11_spill] sm:$0xff] %v12208_v61  ;;  %vm2137_vm3 = vcmp.eq.f32.partialorder %v9151_v40, 0.0  ;;  %v12212_v50 = vsel %vm9171_vm11, 4294967295, %v12211_v50  ;;  %vm2134_vm2 = vcmp.eq.f32.partialorder %v9136_v35, 0.0  ;;  %vm2135_vm7 = vcmp.eq.f32.partialorder %v9165_v1, 0.0  ;;  %7155 = vmatpush3.bf16.msra.mxu1 %v8896_v55  ;;  %v9198_v61 = vpop.permute.xlu1 %1619 }
 0x235   : > { %12213 = vst [vmem:[#allocation12_spill] sm:$0xff] %v12212_v50  ;;  %vm2553_vm12 = vcmp.eq.f32.partialorder %v9165_v1, 1.0  ;;  %vm9178_vm8 = vmpackc.low %vm2137_vm3, %vm2136_vm10  ;;  %vm2555_vm6 = vcmp.eq.f32.partialorder %v9151_v40, 1.0  ;;  %v9184_v22 = vpop.f32.mrb[12].mxu0  ;;  %vm2552_vm5 = vcmp.eq.f32.partialorder %v9136_v35, 1.0  ;;  %7203 = vmatpush3.bf16.msra.mxu0 %v8896_v55  ;;  %7156 = vmatprep.subr.bf16.mxu1 %v8916_v12  ;;  %vm3051_vm11 = vcmp.eq.f32.partialorder %v9165_v1, 2.0 }
 0x236   : > { %vm6311_vm13 = vmpackc.low %vm2135_vm7, %vm2134_vm2  ;;  %v1691_v46 = vadd.f32 %v9184_v22, %v8995_v57  ;;  %v9192_v50 = vpop.f32.mrb[13].mxu0  ;;  %vm2554_vm3 = vcmp.eq.f32.partialorder %v9116_v11, 1.0  ;;  %7204 = vmatprep.subr.bf16.mxu0 %v8916_v12  ;;  %vm3549_vm2 = vcmp.eq.f32.partialorder %v9165_v1, 3.0  ;;  %v12219_v6 = vmov 0 }
 0x237   : > { %12216 = vst [vmem:[#allocation13_spill] sm:$0xff] %v9192_v50  ;;  %7076 = vmatprep.mubr.msk.bf16.mxu1 %vm6311_vm13, %v12166_v4  ;;  %vm6375_vm10 = vmpackc.low %vm2553_vm12, %vm2552_vm5  ;;  %v1689_v55 = vadd.f32 %v8960_v24, %v9192_v50  ;;  %v9203_v25 = vpop.f32.mrb[14].mxu0  ;;  %vm3050_vm12 = vcmp.eq.f32.partialorder %v9136_v35, 2.0  ;;  %vm3053_vm13 = vcmp.eq.f32.partialorder %v9151_v40, 2.0  ;;  %vm12217_vm5 = vcmp.le.f32.partialorder %v8656_v5, 0.0625  ;;  %v9230_v5 = vpop.permute.xlu0 %1624 }
 0x238   : > { %7124 = vmatprep.mubr.msk.bf16.mxu0 %vm6375_vm10, %v12166_v4  ;;  %7077 = vmatmul.mubr.msk.bf16.gmra.mrb[24].mxu1 %vm9178_vm8, %v12166_v4  ;;  %vm6377_vm7 = vmpackc.low %vm2555_vm6, %vm2554_vm3  ;;  %v9214_v57 = vsel %vm12217_vm5, %v1691_v46, -1.0  ;;  %v1692_v24 = vadd.f32 %v9203_v25, %v9007_v19  ;;  %v9219_v50 = vpop.f32.mrb[15].mxu0  ;;  %vm3548_vm6 = vcmp.eq.f32.partialorder %v9136_v35, 3.0  ;;  %vm12222_vm3 = vcmp.le.f32.partialorder %v8626_v7, 0.0625 }
 0x239   : > { %7125 = vmatmul.mubr.msk.bf16.gmra.mrb[24].mxu0 %vm6377_vm7, %v12166_v4  ;;  %12218 = vst [vmem:[#allocation14_spill] sm:$0xff] %v9219_v50  ;;  %7157 = vmatpush3.bf16.msra.mxu1 %v8916_v12  ;;  %vm9224_vm8 = vmpackc.low %vm3051_vm11, %vm3050_vm12  ;;  %v9234_v19 = vsel %vm12222_vm3, %v1689_v55, -1.0  ;;  %v1690_v46 = vadd.f32 %v8970_v34, %v9219_v50  ;;  %vm3052_vm7 = vcmp.eq.f32.partialorder %v9116_v11, 2.0  ;;  %vm12225_vm12 = vcmp.le.f32.partialorder %v8689_v23, 0.0625  ;;  %v1630_v55 = vpop.permute.xlu1 %1629 }
 0x23a   : > { %v12220_v6 = vsel %vm9224_vm8, 4294967295, %v12219_v6  ;;  %7205 = vmatpush3.bf16.msra.mxu0 %v8916_v12  ;;  %7158 = vmatprep.subr.bf16.mxu1 %v8924_v28  ;;  %vm9242_vm11 = vmpackc.low %vm3549_vm2, %vm3548_vm6  ;;  %v9249_v7 = vsel %vm12225_vm12, %v1692_v24, -1.0  ;;  %v12226_v12 = vmov 0  ;;  %vm3550_vm3 = vcmp.eq.f32.partialorder %v9116_v11, 3.0 }
 0x23b   : > { %12221 = vst [vmem:[#allocation20_spill] sm:$0xff] %v12220_v6  ;;  %v12223_v6 = vmov 0  ;;  %7206 = vmatprep.subr.bf16.mxu0 %v8924_v28  ;;  %vm9254_vm5 = vmpackc.low %vm3053_vm13, %vm3052_vm7  ;;  %vm12229_vm2 = vcmp.le.f32.partialorder %v8663_v33, 0.0625  ;;  %vm2140_vm6 = vcmp.eq.f32.partialorder %v9214_v57, 0.0  ;;  %vm2141_vm10 = vcmp.eq.f32.partialorder %v9249_v7, 0.0 }
 0x23c   : > { %v12224_v6 = vsel %vm9242_vm11, 4294967295, %v12223_v6  ;;  %v12227_v12 = vsel %vm9254_vm5, 4294967295, %v12226_v12  ;;  %v9261_v34 = vsel %vm12229_vm2, %v1690_v46, -1.0  ;;  %vm12230_vm12 = vcmp.eq.f32.partialorder %v9151_v40, 3.0  ;;  %vm9274_vm8 = vmpackc.low %vm2141_vm10, %vm2140_vm6 }
 0x23d   : > { %12228 = vst [vmem:[#allocation21_spill] sm:$0xff] %v12227_v12  ;;  %vm9267_vm11 = vmpackc.low %vm12230_vm12, %vm3550_vm3  ;;  %v12231_v23 = vmov 0  ;;  %vm2138_vm13 = vcmp.eq.f32.partialorder %v9234_v19, 0.0  ;;  %vm2139_vm7 = vcmp.eq.f32.partialorder %v9261_v34, 0.0  ;;  %vm2557_vm5 = vcmp.eq.f32.partialorder %v9261_v34, 1.0  ;;  %7159 = vmatpush3.bf16.msra.mxu1 %v8924_v28  ;;  %v7038_v24 = vpop.f32.mrb[0].mxu1  ;;  %v1635_v12 = vpop.permute.xlu0 %1634 }
 0x23e   : > { %v12232_v23 = vsel %vm9267_vm11, 4294967295, %v12231_v23  ;;  %vm2559_vm2 = vcmp.eq.f32.partialorder %v9249_v7, 1.0  ;;  %vm6315_vm3 = vmpackc.low %vm2139_vm7, %vm2138_vm13  ;;  %vm2556_vm12 = vcmp.eq.f32.partialorder %v9234_v19, 1.0  ;;  %7207 = vmatpush3.bf16.msra.mxu0 %v8924_v28  ;;  %7160 = vmatprep.subr.bf16.mxu1 %v8934_v32  ;;  %vm3055_vm11 = vcmp.eq.f32.partialorder %v9261_v34, 2.0 }
 0x23f   : > { %12233 = vst [vmem:[#allocation15_spill] sm:$0xff] %v12232_v23  ;;  %v1695_v46 = vadd.f32 %v7038_v24, %v9132_v52  ;;  %v1454_v23 = vpop.f32.mrb[1].mxu1  ;;  %1777 = vrot.lane.b32.xlu1 %v7038_v24, %s7704_s14  ;;  %7080 = vmatprep.mubr.msk.bf16.mxu1 %vm6315_vm3, %v12166_v4  ;;  %vm6379_vm10 = vmpackc.low %vm2557_vm5, %vm2556_vm12  ;;  %vm2558_vm6 = vcmp.eq.f32.partialorder %v9214_v57, 1.0  ;;  %vm3553_vm13 = vcmp.eq.f32.partialorder %v9261_v34, 3.0  ;;  %vm3054_vm3 = vcmp.eq.f32.partialorder %v9234_v19, 2.0 }
 0x240   : > { %v1693_v28 = vadd.f32 %v9063_v43, %v1454_v23  ;;  %7128 = vmatprep.mubr.msk.bf16.mxu0 %vm6379_vm10, %v12166_v4  ;;  %v7039_v50 = vpop.f32.mrb[2].mxu1  ;;  %7081 = vmatmul.mubr.msk.bf16.gmra.mrb[28].mxu1 %vm9274_vm8, %v12166_v4  ;;  %vm6381_vm7 = vmpackc.low %vm2559_vm2, %vm2558_vm6  ;;  %vm3057_vm5 = vcmp.eq.f32.partialorder %v9249_v7, 2.0  ;;  %vm12236_vm12 = vcmp.le.f32.partialorder %v8704_v37, 0.0625  ;;  %v12237_v33 = vmov 0 }
 0x241   : > { %v9302_v52 = vsel %vm12236_vm12, %v1695_v46, -1.0  ;;  %v1696_v43 = vadd.f32 %v7039_v50, %v9161_v56  ;;  %7129 = vmatmul.mubr.msk.bf16.gmra.mrb[28].mxu0 %vm6381_vm7, %v12166_v4  ;;  %v1457_v24 = vpop.f32.mrb[3].mxu1  ;;  %1779 = vrot.lane.b32.xlu0 %v7039_v50, %s7704_s14  ;;  %vm9309_vm8 = vmpackc.low %vm3055_vm11, %vm3054_vm3  ;;  %vm3552_vm2 = vcmp.eq.f32.partialorder %v9234_v19, 3.0  ;;  %vm3555_vm10 = vcmp.eq.f32.partialorder %v9249_v7, 3.0 }
 0x242   : > { %v12238_v33 = vsel %vm9309_vm8, 4294967295, %v12237_v33  ;;  %vm12239_vm6 = vcmp.le.f32.partialorder %v8696_v38, 0.0625  ;;  %v1694_v56 = vadd.f32 %v9086_v51, %v1457_v24  ;;  %7161 = vmatpush3.bf16.msra.mxu1 %v8934_v32  ;;  %7208 = vmatprep.subr.bf16.mxu0 %v8934_v32  ;;  %vm9324_vm11 = vmpackc.low %vm3553_vm13, %vm3552_vm2  ;;  %v12240_v50 = vmov 0  ;;  %v9343_v51 = vpop.permute.xlu1 %1639 }
 0x243   : > { %v9317_v37 = vsel %vm12239_vm6, %v1693_v28, -1.0  ;;  %v12241_v50 = vsel %vm9324_vm11, 4294967295, %v12240_v50  ;;  %vm3056_vm7 = vcmp.eq.f32.partialorder %v9214_v57, 2.0  ;;  %vm12242_vm3 = vcmp.le.f32.partialorder %v8729_v30, 0.0625  ;;  %1741 = vrot.lane.b32.xlu1 %v8957_v0, %s7704_s14  ;;  %7209 = vmatpush3.bf16.msra.mxu0 %v8934_v32  ;;  %v9369_v0 = vpop.permute.xlu0 %1644 }
 0x244   : > { %v9331_v46 = vsel %vm12242_vm3, %v1696_v43, -1.0  ;;  %vm9338_vm12 = vmpackc.low %vm3057_vm5, %vm3056_vm7  ;;  %v12243_v38 = vmov 0  ;;  %vm3554_vm13 = vcmp.eq.f32.partialorder %v9214_v57, 3.0  ;;  %vm12245_vm2 = vcmp.le.f32.partialorder %v8718_v54, 0.0625  ;;  %7162 = vmatprep.subr.bf16.mxu1 %v8941_v10  ;;  %7210 = vmatprep.subr.bf16.mxu0 %v8941_v10 }
 0x245   : > { %v12244_v38 = vsel %vm9338_vm12, 4294967295, %v12243_v38  ;;  %v9347_v30 = vsel %vm12245_vm2, %v1694_v56, -1.0  ;;  %vm2144_vm6 = vcmp.eq.f32.partialorder %v9302_v52, 0.0  ;;  %vm2145_vm3 = vcmp.eq.f32.partialorder %v9331_v46, 0.0  ;;  %vm9355_vm5 = vmpackc.low %vm3555_vm10, %vm3554_vm13  ;;  %1743 = vrot.lane.b32.xlu0 %v8967_v13, %s7704_s14  ;;  %v7042_v28 = vpop.f32.mrb[4].mxu1 }
 0x246   : > { %v12246_v32 = vmov 0  ;;  %vm2142_vm7 = vcmp.eq.f32.partialorder %v9317_v37, 0.0  ;;  %vm2143_vm2 = vcmp.eq.f32.partialorder %v9347_v30, 0.0  ;;  %vm2561_vm12 = vcmp.eq.f32.partialorder %v9347_v30, 1.0  ;;  %vm9364_vm11 = vmpackc.low %vm2145_vm3, %vm2144_vm6  ;;  %7163 = vmatpush3.bf16.msra.mxu1 %v8941_v10  ;;  %v9374_v43 = vpop.f32.mrb[5].mxu1 }
 0x247   : > { %v12247_v32 = vsel %vm9355_vm5, 4294967295, %v12246_v32  ;;  %vm6319_vm10 = vmpackc.low %vm2143_vm2, %vm2142_vm7  ;;  %vm2560_vm13 = vcmp.eq.f32.partialorder %v9317_v37, 1.0  ;;  %vm3059_vm5 = vcmp.eq.f32.partialorder %v9347_v30, 2.0  ;;  %v1699_v13 = vadd.f32 %v7042_v28, %v1630_v55  ;;  %1773 = vrot.lane.b32.xlu1 %v1454_v23, %s7704_s14  ;;  %7211 = vmatpush3.bf16.msra.mxu0 %v8941_v10 }
 0x248   : > { %12248 = vst [vmem:[#allocation16_spill] sm:$0xff] %v12247_v32  ;;  %7084 = vmatprep.mubr.msk.bf16.mxu1 %vm6319_vm10, %v12166_v4  ;;  %vm6383_vm6 = vmpackc.low %vm2561_vm12, %vm2560_vm13  ;;  %vm2562_vm3 = vcmp.eq.f32.partialorder %v9302_v52, 1.0  ;;  %vm3557_vm8 = vcmp.eq.f32.partialorder %v9347_v30, 3.0  ;;  %v1697_v56 = vadd.f32 %v9198_v61, %v9374_v43  ;;  %v7043_v32 = vpop.f32.mrb[6].mxu1  ;;  %vm12251_vm7 = vcmp.eq.f32.partialorder %v9331_v46, 1.0  ;;  %7244 = vmatprep.subr.bf16.mxu1 %v8844_v48 }
 0x249   : > { %7132 = vmatprep.mubr.msk.bf16.mxu0 %vm6383_vm6, %v12166_v4  ;;  %7085 = vmatmul.mubr.msk.bf16.gmra.mrb[32].mxu1 %vm9364_vm11, %v12166_v4  ;;  %vm6385_vm2 = vmpackc.low %vm12251_vm7, %vm2562_vm3  ;;  %vm3058_vm10 = vcmp.eq.f32.partialorder %v9317_v37, 2.0  ;;  %vm3061_vm12 = vcmp.eq.f32.partialorder %v9331_v46, 2.0  ;;  %vm12252_vm13 = vcmp.le.f32.partialorder %v8756_v49, 0.0625  ;;  %v1700_v55 = vadd.f32 %v7043_v32, %v1635_v12  ;;  %v9395_v61 = vpop.f32.mrb[7].mxu1  ;;  %v1650_v49 = vpop.permute.xlu1 %1649 }
 0x24a   : > { %v9392_v23 = vsel %vm12252_vm13, %v1699_v13, -1.0  ;;  %7133 = vmatmul.mubr.msk.bf16.gmra.mrb[32].mxu0 %vm6385_vm2, %v12166_v4  ;;  %1775 = vrot.lane.b32.xlu0 %v1457_v24, %s7704_s14  ;;  %vm9400_vm11 = vmpackc.low %vm3059_vm5, %vm3058_vm10  ;;  %v12253_v54 = vmov 0  ;;  %vm3556_vm6 = vcmp.eq.f32.partialorder %v9317_v37, 3.0  ;;  %vm3559_vm3 = vcmp.eq.f32.partialorder %v9331_v46, 3.0 }
 0x24b   : > { %v12254_v54 = vsel %vm9400_vm11, 4294967295, %v12253_v54  ;;  %vm12255_vm7 = vcmp.le.f32.partialorder %v8725_v44, 0.0625  ;;  %v1698_v13 = vadd.f32 %v9230_v5, %v9395_v61  ;;  %vm9415_vm5 = vmpackc.low %vm3557_vm8, %vm3556_vm6  ;;  %v12256_v24 = vmov 0  ;;  %1753 = vrot.lane.b32.xlu1 %v8997_v31, %s7704_s14  ;;  %7292 = vmatprep.subr.bf16.mxu0 %v8844_v48  ;;  %v1655_v5 = vpop.permute.xlu0 %1654 }
 0x24c   : > { %v9408_v12 = vsel %vm12255_vm7, %v1697_v56, -1.0  ;;  %v12257_v24 = vsel %vm9415_vm5, 4294967295, %v12256_v24  ;;  %vm3060_vm2 = vcmp.eq.f32.partialorder %v9302_v52, 2.0  ;;  %vm12258_vm10 = vcmp.le.f32.partialorder %v8788_v47, 0.0625 }
 0x24d   : > { %v9423_v44 = vsel %vm12258_vm10, %v1700_v55, -1.0  ;;  %vm9429_vm13 = vmpackc.low %vm3061_vm12, %vm3060_vm2  ;;  %v12259_v10 = vmov 0  ;;  %vm3558_vm8 = vcmp.eq.f32.partialorder %v9302_v52, 3.0  ;;  %vm12262_vm6 = vcmp.le.f32.partialorder %v8762_v21, 0.0625  ;;  %v9457_v31 = vpop.f32.mrb[8].mxu1 }
 0x24e   : > { %v12260_v10 = vsel %vm9429_vm13, 4294967295, %v12259_v10  ;;  %v9437_v56 = vsel %vm12262_vm6, %v1698_v13, -1.0  ;;  %vm2148_vm7 = vcmp.eq.f32.partialorder %v9392_v23, 0.0  ;;  %vm2149_vm10 = vcmp.eq.f32.partialorder %v9423_v44, 0.0  ;;  %vm9443_vm5 = vmpackc.low %vm3559_vm3, %vm3558_vm8  ;;  %1755 = vrot.lane.b32.xlu0 %v9011_v3, %s7704_s14  ;;  %v9462_v55 = vpop.f32.mrb[9].mxu1  ;;  %v1660_v13 = vpop.permute.xlu1 %1659 }
 0x24f   : > { %12261 = vst [vmem:[#allocation17_spill] sm:$0xff] %v12260_v10  ;;  %v12263_v47 = vmov 0  ;;  %vm2146_vm12 = vcmp.eq.f32.partialorder %v9408_v12, 0.0  ;;  %vm2147_vm2 = vcmp.eq.f32.partialorder %v9437_v56, 0.0  ;;  %vm2565_vm6 = vcmp.eq.f32.partialorder %v9437_v56, 1.0  ;;  %vm9452_vm13 = vmpackc.low %vm2149_vm10, %vm2148_vm7  ;;  %1785 = vrot.lane.b32.xlu1 %v7042_v28, %s7704_s14  ;;  %v9471_v10 = vpop.f32.mrb[10].mxu1 }
 0x250   : > { %v12264_v47 = vsel %vm9443_vm5, 4294967295, %v12263_v47  ;;  %vm6323_vm3 = vmpackc.low %vm2147_vm2, %vm2146_vm12  ;;  %vm2564_vm8 = vcmp.eq.f32.partialorder %v9408_v12, 1.0  ;;  %vm3063_vm5 = vcmp.eq.f32.partialorder %v9437_v56, 2.0  ;;  %v1703_v3 = vadd.f32 %v9457_v31, %v1650_v49  ;;  %v9486_v49 = vpop.f32.mrb[11].mxu1 }
 0x251   : > { %12265 = vst [vmem:[#allocation18_spill] sm:$0xff] %v12264_v47  ;;  %7088 = vmatprep.mubr.msk.bf16.mxu1 %vm6323_vm3, %v12166_v4  ;;  %vm6387_vm7 = vmpackc.low %vm2565_vm6, %vm2564_vm8  ;;  %vm2566_vm10 = vcmp.eq.f32.partialorder %v9392_v23, 1.0  ;;  %vm3561_vm11 = vcmp.eq.f32.partialorder %v9437_v56, 3.0  ;;  %v1701_v47 = vadd.f32 %v9343_v51, %v9462_v55  ;;  %vm12268_vm12 = vcmp.eq.f32.partialorder %v9423_v44, 1.0 }
 0x252   : > { %7136 = vmatprep.mubr.msk.bf16.mxu0 %vm6387_vm7, %v12166_v4  ;;  %7089 = vmatmul.mubr.msk.bf16.gmra.mrb[36].mxu1 %vm9452_vm13, %v12166_v4  ;;  %vm6389_vm2 = vmpackc.low %vm12268_vm12, %vm2566_vm10  ;;  %vm3062_vm6 = vcmp.eq.f32.partialorder %v9408_v12, 2.0  ;;  %vm3065_vm3 = vcmp.eq.f32.partialorder %v9423_v44, 2.0  ;;  %vm12269_vm8 = vcmp.le.f32.partialorder %v8804_v58, 0.0625  ;;  %v1704_v51 = vadd.f32 %v9471_v10, %v1655_v5  ;;  %v1665_v58 = vpop.permute.xlu0 %1664 }
 0x253   : > { %v9482_v28 = vsel %vm12269_vm8, %v1703_v3, -1.0  ;;  %7137 = vmatmul.mubr.msk.bf16.gmra.mrb[36].mxu0 %vm6389_vm2, %v12166_v4  ;;  %1787 = vrot.lane.b32.xlu0 %v7043_v32, %s7704_s14  ;;  %vm9491_vm13 = vmpackc.low %vm3063_vm5, %vm3062_vm6  ;;  %v12270_v21 = vmov 0  ;;  %vm3560_vm7 = vcmp.eq.f32.partialorder %v9408_v12, 3.0  ;;  %vm3563_vm10 = vcmp.eq.f32.partialorder %v9423_v44, 3.0 }
 0x254   : > { %v12271_v21 = vsel %vm9491_vm13, 4294967295, %v12270_v21  ;;  %vm12273_vm12 = vcmp.le.f32.partialorder %v8786_v60, 0.0625  ;;  %v1702_v3 = vadd.f32 %v9369_v0, %v9486_v49  ;;  %vm9505_vm2 = vmpackc.low %vm3561_vm11, %vm3560_vm7  ;;  %v12274_v32 = vmov 0  ;;  %1749 = vrot.lane.b32.xlu1 %v9002_v41, %s7704_s14  ;;  %v1670_v41 = vpop.permute.xlu1 %1669 }
 0x255   : > { %12272 = vst [vmem:[#allocation19_spill] sm:$0xff] %v12271_v21  ;;  %v9499_v5 = vsel %vm12273_vm12, %v1701_v47, -1.0  ;;  %v12275_v32 = vsel %vm9505_vm2, 4294967295, %v12274_v32  ;;  %vm3064_vm5 = vcmp.eq.f32.partialorder %v9392_v23, 2.0  ;;  %vm12276_vm6 = vcmp.le.f32.partialorder %v8836_v59, 0.0625  ;;  %v9543_v47 = vpop.f32.mrb[12].mxu1 }
 0x256   : > { %v9512_v21 = vsel %vm12276_vm6, %v1704_v51, -1.0  ;;  %vm9518_vm8 = vmpackc.low %vm3065_vm3, %vm3064_vm5  ;;  %v12277_v60 = vmov 0  ;;  %vm3562_vm11 = vcmp.eq.f32.partialorder %v9392_v23, 3.0  ;;  %vm12280_vm7 = vcmp.le.f32.partialorder %v8812_v36, 0.0625  ;;  %v9550_v51 = vpop.f32.mrb[13].mxu1 }
 0x257   : > { %v12278_v60 = vsel %vm9518_vm8, 4294967295, %v12277_v60  ;;  %v9525_v0 = vsel %vm12280_vm7, %v1702_v3, -1.0  ;;  %vm2152_vm12 = vcmp.eq.f32.partialorder %v9482_v28, 0.0  ;;  %vm2153_vm6 = vcmp.eq.f32.partialorder %v9512_v21, 0.0  ;;  %vm9529_vm2 = vmpackc.low %vm3563_vm10, %vm3562_vm11  ;;  %1751 = vrot.lane.b32.xlu0 %v9027_v53, %s7704_s14  ;;  %v1675_v3 = vpop.permute.xlu0 %1674 }
 0x258   : > { %12279 = vst [vmem:[#allocation22_spill] sm:$0xff] %v12278_v60  ;;  %v12281_v59 = vmov 0  ;;  %vm2150_vm3 = vcmp.eq.f32.partialorder %v9499_v5, 0.0  ;;  %vm2151_vm5 = vcmp.eq.f32.partialorder %v9525_v0, 0.0  ;;  %vm2569_vm8 = vcmp.eq.f32.partialorder %v9525_v0, 1.0  ;;  %vm9538_vm13 = vmpackc.low %vm2153_vm6, %vm2152_vm12  ;;  %1781 = vrot.lane.b32.xlu1 %v9374_v43, %s7704_s14  ;;  %v9557_v60 = vpop.f32.mrb[14].mxu1 }
 0x259   : > { %v12282_v59 = vsel %vm9529_vm2, 4294967295, %v12281_v59  ;;  %vm6327_vm10 = vmpackc.low %vm2151_vm5, %vm2150_vm3  ;;  %vm2568_vm11 = vcmp.eq.f32.partialorder %v9499_v5, 1.0  ;;  %vm3067_vm2 = vcmp.eq.f32.partialorder %v9525_v0, 2.0  ;;  %v1707_v53 = vadd.f32 %v9543_v47, %v1670_v41  ;;  %v9572_v41 = vpop.f32.mrb[15].mxu1 }
 0x25a   : > { %12283 = vst [vmem:[#allocation23_spill] sm:$0xff] %v12282_v59  ;;  %7092 = vmatprep.mubr.msk.bf16.mxu1 %vm6327_vm10, %v12166_v4  ;;  %vm6391_vm12 = vmpackc.low %vm2569_vm8, %vm2568_vm11  ;;  %vm2570_vm6 = vcmp.eq.f32.partialorder %v9482_v28, 1.0  ;;  %vm3565_vm7 = vcmp.eq.f32.partialorder %v9525_v0, 3.0  ;;  %v1705_v59 = vadd.f32 %v1660_v13, %v9550_v51  ;;  %vm12286_vm3 = vcmp.eq.f32.partialorder %v9512_v21, 1.0 }
 0x25b   : > { %7140 = vmatprep.mubr.msk.bf16.mxu0 %vm6391_vm12, %v12166_v4  ;;  %7093 = vmatmul.mubr.msk.bf16.gmra.mrb[40].mxu1 %vm9538_vm13, %v12166_v4  ;;  %vm6393_vm5 = vmpackc.low %vm12286_vm3, %vm2570_vm6  ;;  %vm3066_vm8 = vcmp.eq.f32.partialorder %v9499_v5, 2.0  ;;  %vm3069_vm10 = vcmp.eq.f32.partialorder %v9512_v21, 2.0  ;;  %vm12287_vm11 = vcmp.le.f32.partialorder %v8839_v15, 0.0625  ;;  %v1708_v13 = vadd.f32 %v9557_v60, %v1675_v3 }
 0x25c   : > { %v9568_v43 = vsel %vm12287_vm11, %v1707_v53, -1.0  ;;  %7141 = vmatmul.mubr.msk.bf16.gmra.mrb[40].mxu0 %vm6393_vm5, %v12166_v4  ;;  %1783 = vrot.lane.b32.xlu0 %v9395_v61, %s7704_s14  ;;  %vm9578_vm13 = vmpackc.low %vm3067_vm2, %vm3066_vm8  ;;  %v12288_v36 = vmov 0  ;;  %vm3564_vm12 = vcmp.eq.f32.partialorder %v9499_v5, 3.0  ;;  %vm3567_vm6 = vcmp.eq.f32.partialorder %v9512_v21, 3.0 }
 0x25d   : > { %v12289_v36 = vsel %vm9578_vm13, 4294967295, %v12288_v36  ;;  %vm12290_vm3 = vcmp.le.f32.partialorder %v8829_v14, 0.0625  ;;  %v1706_v53 = vadd.f32 %v1665_v58, %v9572_v41  ;;  %vm9591_vm5 = vmpackc.low %vm3565_vm7, %vm3564_vm12  ;;  %v12291_v61 = vmov 0  ;;  %1761 = vrot.lane.b32.xlu1 %v9088_v26, %s7704_s14 }
 0x25e   : > { %v9586_v15 = vsel %vm12290_vm3, %v1705_v59, -1.0  ;;  %v12292_v61 = vsel %vm9591_vm5, 4294967295, %v12291_v61  ;;  %vm3068_vm2 = vcmp.eq.f32.partialorder %v9482_v28, 2.0  ;;  %vm12293_vm8 = vcmp.le.f32.partialorder %v8889_v20, 0.0625 }
 0x25f   : > { %v9598_v3 = vsel %vm12293_vm8, %v1708_v13, -1.0  ;;  %vm9604_vm11 = vmpackc.low %vm3069_vm10, %vm3068_vm2  ;;  %v12294_v14 = vmov 0  ;;  %vm3566_vm7 = vcmp.eq.f32.partialorder %v9482_v28, 3.0  ;;  %vm12296_vm12 = vcmp.le.f32.partialorder %v8864_v2, 0.0625  ;;  %v7597_v2 = vld [vmem:[#allocation2 + $0x90] sm:$0xff] }
 0x260   : > { %v12295_v14 = vsel %vm9604_vm11, 4294967295, %v12294_v14  ;;  %v9611_v58 = vsel %vm12296_vm12, %v1706_v53, -1.0  ;;  %vm2156_vm3 = vcmp.eq.f32.partialorder %v9568_v43, 0.0  ;;  %vm2157_vm8 = vcmp.eq.f32.partialorder %v9598_v3, 0.0  ;;  %vm9615_vm5 = vmpackc.low %vm3567_vm6, %vm3566_vm7  ;;  %1763 = vrot.lane.b32.xlu0 %v9105_v16, %s7704_s14  ;;  %v12321_v53 = vld [vmem:[#allocation10_spill] sm:$0xff] }
 0x261   : > { %v12297_v20 = vmov 0  ;;  %vm2154_vm10 = vcmp.eq.f32.partialorder %v9586_v15, 0.0  ;;  %vm2155_vm2 = vcmp.eq.f32.partialorder %v9611_v58, 0.0  ;;  %vm2573_vm11 = vcmp.eq.f32.partialorder %v9611_v58, 1.0  ;;  %vm6333_vm13 = vmpackc.low %vm2157_vm8, %vm2156_vm3  ;;  %1793 = vrot.lane.b32.xlu1 %v9457_v31, %s7704_s14 }
 0x262   : > { %v12298_v20 = vsel %vm9615_vm5, 4294967295, %v12297_v20  ;;  %vm2575_vm12 = vcmp.eq.f32.partialorder %v9598_v3, 1.0  ;;  %vm6331_vm15 = vmpackc.low %vm2155_vm2, %vm2154_vm10  ;;  %vm2572_vm0 = vcmp.eq.f32.partialorder %v9586_v15, 1.0  ;;  %vm3071_vm6 = vcmp.eq.f32.partialorder %v9611_v58, 2.0 }
 0x263   : > { %7096 = vmatprep.mubr.msk.bf16.mxu1 %vm6331_vm15, %v12166_v4  ;;  %vm6395_vm7 = vmpackc.low %vm2573_vm11, %vm2572_vm0  ;;  %vm2574_vm5 = vcmp.eq.f32.partialorder %v9568_v43, 1.0  ;;  %vm3569_vm14 = vcmp.eq.f32.partialorder %v9611_v58, 3.0  ;;  %vm3070_vm8 = vcmp.eq.f32.partialorder %v9586_v15, 2.0  ;;  %vm3073_vm10 = vcmp.eq.f32.partialorder %v9598_v3, 2.0 }
 0x264   : > { %7144 = vmatprep.mubr.msk.bf16.mxu0 %vm6395_vm7, %v12166_v4  ;;  %7097 = vmatmul.mubr.msk.bf16.gmra.mrb[44].mxu1 %vm6333_vm13, %v12166_v4  ;;  %vm6397_vm3 = vmpackc.low %vm2575_vm12, %vm2574_vm5  ;;  %vm3568_vm0 = vcmp.eq.f32.partialorder %v9586_v15, 3.0  ;;  %vm3571_vm11 = vcmp.eq.f32.partialorder %v9598_v3, 3.0  ;;  %vm3072_vm5 = vcmp.eq.f32.partialorder %v9568_v43, 2.0  ;;  %vm4039_vm2 = vcmp.eq.f32.partialorder %v8983_v17, 4.0 }
 0x265   : > { %7145 = vmatmul.mubr.msk.bf16.gmra.mrb[44].mxu0 %vm6397_vm3, %v12166_v4  ;;  %1795 = vrot.lane.b32.xlu0 %v9471_v10, %s7704_s14  ;;  %vm9639_vm15 = vmpackc.low %vm3071_vm6, %vm3070_vm8  ;;  %vm4537_vm6 = vcmp.eq.f32.partialorder %v8983_v17, 5.0  ;;  %vm4041_vm7 = vcmp.eq.f32.partialorder %v8979_v9, 4.0  ;;  %vm4536_vm8 = vcmp.eq.f32.partialorder %v8974_v29, 5.0  ;;  %v12311_v10 = vld [vmem:[#allocation6_spill] sm:$0xff]  ;;  %v12315_v59 = vmov 0 }
 0x266   : > { %7164 = vmatprep.mubr.msk.bf16.mxu1 %vm9031_vm9, %v12166_v4  ;;  %7212 = vmatprep.mubr.msk.bf16.mxu0 %vm9046_vm4, %v12166_v4  ;;  %vm9651_vm13 = vmpackc.low %vm3569_vm14, %vm3568_vm0  ;;  %vm3570_vm9 = vcmp.eq.f32.partialorder %v9568_v43, 3.0  ;;  %vm4038_vm14 = vcmp.eq.f32.partialorder %v8974_v29, 4.0  ;;  %v12319_v13 = vmov 0  ;;  %v12324_v31 = vmov 0 }
 0x267   : > { %1757 = vrot.lane.b32.xlu1 %v9096_v62, %s7704_s14  ;;  %vm9659_vm12 = vmpackc.low %vm3073_vm10, %vm3072_vm5  ;;  %vm4539_vm10 = vcmp.eq.f32.partialorder %v8979_v9, 5.0  ;;  %v12309_v62 = vmov 0  ;;  %vm4043_vm5 = vcmp.eq.f32.partialorder %v9067_v63, 4.0 }
 0x268   : > { %vm9665_vm4 = vmpackc.low %vm3571_vm11, %vm3570_vm9  ;;  %vm4040_vm11 = vcmp.eq.f32.partialorder %v12311_v10, 4.0 }
 0x269   : > { %1759 = vrot.lane.b32.xlu0 %v9121_v45, %s7704_s14  ;;  %vm9673_vm3 = vmpackc.low %vm4039_vm2, %vm4038_vm14  ;;  %v12312_v45 = vmov 0  ;;  %vm4538_vm2 = vcmp.eq.f32.partialorder %v12311_v10, 5.0  ;;  %vm4541_vm14 = vcmp.eq.f32.partialorder %v9067_v63, 5.0 }
 0x26a   : > { %v12308_v8 = vsel %vm9673_vm3, 4294967295, %v12307_v8  ;;  %vm9679_vm0 = vmpackc.low %vm4537_vm6, %vm4536_vm8  ;;  %vm4042_vm8 = vcmp.eq.f32.partialorder %v9039_v42, 4.0 }
 0x26b   : > { %v12310_v62 = vsel %vm9679_vm0, 4294967295, %v12309_v62  ;;  %1789 = vrot.lane.b32.xlu1 %v9462_v55, %s7704_s14  ;;  %vm9687_vm9 = vmpackc.low %vm4041_vm7, %vm4040_vm11  ;;  %vm4045_vm0 = vcmp.eq.f32.partialorder %v9053_v39, 4.0  ;;  %v12317_v55 = vld [vmem:[#allocation9_spill] sm:$0xff] }
 0x26c   : > { %v12313_v45 = vsel %vm9687_vm9, 4294967295, %v12312_v45  ;;  %7165 = vmatmul.mubr.msk.bf16.vlgmr.msra.gmra.mrb[48].mxu1 %vm9058_vm1, %v12166_v4  ;;  %vm9696_vm6 = vmpackc.low %vm4539_vm10, %vm4538_vm2  ;;  %vm12318_vm7 = vnez %v12317_v55  ;;  %vm4540_vm1 = vcmp.eq.f32.partialorder %v9039_v42, 5.0  ;;  %vm12322_vm2 = vnez %v12321_v53  ;;  %v9739_v53 = vld [vmem:[%s7851_s13 + $0x8] sm:$0xff]  }
 0x26d   : > { %v12316_v59 = vsel %vm9696_vm6, 4294967295, %v12315_v59  ;;  %7213 = vmatmul.mubr.msk.bf16.vlgmr.msra.gmra.mrb[48].mxu0 %vm12318_vm7, %v12166_v4  ;;  %1791 = vrot.lane.b32.xlu0 %v9486_v49, %s7704_s14  ;;  %vm9707_vm11 = vmpackc.low %vm4043_vm5, %vm4042_vm8  ;;  %vm12323_vm6 = vnez %v12205_v27  ;;  %v12326_v49 = vld [vmem:[#allocation7_spill] sm:$0xff]  ;;  %vm4047_vm8 = vcmp.eq.f32.partialorder %v9165_v1, 4.0  ;;  %v12327_v55 = vmov 0  ;;  %v9735_v27 = vld [vmem:[%s7851_s13] sm:$0xff]  }
 0x26e   : > { %v12320_v13 = vsel %vm9707_vm11, 4294967295, %v12319_v13  ;;  %7168 = vmatprep.mubr.msk.bf16.mxu1 %vm12322_vm2, %v12166_v4  ;;  %7216 = vmatprep.mubr.msk.bf16.mxu0 %vm12323_vm6, %v12166_v4  ;;  %vm9719_vm7 = vmpackc.low %vm4541_vm14, %vm4540_vm1  ;;  %vm4044_vm5 = vcmp.eq.f32.partialorder %v12326_v49, 4.0  ;;  %vm4542_vm2 = vcmp.eq.f32.partialorder %v12326_v49, 5.0  ;;  %vm4545_vm14 = vcmp.eq.f32.partialorder %v9165_v1, 5.0 }
 0x26f   : > { %v12325_v31 = vsel %vm9719_vm7, 4294967295, %v12324_v31  ;;  %1769 = vrot.lane.b32.xlu1 %v9184_v22, %s7704_s14  ;;  %7245 = vmatpush3.bf16.msra.mxu1 %v8844_v48  ;;  %vm9728_vm10 = vmpackc.low %vm4045_vm0, %vm4044_vm5  ;;  %vm12330_vm6 = vcmp.eq.f32.partialorder %v9053_v39, 5.0  ;;  %v12331_v48 = vmov 0  ;;  %vm4046_vm0 = vcmp.eq.f32.partialorder %v9136_v35, 4.0 }
 0x270   : > { %v12328_v55 = vsel %vm9728_vm10, 4294967295, %v12327_v55  ;;  %7293 = vmatpush3.bf16.msra.mxu0 %v9735_v27  ;;  %7246 = vmatprep.subr.bf16.mxu1 %v9739_v53  ;;  %vm9744_vm1 = vmpackc.low %vm12330_vm6, %vm4542_vm2  ;;  %vm4049_vm5 = vcmp.eq.f32.partialorder %v9151_v40, 4.0  ;;  %v12334_v22 = vmov 0  ;;  %vm4544_vm2 = vcmp.eq.f32.partialorder %v9136_v35, 5.0 }
 0x271   : > { %12329 = vst [vmem:[#allocation6_spill] sm:$0xff] %v12328_v55  ;;  %v12332_v48 = vsel %vm9744_vm1, 4294967295, %v12331_v48  ;;  %1771 = vrot.lane.b32.xlu0 %v9203_v25, %s7704_s14  ;;  %7294 = vmatprep.subr.bf16.mxu0 %v9739_v53  ;;  %vm9755_vm10 = vmpackc.low %vm4047_vm8, %vm4046_vm0  ;;  %vm4547_vm6 = vcmp.eq.f32.partialorder %v9151_v40, 5.0  ;;  %vm4048_vm7 = vcmp.eq.f32.partialorder %v9116_v11, 4.0  ;;  %vm4051_vm11 = vcmp.eq.f32.partialorder %v9261_v34, 4.0  ;;  %v9767_v25 = vpop.permute.xlu1 %7500 }
 0x272   : > { %12333 = vst [vmem:[#allocation8_spill] sm:$0xff] %v12332_v48  ;;  %v12335_v22 = vsel %vm9755_vm10, 4294967295, %v12334_v22  ;;  %vm9761_vm1 = vmpackc.low %vm4545_vm14, %vm4544_vm2  ;;  %v12337_v48 = vmov 0  ;;  %vm4546_vm14 = vcmp.eq.f32.partialorder %v9116_v11, 5.0  ;;  %vm4549_vm0 = vcmp.eq.f32.partialorder %v9261_v34, 5.0 }
 0x273   : > { %12336 = vst [vmem:[#allocation9_spill] sm:$0xff] %v12335_v22  ;;  %v12338_v48 = vsel %vm9761_vm1, 4294967295, %v12337_v48  ;;  %12340 = vst [vmem:[#allocation7_spill] sm:$0xff] %v9767_v25  ;;  %1801 = vrot.lane.b32.xlu1 %v9543_v47, %s7704_s14  ;;  %7247 = vmatpush3.bf16.msra.mxu1 %v9739_v53  ;;  %v12341_v22 = vmov 0  ;;  %v12346_v25 = vmov 0  ;;  %v12349_v47 = vld [vmem:[#allocation12_spill] sm:$0xff]  ;;  %vm12392_vm9 = vnez %v12241_v50 }
 0x274   : > { %12339 = vst [vmem:[#allocation10_spill] sm:$0xff] %v12338_v48  ;;  %vm9772_vm8 = vmpackc.low %vm4049_vm5, %vm4048_vm7  ;;  %v12344_v48 = vld [vmem:[#allocation11_spill] sm:$0xff]  ;;  %7295 = vmatpush3.bf16.msra.mxu0 %v9739_v53  ;;  %vm4050_vm7 = vcmp.eq.f32.partialorder %v9234_v19, 4.0  ;;  %vm12356_vm5 = vnez %v12224_v6  ;;  %v12362_v6 = vmov 0  ;;  %v12384_v55 = vmov 0  ;;  %v9922_v50 = vld [vmem:[%s7851_s13 + $0x20] sm:$0xff]  }
 0x275   : > { %v12342_v22 = vsel %vm9772_vm8, 4294967295, %v12341_v22  ;;  %vm12345_vm2 = vnez %v12344_v48  ;;  %vm9782_vm1 = vmpackc.low %vm4547_vm6, %vm4546_vm14  ;;  %vm12350_vm8 = vnez %v12349_v47  ;;  %1803 = vrot.lane.b32.xlu0 %v9557_v60, %s7704_s14  ;;  %v12351_v48 = vmov 0  ;;  %v9811_v60 = vpop.permute.xlu0 %7505 }
 0x276   : > { %12343 = vst [vmem:[#allocation24_spill] sm:$0xff] %v12342_v22  ;;  %7169 = vmatmul.mubr.msk.bf16.gmra.mrb[52].mxu1 %vm12345_vm2, %v12166_v4  ;;  %v12347_v25 = vsel %vm9782_vm1, 4294967295, %v12346_v25  ;;  %7217 = vmatmul.mubr.msk.bf16.gmra.mrb[52].mxu0 %vm12350_vm8, %v12166_v4  ;;  %vm9793_vm10 = vmpackc.low %vm4051_vm11, %vm4050_vm7  ;;  %vm4548_vm6 = vcmp.eq.f32.partialorder %v9234_v19, 5.0  ;;  %vm4551_vm14 = vcmp.eq.f32.partialorder %v9249_v7, 5.0  ;;  %v12357_v47 = vmov 0  ;;  %v9816_v22 = vld [vmem:[%s7851_s13 + $0x10] sm:$0xff]  }
 0x277   : > { %12348 = vst [vmem:[#allocation11_spill] sm:$0xff] %v12347_v25  ;;  %v12352_v48 = vsel %vm9793_vm10, 4294967295, %v12351_v48  ;;  %v12354_v25 = vld [vmem:[#allocation20_spill] sm:$0xff]  ;;  %7220 = vmatprep.mubr.msk.bf16.mxu0 %vm12356_vm5, %v12166_v4  ;;  %vm9805_vm8 = vmpackc.low %vm4549_vm0, %vm4548_vm6  ;;  %vm4052_vm11 = vcmp.eq.f32.partialorder %v9214_v57, 4.0  ;;  %7248 = vmatprep.subr.bf16.mxu1 %v9816_v22  ;;  %vm12361_vm5 = vcmp.eq.f32.partialorder %v9249_v7, 4.0  ;;  %vm4550_vm6 = vcmp.eq.f32.partialorder %v9214_v57, 5.0 }
 0x278   : > { %12353 = vst [vmem:[#allocation12_spill] sm:$0xff] %v12352_v48  ;;  %vm12355_vm2 = vnez %v12354_v25  ;;  %v12358_v47 = vsel %vm9805_vm8, 4294967295, %v12357_v47  ;;  %v12360_v48 = vld [vmem:[#allocation13_spill] sm:$0xff]  ;;  %vm9821_vm0 = vmpackc.low %vm12361_vm5, %vm4052_vm11  ;;  %7296 = vmatprep.subr.bf16.mxu0 %v9816_v22  ;;  %7249 = vmatpush3.bf16.msra.mxu1 %v9816_v22  ;;  %v12365_v25 = vmov 0  ;;  %vm4054_vm8 = vcmp.eq.f32.partialorder %v9317_v37, 4.0 }
 0x279   : > { %7172 = vmatprep.mubr.msk.bf16.mxu1 %vm12355_vm2, %v12166_v4  ;;  %12359 = vst [vmem:[#allocation20_spill] sm:$0xff] %v12358_v47  ;;  %1765 = vrot.lane.b32.xlu1 %v12360_v48, %s7704_s14  ;;  %v12363_v6 = vsel %vm9821_vm0, 4294967295, %v12362_v6  ;;  %vm9831_vm7 = vmpackc.low %vm4551_vm14, %vm4550_vm6  ;;  %v9837_v48 = vpop.permute.xlu1 %7510  ;;  %vm12370_vm5 = vcmp.eq.f32.partialorder %v9347_v30, 4.0  ;;  %v12371_v47 = vmov 0  ;;  %vm4552_vm14 = vcmp.eq.f32.partialorder %v9317_v37, 5.0 }
 0x27a   : > { %12364 = vst [vmem:[#allocation13_spill] sm:$0xff] %v12363_v6  ;;  %v12366_v25 = vsel %vm9831_vm7, 4294967295, %v12365_v25  ;;  %12368 = vst [vmem:[#allocation26_spill] sm:$0xff] %v9837_v48  ;;  %v12369_v6 = vld [vmem:[#allocation14_spill] sm:$0xff]  ;;  %7297 = vmatpush3.bf16.msra.mxu0 %v9816_v22  ;;  %vm4555_vm6 = vcmp.eq.f32.partialorder %v9331_v46, 5.0  ;;  %vm12374_vm11 = vcmp.eq.f32.partialorder %v9347_v30, 5.0  ;;  %v9863_v48 = vpop.permute.xlu0 %7515 }
 0x27b   : > { %12367 = vst [vmem:[#allocation25_spill] sm:$0xff] %v12366_v25  ;;  %1767 = vrot.lane.b32.xlu0 %v12369_v6, %s7704_s14  ;;  %vm9844_vm2 = vmpackc.low %vm12370_vm5, %vm4054_vm8  ;;  %v9851_v25 = vld [vmem:[%s7851_s13 + $0x18] sm:$0xff]   ;;  %v12375_v6 = vmov 0  ;;  %vm4056_vm8 = vcmp.eq.f32.partialorder %v9302_v52, 4.0  ;;  %vm4059_vm5 = vcmp.eq.f32.partialorder %v9437_v56, 4.0  ;;  %vm4058_vm1 = vcmp.eq.f32.partialorder %v9408_v12, 4.0 }
 0x27c   : > { %v12372_v47 = vsel %vm9844_vm2, 4294967295, %v12371_v47  ;;  %7250 = vmatprep.subr.bf16.mxu1 %v9851_v25  ;;  %7298 = vmatprep.subr.bf16.mxu0 %v9851_v25  ;;  %vm9857_vm7 = vmpackc.low %vm12374_vm11, %vm4552_vm14  ;;  %vm12378_vm2 = vcmp.eq.f32.partialorder %v9331_v46, 4.0  ;;  %vm4554_vm11 = vcmp.eq.f32.partialorder %v9302_v52, 5.0  ;;  %vm4557_vm14 = vcmp.eq.f32.partialorder %v9437_v56, 5.0  ;;  %v12543_v26 = vld [vmem:[#allocation10_spill] sm:$0xff] }
 0x27d   : > { %12373 = vst [vmem:[#allocation14_spill] sm:$0xff] %v12372_v47  ;;  %v12376_v6 = vsel %vm9857_vm7, 4294967295, %v12375_v6  ;;  %1797 = vrot.lane.b32.xlu1 %v9550_v51, %s7704_s14  ;;  %vm9869_vm0 = vmpackc.low %vm12378_vm2, %vm4056_vm8  ;;  %v12379_v47 = vmov 0  ;;  %v9884_v51 = vpop.permute.xlu1 %7520  ;;  %7251 = vmatpush3.bf16.msra.mxu1 %v9851_v25 }
 0x27e   : > { %12377 = vst [vmem:[#allocation27_spill] sm:$0xff] %v12376_v6  ;;  %v12380_v47 = vsel %vm9869_vm0, 4294967295, %v12379_v47  ;;  %v12382_v6 = vld [vmem:[#allocation21_spill] sm:$0xff]  ;;  %vm9878_vm10 = vmpackc.low %vm4555_vm6, %vm4554_vm11  ;;  %vm12391_vm11 = vnez %v12238_v33  ;;  %7299 = vmatpush3.bf16.msra.mxu0 %v9851_v25  ;;  %v12398_v33 = vmov 0  ;;  %7252 = vmatprep.subr.bf16.mxu1 %v9922_v50 }
 0x27f   : > { %12381 = vst [vmem:[#allocation28_spill] sm:$0xff] %v12380_v47  ;;  %vm12383_vm7 = vnez %v12382_v6  ;;  %v12385_v55 = vsel %vm9878_vm10, 4294967295, %v12384_v55  ;;  %12386 = vst [vmem:[#allocation21_spill] sm:$0xff] %v9884_v51  ;;  %v12387_v47 = vld [vmem:[#allocation15_spill] sm:$0xff]  ;;  %1799 = vrot.lane.b32.xlu0 %v9572_v41, %s7704_s14  ;;  %v12389_v6 = vmov 0  ;;  %v9909_v41 = vpop.permute.xlu0 %7525  ;;  %7300 = vmatprep.subr.bf16.mxu0 %v9922_v50  ;;  %v12402_v51 = vmov 0 }
 0x280   : > { %7173 = vmatmul.mubr.msk.bf16.gmra.mrb[56].mxu1 %vm12383_vm7, %v12166_v4  ;;  %vm12388_vm2 = vnez %v12387_v47  ;;  %vm9891_vm8 = vmpackc.low %vm4059_vm5, %vm4058_vm1  ;;  %vm4556_vm7 = vcmp.eq.f32.partialorder %v9408_v12, 5.0  ;;  %v12393_v47 = vmov 0  ;;  %vm4060_vm1 = vcmp.eq.f32.partialorder %v9392_v23, 4.0  ;;  %12396 = vst [vmem:[#allocation29_spill] sm:$0xff] %v9909_v41 }
 0x281   : > { %7221 = vmatmul.mubr.msk.bf16.gmra.mrb[56].mxu0 %vm12388_vm2, %v12166_v4  ;;  %v12390_v6 = vsel %vm9891_vm8, 4294967295, %v12389_v6  ;;  %7176 = vmatprep.mubr.msk.bf16.mxu1 %vm12391_vm11, %v12166_v4  ;;  %vm9903_vm2 = vmpackc.low %vm4557_vm14, %vm4556_vm7  ;;  %vm4063_vm5 = vcmp.eq.f32.partialorder %v9525_v0, 4.0  ;;  %vm12397_vm11 = vcmp.eq.f32.partialorder %v9423_v44, 4.0  ;;  %vm4561_vm14 = vcmp.eq.f32.partialorder %v9525_v0, 5.0 }
 0x282   : > { %7224 = vmatprep.mubr.msk.bf16.mxu0 %vm12392_vm9, %v12166_v4  ;;  %v12394_v47 = vsel %vm9903_vm2, 4294967295, %v12393_v47  ;;  %vm9915_vm6 = vmpackc.low %vm12397_vm11, %vm4060_vm1  ;;  %vm4558_vm9 = vcmp.eq.f32.partialorder %v9392_v23, 5.0  ;;  %vm12401_vm7 = vcmp.eq.f32.partialorder %v9423_v44, 5.0  ;;  %vm4062_vm1 = vcmp.eq.f32.partialorder %v9499_v5, 4.0  ;;  %7253 = vmatpush3.bf16.msra.mxu1 %v9922_v50 }
 0x283   : > { %12395 = vst [vmem:[#allocation15_spill] sm:$0xff] %v12394_v47  ;;  %v12399_v33 = vsel %vm9915_vm6, 4294967295, %v12398_v33  ;;  %vm9928_vm2 = vmpackc.low %vm12401_vm7, %vm4558_vm9  ;;  %vm4065_vm11 = vcmp.eq.f32.partialorder %v9512_v21, 4.0  ;;  %v12406_v41 = vmov 0  ;;  %vm4560_vm8 = vcmp.eq.f32.partialorder %v9499_v5, 5.0  ;;  %7301 = vmatpush3.bf16.msra.mxu0 %v9922_v50 }
 0x284   : > { %12400 = vst [vmem:[#allocation30_spill] sm:$0xff] %v12399_v33  ;;  %v12403_v51 = vsel %vm9928_vm2, 4294967295, %v12402_v51  ;;  %v9934_v33 = vpop.permute.xlu1 %7530  ;;  %vm9936_vm6 = vmpackc.low %vm4063_vm5, %vm4062_vm1  ;;  %vm4563_vm10 = vcmp.eq.f32.partialorder %v9512_v21, 5.0  ;;  %v12409_v47 = vmov 0  ;;  %vm4064_vm9 = vcmp.eq.f32.partialorder %v9482_v28, 4.0 }
 0x285   : > { %12404 = vst [vmem:[#allocation31_spill] sm:$0xff] %v12403_v51  ;;  %12405 = vst [vmem:[#allocation32_spill] sm:$0xff] %v9934_v33  ;;  %v12407_v41 = vsel %vm9936_vm6, 4294967295, %v12406_v41  ;;  %v9948_v51 = vpop.permute.xlu0 %7535  ;;  %v12413_v33 = vmov 0  ;;  %vm4562_vm1 = vcmp.eq.f32.partialorder %v9482_v28, 5.0  ;;  %vm5535_vm6 = vcmp.eq.f32.partialorder %v8979_v9, 7.0 }
 0x286   : > { %12408 = vst [vmem:[#allocation33_spill] sm:$0xff] %v12407_v41  ;;  %vm9942_vm0 = vmpackc.low %vm4561_vm14, %vm4560_vm8  ;;  %vm12416_vm14 = vnez %v12244_v38  ;;  %v12420_v41 = vld [vmem:[#allocation16_spill] sm:$0xff]  ;;  %v12424_v38 = vmov 0 }
 0x287   : > { %v12410_v47 = vsel %vm9942_vm0, 4294967295, %v12409_v47  ;;  %12412 = vst [vmem:[#allocation35_spill] sm:$0xff] %v9948_v51  ;;  %vm9952_vm5 = vmpackc.low %vm4065_vm11, %vm4064_vm9  ;;  %v12417_v51 = vmov 0  ;;  %vm4066_vm11 = vcmp.eq.f32.partialorder %v9586_v15, 4.0  ;;  %vm12421_vm8 = vnez %v12420_v41 }
 0x288   : > { %12411 = vst [vmem:[#allocation34_spill] sm:$0xff] %v12410_v47  ;;  %v12414_v33 = vsel %vm9952_vm5, 4294967295, %v12413_v33  ;;  %7177 = vmatmul.mubr.msk.bf16.gmra.mrb[60].mxu1 %vm12416_vm14, %v12166_v4  ;;  %v9962_v47 = vld [vmem:[%s7851_s13 + $0x28] sm:$0xff]   ;;  %vm9965_vm7 = vmpackc.low %vm4563_vm10, %vm4562_vm1  ;;  %vm12422_vm14 = vnez %v12254_v54  ;;  %vm12423_vm10 = vcmp.eq.f32.partialorder %v9611_v58, 4.0  ;;  %vm4567_vm9 = vcmp.eq.f32.partialorder %v9598_v3, 5.0 }
 0x289   : > { %12415 = vst [vmem:[#allocation36_spill] sm:$0xff] %v12414_v33  ;;  %7254 = vmatprep.subr.bf16.mxu1 %v9962_v47  ;;  %v12418_v51 = vsel %vm9965_vm7, 4294967295, %v12417_v51  ;;  %v9971_v33 = vpop.permute.xlu1 %7540  ;;  %7225 = vmatmul.mubr.msk.bf16.gmra.mrb[60].mxu0 %vm12421_vm8, %v12166_v4  ;;  %vm9981_vm1 = vmpackc.low %vm12423_vm10, %vm4066_vm11  ;;  %vm4564_vm7 = vcmp.eq.f32.partialorder %v9586_v15, 5.0  ;;  %vm12427_vm5 = vnez %v12257_v24  ;;  %vm12428_vm8 = vcmp.eq.f32.partialorder %v9611_v58, 5.0  ;;  %v9999_v41 = vpop.permute.xlu0 %7545 }
 0x28a   : > { %12419 = vst [vmem:[#allocation37_spill] sm:$0xff] %v12418_v51  ;;  %7180 = vmatprep.mubr.msk.bf16.mxu1 %vm12422_vm14, %v12166_v4  ;;  %v12425_v38 = vsel %vm9981_vm1, 4294967295, %v12424_v38  ;;  %7228 = vmatprep.mubr.msk.bf16.mxu0 %vm12427_vm5, %v12166_v4  ;;  %vm9993_vm0 = vmpackc.low %vm12428_vm8, %vm4564_vm7  ;;  %v12429_v54 = vmov 0  ;;  %vm4068_vm11 = vcmp.eq.f32.partialorder %v9568_v43, 4.0  ;;  %vm5035_vm14 = vcmp.eq.f32.partialorder %v8983_v17, 6.0 }
 0x28b   : > { %12426 = vst [vmem:[#allocation16_spill] sm:$0xff] %v12425_v38  ;;  %7302 = vmatprep.subr.bf16.mxu0 %v9962_v47  ;;  %v12430_v54 = vsel %vm9993_vm0, 4294967295, %v12429_v54  ;;  %7255 = vmatpush3.bf16.msra.mxu1 %v9962_v47  ;;  %vm12432_vm5 = vcmp.eq.f32.partialorder %v9598_v3, 4.0  ;;  %v12433_v24 = vmov 0  ;;  %vm4566_vm7 = vcmp.eq.f32.partialorder %v9568_v43, 5.0 }
 0x28c   : > { %12431 = vst [vmem:[#allocation38_spill] sm:$0xff] %v12430_v54  ;;  %7303 = vmatpush3.bf16.msra.mxu0 %v9962_v47  ;;  %vm10005_vm10 = vmpackc.low %vm12432_vm5, %vm4068_vm11  ;;  %vm5533_vm8 = vcmp.eq.f32.partialorder %v8983_v17, 7.0  ;;  %v10012_v54 = vld [vmem:[%s7851_s13 + $0x30] sm:$0xff]   ;;  %v12436_v38 = vmov 0  ;;  %vm5034_vm11 = vcmp.eq.f32.partialorder %v8974_v29, 6.0  ;;  %vm5037_vm5 = vcmp.eq.f32.partialorder %v8979_v9, 6.0 }
 0x28d   : > { %v12434_v24 = vsel %vm10005_vm10, 4294967295, %v12433_v24  ;;  %7256 = vmatprep.subr.bf16.mxu1 %v10012_v54  ;;  %7304 = vmatprep.subr.bf16.mxu0 %v10012_v54  ;;  %vm10018_vm0 = vmpackc.low %vm4567_vm9, %vm4566_vm7  ;;  %v12440_v17 = vmov 0  ;;  %vm5532_vm1 = vcmp.eq.f32.partialorder %v8974_v29, 7.0  ;;  %v12443_v51 = vmov 0  ;;  %v12449_v29 = vld [vmem:[#allocation17_spill] sm:$0xff] }
 0x28e   : > { %12435 = vst [vmem:[#allocation39_spill] sm:$0xff] %v12434_v24  ;;  %v12437_v38 = vsel %vm10018_vm0, 4294967295, %v12436_v38  ;;  %v10024_v24 = vpop.permute.xlu1 %7550  ;;  %vm10026_vm10 = vmpackc.low %vm5035_vm14, %vm5034_vm11  ;;  %vm5036_vm9 = vcmp.eq.f32.partialorder %v12311_v10, 6.0  ;;  %vm5534_vm11 = vcmp.eq.f32.partialorder %v12311_v10, 7.0  ;;  %v10052_v9 = vld [vmem:[%s7851_s13 + $0x38] sm:$0xff]   ;;  %v12453_v10 = vld [vmem:[#allocation18_spill] sm:$0xff] }
 0x28f   : > { %12438 = vst [vmem:[#allocation40_spill] sm:$0xff] %v12437_v38  ;;  %12439 = vst [vmem:[#allocation41_spill] sm:$0xff] %v10024_v24  ;;  %v12441_v17 = vsel %vm10026_vm10, 4294967295, %v12440_v17  ;;  %v10038_v38 = vpop.permute.xlu0 %7555  ;;  %7257 = vmatpush3.bf16.msra.mxu1 %v10012_v54  ;;  %v12458_v24 = vmov 0  ;;  %vm5045_vm10 = vcmp.eq.f32.partialorder %v9151_v40, 6.0 }
 0x290   : > { %12442 = vst [vmem:[#allocation42_spill] sm:$0xff] %v12441_v17  ;;  %vm10032_vm2 = vmpackc.low %vm5533_vm8, %vm5532_vm1  ;;  %7305 = vmatpush3.bf16.msra.mxu0 %v10012_v54  ;;  %v12446_v17 = vmov 0  ;;  %vm12450_vm8 = vnez %v12449_v29  ;;  %7258 = vmatprep.subr.bf16.mxu1 %v10052_v9  ;;  %vm12454_vm1 = vnez %v12453_v10  ;;  %v12455_v29 = vld [vmem:[#allocation19_spill] sm:$0xff]  ;;  %v12462_v10 = vmov 0 }
 0x291   : > { %v12444_v51 = vsel %vm10032_vm2, 4294967295, %v12443_v51  ;;  %vm10042_vm14 = vmpackc.low %vm5037_vm5, %vm5036_vm9  ;;  %7181 = vmatmul.mubr.msk.bf16.gmra.mrb[64].mxu1 %vm12450_vm8, %v12166_v4  ;;  %vm5038_vm5 = vcmp.eq.f32.partialorder %v9039_v42, 6.0  ;;  %7229 = vmatmul.mubr.msk.bf16.gmra.mrb[64].mxu0 %vm12454_vm1, %v12166_v4  ;;  %vm12456_vm8 = vnez %v12455_v29  ;;  %vm5539_vm9 = vcmp.eq.f32.partialorder %v9053_v39, 7.0 }
 0x292   : > { %12445 = vst [vmem:[#allocation43_spill] sm:$0xff] %v12444_v51  ;;  %v12447_v17 = vsel %vm10042_vm14, 4294967295, %v12446_v17  ;;  %vm10055_vm7 = vmpackc.low %vm5535_vm6, %vm5534_vm11  ;;  %v12451_v51 = vmov 0  ;;  %7184 = vmatprep.mubr.msk.bf16.mxu1 %vm12456_vm8, %v12166_v4  ;;  %vm12457_vm14 = vcmp.eq.f32.partialorder %v9067_v63, 6.0  ;;  %vm5536_vm11 = vcmp.eq.f32.partialorder %v9039_v42, 7.0  ;;  %7306 = vmatprep.subr.bf16.mxu0 %v10052_v9 }
 0x293   : > { %12448 = vst [vmem:[#allocation44_spill] sm:$0xff] %v12447_v17  ;;  %v12452_v51 = vsel %vm10055_vm7, 4294967295, %v12451_v51  ;;  %v10061_v17 = vpop.permute.xlu1 %7560  ;;  %vm10071_vm6 = vmpackc.low %vm12457_vm14, %vm5038_vm5  ;;  %vm12460_vm7 = vnez %v12275_v32  ;;  %vm12461_vm1 = vcmp.eq.f32.partialorder %v9067_v63, 7.0  ;;  %vm5040_vm14 = vcmp.eq.f32.partialorder %v12326_v49, 6.0  ;;  %v10089_v29 = vpop.permute.xlu0 %7565  ;;  %7259 = vmatpush3.bf16.msra.mxu1 %v10052_v9 }
 0x294   : > { %v12459_v24 = vsel %vm10071_vm6, 4294967295, %v12458_v24  ;;  %7232 = vmatprep.mubr.msk.bf16.mxu0 %vm12460_vm7, %v12166_v4  ;;  %vm10083_vm2 = vmpackc.low %vm12461_vm1, %vm5536_vm11  ;;  %vm5043_vm5 = vcmp.eq.f32.partialorder %v9165_v1, 6.0  ;;  %7307 = vmatpush3.bf16.msra.mxu0 %v10052_v9  ;;  %vm12464_vm7 = vcmp.eq.f32.partialorder %v9053_v39, 6.0  ;;  %v12465_v42 = vmov 0 }
 0x295   : > { %v12463_v10 = vsel %vm10083_vm2, 4294967295, %v12462_v10  ;;  %vm10095_vm8 = vmpackc.low %vm12464_vm7, %vm5040_vm14  ;;  %vm5538_vm11 = vcmp.eq.f32.partialorder %v12326_v49, 7.0  ;;  %vm5541_vm1 = vcmp.eq.f32.partialorder %v9165_v1, 7.0  ;;  %7340 = vmatprep.subr.bf16.mxu1 %v9735_v27  ;;  %7388 = vmatprep.subr.bf16.mxu0 %v9735_v27  ;;  %v12467_v63 = vmov 0 }
 0x296   : > { %v12466_v42 = vsel %vm10095_vm8, 4294967295, %v12465_v42  ;;  %vm10103_vm2 = vmpackc.low %vm5539_vm9, %vm5538_vm11  ;;  %vm5042_vm6 = vcmp.eq.f32.partialorder %v9136_v35, 6.0  ;;  %v12470_v32 = vmov 0  ;;  %vm5540_vm7 = vcmp.eq.f32.partialorder %v9136_v35, 7.0  ;;  %v12478_v35 = vld [vmem:[#allocation22_spill] sm:$0xff] }
 0x297   : > { %v12468_v63 = vsel %vm10103_vm2, 4294967295, %v12467_v63  ;;  %v10109_v39 = vpop.permute.xlu1 %7570  ;;  %vm10111_vm14 = vmpackc.low %vm5043_vm5, %vm5042_vm6  ;;  %vm5543_vm8 = vcmp.eq.f32.partialorder %v9151_v40, 7.0  ;;  %v12472_v1 = vmov 0  ;;  %vm5044_vm9 = vcmp.eq.f32.partialorder %v9116_v11, 6.0  ;;  %v10123_v49 = vpop.permute.xlu0 %7575 }
 0x298   : > { %12469 = vst [vmem:[#allocation17_spill] sm:$0xff] %v12468_v63  ;;  %v12471_v32 = vsel %vm10111_vm14, 4294967295, %v12470_v32  ;;  %vm10117_vm0 = vmpackc.low %vm5541_vm1, %vm5540_vm7  ;;  %vm5047_vm11 = vcmp.eq.f32.partialorder %v9261_v34, 6.0  ;;  %v12475_v63 = vmov 0  ;;  %vm5542_vm6 = vcmp.eq.f32.partialorder %v9116_v11, 7.0 }
 0x299   : > { %v12473_v1 = vsel %vm10117_vm0, 4294967295, %v12472_v1  ;;  %vm10125_vm2 = vmpackc.low %vm5045_vm10, %vm5044_vm9  ;;  %vm5545_vm5 = vcmp.eq.f32.partialorder %v9261_v34, 7.0  ;;  %vm12479_vm1 = vnez %v12478_v35  ;;  %v12480_v40 = vmov 0  ;;  %v7595_v34 = vld [vmem:[#allocation2 + $0x10] sm:$0xff] }
 0x29a   : > { %12474 = vst [vmem:[#allocation18_spill] sm:$0xff] %v12473_v1  ;;  %v12476_v63 = vsel %vm10125_vm2, 4294967295, %v12475_v63  ;;  %7185 = vmatmul.mubr.msk.bf16.gmra.mrb[68].mxu1 %vm12479_vm1, %v12166_v4  ;;  %vm10134_vm7 = vmpackc.low %vm5543_vm8, %vm5542_vm6  ;;  %vm5046_vm0 = vcmp.eq.f32.partialorder %v9234_v19, 6.0  ;;  %vm5049_vm14 = vcmp.eq.f32.partialorder %v9249_v7, 6.0  ;;  %v12482_v1 = vld [vmem:[#allocation23_spill] sm:$0xff]  ;;  %vm12484_vm9 = vnez %v12289_v36 }
 0x29b   : > { %12477 = vst [vmem:[#allocation19_spill] sm:$0xff] %v12476_v63  ;;  %v12481_v40 = vsel %vm10134_vm7, 4294967295, %v12480_v40  ;;  %vm12483_vm10 = vnez %v12482_v1  ;;  %v1746_v63 = vpop.permute.xlu1 %1745  ;;  %7188 = vmatprep.mubr.msk.bf16.mxu1 %vm12484_vm9, %v12166_v4  ;;  %vm10146_vm2 = vmpackc.low %vm5047_vm11, %vm5046_vm0  ;;  %v12485_v11 = vmov 0  ;;  %vm5544_vm8 = vcmp.eq.f32.partialorder %v9234_v19, 7.0  ;;  %v1748_v36 = vpop.permute.xlu0 %1747 }
 0x29c   : > { %7233 = vmatmul.mubr.msk.bf16.gmra.mrb[68].mxu0 %vm12483_vm10, %v12166_v4  ;;  %v12486_v11 = vsel %vm10146_vm2, 4294967295, %v12485_v11  ;;  %vm5547_vm6 = vcmp.eq.f32.partialorder %v9249_v7, 7.0  ;;  %v1839_v35 = vadd.f32 %v7595_v34, %v1746_v63  ;;  %vm12488_vm1 = vnez %v12292_v61  ;;  %vm10155_vm10 = vmpackc.low %vm5545_vm5, %vm5544_vm8  ;;  %v7596_v7 = vld [vmem:[#allocation2 + $0x18] sm:$0xff] }
 0x29d   : > { %12487 = vst [vmem:[#allocation22_spill] sm:$0xff] %v12486_v11  ;;  %7236 = vmatprep.mubr.msk.bf16.mxu0 %vm12488_vm1, %v12166_v4  ;;  %v12489_v1 = vmov 0  ;;  %vm5048_vm9 = vcmp.eq.f32.partialorder %v9214_v57, 6.0  ;;  %vm5051_vm0 = vcmp.eq.f32.partialorder %v9347_v30, 6.0  ;;  %v12491_v11 = vmov 0 }
 0x29e   : > { %v12490_v1 = vsel %vm10155_vm10, 4294967295, %v12489_v1  ;;  %vm10161_vm11 = vmpackc.low %vm5049_vm14, %vm5048_vm9  ;;  %vm5546_vm2 = vcmp.eq.f32.partialorder %v9214_v57, 7.0  ;;  %vm5549_vm7 = vcmp.eq.f32.partialorder %v9347_v30, 7.0  ;;  %v7627_v19 = vadd.low.f32.bf16 %v1839_v35, %v9811_v60  ;;  %v2455_v35 = vld [vmem:[%s7846_s10 + $0x40] sm:$0xff] }
 0x29f   : > { %v12492_v11 = vsel %vm10161_vm11, 4294967295, %v12491_v11  ;;  %v1840_v61 = vadd.f32 %v7596_v7, %v1748_v36  ;;  %vm10168_vm5 = vmpackc.low %vm5547_vm6, %vm5546_vm2  ;;  %v12493_v63 = vmov 0  ;;  %vm5050_vm8 = vcmp.eq.f32.partialorder %v9317_v37, 6.0  ;;  %v7600_v36 = vld [vmem:[#allocation2 + $0x8] sm:$0xff]  ;;  %v12548_v7 = vld [vmem:[#allocation24_spill] sm:$0xff] }
 0x2a0   : > { %v12494_v63 = vsel %vm10168_vm5, 4294967295, %v12493_v63  ;;  %vm5053_vm1 = vcmp.eq.f32.partialorder %v9331_v46, 6.0  ;;  %vm10174_vm14 = vmpackc.low %vm5051_vm0, %vm5050_vm8  ;;  %v12495_v34 = vmov 0  ;;  %vm5548_vm9 = vcmp.eq.f32.partialorder %v9317_v37, 7.0 }
 0x2a1   : > { %v12496_v34 = vsel %vm10174_vm14, 4294967295, %v12495_v34  ;;  %vm5551_vm11 = vcmp.eq.f32.partialorder %v9331_v46, 7.0  ;;  %vm12497_vm10 = vcmask 7168   ;;  %v7628_v57 = vadd.high.f32.bf16 %v1840_v61, %v9811_v60  ;;  %vm10182_vm2 = vmpackc.low %vm5549_vm7, %vm5548_vm9 }
 0x2a2   : > { %2064 = vst.msk [vmem:[#allocation2 + $0x10] sm:$0xff] %vm12497_vm10, %v7627_v19  ;;  %vm5052_vm6 = vcmp.eq.f32.partialorder %v9302_v52, 6.0  ;;  %vm5055_vm5 = vcmp.eq.f32.partialorder %v9437_v56, 6.0  ;;  %vm5550_vm8 = vcmp.eq.f32.partialorder %v9302_v52, 7.0  ;;  %vm5553_vm14 = vcmp.eq.f32.partialorder %v9437_v56, 7.0  ;;  %vm12502_vm3 = vmmov %vm12497_vm10 }
 0x2a3   : > { %vm10188_vm0 = vmpackc.low %vm5053_vm1, %vm5052_vm6  ;;  %2065 = vst.msk [vmem:[#allocation2 + $0x18] sm:$0xff] %vm12502_vm3, %v7628_v57  ;;  %vm12503_vm7 = vnez %v12295_v14  ;;  %v12504_v37 = vmov 0  ;;  %vm5054_vm9 = vcmp.eq.f32.partialorder %v9408_v12, 6.0  ;;  %vm5057_vm1 = vcmp.eq.f32.partialorder %v9423_v44, 6.0 }
 0x2a4   : > { %7189 = vmatmul.mubr.msk.bf16.gmra.mrb[72].mxu1 %vm12503_vm7, %v12166_v4  ;;  %vm10198_vm10 = vmpackc.low %vm5551_vm11, %vm5550_vm8  ;;  %vm12506_vm6 = vnez %v12298_v20  ;;  %v12507_v52 = vmov 0  ;;  %vm5552_vm11 = vcmp.eq.f32.partialorder %v9408_v12, 7.0  ;;  %vm5555_vm8 = vcmp.eq.f32.partialorder %v9423_v44, 7.0  ;;  %v12541_v20 = vld [vmem:[#allocation9_spill] sm:$0xff] }
 0x2a5   : > { %v12505_v37 = vsel %vm10198_vm10, 4294967295, %v12504_v37  ;;  %7237 = vmatmul.mubr.msk.bf16.gmra.mrb[72].mxu0 %vm12506_vm6, %v12166_v4  ;;  %7192 = vmatprep.mubr.msk.bf16.mxu1 %vm9639_vm15, %v12166_v4  ;;  %vm10210_vm3 = vmpackc.low %vm5055_vm5, %vm5054_vm9  ;;  %vm5056_vm6 = vcmp.eq.f32.partialorder %v9392_v23, 6.0  ;;  %vm5059_vm15 = vcmp.eq.f32.partialorder %v9525_v0, 6.0  ;;  %v12511_v56 = vmov 0 }
 0x2a6   : > { %v12508_v52 = vsel %vm10210_vm3, 4294967295, %v12507_v52  ;;  %7240 = vmatprep.mubr.msk.bf16.mxu0 %vm9651_vm13, %v12166_v4  ;;  %vm10219_vm7 = vmpackc.low %vm5553_vm14, %vm5552_vm11  ;;  %vm5554_vm9 = vcmp.eq.f32.partialorder %v9392_v23, 7.0  ;;  %vm5557_vm3 = vcmp.eq.f32.partialorder %v9525_v0, 7.0  ;;  %v12513_v12 = vmov 0 }
 0x2a7   : > { %vm10225_vm5 = vmpackc.low %vm5057_vm1, %vm5056_vm6  ;;  %vm5058_vm13 = vcmp.eq.f32.partialorder %v9499_v5, 6.0  ;;  %vm5061_vm14 = vcmp.eq.f32.partialorder %v9512_v21, 6.0  ;;  %vm5556_vm1 = vcmp.eq.f32.partialorder %v9499_v5, 7.0  ;;  %vm5559_vm6 = vcmp.eq.f32.partialorder %v9512_v21, 7.0 }
 0x2a8   : > { %v12512_v56 = vsel %vm10225_vm5, 4294967295, %v12511_v56  ;;  %vm10231_vm10 = vmpackc.low %vm5555_vm8, %vm5554_vm9  ;;  %v12517_v23 = vmov 0  ;;  %vm5060_vm8 = vcmp.eq.f32.partialorder %v9482_v28, 6.0  ;;  %vm5063_vm9 = vcmp.eq.f32.partialorder %v9611_v58, 6.0 }
 0x2a9   : > { %v12514_v12 = vsel %vm10231_vm10, 4294967295, %v12513_v12  ;;  %vm10237_vm11 = vmpackc.low %vm5059_vm15, %vm5058_vm13  ;;  %v12519_v0 = vmov 0  ;;  %vm5558_vm15 = vcmp.eq.f32.partialorder %v9482_v28, 7.0  ;;  %vm5561_vm13 = vcmp.eq.f32.partialorder %v9611_v58, 7.0 }
 0x2aa   : > { %vm10243_vm5 = vmpackc.low %vm5557_vm3, %vm5556_vm1  ;;  %v12521_v21 = vmov 0  ;;  %vm5062_vm1 = vcmp.eq.f32.partialorder %v9586_v15, 6.0 }
 0x2ab   : > { %v12518_v23 = vsel %vm10243_vm5, 4294967295, %v12517_v23  ;;  %vm10249_vm10 = vmpackc.low %vm5061_vm14, %vm5060_vm8  ;;  %vm5065_vm5 = vcmp.eq.f32.partialorder %v9598_v3, 6.0  ;;  %vm12523_vm14 = vnez %v12308_v8 }
 0x2ac   : > { %v12520_v0 = vsel %vm10249_vm10, 4294967295, %v12519_v0  ;;  %7193 = vmatmul.mubr.msk.bf16.gmra.mrb[76].mxu1 %vm9659_vm12, %v12166_v4  ;;  %vm10258_vm3 = vmpackc.low %vm5559_vm6, %vm5558_vm15  ;;  %vm5560_vm12 = vcmp.eq.f32.partialorder %v9586_v15, 7.0  ;;  %vm5563_vm6 = vcmp.eq.f32.partialorder %v9598_v3, 7.0  ;;  %vm12526_vm15 = vnez %v12310_v62  ;;  %v12539_v3 = vld [vmem:[#allocation8_spill] sm:$0xff]  ;;  %v7598_v62 = vld [vmem:[#allocation2 + $0x98] sm:$0xff] }
 0x2ad   : > { %v12522_v21 = vsel %vm10258_vm3, 4294967295, %v12521_v21  ;;  %7241 = vmatmul.mubr.msk.bf16.gmra.mrb[76].mxu0 %vm9665_vm4, %v12166_v4  ;;  %7260 = vmatprep.mubr.msk.bf16.mxu1 %vm12523_vm14, %v12166_v4  ;;  %vm10270_vm8 = vmpackc.low %vm5063_vm9, %vm5062_vm1  ;;  %vm5064_vm4 = vcmp.eq.f32.partialorder %v9568_v43, 6.0  ;;  %vm5562_vm9 = vcmp.eq.f32.partialorder %v9568_v43, 7.0  ;;  %vm12533_vm14 = vnez %v12313_v45  ;;  %v12537_v43 = vld [vmem:[#allocation6_spill] sm:$0xff] }
 0x2ae   : > { %7308 = vmatprep.mubr.msk.bf16.mxu0 %vm12526_vm15, %v12166_v4  ;;  %vm10279_vm3 = vmpackc.low %vm5561_vm13, %vm5560_vm12  ;;  %vm12534_vm13 = vnez %v12316_v59  ;;  %vm12536_vm12 = vnez %v12325_v31  ;;  %vm12540_vm15 = vnez %v12539_v3  ;;  %v7599_v31 = vld [vmem:[#allocation2] sm:$0xff] }
 0x2af   : > { %vm10284_vm10 = vmpackc.low %vm5065_vm5, %vm5064_vm4  ;;  %vm12535_vm5 = vnez %v12320_v13  ;;  %vm12542_vm4 = vnez %v12541_v20 }
 0x2b0   : > { %vm10289_vm1 = vmpackc.low %vm5563_vm6, %vm5562_vm9  ;;  %vm12538_vm6 = vnez %v12537_v43  ;;  %vm12544_vm9 = vnez %v12543_v26  ;;  %v7601_v43 = vld [vmem:[#allocation2 + $0x80] sm:$0xff] }
 0x2b1   : > { %v1778_v58 = vpop.permute.xlu1 %1777 }
 0x2b2   : > { %v1855_v16 = vadd.f32 %v7597_v2, %v1778_v58  ;;  %v12555_v58 = vld [vmem:[#allocation20_spill] sm:$0xff] }
 0x2b3   : > { %v1780_v18 = vpop.permute.xlu0 %1779 }
 0x2b4   : > { %7261 = vmatmul.mubr.msk.bf16.vlgmr.msra.gmra.mrb[80].mxu1 %vm12533_vm14, %v12166_v4  ;;  %v7629_v8 = vadd.low.f32.bf16 %v1855_v16, %v9999_v41  ;;  %v1856_v45 = vadd.f32 %v7598_v62, %v1780_v18  ;;  %vm12545_vm14 = vcmask 7168   ;;  %v7602_v16 = vld [vmem:[#allocation2 + $0x88] sm:$0xff]  ;;  %v7603_v62 = vld [vmem:[#allocation2 + $0x30] sm:$0xff] }
 0x2b5   : > { %7309 = vmatmul.mubr.msk.bf16.vlgmr.msra.gmra.mrb[80].mxu0 %vm12534_vm13, %v12166_v4  ;;  %7264 = vmatprep.mubr.msk.bf16.mxu1 %vm12535_vm5, %v12166_v4  ;;  %v1742_v59 = vpop.permute.xlu1 %1741  ;;  %vm12546_vm13 = vmmov %vm12545_vm14  ;;  %vm12549_vm5 = vnez %v12548_v7 }
 0x2b6   : > { %7312 = vmatprep.mubr.msk.bf16.mxu0 %vm12536_vm12, %v12166_v4  ;;  %7341 = vmatpush3.bf16.msra.mxu1 %v9735_v27  ;;  %2080 = vst.msk [vmem:[#allocation2 + $0x90] sm:$0xff] %vm12545_vm14, %v7629_v8  ;;  %v7630_v13 = vadd.high.f32.bf16 %v1856_v45, %v9999_v41  ;;  %v12550_v41 = vld [vmem:[#allocation11_spill] sm:$0xff] }
 0x2b7   : > { %7389 = vmatpush3.bf16.msra.mxu0 %v9735_v27  ;;  %7342 = vmatprep.subr.bf16.mxu1 %v9739_v53  ;;  %v1837_v27 = vadd.f32 %v7599_v31, %v1742_v59  ;;  %vm12551_vm12 = vnez %v12550_v41 }
 0x2b8   : > { %7390 = vmatprep.subr.bf16.mxu0 %v9739_v53  ;;  %2081 = vst.msk [vmem:[#allocation2 + $0x98] sm:$0xff] %vm12546_vm13, %v7630_v13  ;;  %v7604_v13 = vld [vmem:[#allocation2 + $0x38] sm:$0xff] }
 0x2b9   : > { %v1774_v61 = vpop.permute.xlu1 %1773 }
 0x2ba   : > { %7343 = vmatpush3.bf16.msra.mxu1 %v9739_v53  ;;  %v1853_v3 = vadd.f32 %v7601_v43, %v1774_v61  ;;  %v7606_v61 = vld [vmem:[#allocation2 + $0xb8] sm:$0xff]  ;;  %v7607_v43 = vld [vmem:[#allocation2 + $0x20] sm:$0xff] }
 0x2bb   : > { %7391 = vmatpush3.bf16.msra.mxu0 %v9739_v53  ;;  %7344 = vmatprep.subr.bf16.mxu1 %v9816_v22  ;;  %v1744_v53 = vpop.permute.xlu0 %1743 }
 0x2bc   : > { %7265 = vmatmul.mubr.msk.bf16.gmra.mrb[84].mxu1 %vm12538_vm6, %v12166_v4  ;;  %7392 = vmatprep.subr.bf16.mxu0 %v9816_v22  ;;  %v1838_v19 = vadd.f32 %v7600_v36, %v1744_v53  ;;  %v7633_v2 = vadd.low.f32.bf16 %v1853_v3, %v9971_v33 }
 0x2bd   : > { %7313 = vmatmul.mubr.msk.bf16.gmra.mrb[84].mxu0 %vm12540_vm15, %v12166_v4  ;;  %7268 = vmatprep.mubr.msk.bf16.mxu1 %vm12542_vm4, %v12166_v4  ;;  %vm12554_vm15 = vmmov %vm12546_vm13  ;;  %vm12556_vm4 = vnez %v12555_v58  ;;  %v1754_v18 = vpop.permute.xlu1 %1753  ;;  %v12571_v58 = vld [vmem:[#allocation26_spill] sm:$0xff] }
 0x2be   : > { %7316 = vmatprep.mubr.msk.bf16.mxu0 %vm12544_vm9, %v12166_v4  ;;  %7345 = vmatpush3.bf16.msra.mxu1 %v9816_v22  ;;  %vm12557_vm9 = vmmov %vm12546_vm13  ;;  %v1843_v45 = vadd.f32 %v7603_v62, %v1754_v18  ;;  %v7609_v18 = vld [vmem:[#allocation2 + $0xa0] sm:$0xff]  ;;  %v12577_v62 = vld [vmem:[#allocation15_spill] sm:$0xff] }
 0x2bf   : > { %7393 = vmatpush3.bf16.msra.mxu0 %v9816_v22  ;;  %7346 = vmatprep.subr.bf16.mxu1 %v9851_v25  ;;  %v12547_v22 = vld [vmem:[#allocation7_spill] sm:$0xff]  ;;  %v1776_v20 = vpop.permute.xlu0 %1775  ;;  %vm12558_vm14 = vmmov %vm12557_vm9 }
 0x2c0   : > { %7394 = vmatprep.subr.bf16.mxu0 %v9851_v25  ;;  %v7631_v60 = vadd.low.f32.bf16 %v1837_v27, %v12547_v22  ;;  %v7632_v57 = vadd.high.f32.bf16 %v1838_v19, %v12547_v22  ;;  %v1854_v26 = vadd.f32 %v7602_v16, %v1776_v20  ;;  %2078 = vst.msk [vmem:[#allocation2 + $0x80] sm:$0xff] %vm12558_vm14, %v7633_v2  ;;  %vm12559_vm13 = vmmov %vm12557_vm9  ;;  %v12560_v27 = vld [vmem:[#allocation13_spill] sm:$0xff]  ;;  %v12567_v19 = vld [vmem:[#allocation27_spill] sm:$0xff] }
 0x2c1   : > { %v7635_v59 = vadd.low.f32.bf16 %v1843_v45, %v9863_v48  ;;  %v1786_v53 = vpop.permute.xlu1 %1785  ;;  %vm12569_vm14 = vmmov %vm12557_vm9  ;;  %v7608_v2 = vld [vmem:[#allocation2 + $0x28] sm:$0xff] }
 0x2c2   : > { %7347 = vmatpush3.bf16.msra.mxu1 %v9851_v25  ;;  %2062 = vst.msk [vmem:[#allocation2] sm:$0xff] %vm12554_vm15, %v7631_v60  ;;  %v7634_v8 = vadd.high.f32.bf16 %v1854_v26, %v9971_v33  ;;  %v12562_v33 = vld [vmem:[#allocation25_spill] sm:$0xff]  ;;  %vm12566_vm15 = vmmov %vm12557_vm9  ;;  %v7605_v60 = vld [vmem:[#allocation2 + $0xb0] sm:$0xff] }
 0x2c3   : > { %7395 = vmatpush3.bf16.msra.mxu0 %v9851_v25  ;;  %7348 = vmatprep.subr.bf16.mxu1 %v9922_v50  ;;  %v12552_v25 = vld [vmem:[#allocation12_spill] sm:$0xff]  ;;  %2063 = vst.msk [vmem:[#allocation2 + $0x8] sm:$0xff] %vm12557_vm9, %v7632_v57  ;;  %v1859_v36 = vadd.f32 %v7605_v60, %v1786_v53  ;;  %v7612_v60 = vld [vmem:[#allocation2 + $0x58] sm:$0xff] }
 0x2c4   : > { %7269 = vmatmul.mubr.msk.bf16.gmra.mrb[88].mxu1 %vm12549_vm5, %v12166_v4  ;;  %7396 = vmatprep.subr.bf16.mxu0 %v9922_v50  ;;  %vm12553_vm6 = vnez %v12552_v25  ;;  %2079 = vst.msk [vmem:[#allocation2 + $0x88] sm:$0xff] %vm12559_vm13, %v7634_v8  ;;  %vm12561_vm5 = vnez %v12560_v27  ;;  %vm12570_vm13 = vmmov %vm12557_vm9  ;;  %v12572_v26 = vld [vmem:[#allocation28_spill] sm:$0xff] }
 0x2c5   : > { %7317 = vmatmul.mubr.msk.bf16.gmra.mrb[88].mxu0 %vm12551_vm12, %v12166_v4  ;;  %7272 = vmatprep.mubr.msk.bf16.mxu1 %vm12553_vm6, %v12166_v4  ;;  %vm12563_vm12 = vnez %v12562_v33  ;;  %2068 = vst.msk [vmem:[#allocation2 + $0x30] sm:$0xff] %vm12566_vm15, %v7635_v59  ;;  %v7637_v41 = vadd.low.f32.bf16 %v1859_v36, %v10038_v38  ;;  %vm12576_vm15 = vmmov %vm12557_vm9  ;;  %v7610_v59 = vld [vmem:[#allocation2 + $0xa8] sm:$0xff]  ;;  %v7611_v27 = vld [vmem:[#allocation2 + $0x50] sm:$0xff] }
 0x2c6   : > { %7320 = vmatprep.mubr.msk.bf16.mxu0 %vm12556_vm4, %v12166_v4  ;;  %7349 = vmatpush3.bf16.msra.mxu1 %v9922_v50  ;;  %vm12568_vm4 = vnez %v12567_v19  ;;  %v12583_v19 = vld [vmem:[#allocation30_spill] sm:$0xff] }
 0x2c7   : > { %7397 = vmatpush3.bf16.msra.mxu0 %v9922_v50  ;;  %7350 = vmatprep.subr.bf16.mxu1 %v9962_v47  ;;  %v1756_v50 = vpop.permute.xlu0 %1755  ;;  %2084 = vst.msk [vmem:[#allocation2 + $0xb0] sm:$0xff] %vm12569_vm14, %v7637_v41  ;;  %vm12580_vm14 = vmmov %vm12557_vm9 }
 0x2c8   : > { %7398 = vmatprep.subr.bf16.mxu0 %v9962_v47  ;;  %v1844_v31 = vadd.f32 %v7604_v13, %v1756_v50 }
 0x2ca   : > { %7351 = vmatpush3.bf16.msra.mxu1 %v9962_v47  ;;  %v7636_v22 = vadd.high.f32.bf16 %v1844_v31, %v9863_v48  ;;  %v1750_v48 = vpop.permute.xlu1 %1749 }
 0x2cb   : > { %7399 = vmatpush3.bf16.msra.mxu0 %v9962_v47  ;;  %7352 = vmatprep.subr.bf16.mxu1 %v10012_v54  ;;  %v12564_v47 = vld [vmem:[#allocation14_spill] sm:$0xff]  ;;  %v1788_v7 = vpop.permute.xlu0 %1787  ;;  %v1841_v3 = vadd.f32 %v7607_v43, %v1750_v48  ;;  %v7613_v48 = vld [vmem:[#allocation2 + $0xd0] sm:$0xff] }
 0x2cc   : > { %7273 = vmatmul.mubr.msk.bf16.gmra.mrb[92].mxu1 %vm12561_vm5, %v12166_v4  ;;  %7400 = vmatprep.subr.bf16.mxu0 %v10012_v54  ;;  %vm12565_vm6 = vnez %v12564_v47  ;;  %2069 = vst.msk [vmem:[#allocation2 + $0x38] sm:$0xff] %vm12557_vm9, %v7636_v22  ;;  %v1860_v25 = vadd.f32 %v7606_v61, %v1788_v7  ;;  %vm12573_vm5 = vnez %v12572_v26  ;;  %v12582_v47 = vld [vmem:[#allocation29_spill] sm:$0xff]  ;;  %v12585_v7 = vld [vmem:[#allocation31_spill] sm:$0xff]  ;;  %v12590_v43 = vld [vmem:[#allocation34_spill] sm:$0xff] }
 0x2cd   : > { %7321 = vmatmul.mubr.msk.bf16.gmra.mrb[92].mxu0 %vm12563_vm12, %v12166_v4  ;;  %7276 = vmatprep.mubr.msk.bf16.mxu1 %vm12565_vm6, %v12166_v4  ;;  %v7639_v20 = vadd.low.f32.bf16 %v1841_v3, %v12571_v58  ;;  %vm12574_vm12 = vnez %v12385_v55  ;;  %vm12575_vm6 = vnez %v12390_v6  ;;  %v12579_v55 = vld [vmem:[#allocation41_spill] sm:$0xff]  ;;  %v7615_v26 = vld [vmem:[#allocation2 + $0x40] sm:$0xff] }
 0x2ce   : > { %7324 = vmatprep.mubr.msk.bf16.mxu0 %vm12568_vm4, %v12166_v4  ;;  %7353 = vmatpush3.bf16.msra.mxu1 %v10012_v54  ;;  %v7638_v57 = vadd.high.f32.bf16 %v1860_v25, %v10038_v38  ;;  %v1782_v38 = vpop.permute.xlu1 %1781  ;;  %vm12578_vm4 = vnez %v12577_v62  ;;  %v12587_v61 = vld [vmem:[#allocation33_spill] sm:$0xff]  ;;  %v7616_v62 = vld [vmem:[#allocation2 + $0x48] sm:$0xff] }
 0x2cf   : > { %7401 = vmatpush3.bf16.msra.mxu0 %v10012_v54  ;;  %7354 = vmatprep.subr.bf16.mxu1 %v10052_v9  ;;  %v1752_v54 = vpop.permute.xlu0 %1751  ;;  %2066 = vst.msk [vmem:[#allocation2 + $0x20] sm:$0xff] %vm12576_vm15, %v7639_v20  ;;  %v1857_v8 = vadd.f32 %v7609_v18, %v1782_v38  ;;  %vm12589_vm15 = vmmov %vm12557_vm9  ;;  %v12594_v18 = vld [vmem:[#allocation21_spill] sm:$0xff] }
 0x2d0   : > { %7402 = vmatprep.subr.bf16.mxu0 %v10052_v9  ;;  %2085 = vst.msk [vmem:[#allocation2 + $0xb8] sm:$0xff] %vm12570_vm13, %v7638_v57  ;;  %v1842_v16 = vadd.f32 %v7608_v2, %v1752_v54  ;;  %vm12581_vm13 = vmmov %vm12557_vm9 }
 0x2d1   : > { %v7641_v50 = vadd.low.f32.bf16 %v1857_v8, %v12579_v55 }
 0x2d2   : > { %7355 = vmatpush3.bf16.msra.mxu1 %v10052_v9  ;;  %v1762_v31 = vpop.permute.xlu1 %1761 }
 0x2d3   : > { %7403 = vmatpush3.bf16.msra.mxu0 %v10052_v9  ;;  %v7640_v9 = vadd.high.f32.bf16 %v1842_v16, %v12571_v58  ;;  %v1784_v45 = vpop.permute.xlu0 %1783  ;;  %2082 = vst.msk [vmem:[#allocation2 + $0xa0] sm:$0xff] %vm12580_vm14, %v7641_v50  ;;  %v1847_v33 = vadd.f32 %v7611_v27, %v1762_v31  ;;  %v7614_v58 = vld [vmem:[#allocation2 + $0xd8] sm:$0xff]  ;;  %vm12592_vm14 = vmmov %vm12557_vm9  ;;  %v7617_v31 = vld [vmem:[#allocation2 + $0xc0] sm:$0xff] }
 0x2d4   : > { %7277 = vmatmul.mubr.msk.bf16.gmra.mrb[96].mxu1 %vm12573_vm5, %v12166_v4  ;;  %v1858_v13 = vadd.f32 %v7610_v59, %v1784_v45  ;;  %vm12584_vm5 = vnez %v12583_v19  ;;  %v12597_v50 = vld [vmem:[#allocation37_spill] sm:$0xff]  ;;  %v12602_v27 = vld [vmem:[#allocation38_spill] sm:$0xff]  ;;  %v7619_v19 = vld [vmem:[#allocation2 + $0x70] sm:$0xff] }
 0x2d5   : > { %7325 = vmatmul.mubr.msk.bf16.gmra.mrb[96].mxu0 %vm12574_vm12, %v12166_v4  ;;  %7280 = vmatprep.mubr.msk.bf16.mxu1 %vm12575_vm6, %v12166_v4  ;;  %2067 = vst.msk [vmem:[#allocation2 + $0x28] sm:$0xff] %vm12557_vm9, %v7640_v9  ;;  %v7643_v22 = vadd.low.f32.bf16 %v1847_v33, %v12582_v47  ;;  %vm12586_vm12 = vnez %v12585_v7  ;;  %vm12588_vm6 = vnez %v12587_v61  ;;  %v12606_v61 = vld [vmem:[#allocation35_spill] sm:$0xff] }
 0x2d6   : > { %7328 = vmatprep.mubr.msk.bf16.mxu0 %vm12578_vm4, %v12166_v4  ;;  %v7642_v6 = vadd.high.f32.bf16 %v1858_v13, %v12579_v55  ;;  %v1794_v41 = vpop.permute.xlu1 %1793  ;;  %vm12591_vm4 = vnez %v12590_v43  ;;  %v12595_v55 = vld [vmem:[#allocation36_spill] sm:$0xff]  ;;  %v12607_v43 = vld [vmem:[#allocation39_spill] sm:$0xff] }
 0x2d7   : > { %v1764_v53 = vpop.permute.xlu0 %1763  ;;  %2072 = vst.msk [vmem:[#allocation2 + $0x50] sm:$0xff] %vm12589_vm15, %v7643_v22  ;;  %v1863_v57 = vadd.f32 %v7613_v48, %v1794_v41  ;;  %vm12601_vm15 = vmmov %vm12557_vm9  ;;  %v7620_v48 = vld [vmem:[#allocation2 + $0x78] sm:$0xff] }
 0x2d8   : > { %2083 = vst.msk [vmem:[#allocation2 + $0xa8] sm:$0xff] %vm12581_vm13, %v7642_v6  ;;  %v1848_v36 = vadd.f32 %v7612_v60, %v1764_v53  ;;  %vm12593_vm13 = vmmov %vm12557_vm9 }
 0x2d9   : > { %v7645_v54 = vadd.low.f32.bf16 %v1863_v57, %v10089_v29 }
 0x2da   : > { %v7644_v25 = vadd.high.f32.bf16 %v1848_v36, %v12582_v47  ;;  %v1758_v2 = vpop.permute.xlu1 %1757  ;;  %v7618_v47 = vld [vmem:[#allocation2 + $0xc8] sm:$0xff] }
 0x2db   : > { %v1796_v3 = vpop.permute.xlu0 %1795  ;;  %2088 = vst.msk [vmem:[#allocation2 + $0xd0] sm:$0xff] %vm12592_vm14, %v7645_v54  ;;  %v1845_v38 = vadd.f32 %v7615_v26, %v1758_v2  ;;  %vm12604_vm14 = vmmov %vm12557_vm9 }
 0x2dc   : > { %7281 = vmatmul.mubr.msk.bf16.gmra.mrb[100].mxu1 %vm12584_vm5, %v12166_v4  ;;  %2073 = vst.msk [vmem:[#allocation2 + $0x58] sm:$0xff] %vm12557_vm9, %v7644_v25  ;;  %v1864_v20 = vadd.f32 %v7614_v58, %v1796_v3  ;;  %vm12596_vm5 = vnez %v12595_v55  ;;  %v12609_v3 = vld [vmem:[#allocation40_spill] sm:$0xff] }
 0x2dd   : > { %7329 = vmatmul.mubr.msk.bf16.gmra.mrb[100].mxu0 %vm12586_vm12, %v12166_v4  ;;  %7284 = vmatprep.mubr.msk.bf16.mxu1 %vm12588_vm6, %v12166_v4  ;;  %v7647_v8 = vadd.low.f32.bf16 %v1845_v38, %v12594_v18  ;;  %vm12598_vm12 = vnez %v12597_v50 }
 0x2de   : > { %7332 = vmatprep.mubr.msk.bf16.mxu0 %vm12591_vm4, %v12166_v4  ;;  %v7646_v16 = vadd.high.f32.bf16 %v1864_v20, %v10089_v29  ;;  %v1790_v59 = vpop.permute.xlu1 %1789  ;;  %v12599_v29 = vld [vmem:[#allocation16_spill] sm:$0xff]  ;;  %vm12603_vm4 = vnez %v12602_v27 }
 0x2df   : > { %v1760_v9 = vpop.permute.xlu0 %1759  ;;  %vm12600_vm6 = vnez %v12599_v29  ;;  %2070 = vst.msk [vmem:[#allocation2 + $0x40] sm:$0xff] %vm12601_vm15, %v7647_v8  ;;  %v1861_v6 = vadd.f32 %v7617_v31, %v1790_v59  ;;  %vm12613_vm15 = vmmov %vm12557_vm9  ;;  %v7621_v20 = vld [vmem:[#allocation2 + $0xf0] sm:$0xff] }
 0x2e0   : > { %2089 = vst.msk [vmem:[#allocation2 + $0xd8] sm:$0xff] %vm12593_vm13, %v7646_v16  ;;  %v1846_v45 = vadd.f32 %v7616_v62, %v1760_v9  ;;  %vm12605_vm13 = vmmov %vm12557_vm9  ;;  %v12614_v16 = vld [vmem:[#allocation43_spill] sm:$0xff]  ;;  %v7622_v9 = vld [vmem:[#allocation2 + $0xf8] sm:$0xff] }
 0x2e1   : > { %v7649_v53 = vadd.low.f32.bf16 %v1861_v6, %v10061_v17  ;;  %v12618_v59 = vld [vmem:[#allocation32_spill] sm:$0xff] }
 0x2e2   : > { %v7648_v13 = vadd.high.f32.bf16 %v1846_v45, %v12594_v18  ;;  %v1770_v60 = vpop.permute.xlu1 %1769  ;;  %v7623_v45 = vld [vmem:[#allocation2 + $0x60] sm:$0xff]  ;;  %v12619_v6 = vld [vmem:[#allocation44_spill] sm:$0xff] }
 0x2e3   : > { %v1792_v33 = vpop.permute.xlu0 %1791  ;;  %2086 = vst.msk [vmem:[#allocation2 + $0xc0] sm:$0xff] %vm12604_vm14, %v7649_v53  ;;  %v1851_v7 = vadd.f32 %v7619_v19, %v1770_v60  ;;  %vm12616_vm14 = vmmov %vm12557_vm9  ;;  %v2449_v19 = vld [vmem:[%s7846_s10 + $0x10] sm:$0xff] }
 0x2e4   : > { %7285 = vmatmul.mubr.msk.bf16.gmra.mrb[104].mxu1 %vm12596_vm5, %v12166_v4  ;;  %2071 = vst.msk [vmem:[#allocation2 + $0x48] sm:$0xff] %vm12557_vm9, %v7648_v13  ;;  %v1862_v22 = vadd.f32 %v7618_v47, %v1792_v33  ;;  %vm12608_vm5 = vnez %v12607_v43  ;;  %v7624_v13 = vld [vmem:[#allocation2 + $0x68] sm:$0xff]  ;;  %v7625_v33 = vld [vmem:[#allocation2 + $0xe0] sm:$0xff] }
 0x2e5   : > { %7333 = vmatmul.mubr.msk.bf16.gmra.mrb[104].mxu0 %vm12598_vm12, %v12166_v4  ;;  %7288 = vmatprep.mubr.msk.bf16.mxu1 %vm12600_vm6, %v12166_v4  ;;  %v7651_v25 = vadd.low.f32.bf16 %v1851_v7, %v12606_v61  ;;  %vm12610_vm12 = vnez %v12609_v3 }
 0x2e6   : > { %7336 = vmatprep.mubr.msk.bf16.mxu0 %vm12603_vm4, %v12166_v4  ;;  %v7650_v36 = vadd.high.f32.bf16 %v1862_v22, %v10061_v17  ;;  %v1802_v54 = vpop.permute.xlu1 %1801  ;;  %v12611_v17 = vld [vmem:[#allocation42_spill] sm:$0xff]  ;;  %vm12615_vm4 = vnez %v12614_v16  ;;  %v7626_v22 = vld [vmem:[#allocation2 + $0xe8] sm:$0xff] }
 0x2e7   : > { %v1772_v41 = vpop.permute.xlu0 %1771  ;;  %vm12612_vm6 = vnez %v12611_v17  ;;  %2076 = vst.msk [vmem:[#allocation2 + $0x70] sm:$0xff] %vm12613_vm15, %v7651_v25  ;;  %v1867_v2 = vadd.f32 %v7621_v20, %v1802_v54  ;;  %vm12623_vm15 = vmmov %vm12557_vm9 }
 0x2e8   : > { %2087 = vst.msk [vmem:[#allocation2 + $0xc8] sm:$0xff] %vm12605_vm13, %v7650_v36  ;;  %v1852_v57 = vadd.f32 %v7620_v48, %v1772_v41  ;;  %vm12617_vm13 = vmmov %vm12557_vm9  ;;  %v12631_v36 = vld [vmem:[#allocation18_spill] sm:$0xff]  ;;  %v2450_v41 = vld [vmem:[%s7846_s10 + $0x18] sm:$0xff] }
 0x2e9   : > { %v7653_v38 = vadd.low.f32.bf16 %v1867_v2, %v10123_v49  ;;  %v2448_v48 = vld [vmem:[%s7846_s10 + $0x8] sm:$0xff]  ;;  %v2453_v2 = vld [vmem:[%s7846_s10 + $0x30] sm:$0xff] }
 0x2ea   : > { %v7652_v58 = vadd.high.f32.bf16 %v1852_v57, %v12606_v61 }
 0x2eb   : > { %v1804_v26 = vpop.permute.xlu0 %1803  ;;  %v1766_v8 = vpop.permute.xlu1 %1765  ;;  %2092 = vst.msk [vmem:[#allocation2 + $0xf0] sm:$0xff] %vm12616_vm14, %v7653_v38  ;;  %vm12625_vm14 = vmmov %vm12557_vm9 }
 0x2ec   : > { %7289 = vmatmul.mubr.msk.bf16.gmra.mrb[108].mxu1 %vm12608_vm5, %v12166_v4  ;;  %2077 = vst.msk [vmem:[#allocation2 + $0x78] sm:$0xff] %vm12557_vm9, %v7652_v58  ;;  %v1868_v18 = vadd.f32 %v7622_v9, %v1804_v26  ;;  %v1849_v55 = vadd.f32 %v7623_v45, %v1766_v8  ;;  %vm12620_vm5 = vnez %v12619_v6  ;;  %v2454_v26 = vld [vmem:[%s7846_s10 + $0x38] sm:$0xff] }
 0x2ed   : > { %7337 = vmatmul.mubr.msk.bf16.gmra.mrb[108].mxu0 %vm12610_vm12, %v12166_v4  ;;  %7356 = vmatprep.mubr.msk.bf16.mxu1 %vm12612_vm6, %v12166_v4  ;;  %vm12621_vm12 = vnez %v12452_v51  ;;  %vm12622_vm6 = vnez %v12459_v24 }
 0x2ee   : > { %7404 = vmatprep.mubr.msk.bf16.mxu0 %vm12615_vm4, %v12166_v4  ;;  %v7654_v62 = vadd.high.f32.bf16 %v1868_v18, %v10123_v49  ;;  %v7655_v29 = vadd.low.f32.bf16 %v1849_v55, %v12618_v59  ;;  %vm12624_vm4 = vnez %v12463_v10  ;;  %v12628_v10 = vld [vmem:[#allocation17_spill] sm:$0xff]  ;;  %v2452_v18 = vld [vmem:[%s7846_s10 + $0x28] sm:$0xff] }
 0x2ef   : > { %v1768_v50 = vpop.permute.xlu0 %1767  ;;  %v1798_v27 = vpop.permute.xlu1 %1797 }
 0x2f0   : > { %2093 = vst.msk [vmem:[#allocation2 + $0xf8] sm:$0xff] %vm12617_vm13, %v7654_v62  ;;  %v1850_v31 = vadd.f32 %v7624_v13, %v1768_v50  ;;  %v1865_v53 = vadd.f32 %v7625_v33, %v1798_v27  ;;  %vm12626_vm13 = vmmov %vm12557_vm9 }
 0x2f1   : > { %2074 = vst.msk [vmem:[#allocation2 + $0x60] sm:$0xff] %vm12623_vm15, %v7655_v29  ;;  %vm12632_vm15 = vnez %v12631_v36  ;;  %v2457_v29 = vld [vmem:[%s7846_s10 + $0x50] sm:$0xff]  ;;  %v2462_v36 = vld [vmem:[%s7846_s10 + $0x78] sm:$0xff] }
 0x2f2   : > { %v7656_v49 = vadd.high.f32.bf16 %v1850_v31, %v12618_v59  ;;  %v7657_v51 = vadd.low.f32.bf16 %v1865_v53, %v10109_v39  ;;  %v2458_v31 = vld [vmem:[%s7846_s10 + $0x58] sm:$0xff] }
 0x2f3   : > { %v1800_v47 = vpop.permute.xlu0 %1799 }
 0x2f4   : > { %7357 = vmatmul.mubr.msk.bf16.vlgmr.msra.gmra.mrb[112].mxu1 %vm12620_vm5, %v12166_v4  ;;  %2075 = vst.msk [vmem:[#allocation2 + $0x68] sm:$0xff] %vm12557_vm9, %v7656_v49  ;;  %v1866_v24 = vadd.f32 %v7626_v22, %v1800_v47  ;;  %vm12627_vm5 = vnez %v12466_v42  ;;  %vm12635_vm9 = vnez %v12481_v40  ;;  %v12636_v42 = vld [vmem:[#allocation22_spill] sm:$0xff]  ;;  %v2456_v49 = vld [vmem:[%s7846_s10 + $0x48] sm:$0xff] }
 0x2f5   : > { %7405 = vmatmul.mubr.msk.bf16.vlgmr.msra.gmra.mrb[112].mxu0 %vm12621_vm12, %v12166_v4  ;;  %7360 = vmatprep.mubr.msk.bf16.mxu1 %vm12622_vm6, %v12166_v4  ;;  %2090 = vst.msk [vmem:[#allocation2 + $0xe0] sm:$0xff] %vm12625_vm14, %v7657_v51  ;;  %vm12629_vm12 = vnez %v12628_v10  ;;  %vm12630_vm6 = vnez %v12471_v32  ;;  %vm12637_vm14 = vnez %v12636_v42  ;;  %v2447_v32 = vld [vmem:[%s7846_s10] sm:$0xff] }
 0x2f6   : > { %7408 = vmatprep.mubr.msk.bf16.mxu0 %vm12624_vm4, %v12166_v4  ;;  %v7658_v60 = vadd.high.f32.bf16 %v1866_v24, %v10109_v39  ;;  %v12633_v39 = vld [vmem:[#allocation19_spill] sm:$0xff] }
 0x2f7   : > { %vm12634_vm4 = vnez %v12633_v39 }
 0x2f8   : > { %2091 = vst.msk [vmem:[#allocation2 + $0xe8] sm:$0xff] %vm12626_vm13, %v7658_v60  ;;  %vm12638_vm13 = vnez %v12490_v1  ;;  %v2461_v60 = vld [vmem:[%s7846_s10 + $0x70] sm:$0xff] }
 0x2fa   : > { %v7070_v7 = vpop.f32.mrb[16].mxu1 }
 0x2fb   : > { %v2481_v61 = vadd.f32 %v7070_v7, %v2449_v19  ;;  %v7118_v25 = vpop.f32.mrb[16].mxu0  ;;  %v2320_v40 = vpop.f32.mrb[17].mxu1  ;;  %v2460_v19 = vld [vmem:[%s7846_s10 + $0x68] sm:$0xff] }
 0x2fc   : > { %7361 = vmatmul.mubr.msk.bf16.gmra.mrb[116].mxu1 %vm12627_vm5, %v12166_v4  ;;  %vm2511_vm5 = vcmask 97280   ;;  %2885 = vrot.lane.b32.xlu1 %v7118_v25, %s7705_s15  ;;  %v2479_v57 = vadd.f32 %v2447_v32, %v2320_v40  ;;  %v2690_v43 = vpop.f32.mrb[17].mxu0  ;;  %v7071_v3 = vpop.f32.mrb[18].mxu1 }
 0x2fd   : > { %7409 = vmatmul.mubr.msk.bf16.gmra.mrb[116].mxu0 %vm12629_vm12, %v12166_v4  ;;  %7364 = vmatprep.mubr.msk.bf16.mxu1 %vm12630_vm6, %v12166_v4  ;;  %2514 = vst.msk [vmem:[%s7846_s10 + $0x10] sm:$0xff] %vm2511_vm5, %v2481_v61  ;;  %v2482_v1 = vadd.f32 %v7071_v3, %v2450_v41  ;;  %v7119_v54 = vpop.f32.mrb[18].mxu0  ;;  %v2323_v17 = vpop.f32.mrb[19].mxu1  ;;  %vm12639_vm12 = vnez %v12492_v11  ;;  %vm12640_vm6 = vnez %v12494_v63  ;;  %v2451_v11 = vld [vmem:[%s7846_s10 + $0x20] sm:$0xff] }
 0x2fe   : > { %7412 = vmatprep.mubr.msk.bf16.mxu0 %vm12632_vm15, %v12166_v4  ;;  %2512 = vst.msk [vmem:[%s7846_s10] sm:$0xff] %vm2511_vm5, %v2479_v57  ;;  %2887 = vrot.lane.b32.xlu0 %v7119_v54, %s7705_s15  ;;  %v2480_v58 = vadd.f32 %v2448_v48, %v2323_v17  ;;  %v2693_v20 = vpop.f32.mrb[19].mxu0  ;;  %vm12641_vm15 = vnez %v12496_v34  ;;  %v2465_v48 = vld [vmem:[%s7846_s10 + $0x90] sm:$0xff]  ;;  %v2464_v54 = vld [vmem:[%s7846_s10 + $0x88] sm:$0xff] }
 0x2ff   : > { %2515 = vst.msk [vmem:[%s7846_s10 + $0x18] sm:$0xff] %vm2511_vm5, %v2482_v1 }
 0x300   : > { %2513 = vst.msk [vmem:[%s7846_s10 + $0x8] sm:$0xff] %vm2511_vm5, %v2480_v58  ;;  %2881 = vrot.lane.b32.xlu1 %v2690_v43, %s7705_s15  ;;  %v2466_v43 = vld [vmem:[%s7846_s10 + $0x98] sm:$0xff] }
 0x302   : > { %2883 = vrot.lane.b32.xlu0 %v2693_v20, %s7705_s15  ;;  %v7074_v16 = vpop.f32.mrb[20].mxu1 }
 0x303   : > { %v2485_v38 = vadd.f32 %v7074_v16, %v2453_v2  ;;  %v7122_v63 = vpop.f32.mrb[20].mxu0  ;;  %v2336_v9 = vpop.f32.mrb[21].mxu1 }
 0x304   : > { %7365 = vmatmul.mubr.msk.bf16.gmra.mrb[120].mxu1 %vm12634_vm4, %v12166_v4  ;;  %2893 = vrot.lane.b32.xlu1 %v7122_v63, %s7705_s15  ;;  %v2483_v34 = vadd.f32 %v2451_v11, %v2336_v9  ;;  %v2706_v8 = vpop.f32.mrb[21].mxu0  ;;  %v7075_v62 = vpop.f32.mrb[22].mxu1  ;;  %vm12643_vm4 = vnez %v12508_v52  ;;  %v2470_v9 = vld [vmem:[%s7846_s10 + $0xb8] sm:$0xff] }
 0x305   : > { %7413 = vmatmul.mubr.msk.bf16.gmra.mrb[120].mxu0 %vm12635_vm9, %v12166_v4  ;;  %7368 = vmatprep.mubr.msk.bf16.mxu1 %vm12637_vm14, %v12166_v4  ;;  %2518 = vst.msk [vmem:[%s7846_s10 + $0x30] sm:$0xff] %vm2511_vm5, %v2485_v38  ;;  %v2486_v30 = vadd.f32 %v7075_v62, %v2454_v26  ;;  %v7123_v45 = vpop.f32.mrb[22].mxu0  ;;  %v2339_v55 = vpop.f32.mrb[23].mxu1  ;;  %vm12646_vm9 = vnez %v12518_v23  ;;  %vm12648_vm14 = vnez %v12522_v21  ;;  %v2469_v26 = vld [vmem:[%s7846_s10 + $0xb0] sm:$0xff]  ;;  %v2467_v38 = vld [vmem:[%s7846_s10 + $0xa0] sm:$0xff] }
 0x306   : > { %7416 = vmatprep.mubr.msk.bf16.mxu0 %vm12638_vm13, %v12166_v4  ;;  %2516 = vst.msk [vmem:[%s7846_s10 + $0x20] sm:$0xff] %vm2511_vm5, %v2483_v34  ;;  %2895 = vrot.lane.b32.xlu0 %v7123_v45, %s7705_s15  ;;  %v2484_v50 = vadd.f32 %v2452_v18, %v2339_v55  ;;  %v2709_v59 = vpop.f32.mrb[23].mxu0  ;;  %vm5001_vm13 = vcmask 589280  }
 0x307   : > { %2519 = vst.msk [vmem:[%s7846_s10 + $0x38] sm:$0xff] %vm2511_vm5, %v2486_v30 }
 0x308   : > { %2517 = vst.msk [vmem:[%s7846_s10 + $0x28] sm:$0xff] %vm2511_vm5, %v2484_v50  ;;  %2889 = vrot.lane.b32.xlu1 %v2706_v8, %s7705_s15  ;;  %v2468_v8 = vld [vmem:[%s7846_s10 + $0xa8] sm:$0xff] }
 0x30a   : > { %2891 = vrot.lane.b32.xlu0 %v2709_v59, %s7705_s15 }
 0x30b   : > { %v7078_v13 = vpop.f32.mrb[24].mxu1 }
 0x30c   : > { %7369 = vmatmul.mubr.msk.bf16.gmra.mrb[124].mxu1 %vm12639_vm12, %v12166_v4  ;;  %v2489_v6 = vadd.f32 %v7078_v13, %v2457_v29  ;;  %v2352_v27 = vpop.f32.mrb[25].mxu1  ;;  %v2473_v29 = vld [vmem:[%s7846_s10 + $0xd0] sm:$0xff]  ;;  %vm5997_vm12 = vcmask 786080  }
 0x30d   : > { %7417 = vmatmul.mubr.msk.bf16.gmra.mrb[124].mxu0 %vm12640_vm6, %v12166_v4  ;;  %7372 = vmatprep.mubr.msk.bf16.mxu1 %vm12641_vm15, %v12166_v4  ;;  %v2487_v52 = vadd.f32 %v2455_v35, %v2352_v27  ;;  %v7079_v53 = vpop.f32.mrb[26].mxu1  ;;  %v2471_v35 = vld [vmem:[%s7846_s10 + $0xc0] sm:$0xff] }
 0x30e   : > { %7420 = vmatprep.mubr.msk.bf16.mxu0 %vm10182_vm2, %v12166_v4  ;;  %vm12642_vm2 = vnez %v12505_v37  ;;  %v7126_v37 = vpop.f32.mrb[24].mxu0  ;;  %2522 = vst.msk [vmem:[%s7846_s10 + $0x50] sm:$0xff] %vm2511_vm5, %v2489_v6  ;;  %v2490_v46 = vadd.f32 %v7079_v53, %v2458_v31  ;;  %v2355_v51 = vpop.f32.mrb[27].mxu1  ;;  %v2474_v31 = vld [vmem:[%s7846_s10 + $0xd8] sm:$0xff] }
 0x30f   : > { %2901 = vrot.lane.b32.xlu1 %v7126_v37, %s7705_s15  ;;  %v2722_v33 = vpop.f32.mrb[25].mxu0  ;;  %2520 = vst.msk [vmem:[%s7846_s10 + $0x40] sm:$0xff] %vm2511_vm5, %v2487_v52  ;;  %v2488_v22 = vadd.f32 %v2456_v49, %v2355_v51  ;;  %v2472_v49 = vld [vmem:[%s7846_s10 + $0xc8] sm:$0xff] }
 0x310   : > { %v7127_v47 = vpop.f32.mrb[26].mxu0  ;;  %2523 = vst.msk [vmem:[%s7846_s10 + $0x58] sm:$0xff] %vm2511_vm5, %v2490_v46 }
 0x311   : > { %2903 = vrot.lane.b32.xlu0 %v7127_v47, %s7705_s15  ;;  %v2725_v24 = vpop.f32.mrb[27].mxu0  ;;  %2521 = vst.msk [vmem:[%s7846_s10 + $0x48] sm:$0xff] %vm2511_vm5, %v2488_v22 }
 0x313   : > { %2897 = vrot.lane.b32.xlu1 %v2722_v33, %s7705_s15  ;;  %v7082_v10 = vpop.f32.mrb[28].mxu1 }
 0x314   : > { %7373 = vmatmul.mubr.msk.bf16.gmra.mrb[128].mxu1 %vm10188_vm0, %v12166_v4  ;;  %vm12644_vm0 = vnez %v12512_v56  ;;  %v2459_v56 = vld [vmem:[%s7846_s10 + $0x60] sm:$0xff]  ;;  %v2493_v39 = vadd.f32 %v7082_v10, %v2461_v60  ;;  %v2368_v42 = vpop.f32.mrb[29].mxu1  ;;  %v2477_v60 = vld [vmem:[%s7846_s10 + $0xf0] sm:$0xff] }
 0x315   : > { %7421 = vmatmul.mubr.msk.bf16.gmra.mrb[128].mxu0 %vm12642_vm2, %v12166_v4  ;;  %7376 = vmatprep.mubr.msk.bf16.mxu1 %vm12643_vm4, %v12166_v4  ;;  %v2491_v44 = vadd.f32 %v2459_v56, %v2368_v42  ;;  %v7083_v7 = vpop.f32.mrb[30].mxu1  ;;  %v2475_v56 = vld [vmem:[%s7846_s10 + $0xe0] sm:$0xff] }
 0x316   : > { %7424 = vmatprep.mubr.msk.bf16.mxu0 %vm10219_vm7, %v12166_v4  ;;  %vm12645_vm7 = vnez %v12514_v12  ;;  %2899 = vrot.lane.b32.xlu0 %v2725_v24, %s7705_s15  ;;  %v7130_v12 = vpop.f32.mrb[28].mxu0  ;;  %2526 = vst.msk [vmem:[%s7846_s10 + $0x70] sm:$0xff] %vm2511_vm5, %v2493_v39  ;;  %v2494_v23 = vadd.f32 %v7083_v7, %v2462_v36  ;;  %v2371_v61 = vpop.f32.mrb[31].mxu1  ;;  %v2478_v36 = vld [vmem:[%s7846_s10 + $0xf8] sm:$0xff] }
 0x317   : > { %2909 = vrot.lane.b32.xlu1 %v7130_v12, %s7705_s15  ;;  %v2738_v32 = vpop.f32.mrb[29].mxu0  ;;  %2524 = vst.msk [vmem:[%s7846_s10 + $0x60] sm:$0xff] %vm2511_vm5, %v2491_v44  ;;  %v2492_v25 = vadd.f32 %v2460_v19, %v2371_v61  ;;  %v2476_v19 = vld [vmem:[%s7846_s10 + $0xe8] sm:$0xff] }
 0x318   : > { %v7131_v41 = vpop.f32.mrb[30].mxu0  ;;  %2527 = vst.msk [vmem:[%s7846_s10 + $0x78] sm:$0xff] %vm2511_vm5, %v2494_v23 }
 0x319   : > { %v2741_v40 = vpop.f32.mrb[31].mxu0  ;;  %2525 = vst.msk [vmem:[%s7846_s10 + $0x68] sm:$0xff] %vm2511_vm5, %v2492_v25 }
 0x31a   : > { %2911 = vrot.lane.b32.xlu0 %v7131_v41, %s7705_s15 }
 0x31b   : > { %2905 = vrot.lane.b32.xlu1 %v2738_v32, %s7705_s15 }
 0x31c   : > { %7377 = vmatmul.mubr.msk.bf16.gmra.mrb[132].mxu1 %vm12644_vm0, %v12166_v4  ;;  %v7086_v57 = vpop.f32.mrb[32].mxu1 }
 0x31d   : > { %7425 = vmatmul.mubr.msk.bf16.gmra.mrb[132].mxu0 %vm12645_vm7, %v12166_v4  ;;  %7380 = vmatprep.mubr.msk.bf16.mxu1 %vm10237_vm11, %v12166_v4  ;;  %vm12647_vm11 = vnez %v12520_v0  ;;  %v2463_v0 = vld [vmem:[%s7846_s10 + $0x80] sm:$0xff]  ;;  %v2497_v3 = vadd.f32 %v7086_v57, %v2465_v48  ;;  %v7134_v21 = vpop.f32.mrb[32].mxu0  ;;  %v2384_v1 = vpop.f32.mrb[33].mxu1 }
 0x31e   : > { %7428 = vmatprep.mubr.msk.bf16.mxu0 %vm12646_vm9, %v12166_v4  ;;  %2907 = vrot.lane.b32.xlu0 %v2741_v40, %s7705_s15  ;;  %v2495_v28 = vadd.f32 %v2463_v0, %v2384_v1  ;;  %v2754_v17 = vpop.f32.mrb[33].mxu0  ;;  %v7087_v5 = vpop.f32.mrb[34].mxu1 }
 0x31f   : > { %2917 = vrot.lane.b32.xlu1 %v7134_v21, %s7705_s15  ;;  %2530 = vst.msk [vmem:[%s7846_s10 + $0x90] sm:$0xff] %vm2511_vm5, %v2497_v3  ;;  %v2498_v58 = vadd.f32 %v7087_v5, %v2466_v43  ;;  %v7135_v20 = vpop.f32.mrb[34].mxu0  ;;  %v2387_v2 = vpop.f32.mrb[35].mxu1 }
 0x320   : > { %2528 = vst.msk [vmem:[%s7846_s10 + $0x80] sm:$0xff] %vm2511_vm5, %v2495_v28  ;;  %v2496_v11 = vadd.f32 %v2464_v54, %v2387_v2  ;;  %v2757_v16 = vpop.f32.mrb[35].mxu0 }
 0x321   : > { %2531 = vst.msk [vmem:[%s7846_s10 + $0x98] sm:$0xff] %vm2511_vm5, %v2498_v58 }
 0x322   : > { %2919 = vrot.lane.b32.xlu0 %v7135_v20, %s7705_s15  ;;  %2529 = vst.msk [vmem:[%s7846_s10 + $0x88] sm:$0xff] %vm2511_vm5, %v2496_v11 }
 0x323   : > { %2913 = vrot.lane.b32.xlu1 %v2754_v17, %s7705_s15 }
 0x324   : > { %7381 = vmatmul.mubr.msk.bf16.gmra.mrb[136].mxu1 %vm12647_vm11, %v12166_v4 }
 0x325   : > { %7429 = vmatmul.mubr.msk.bf16.gmra.mrb[136].mxu0 %vm12648_vm14, %v12166_v4  ;;  %7384 = vmatprep.mubr.msk.bf16.mxu1 %vm10270_vm8, %v12166_v4  ;;  %v7090_v63 = vpop.f32.mrb[36].mxu1  ;;  %vm4005_vm8 = vcmask 392480  }
 0x326   : > { %7432 = vmatprep.mubr.msk.bf16.mxu0 %vm10279_vm3, %v12166_v4  ;;  %2915 = vrot.lane.b32.xlu0 %v2757_v16, %s7705_s15  ;;  %v2501_v18 = vadd.f32 %v7090_v63, %v2469_v26  ;;  %v7138_v14 = vpop.f32.mrb[36].mxu0  ;;  %v2400_v34 = vpop.f32.mrb[37].mxu1  ;;  %vm3507_vm3 = vcmask 294080  }
 0x327   : > { %2925 = vrot.lane.b32.xlu1 %v7138_v14, %s7705_s15  ;;  %v2499_v62 = vadd.f32 %v2467_v38, %v2400_v34  ;;  %v2770_v15 = vpop.f32.mrb[37].mxu0 }
 0x328   : > { %2534 = vst.msk [vmem:[%s7846_s10 + $0xb0] sm:$0xff] %vm2511_vm5, %v2501_v18  ;;  %v7139_v45 = vpop.f32.mrb[38].mxu0 }
 0x329   : > { %2532 = vst.msk [vmem:[%s7846_s10 + $0xa0] sm:$0xff] %vm2511_vm5, %v2499_v62  ;;  %v2773_v59 = vpop.f32.mrb[39].mxu0 }
 0x32a   : > { %2927 = vrot.lane.b32.xlu0 %v7139_v45, %s7705_s15 }
 0x32b   : > { %2921 = vrot.lane.b32.xlu1 %v2770_v15, %s7705_s15 }
 0x32c   : > { %7385 = vmatmul.mubr.msk.bf16.gmra.mrb[140].mxu1 %vm10284_vm10, %v12166_v4  ;;  %vm3009_vm10 = vcmask 195680  }
 0x32d   : > { %7433 = vmatmul.mubr.msk.bf16.gmra.mrb[140].mxu0 %vm10289_vm1, %v12166_v4  ;;  %v7091_v4 = vpop.f32.mrb[38].mxu1  ;;  %vm4503_vm1 = vcmask 490880  }
 0x32e   : > { %v2502_v30 = vadd.f32 %v7091_v4, %v2470_v9  ;;  %v2403_v55 = vpop.f32.mrb[39].mxu1  ;;  %2923 = vrot.lane.b32.xlu0 %v2773_v59, %s7705_s15 }
 0x32f   : > { %v2500_v50 = vadd.f32 %v2468_v8, %v2403_v55  ;;  %v7094_v13 = vpop.f32.mrb[40].mxu1  ;;  %v7142_v37 = vpop.f32.mrb[40].mxu0 }
 0x330   : > { %2535 = vst.msk [vmem:[%s7846_s10 + $0xb8] sm:$0xff] %vm2511_vm5, %v2502_v30  ;;  %v2505_v6 = vadd.f32 %v7094_v13, %v2473_v29  ;;  %v2416_v27 = vpop.f32.mrb[41].mxu1  ;;  %2933 = vrot.lane.b32.xlu1 %v7142_v37, %s7705_s15  ;;  %v2786_v33 = vpop.f32.mrb[41].mxu0 }
 0x331   : > { %2533 = vst.msk [vmem:[%s7846_s10 + $0xa8] sm:$0xff] %vm2511_vm5, %v2500_v50  ;;  %v2503_v52 = vadd.f32 %v2471_v35, %v2416_v27  ;;  %v7095_v53 = vpop.f32.mrb[42].mxu1  ;;  %v7143_v47 = vpop.f32.mrb[42].mxu0 }
 0x332   : > { %2538 = vst.msk [vmem:[%s7846_s10 + $0xd0] sm:$0xff] %vm2511_vm5, %v2505_v6  ;;  %v2506_v46 = vadd.f32 %v7095_v53, %v2474_v31  ;;  %v2419_v51 = vpop.f32.mrb[43].mxu1  ;;  %2935 = vrot.lane.b32.xlu0 %v7143_v47, %s7705_s15  ;;  %v2789_v24 = vpop.f32.mrb[43].mxu0 }
 0x333   : > { %2536 = vst.msk [vmem:[%s7846_s10 + $0xc0] sm:$0xff] %vm2511_vm5, %v2503_v52  ;;  %v2504_v22 = vadd.f32 %v2472_v49, %v2419_v51 }
 0x334   : > { %2539 = vst.msk [vmem:[%s7846_s10 + $0xd8] sm:$0xff] %vm2511_vm5, %v2506_v46  ;;  %2929 = vrot.lane.b32.xlu1 %v2786_v33, %s7705_s15 }
 0x335   : > { %2537 = vst.msk [vmem:[%s7846_s10 + $0xc8] sm:$0xff] %vm2511_vm5, %v2504_v22 }
 0x336   : > { %2931 = vrot.lane.b32.xlu0 %v2789_v24, %s7705_s15 }
 0x337   : > { %v7098_v10 = vpop.f32.mrb[44].mxu1 }
 0x338   : > { %v2509_v39 = vadd.f32 %v7098_v10, %v2477_v60  ;;  %v7146_v12 = vpop.f32.mrb[44].mxu0  ;;  %v2432_v42 = vpop.f32.mrb[45].mxu1 }
 0x339   : > { %2941 = vrot.lane.b32.xlu1 %v7146_v12, %s7705_s15  ;;  %v2507_v44 = vadd.f32 %v2475_v56, %v2432_v42  ;;  %v2802_v32 = vpop.f32.mrb[45].mxu0  ;;  %v7099_v7 = vpop.f32.mrb[46].mxu1 }
 0x33a   : > { %2542 = vst.msk [vmem:[%s7846_s10 + $0xf0] sm:$0xff] %vm2511_vm5, %v2509_v39  ;;  %v2510_v23 = vadd.f32 %v7099_v7, %v2478_v36  ;;  %v7147_v41 = vpop.f32.mrb[46].mxu0  ;;  %v2435_v61 = vpop.f32.mrb[47].mxu1 }
 0x33b   : > { %2540 = vst.msk [vmem:[%s7846_s10 + $0xe0] sm:$0xff] %vm2511_vm5, %v2507_v44  ;;  %2943 = vrot.lane.b32.xlu0 %v7147_v41, %s7705_s15  ;;  %v2508_v25 = vadd.f32 %v2476_v19, %v2435_v61  ;;  %v2805_v40 = vpop.f32.mrb[47].mxu0  ;;  %v2819_v44 = vld [vmem:[%s7846_s10 + $0x10] sm:$0xff] }
 0x33c   : > { %2543 = vst.msk [vmem:[%s7846_s10 + $0xf8] sm:$0xff] %vm2511_vm5, %v2510_v23  ;;  %v2820_v23 = vld [vmem:[%s7846_s10 + $0x18] sm:$0xff] }
 0x33d   : > { %2541 = vst.msk [vmem:[%s7846_s10 + $0xe8] sm:$0xff] %vm2511_vm5, %v2508_v25  ;;  %2937 = vrot.lane.b32.xlu1 %v2802_v32, %s7705_s15  ;;  %vm5499_vm5 = vcmask 687680  }
 0x33f   : > { %2939 = vrot.lane.b32.xlu0 %v2805_v40, %s7705_s15  ;;  %v7166_v48 = vpop.f32.mrb[48].mxu1  ;;  %v2817_v40 = vld [vmem:[%s7846_s10] sm:$0xff] }
 0x340   : > { %v7214_v0 = vpop.f32.mrb[48].mxu0  ;;  %v3188_v57 = vpop.f32.mrb[49].mxu1 }
 0x341   : > { %v3686_v43 = vpop.f32.mrb[49].mxu0  ;;  %3383 = vrot.lane.b32.xlu1 %v7166_v48, %s7706_s16  ;;  %v7167_v3 = vpop.f32.mrb[50].mxu1 }
 0x342   : > { %v7215_v21 = vpop.f32.mrb[50].mxu0  ;;  %v3191_v1 = vpop.f32.mrb[51].mxu1 }
 0x343   : > { %v3689_v54 = vpop.f32.mrb[51].mxu0  ;;  %3385 = vrot.lane.b32.xlu0 %v7167_v3, %s7706_s16 }
 0x345   : > { %3881 = vrot.lane.b32.xlu1 %v7214_v0, %s7707_s17 }
 0x347   : > { %3883 = vrot.lane.b32.xlu0 %v7215_v21, %s7707_s17  ;;  %v2818_v21 = vld [vmem:[%s7846_s10 + $0x8] sm:$0xff] }
 0x349   : > { %v7170_v28 = vpop.f32.mrb[52].mxu1  ;;  %v7218_v17 = vpop.f32.mrb[52].mxu0  ;;  %3379 = vrot.lane.b32.xlu1 %v3188_v57, %s7706_s16 }
 0x34a   : > { %v3204_v5 = vpop.f32.mrb[53].mxu1  ;;  %v3702_v58 = vpop.f32.mrb[53].mxu0 }
 0x34b   : > { %v7171_v20 = vpop.f32.mrb[54].mxu1  ;;  %v7219_v2 = vpop.f32.mrb[54].mxu0  ;;  %3381 = vrot.lane.b32.xlu0 %v3191_v1, %s7706_s16 }
 0x34c   : > { %v3207_v11 = vpop.f32.mrb[55].mxu1  ;;  %v3705_v16 = vpop.f32.mrb[55].mxu0 }
 0x34d   : > { %3877 = vrot.lane.b32.xlu1 %v3686_v43, %s7707_s17 }
 0x34f   : > { %3879 = vrot.lane.b32.xlu0 %v3689_v54, %s7707_s17 }
 0x351   : > { %3391 = vrot.lane.b32.xlu1 %v7170_v28, %s7706_s16 }
 0x353   : > { %v7174_v26 = vpop.f32.mrb[56].mxu1  ;;  %3393 = vrot.lane.b32.xlu0 %v7171_v20, %s7706_s16 }
 0x354   : > { %v7222_v38 = vpop.f32.mrb[56].mxu0  ;;  %v3220_v63 = vpop.f32.mrb[57].mxu1 }
 0x355   : > { %v3718_v9 = vpop.f32.mrb[57].mxu0  ;;  %v7175_v18 = vpop.f32.mrb[58].mxu1  ;;  %3889 = vrot.lane.b32.xlu1 %v7218_v17, %s7707_s17 }
 0x356   : > { %v7223_v14 = vpop.f32.mrb[58].mxu0  ;;  %v3223_v34 = vpop.f32.mrb[59].mxu1 }
 0x357   : > { %v3721_v8 = vpop.f32.mrb[59].mxu0  ;;  %3891 = vrot.lane.b32.xlu0 %v7219_v2, %s7707_s17 }
 0x359   : > { %3387 = vrot.lane.b32.xlu1 %v3204_v5, %s7706_s16 }
 0x35b   : > { %v7178_v62 = vpop.f32.mrb[60].mxu1  ;;  %3389 = vrot.lane.b32.xlu0 %v3207_v11, %s7706_s16 }
 0x35c   : > { %v7226_v15 = vpop.f32.mrb[60].mxu0  ;;  %v3236_v4 = vpop.f32.mrb[61].mxu1 }
 0x35d   : > { %v10709_v30 = vpop.f32.mrb[61].mxu0  ;;  %v7179_v45 = vpop.f32.mrb[62].mxu1  ;;  %3885 = vrot.lane.b32.xlu1 %v3702_v58, %s7707_s17  ;;  %v2823_v58 = vld [vmem:[%s7846_s10 + $0x30] sm:$0xff] }
 0x35e   : > { %v7227_v55 = vpop.f32.mrb[62].mxu0  ;;  %v10712_v50 = vpop.f32.mrb[63].mxu1 }
 0x35f   : > { %v10714_v59 = vpop.f32.mrb[63].mxu0  ;;  %3887 = vrot.lane.b32.xlu0 %v3705_v16, %s7707_s17  ;;  %v2824_v16 = vld [vmem:[%s7846_s10 + $0x38] sm:$0xff] }
 0x361   : > { %3399 = vrot.lane.b32.xlu1 %v7174_v26, %s7706_s16 }
 0x363   : > { %3401 = vrot.lane.b32.xlu0 %v7175_v18, %s7706_s16 }
 0x364   : > { %v10719_v29 = vpop.f32.mrb[64].mxu1  ;;  %v10721_v35 = vpop.f32.mrb[64].mxu0 }
 0x365   : > { %v10723_v13 = vpop.f32.mrb[65].mxu1  ;;  %v10725_v31 = vpop.f32.mrb[65].mxu0  ;;  %3897 = vrot.lane.b32.xlu1 %v7222_v38, %s7707_s17 }
 0x366   : > { %v10728_v6 = vpop.f32.mrb[66].mxu1  ;;  %v10730_v37 = vpop.f32.mrb[66].mxu0 }
 0x367   : > { %v10732_v27 = vpop.f32.mrb[67].mxu1  ;;  %v10734_v49 = vpop.f32.mrb[67].mxu0  ;;  %3899 = vrot.lane.b32.xlu0 %v7223_v14, %s7707_s17 }
 0x369   : > { %3395 = vrot.lane.b32.xlu1 %v3220_v63, %s7706_s16 }
 0x36b   : > { %3397 = vrot.lane.b32.xlu0 %v3223_v34, %s7706_s16 }
 0x36d   : > { %v10739_v52 = vpop.f32.mrb[68].mxu1  ;;  %3893 = vrot.lane.b32.xlu1 %v3718_v9, %s7707_s17  ;;  %v2821_v9 = vld [vmem:[%s7846_s10 + $0x20] sm:$0xff] }
 0x36e   : > { %v10743_v53 = vpop.f32.mrb[69].mxu1  ;;  %v2886_v19 = vpop.permute.xlu1 %2885 }
 0x36f   : > { %v10741_v33 = vpop.f32.mrb[68].mxu0  ;;  %v10748_v47 = vpop.f32.mrb[70].mxu1  ;;  %3895 = vrot.lane.b32.xlu0 %v3721_v8, %s7707_s17  ;;  %v2979_v7 = vadd.f32 %v2886_v19, %v2819_v44 }
 0x370   : > { %v10745_v46 = vpop.f32.mrb[69].mxu0  ;;  %v10752_v22 = vpop.f32.mrb[71].mxu1 }
 0x371   : > { %v10750_v51 = vpop.f32.mrb[70].mxu0  ;;  %3407 = vrot.lane.b32.xlu1 %v7178_v62, %s7706_s16  ;;  %v2888_v41 = vpop.permute.xlu0 %2887  ;;  %3012 = vst.msk [vmem:[%s7846_s10 + $0x10] sm:$0xff] %vm3009_vm10, %v2979_v7  ;;  %v2828_v7 = vld [vmem:[%s7846_s10 + $0x58] sm:$0xff] }
 0x372   : > { %v10754_v24 = vpop.f32.mrb[71].mxu0  ;;  %v2980_v61 = vadd.f32 %v2888_v41, %v2820_v23  ;;  %v2882_v25 = vpop.permute.xlu1 %2881 }
 0x373   : > { %3409 = vrot.lane.b32.xlu0 %v7179_v45, %s7706_s16  ;;  %v2977_v0 = vadd.f32 %v2882_v25, %v2817_v40  ;;  %v2825_v25 = vld [vmem:[%s7846_s10 + $0x40] sm:$0xff] }
 0x374   : > { %3013 = vst.msk [vmem:[%s7846_s10 + $0x18] sm:$0xff] %vm3009_vm10, %v2980_v61 }
 0x375   : > { %3905 = vrot.lane.b32.xlu1 %v7226_v15, %s7707_s17  ;;  %v2884_v1 = vpop.permute.xlu0 %2883  ;;  %3010 = vst.msk [vmem:[%s7846_s10] sm:$0xff] %vm3009_vm10, %v2977_v0  ;;  %v2822_v15 = vld [vmem:[%s7846_s10 + $0x28] sm:$0xff] }
 0x376   : > { %v2978_v54 = vadd.f32 %v2884_v1, %v2818_v21  ;;  %v2894_v5 = vpop.permute.xlu1 %2893  ;;  %v2826_v1 = vld [vmem:[%s7846_s10 + $0x48] sm:$0xff] }
 0x377   : > { %v10759_v60 = vpop.f32.mrb[72].mxu1  ;;  %3907 = vrot.lane.b32.xlu0 %v7227_v55, %s7707_s17  ;;  %v2983_v2 = vadd.f32 %v2894_v5, %v2823_v58 }
 0x378   : > { %v10761_v56 = vpop.f32.mrb[72].mxu0  ;;  %v10763_v10 = vpop.f32.mrb[73].mxu1  ;;  %3011 = vst.msk [vmem:[%s7846_s10 + $0x8] sm:$0xff] %vm3009_vm10, %v2978_v54 }
 0x379   : > { %v10765_v36 = vpop.f32.mrb[73].mxu0  ;;  %v10768_v39 = vpop.f32.mrb[74].mxu1  ;;  %3403 = vrot.lane.b32.xlu1 %v3236_v4, %s7706_s16  ;;  %3016 = vst.msk [vmem:[%s7846_s10 + $0x30] sm:$0xff] %vm3009_vm10, %v2983_v2 }
 0x37a   : > { %v10770_v12 = vpop.f32.mrb[74].mxu0  ;;  %v10772_v42 = vpop.f32.mrb[75].mxu1 }
 0x37b   : > { %v10775_v32 = vpop.f32.mrb[75].mxu0  ;;  %3405 = vrot.lane.b32.xlu0 %v10712_v50, %s7706_s16  ;;  %v2896_v26 = vpop.permute.xlu0 %2895 }
 0x37c   : > { %v2984_v38 = vadd.f32 %v2896_v26, %v2824_v16  ;;  %v2890_v63 = vpop.permute.xlu1 %2889  ;;  %v2831_v16 = vld [vmem:[%s7846_s10 + $0x70] sm:$0xff] }
 0x37d   : > { %3901 = vrot.lane.b32.xlu1 %v10709_v30, %s7707_s17  ;;  %v2981_v14 = vadd.f32 %v2890_v63, %v2821_v9  ;;  %v2832_v63 = vld [vmem:[%s7846_s10 + $0x78] sm:$0xff] }
 0x37e   : > { %3017 = vst.msk [vmem:[%s7846_s10 + $0x38] sm:$0xff] %vm3009_vm10, %v2984_v38 }
 0x37f   : > { %v10784_v48 = vpop.f32.mrb[76].mxu1  ;;  %3903 = vrot.lane.b32.xlu0 %v10714_v59, %s7707_s17  ;;  %v2892_v4 = vpop.permute.xlu0 %2891  ;;  %3014 = vst.msk [vmem:[%s7846_s10 + $0x20] sm:$0xff] %vm3009_vm10, %v2981_v14  ;;  %v2827_v59 = vld [vmem:[%s7846_s10 + $0x50] sm:$0xff] }
 0x380   : > { %v10788_v57 = vpop.f32.mrb[76].mxu0  ;;  %v10790_v43 = vpop.f32.mrb[77].mxu1  ;;  %v2982_v30 = vadd.f32 %v2892_v4, %v2822_v15  ;;  %v2829_v4 = vld [vmem:[%s7846_s10 + $0x60] sm:$0xff] }
 0x381   : > { %v10792_v3 = vpop.f32.mrb[77].mxu0  ;;  %v10798_v28 = vpop.f32.mrb[78].mxu1  ;;  %3415 = vrot.lane.b32.xlu1 %v10719_v29, %s7706_s16 }
 0x382   : > { %v10800_v17 = vpop.f32.mrb[78].mxu0  ;;  %v10803_v20 = vpop.f32.mrb[79].mxu1  ;;  %3015 = vst.msk [vmem:[%s7846_s10 + $0x28] sm:$0xff] %vm3009_vm10, %v2982_v30 }
 0x383   : > { %v10809_v11 = vpop.f32.mrb[79].mxu0  ;;  %v2902_v50 = vpop.permute.xlu1 %2901  ;;  %3417 = vrot.lane.b32.xlu0 %v10728_v6, %s7706_s16 }
 0x384   : > { %v2987_v29 = vadd.f32 %v2902_v50, %v2827_v59  ;;  %v2904_v23 = vpop.permute.xlu0 %2903 }
 0x385   : > { %3913 = vrot.lane.b32.xlu1 %v10721_v35, %s7707_s17  ;;  %v2988_v41 = vadd.f32 %v2904_v23, %v2828_v7 }
 0x386   : > { %3020 = vst.msk [vmem:[%s7846_s10 + $0x50] sm:$0xff] %vm3009_vm10, %v2987_v29  ;;  %v2830_v29 = vld [vmem:[%s7846_s10 + $0x68] sm:$0xff] }
 0x387   : > { %v10819_v18 = vpop.f32.mrb[80].mxu1  ;;  %v2898_v61 = vpop.permute.xlu1 %2897  ;;  %3915 = vrot.lane.b32.xlu0 %v10730_v37, %s7707_s17  ;;  %3021 = vst.msk [vmem:[%s7846_s10 + $0x58] sm:$0xff] %vm3009_vm10, %v2988_v41 }
 0x388   : > { %v10823_v34 = vpop.f32.mrb[80].mxu0  ;;  %v10825_v8 = vpop.f32.mrb[81].mxu1  ;;  %v2985_v40 = vadd.f32 %v2898_v61, %v2825_v25  ;;  %v2835_v25 = vld [vmem:[%s7846_s10 + $0x90] sm:$0xff] }
 0x389   : > { %v10827_v62 = vpop.f32.mrb[81].mxu0  ;;  %v10834_v45 = vpop.f32.mrb[82].mxu1  ;;  %3411 = vrot.lane.b32.xlu1 %v10723_v13, %s7706_s16 }
 0x38a   : > { %v10836_v55 = vpop.f32.mrb[82].mxu0  ;;  %v10839_v19 = vpop.f32.mrb[83].mxu1  ;;  %3018 = vst.msk [vmem:[%s7846_s10 + $0x40] sm:$0xff] %vm3009_vm10, %v2985_v40 }
 0x38b   : > { %v10845_v44 = vpop.f32.mrb[83].mxu0  ;;  %v2900_v54 = vpop.permute.xlu0 %2899  ;;  %3413 = vrot.lane.b32.xlu0 %v10732_v27, %s7706_s16 }
 0x38c   : > { %v2986_v37 = vadd.f32 %v2900_v54, %v2826_v1  ;;  %v2910_v2 = vpop.permute.xlu1 %2909  ;;  %v2836_v54 = vld [vmem:[%s7846_s10 + $0x98] sm:$0xff] }
 0x38d   : > { %v2991_v13 = vadd.f32 %v2910_v2, %v2831_v16  ;;  %3909 = vrot.lane.b32.xlu1 %v10725_v31, %s7707_s17 }
 0x38e   : > { %3019 = vst.msk [vmem:[%s7846_s10 + $0x48] sm:$0xff] %vm3009_vm10, %v2986_v37 }
 0x38f   : > { %v10855_v6 = vpop.f32.mrb[84].mxu1  ;;  %v2912_v9 = vpop.permute.xlu0 %2911  ;;  %3024 = vst.msk [vmem:[%s7846_s10 + $0x70] sm:$0xff] %vm3009_vm10, %v2991_v13  ;;  %3911 = vrot.lane.b32.xlu0 %v10734_v49, %s7707_s17  ;;  %v2833_v13 = vld [vmem:[%s7846_s10 + $0x80] sm:$0xff] }
 0x390   : > { %v10859_v0 = vpop.f32.mrb[84].mxu0  ;;  %v10861_v35 = vpop.f32.mrb[85].mxu1  ;;  %v2992_v14 = vadd.f32 %v2912_v9, %v2832_v63 }
 0x391   : > { %v10863_v21 = vpop.f32.mrb[85].mxu0  ;;  %v10870_v5 = vpop.f32.mrb[86].mxu1  ;;  %3423 = vrot.lane.b32.xlu1 %v10739_v52, %s7706_s16 }
 0x392   : > { %v10872_v58 = vpop.f32.mrb[86].mxu0  ;;  %v10875_v26 = vpop.f32.mrb[87].mxu1  ;;  %3025 = vst.msk [vmem:[%s7846_s10 + $0x78] sm:$0xff] %vm3009_vm10, %v2992_v14 }
 0x393   : > { %v10881_v38 = vpop.f32.mrb[87].mxu0  ;;  %v2906_v15 = vpop.permute.xlu1 %2905  ;;  %3425 = vrot.lane.b32.xlu0 %v10748_v47, %s7706_s16 }
 0x394   : > { %v2989_v30 = vadd.f32 %v2906_v15, %v2829_v4  ;;  %v2908_v7 = vpop.permute.xlu0 %2907  ;;  %v2834_v15 = vld [vmem:[%s7846_s10 + $0x88] sm:$0xff] }
 0x395   : > { %v2990_v49 = vadd.f32 %v2908_v7, %v2830_v29  ;;  %3921 = vrot.lane.b32.xlu1 %v10741_v33, %s7707_s17 }
 0x396   : > { %3022 = vst.msk [vmem:[%s7846_s10 + $0x60] sm:$0xff] %vm3009_vm10, %v2989_v30 }
 0x397   : > { %v10891_v27 = vpop.f32.mrb[88].mxu1  ;;  %v2918_v61 = vpop.permute.xlu1 %2917  ;;  %3023 = vst.msk [vmem:[%s7846_s10 + $0x68] sm:$0xff] %vm3009_vm10, %v2990_v49  ;;  %3923 = vrot.lane.b32.xlu0 %v10750_v51, %s7707_s17  ;;  %v2839_v49 = vld [vmem:[%s7846_s10 + $0xb0] sm:$0xff] }
 0x398   : > { %v10895_v50 = vpop.f32.mrb[88].mxu0  ;;  %v10897_v31 = vpop.f32.mrb[89].mxu1  ;;  %v2995_v52 = vadd.f32 %v2918_v61, %v2835_v25 }
 0x399   : > { %v10899_v59 = vpop.f32.mrb[89].mxu0  ;;  %v10906_v23 = vpop.f32.mrb[90].mxu1  ;;  %3419 = vrot.lane.b32.xlu1 %v10743_v53, %s7706_s16 }
 0x39a   : > { %v10908_v41 = vpop.f32.mrb[90].mxu0  ;;  %v10911_v40 = vpop.f32.mrb[91].mxu1  ;;  %3028 = vst.msk [vmem:[%s7846_s10 + $0x90] sm:$0xff] %vm3009_vm10, %v2995_v52  ;;  %v2840_v52 = vld [vmem:[%s7846_s10 + $0xb8] sm:$0xff] }
 0x39b   : > { %v10917_v1 = vpop.f32.mrb[91].mxu0  ;;  %v2920_v37 = vpop.permute.xlu0 %2919  ;;  %3421 = vrot.lane.b32.xlu0 %v10752_v22, %s7706_s16 }
 0x39c   : > { %v2996_v2 = vadd.f32 %v2920_v37, %v2836_v54  ;;  %v2914_v16 = vpop.permute.xlu1 %2913 }
 0x39d   : > { %v2993_v63 = vadd.f32 %v2914_v16, %v2833_v13  ;;  %3917 = vrot.lane.b32.xlu1 %v10745_v46, %s7707_s17  ;;  %v2837_v16 = vld [vmem:[%s7846_s10 + $0xa0] sm:$0xff] }
 0x39e   : > { %3029 = vst.msk [vmem:[%s7846_s10 + $0x98] sm:$0xff] %vm3009_vm10, %v2996_v2 }
 0x39f   : > { %v10927_v47 = vpop.f32.mrb[92].mxu1  ;;  %v2916_v4 = vpop.permute.xlu0 %2915  ;;  %3026 = vst.msk [vmem:[%s7846_s10 + $0x80] sm:$0xff] %vm3009_vm10, %v2993_v63  ;;  %3919 = vrot.lane.b32.xlu0 %v10754_v24, %s7707_s17 }
 0x3a0   : > { %v10931_v9 = vpop.f32.mrb[92].mxu0  ;;  %v10933_v33 = vpop.f32.mrb[93].mxu1  ;;  %v2994_v51 = vadd.f32 %v2916_v4, %v2834_v15  ;;  %v2838_v4 = vld [vmem:[%s7846_s10 + $0xa8] sm:$0xff] }
 0x3a1   : > { %v10935_v14 = vpop.f32.mrb[93].mxu0  ;;  %v10942_v30 = vpop.f32.mrb[94].mxu1  ;;  %3431 = vrot.lane.b32.xlu1 %v10759_v60, %s7706_s16 }
 0x3a2   : > { %v10944_v29 = vpop.f32.mrb[94].mxu0  ;;  %v2926_v7 = vpop.permute.xlu1 %2925  ;;  %3027 = vst.msk [vmem:[%s7846_s10 + $0x88] sm:$0xff] %vm3009_vm10, %v2994_v51 }
 0x3a3   : > { %v10947_v61 = vpop.f32.mrb[95].mxu1  ;;  %v2999_v53 = vadd.f32 %v2926_v7, %v2839_v49  ;;  %v10953_v25 = vpop.f32.mrb[95].mxu0  ;;  %3433 = vrot.lane.b32.xlu0 %v10768_v39, %s7706_s16 }
 0x3a4   : > { %v2928_v54 = vpop.permute.xlu0 %2927 }
 0x3a5   : > { %3032 = vst.msk [vmem:[%s7846_s10 + $0xb0] sm:$0xff] %vm3009_vm10, %v2999_v53  ;;  %v3000_v37 = vadd.f32 %v2928_v54, %v2840_v52  ;;  %v2843_v52 = vld [vmem:[%s7846_s10 + $0xd0] sm:$0xff]  ;;  %3929 = vrot.lane.b32.xlu1 %v10761_v56, %s7707_s17 }
 0x3a6   : > { %v2922_v2 = vpop.permute.xlu1 %2921 }
 0x3a7   : > { %v10963_v22 = vpop.f32.mrb[96].mxu1  ;;  %3033 = vst.msk [vmem:[%s7846_s10 + $0xb8] sm:$0xff] %vm3009_vm10, %v3000_v37  ;;  %v2997_v13 = vadd.f32 %v2922_v2, %v2837_v16  ;;  %v2844_v2 = vld [vmem:[%s7846_s10 + $0xd8] sm:$0xff]  ;;  %3931 = vrot.lane.b32.xlu0 %v10770_v12, %s7707_s17 }
 0x3a8   : > { %v10967_v63 = vpop.f32.mrb[96].mxu0  ;;  %v10969_v46 = vpop.f32.mrb[97].mxu1 }
 0x3a9   : > { %v10971_v15 = vpop.f32.mrb[97].mxu0  ;;  %v2924_v51 = vpop.permute.xlu0 %2923  ;;  %3030 = vst.msk [vmem:[%s7846_s10 + $0xa0] sm:$0xff] %vm3009_vm10, %v2997_v13  ;;  %3427 = vrot.lane.b32.xlu1 %v10763_v10, %s7706_s16 }
 0x3aa   : > { %v2998_v24 = vadd.f32 %v2924_v51, %v2838_v4  ;;  %v10978_v7 = vpop.f32.mrb[98].mxu1  ;;  %v10980_v49 = vpop.f32.mrb[98].mxu0  ;;  %v2841_v51 = vld [vmem:[%s7846_s10 + $0xc0] sm:$0xff] }
 0x3ab   : > { %v2934_v53 = vpop.permute.xlu1 %2933  ;;  %v10983_v54 = vpop.f32.mrb[99].mxu1  ;;  %3429 = vrot.lane.b32.xlu0 %v10772_v42, %s7706_s16 }
 0x3ac   : > { %3031 = vst.msk [vmem:[%s7846_s10 + $0xa8] sm:$0xff] %vm3009_vm10, %v2998_v24  ;;  %v3003_v60 = vadd.f32 %v2934_v53, %v2843_v52  ;;  %v10989_v37 = vpop.f32.mrb[99].mxu0 }
 0x3ad   : > { %v2936_v16 = vpop.permute.xlu0 %2935  ;;  %3925 = vrot.lane.b32.xlu1 %v10765_v36, %s7707_s17 }
 0x3ae   : > { %3036 = vst.msk [vmem:[%s7846_s10 + $0xd0] sm:$0xff] %vm3009_vm10, %v3003_v60  ;;  %v3004_v13 = vadd.f32 %v2936_v16, %v2844_v2  ;;  %v2842_v60 = vld [vmem:[%s7846_s10 + $0xc8] sm:$0xff] }
 0x3af   : > { %v2930_v4 = vpop.permute.xlu1 %2929  ;;  %v10999_v39 = vpop.f32.mrb[100].mxu1  ;;  %3927 = vrot.lane.b32.xlu0 %v10775_v32, %s7707_s17 }
 0x3b0   : > { %3037 = vst.msk [vmem:[%s7846_s10 + $0xd8] sm:$0xff] %vm3009_vm10, %v3004_v13  ;;  %v3001_v24 = vadd.f32 %v2930_v4, %v2841_v51  ;;  %v11003_v53 = vpop.f32.mrb[100].mxu0  ;;  %v11005_v56 = vpop.f32.mrb[101].mxu1  ;;  %v2847_v51 = vld [vmem:[%s7846_s10 + $0xf0] sm:$0xff] }
 0x3b1   : > { %12649 = vst [vmem:[#allocation23_spill] sm:$0xff] %v11005_v56  ;;  %v11007_v52 = vpop.f32.mrb[101].mxu0  ;;  %v2932_v2 = vpop.permute.xlu0 %2931  ;;  %3439 = vrot.lane.b32.xlu1 %v10784_v48, %s7706_s16 }
 0x3b2   : > { %12650 = vst [vmem:[#allocation6_spill] sm:$0xff] %v11007_v52  ;;  %3034 = vst.msk [vmem:[%s7846_s10 + $0xc0] sm:$0xff] %vm3009_vm10, %v3001_v24  ;;  %v3002_v12 = vadd.f32 %v2932_v2, %v2842_v60  ;;  %v11014_v16 = vpop.f32.mrb[102].mxu1  ;;  %v11016_v13 = vpop.f32.mrb[102].mxu0  ;;  %v2848_v24 = vld [vmem:[%s7846_s10 + $0xf8] sm:$0xff] }
 0x3b3   : > { %12651 = vst [vmem:[#allocation8_spill] sm:$0xff] %v11016_v13  ;;  %v2942_v4 = vpop.permute.xlu1 %2941  ;;  %v11019_v56 = vpop.f32.mrb[103].mxu1  ;;  %3441 = vrot.lane.b32.xlu0 %v10798_v28, %s7706_s16 }
 0x3b4   : > { %12652 = vst [vmem:[#allocation9_spill] sm:$0xff] %v11019_v56  ;;  %3035 = vst.msk [vmem:[%s7846_s10 + $0xc8] sm:$0xff] %vm3009_vm10, %v3002_v12  ;;  %v3007_v10 = vadd.f32 %v2942_v4, %v2847_v51  ;;  %v11025_v52 = vpop.f32.mrb[103].mxu0  ;;  %v2845_v56 = vld [vmem:[%s7846_s10 + $0xe0] sm:$0xff] }
 0x3b5   : > { %v2944_v60 = vpop.permute.xlu0 %2943  ;;  %3937 = vrot.lane.b32.xlu1 %v10788_v57, %s7707_s17 }
 0x3b6   : > { %3040 = vst.msk [vmem:[%s7846_s10 + $0xf0] sm:$0xff] %vm3009_vm10, %v3007_v10  ;;  %v3008_v2 = vadd.f32 %v2944_v60, %v2848_v24  ;;  %v2846_v10 = vld [vmem:[%s7846_s10 + $0xe8] sm:$0xff] }
 0x3b7   : > { %v2938_v13 = vpop.permute.xlu1 %2937  ;;  %v11035_v42 = vpop.f32.mrb[104].mxu1  ;;  %3939 = vrot.lane.b32.xlu0 %v10800_v17, %s7707_s17 }
 0x3b8   : > { %3041 = vst.msk [vmem:[%s7846_s10 + $0xf8] sm:$0xff] %vm3009_vm10, %v3008_v2  ;;  %v3005_v12 = vadd.f32 %v2938_v13, %v2845_v56  ;;  %v11039_v4 = vpop.f32.mrb[104].mxu0  ;;  %v11041_v36 = vpop.f32.mrb[105].mxu1  ;;  %v3317_v2 = vld [vmem:[%s7846_s10 + $0x10] sm:$0xff] }
 0x3b9   : > { %12653 = vst [vmem:[#allocation10_spill] sm:$0xff] %v11041_v36  ;;  %v11043_v51 = vpop.f32.mrb[105].mxu0  ;;  %v2940_v24 = vpop.permute.xlu0 %2939  ;;  %3435 = vrot.lane.b32.xlu1 %v10790_v43, %s7706_s16 }
 0x3ba   : > { %12654 = vst [vmem:[#allocation7_spill] sm:$0xff] %v11043_v51  ;;  %3038 = vst.msk [vmem:[%s7846_s10 + $0xe0] sm:$0xff] %vm3009_vm10, %v3005_v12  ;;  %v3006_v32 = vadd.f32 %v2940_v24, %v2846_v10  ;;  %v11050_v60 = vpop.f32.mrb[106].mxu1  ;;  %v11052_v56 = vpop.f32.mrb[106].mxu0  ;;  %v3318_v12 = vld [vmem:[%s7846_s10 + $0x18] sm:$0xff] }
 0x3bb   : > { %v11054_v13 = vpop.f32.mrb[107].mxu0  ;;  %v3384_v51 = vpop.permute.xlu1 %3383  ;;  %3437 = vrot.lane.b32.xlu0 %v10803_v20, %s7706_s16 }
 0x3bc   : > { %12655 = vst [vmem:[#allocation24_spill] sm:$0xff] %v11054_v13  ;;  %3039 = vst.msk [vmem:[%s7846_s10 + $0xe8] sm:$0xff] %vm3009_vm10, %v3006_v32  ;;  %v3477_v48 = vadd.f32 %v3384_v51, %v3317_v2  ;;  %v11061_v36 = vpop.f32.mrb[107].mxu1 }
 0x3bd   : > { %12656 = vst [vmem:[#allocation11_spill] sm:$0xff] %v11061_v36  ;;  %v3386_v10 = vpop.permute.xlu0 %3385  ;;  %3933 = vrot.lane.b32.xlu1 %v10792_v3, %s7707_s17 }
 0x3be   : > { %3510 = vst.msk [vmem:[%s7846_s10 + $0x10] sm:$0xff] %vm3507_vm3, %v3477_v48  ;;  %v3478_v24 = vadd.f32 %v3386_v10, %v3318_v12  ;;  %v3315_v10 = vld [vmem:[%s7846_s10] sm:$0xff] }
 0x3bf   : > { %v3882_v13 = vpop.permute.xlu1 %3881  ;;  %v11070_v28 = vpop.f32.mrb[108].mxu1  ;;  %3935 = vrot.lane.b32.xlu0 %v10809_v11, %s7707_s17 }
 0x3c0   : > { %12657 = vst [vmem:[#allocation12_spill] sm:$0xff] %v11070_v28  ;;  %3511 = vst.msk [vmem:[%s7846_s10 + $0x18] sm:$0xff] %vm3507_vm3, %v3478_v24  ;;  %v11074_v51 = vpop.f32.mrb[108].mxu0  ;;  %v11076_v32 = vpop.f32.mrb[109].mxu1 }
 0x3c1   : > { %12658 = vst [vmem:[#allocation20_spill] sm:$0xff] %v11074_v51  ;;  %12659 = vst [vmem:[#allocation13_spill] sm:$0xff] %v11076_v32  ;;  %v11078_v57 = vpop.f32.mrb[109].mxu0  ;;  %v3884_v2 = vpop.permute.xlu0 %3883  ;;  %v3316_v51 = vld [vmem:[%s7846_s10 + $0x8] sm:$0xff]  ;;  %4379 = vrot.lane.b32.xlu1 %v10819_v18, %s7708_s18 }
 0x3c2   : > { %12660 = vst [vmem:[#allocation25_spill] sm:$0xff] %v11078_v57  ;;  %v11082_v48 = vpop.f32.mrb[110].mxu1  ;;  %v11084_v17 = vpop.f32.mrb[110].mxu0 }
 0x3c3   : > { %12661 = vst [vmem:[#allocation14_spill] sm:$0xff] %v11082_v48  ;;  %12662 = vst [vmem:[#allocation27_spill] sm:$0xff] %v11084_v17  ;;  %v11086_v12 = vpop.f32.mrb[111].mxu0  ;;  %v3380_v24 = vpop.permute.xlu1 %3379  ;;  %4381 = vrot.lane.b32.xlu0 %v10834_v45, %s7708_s18 }
 0x3c4   : > { %12663 = vst [vmem:[#allocation26_spill] sm:$0xff] %v11086_v12  ;;  %v3475_v32 = vadd.f32 %v3380_v24, %v3315_v10  ;;  %v11091_v57 = vpop.f32.mrb[111].mxu1 }
 0x3c5   : > { %v3815_v43 = vld [vmem:[%s7846_s10 + $0x10] sm:$0xff]  ;;  %v3382_v48 = vpop.permute.xlu0 %3381  ;;  %4877 = vrot.lane.b32.xlu1 %v10823_v34, %s7709_s19 }
 0x3c6   : > { %v3975_v17 = vadd.f32 %v3882_v13, %v3815_v43  ;;  %3508 = vst.msk [vmem:[%s7846_s10] sm:$0xff] %vm3507_vm3, %v3475_v32  ;;  %v3476_v12 = vadd.f32 %v3382_v48, %v3316_v51  ;;  %v3321_v48 = vld [vmem:[%s7846_s10 + $0x30] sm:$0xff]  ;;  %v3322_v43 = vld [vmem:[%s7846_s10 + $0x38] sm:$0xff] }
 0x3c7   : > { %v3816_v28 = vld [vmem:[%s7846_s10 + $0x18] sm:$0xff]  ;;  %v3878_v36 = vpop.permute.xlu1 %3877  ;;  %v11102_v20 = vpop.f32.mrb[112].mxu1  ;;  %4879 = vrot.lane.b32.xlu0 %v10836_v55, %s7709_s19 }
 0x3c8   : > { %4008 = vst.msk [vmem:[%s7846_s10 + $0x10] sm:$0xff] %vm4005_vm8, %v3975_v17  ;;  %v3976_v10 = vadd.f32 %v3884_v2, %v3816_v28  ;;  %v11108_v3 = vpop.f32.mrb[112].mxu0  ;;  %v11110_v13 = vpop.f32.mrb[113].mxu1 }
 0x3c9   : > { %3509 = vst.msk [vmem:[%s7846_s10 + $0x8] sm:$0xff] %vm3507_vm3, %v3476_v12  ;;  %12664 = vst [vmem:[#allocation28_spill] sm:$0xff] %v11110_v13  ;;  %v11112_v32 = vpop.f32.mrb[113].mxu0  ;;  %v3880_v11 = vpop.permute.xlu0 %3879  ;;  %4375 = vrot.lane.b32.xlu1 %v10825_v8, %s7708_s18 }
 0x3ca   : > { %12665 = vst [vmem:[#allocation15_spill] sm:$0xff] %v11112_v32  ;;  %4009 = vst.msk [vmem:[%s7846_s10 + $0x18] sm:$0xff] %vm4005_vm8, %v3976_v10  ;;  %v11118_v51 = vpop.f32.mrb[114].mxu1  ;;  %v11120_v28 = vpop.f32.mrb[114].mxu0 }
 0x3cb   : > { %12666 = vst [vmem:[#allocation41_spill] sm:$0xff] %v11120_v28  ;;  %v11122_v2 = vpop.f32.mrb[115].mxu0  ;;  %v3392_v17 = vpop.permute.xlu1 %3391  ;;  %4377 = vrot.lane.b32.xlu0 %v10839_v19, %s7708_s18 }
 0x3cc   : > { %12667 = vst [vmem:[#allocation29_spill] sm:$0xff] %v11122_v2  ;;  %v3481_v12 = vadd.f32 %v3392_v17, %v3321_v48  ;;  %v11127_v18 = vpop.f32.mrb[115].mxu1 }
 0x3cd   : > { %v3813_v24 = vld [vmem:[%s7846_s10] sm:$0xff]  ;;  %v3394_v10 = vpop.permute.xlu0 %3393  ;;  %4873 = vrot.lane.b32.xlu1 %v10827_v62, %s7709_s19 }
 0x3ce   : > { %v3973_v32 = vadd.f32 %v3878_v36, %v3813_v24  ;;  %3514 = vst.msk [vmem:[%s7846_s10 + $0x30] sm:$0xff] %vm3507_vm3, %v3481_v12  ;;  %v3482_v2 = vadd.f32 %v3394_v10, %v3322_v43  ;;  %v3320_v10 = vld [vmem:[%s7846_s10 + $0x28] sm:$0xff] }
 0x3cf   : > { %v3890_v28 = vpop.permute.xlu1 %3889  ;;  %v11138_v45 = vpop.f32.mrb[116].mxu1  ;;  %4875 = vrot.lane.b32.xlu0 %v10845_v44, %s7709_s19 }
 0x3d0   : > { %v3814_v13 = vld [vmem:[%s7846_s10 + $0x8] sm:$0xff]  ;;  %4006 = vst.msk [vmem:[%s7846_s10] sm:$0xff] %vm4005_vm8, %v3973_v32  ;;  %v11144_v34 = vpop.f32.mrb[116].mxu0  ;;  %v11146_v36 = vpop.f32.mrb[117].mxu1 }
 0x3d1   : > { %v3974_v48 = vadd.f32 %v3880_v11, %v3814_v13  ;;  %3515 = vst.msk [vmem:[%s7846_s10 + $0x38] sm:$0xff] %vm3507_vm3, %v3482_v2  ;;  %12668 = vst [vmem:[#allocation30_spill] sm:$0xff] %v11146_v36  ;;  %v11148_v17 = vpop.f32.mrb[117].mxu0  ;;  %v3892_v55 = vpop.permute.xlu0 %3891  ;;  %v3319_v2 = vld [vmem:[%s7846_s10 + $0x20] sm:$0xff]  ;;  %4387 = vrot.lane.b32.xlu1 %v10855_v6, %s7708_s18 }
 0x3d2   : > { %12669 = vst [vmem:[#allocation31_spill] sm:$0xff] %v11148_v17  ;;  %v11154_v32 = vpop.f32.mrb[118].mxu1  ;;  %v11156_v13 = vpop.f32.mrb[118].mxu0 }
 0x3d3   : > { %4007 = vst.msk [vmem:[%s7846_s10 + $0x8] sm:$0xff] %vm4005_vm8, %v3974_v48  ;;  %12670 = vst [vmem:[#allocation33_spill] sm:$0xff] %v11156_v13  ;;  %v11158_v11 = vpop.f32.mrb[119].mxu0  ;;  %v3388_v12 = vpop.permute.xlu1 %3387  ;;  %4389 = vrot.lane.b32.xlu0 %v10870_v5, %s7708_s18 }
 0x3d4   : > { %12671 = vst [vmem:[#allocation34_spill] sm:$0xff] %v11158_v11  ;;  %v3479_v24 = vadd.f32 %v3388_v12, %v3319_v2  ;;  %v11163_v8 = vpop.f32.mrb[119].mxu1 }
 0x3d5   : > { %v3819_v43 = vld [vmem:[%s7846_s10 + $0x30] sm:$0xff]  ;;  %v3390_v48 = vpop.permute.xlu0 %3389  ;;  %4885 = vrot.lane.b32.xlu1 %v10859_v0, %s7709_s19 }
 0x3d6   : > { %v3979_v17 = vadd.f32 %v3890_v28, %v3819_v43  ;;  %3512 = vst.msk [vmem:[%s7846_s10 + $0x20] sm:$0xff] %vm3507_vm3, %v3479_v24  ;;  %v3480_v11 = vadd.f32 %v3390_v48, %v3320_v10  ;;  %v3326_v48 = vld [vmem:[%s7846_s10 + $0x58] sm:$0xff] }
 0x3d7   : > { %v3886_v13 = vpop.permute.xlu1 %3885  ;;  %v11174_v19 = vpop.f32.mrb[120].mxu1  ;;  %4887 = vrot.lane.b32.xlu0 %v10872_v58, %s7709_s19 }
 0x3d8   : > { %v3820_v36 = vld [vmem:[%s7846_s10 + $0x38] sm:$0xff]  ;;  %4012 = vst.msk [vmem:[%s7846_s10 + $0x30] sm:$0xff] %vm4005_vm8, %v3979_v17  ;;  %v11180_v62 = vpop.f32.mrb[120].mxu0  ;;  %v11182_v28 = vpop.f32.mrb[121].mxu1 }
 0x3d9   : > { %v3980_v2 = vadd.f32 %v3892_v55, %v3820_v36  ;;  %3513 = vst.msk [vmem:[%s7846_s10 + $0x28] sm:$0xff] %vm3507_vm3, %v3480_v11  ;;  %12672 = vst [vmem:[#allocation21_spill] sm:$0xff] %v11182_v28  ;;  %v11184_v12 = vpop.f32.mrb[121].mxu0  ;;  %v3888_v44 = vpop.permute.xlu0 %3887  ;;  %v3325_v11 = vld [vmem:[%s7846_s10 + $0x50] sm:$0xff]  ;;  %4383 = vrot.lane.b32.xlu1 %v10861_v35, %s7708_s18 }
 0x3da   : > { %12673 = vst [vmem:[#allocation36_spill] sm:$0xff] %v11184_v12  ;;  %v11190_v17 = vpop.f32.mrb[122].mxu1  ;;  %v11192_v36 = vpop.f32.mrb[122].mxu0 }
 0x3db   : > { %4013 = vst.msk [vmem:[%s7846_s10 + $0x38] sm:$0xff] %vm4005_vm8, %v3980_v2  ;;  %12674 = vst [vmem:[#allocation37_spill] sm:$0xff] %v11192_v36  ;;  %v11194_v55 = vpop.f32.mrb[123].mxu0  ;;  %v3400_v24 = vpop.permute.xlu1 %3399  ;;  %4385 = vrot.lane.b32.xlu0 %v10875_v26, %s7708_s18 }
 0x3dc   : > { %12675 = vst [vmem:[#allocation16_spill] sm:$0xff] %v11194_v55  ;;  %v3485_v43 = vadd.f32 %v3400_v24, %v3325_v11  ;;  %v11199_v6 = vpop.f32.mrb[123].mxu1 }
 0x3dd   : > { %v3817_v10 = vld [vmem:[%s7846_s10 + $0x20] sm:$0xff]  ;;  %v3402_v2 = vpop.permute.xlu0 %3401  ;;  %4881 = vrot.lane.b32.xlu1 %v10863_v21, %s7709_s19 }
 0x3de   : > { %v3977_v12 = vadd.f32 %v3886_v13, %v3817_v10  ;;  %3518 = vst.msk [vmem:[%s7846_s10 + $0x50] sm:$0xff] %vm3507_vm3, %v3485_v43  ;;  %v3486_v55 = vadd.f32 %v3402_v2, %v3326_v48  ;;  %v3324_v2 = vld [vmem:[%s7846_s10 + $0x48] sm:$0xff] }
 0x3df   : > { %v3898_v36 = vpop.permute.xlu1 %3897  ;;  %v11210_v5 = vpop.f32.mrb[124].mxu1  ;;  %4883 = vrot.lane.b32.xlu0 %v10881_v38, %s7709_s19 }
 0x3e0   : > { %v3818_v28 = vld [vmem:[%s7846_s10 + $0x28] sm:$0xff]  ;;  %4010 = vst.msk [vmem:[%s7846_s10 + $0x20] sm:$0xff] %vm4005_vm8, %v3977_v12  ;;  %v11216_v0 = vpop.f32.mrb[124].mxu0  ;;  %v11218_v13 = vpop.f32.mrb[125].mxu1 }
 0x3e1   : > { %v3978_v11 = vadd.f32 %v3888_v44, %v3818_v28  ;;  %3519 = vst.msk [vmem:[%s7846_s10 + $0x58] sm:$0xff] %vm3507_vm3, %v3486_v55  ;;  %12676 = vst [vmem:[#allocation38_spill] sm:$0xff] %v11218_v13  ;;  %v11220_v24 = vpop.f32.mrb[125].mxu0  ;;  %v3900_v58 = vpop.permute.xlu0 %3899  ;;  %v3323_v55 = vld [vmem:[%s7846_s10 + $0x40] sm:$0xff]  ;;  %4395 = vrot.lane.b32.xlu1 %v10891_v27, %s7708_s18 }
 0x3e2   : > { %12677 = vst [vmem:[#allocation35_spill] sm:$0xff] %v11220_v24  ;;  %v11226_v12 = vpop.f32.mrb[126].mxu1  ;;  %v11228_v28 = vpop.f32.mrb[126].mxu0 }
 0x3e3   : > { %4011 = vst.msk [vmem:[%s7846_s10 + $0x28] sm:$0xff] %vm4005_vm8, %v3978_v11  ;;  %12678 = vst [vmem:[#allocation39_spill] sm:$0xff] %v11228_v28  ;;  %v11230_v44 = vpop.f32.mrb[127].mxu0  ;;  %v3396_v43 = vpop.permute.xlu1 %3395  ;;  %4397 = vrot.lane.b32.xlu0 %v10906_v23, %s7708_s18 }
 0x3e4   : > { %12679 = vst [vmem:[#allocation40_spill] sm:$0xff] %v11230_v44  ;;  %v3483_v10 = vadd.f32 %v3396_v43, %v3323_v55  ;;  %v11235_v35 = vpop.f32.mrb[127].mxu1 }
 0x3e5   : > { %v3823_v48 = vld [vmem:[%s7846_s10 + $0x50] sm:$0xff]  ;;  %v3398_v11 = vpop.permute.xlu0 %3397  ;;  %4893 = vrot.lane.b32.xlu1 %v10895_v50, %s7709_s19 }
 0x3e6   : > { %v3983_v24 = vadd.f32 %v3898_v36, %v3823_v48  ;;  %3516 = vst.msk [vmem:[%s7846_s10 + $0x40] sm:$0xff] %vm3507_vm3, %v3483_v10  ;;  %v3484_v44 = vadd.f32 %v3398_v11, %v3324_v2  ;;  %v3330_v11 = vld [vmem:[%s7846_s10 + $0x78] sm:$0xff] }
 0x3e7   : > { %v3894_v28 = vpop.permute.xlu1 %3893  ;;  %v11246_v26 = vpop.f32.mrb[128].mxu1  ;;  %4895 = vrot.lane.b32.xlu0 %v10908_v41, %s7709_s19 }
 0x3e8   : > { %v3824_v13 = vld [vmem:[%s7846_s10 + $0x58] sm:$0xff]  ;;  %4016 = vst.msk [vmem:[%s7846_s10 + $0x50] sm:$0xff] %vm4005_vm8, %v3983_v24  ;;  %v11252_v21 = vpop.f32.mrb[128].mxu0  ;;  %v11254_v36 = vpop.f32.mrb[129].mxu1 }
 0x3e9   : > { %v3984_v55 = vadd.f32 %v3900_v58, %v3824_v13  ;;  %3517 = vst.msk [vmem:[%s7846_s10 + $0x48] sm:$0xff] %vm3507_vm3, %v3484_v44  ;;  %12680 = vst [vmem:[#allocation42_spill] sm:$0xff] %v11254_v36  ;;  %v11256_v43 = vpop.f32.mrb[129].mxu0  ;;  %v3896_v38 = vpop.permute.xlu0 %3895  ;;  %v3329_v44 = vld [vmem:[%s7846_s10 + $0x70] sm:$0xff]  ;;  %4391 = vrot.lane.b32.xlu1 %v10897_v31, %s7708_s18 }
 0x3ea   : > { %12681 = vst [vmem:[#allocation43_spill] sm:$0xff] %v11256_v43  ;;  %v11262_v24 = vpop.f32.mrb[130].mxu1  ;;  %v11264_v13 = vpop.f32.mrb[130].mxu0 }
 0x3eb   : > { %4017 = vst.msk [vmem:[%s7846_s10 + $0x58] sm:$0xff] %vm4005_vm8, %v3984_v55  ;;  %12682 = vst [vmem:[#allocation32_spill] sm:$0xff] %v11264_v13  ;;  %v11266_v58 = vpop.f32.mrb[131].mxu0  ;;  %v3408_v10 = vpop.permute.xlu1 %3407  ;;  %4393 = vrot.lane.b32.xlu0 %v10911_v40, %s7708_s18 }
 0x3ec   : > { %12683 = vst [vmem:[#allocation44_spill] sm:$0xff] %v11266_v58  ;;  %v3489_v48 = vadd.f32 %v3408_v10, %v3329_v44  ;;  %v11271_v27 = vpop.f32.mrb[131].mxu1 }
 0x3ed   : > { %v3821_v2 = vld [vmem:[%s7846_s10 + $0x40] sm:$0xff]  ;;  %v3410_v55 = vpop.permute.xlu0 %3409  ;;  %4889 = vrot.lane.b32.xlu1 %v10899_v59, %s7709_s19 }
 0x3ee   : > { %v3981_v43 = vadd.f32 %v3894_v28, %v3821_v2  ;;  %3522 = vst.msk [vmem:[%s7846_s10 + $0x70] sm:$0xff] %vm3507_vm3, %v3489_v48  ;;  %v3490_v58 = vadd.f32 %v3410_v55, %v3330_v11  ;;  %v3328_v55 = vld [vmem:[%s7846_s10 + $0x68] sm:$0xff] }
 0x3ef   : > { %v3906_v13 = vpop.permute.xlu1 %3905  ;;  %v11282_v23 = vpop.f32.mrb[132].mxu1  ;;  %4891 = vrot.lane.b32.xlu0 %v10917_v1, %s7709_s19 }
 0x3f0   : > { %v3822_v36 = vld [vmem:[%s7846_s10 + $0x48] sm:$0xff]  ;;  %4014 = vst.msk [vmem:[%s7846_s10 + $0x40] sm:$0xff] %vm4005_vm8, %v3981_v43  ;;  %v11288_v50 = vpop.f32.mrb[132].mxu0  ;;  %v11290_v28 = vpop.f32.mrb[133].mxu1 }
 0x3f1   : > { %v3982_v44 = vadd.f32 %v3896_v38, %v3822_v36  ;;  %3523 = vst.msk [vmem:[%s7846_s10 + $0x78] sm:$0xff] %vm3507_vm3, %v3490_v58  ;;  %12684 = vst [vmem:[#allocation17_spill] sm:$0xff] %v11290_v28  ;;  %v11292_v10 = vpop.f32.mrb[133].mxu0  ;;  %v3908_v41 = vpop.permute.xlu0 %3907  ;;  %v3327_v58 = vld [vmem:[%s7846_s10 + $0x60] sm:$0xff]  ;;  %4403 = vrot.lane.b32.xlu1 %v10927_v47, %s7708_s18 }
 0x3f2   : > { %12685 = vst [vmem:[#allocation18_spill] sm:$0xff] %v11292_v10  ;;  %v11298_v43 = vpop.f32.mrb[134].mxu1  ;;  %v11300_v36 = vpop.f32.mrb[134].mxu0 }
 0x3f3   : > { %4015 = vst.msk [vmem:[%s7846_s10 + $0x48] sm:$0xff] %vm4005_vm8, %v3982_v44  ;;  %12686 = vst [vmem:[#allocation19_spill] sm:$0xff] %v11300_v36  ;;  %v11302_v38 = vpop.f32.mrb[135].mxu0  ;;  %v3404_v48 = vpop.permute.xlu1 %3403  ;;  %4405 = vrot.lane.b32.xlu0 %v10942_v30, %s7708_s18 }
 0x3f4   : > { %12687 = vst [vmem:[#allocation22_spill] sm:$0xff] %v11302_v38  ;;  %v3487_v2 = vadd.f32 %v3404_v48, %v3327_v58  ;;  %v11307_v31 = vpop.f32.mrb[135].mxu1 }
 0x3f5   : > { %v3827_v11 = vld [vmem:[%s7846_s10 + $0x70] sm:$0xff]  ;;  %v3406_v44 = vpop.permute.xlu0 %3405  ;;  %4901 = vrot.lane.b32.xlu1 %v10931_v9, %s7709_s19 }
 0x3f6   : > { %v3987_v10 = vadd.f32 %v3906_v13, %v3827_v11  ;;  %3520 = vst.msk [vmem:[%s7846_s10 + $0x60] sm:$0xff] %vm3507_vm3, %v3487_v2  ;;  %v3488_v38 = vadd.f32 %v3406_v44, %v3328_v55  ;;  %v3334_v44 = vld [vmem:[%s7846_s10 + $0x98] sm:$0xff] }
 0x3f7   : > { %v3902_v36 = vpop.permute.xlu1 %3901  ;;  %v11318_v40 = vpop.f32.mrb[136].mxu1  ;;  %4903 = vrot.lane.b32.xlu0 %v10944_v29, %s7709_s19 }
 0x3f8   : > { %v3828_v28 = vld [vmem:[%s7846_s10 + $0x78] sm:$0xff]  ;;  %4020 = vst.msk [vmem:[%s7846_s10 + $0x70] sm:$0xff] %vm4005_vm8, %v3987_v10  ;;  %v11324_v59 = vpop.f32.mrb[136].mxu0  ;;  %v11326_v13 = vpop.f32.mrb[137].mxu1 }
 0x3f9   : > { %v3988_v58 = vadd.f32 %v3908_v41, %v3828_v28  ;;  %3521 = vst.msk [vmem:[%s7846_s10 + $0x68] sm:$0xff] %vm3507_vm3, %v3488_v38  ;;  %12688 = vst [vmem:[#allocation45_spill] sm:$0xff] %v11324_v59  ;;  %v11328_v48 = vpop.f32.mrb[137].mxu0  ;;  %v3904_v1 = vpop.permute.xlu0 %3903  ;;  %v3333_v38 = vld [vmem:[%s7846_s10 + $0x90] sm:$0xff]  ;;  %4399 = vrot.lane.b32.xlu1 %v10933_v33, %s7708_s18 }
 0x3fa   : > { %12689 = vst [vmem:[#allocation46_spill] sm:$0xff] %v11328_v48  ;;  %v11334_v10 = vpop.f32.mrb[138].mxu1  ;;  %v11336_v28 = vpop.f32.mrb[138].mxu0 }
 0x3fb   : > { %4021 = vst.msk [vmem:[%s7846_s10 + $0x78] sm:$0xff] %vm4005_vm8, %v3988_v58  ;;  %12690 = vst [vmem:[#allocation47_spill] sm:$0xff] %v11336_v28  ;;  %v11338_v41 = vpop.f32.mrb[139].mxu0  ;;  %v3416_v2 = vpop.permute.xlu1 %3415  ;;  %4401 = vrot.lane.b32.xlu0 %v10947_v61, %s7708_s18 }
 0x3fc   : > { %12691 = vst [vmem:[#allocation48_spill] sm:$0xff] %v11338_v41  ;;  %v3493_v11 = vadd.f32 %v3416_v2, %v3333_v38  ;;  %v11343_v47 = vpop.f32.mrb[139].mxu1 }
 0x3fd   : > { %v3825_v55 = vld [vmem:[%s7846_s10 + $0x60] sm:$0xff]  ;;  %v3418_v58 = vpop.permute.xlu0 %3417  ;;  %4897 = vrot.lane.b32.xlu1 %v10935_v14, %s7709_s19 }
 0x3fe   : > { %v3985_v28 = vadd.f32 %v3902_v36, %v3825_v55  ;;  %3526 = vst.msk [vmem:[%s7846_s10 + $0x90] sm:$0xff] %vm3507_vm3, %v3493_v11  ;;  %v3494_v59 = vadd.f32 %v3418_v58, %v3334_v44  ;;  %v3332_v58 = vld [vmem:[%s7846_s10 + $0x88] sm:$0xff] }
 0x3ff   : > { %v3914_v48 = vpop.permute.xlu1 %3913  ;;  %v11354_v30 = vpop.f32.mrb[140].mxu1  ;;  %4899 = vrot.lane.b32.xlu0 %v10953_v25, %s7709_s19 }
 0x400   : > { %v3826_v41 = vld [vmem:[%s7846_s10 + $0x68] sm:$0xff]  ;;  %4018 = vst.msk [vmem:[%s7846_s10 + $0x60] sm:$0xff] %vm4005_vm8, %v3985_v28  ;;  %v11360_v9 = vpop.f32.mrb[140].mxu0  ;;  %v11362_v36 = vpop.f32.mrb[141].mxu1 }
 0x401   : > { %v3986_v38 = vadd.f32 %v3904_v1, %v3826_v41  ;;  %3527 = vst.msk [vmem:[%s7846_s10 + $0x98] sm:$0xff] %vm3507_vm3, %v3494_v59  ;;  %12692 = vst [vmem:[#allocation49_spill] sm:$0xff] %v11360_v9  ;;  %v11364_v2 = vpop.f32.mrb[141].mxu0  ;;  %v3916_v29 = vpop.permute.xlu0 %3915  ;;  %v3331_v41 = vld [vmem:[%s7846_s10 + $0x80] sm:$0xff]  ;;  %4411 = vrot.lane.b32.xlu1 %v10963_v22, %s7708_s18 }
 0x402   : > { %12693 = vst [vmem:[#allocation50_spill] sm:$0xff] %v11364_v2  ;;  %v11370_v28 = vpop.f32.mrb[142].mxu1  ;;  %v11372_v1 = vpop.f32.mrb[142].mxu0 }
 0x403   : > { %4019 = vst.msk [vmem:[%s7846_s10 + $0x68] sm:$0xff] %vm4005_vm8, %v3986_v38  ;;  %12694 = vst [vmem:[#allocation51_spill] sm:$0xff] %v11372_v1  ;;  %v11374_v59 = vpop.f32.mrb[143].mxu0  ;;  %v3412_v11 = vpop.permute.xlu1 %3411  ;;  %4413 = vrot.lane.b32.xlu0 %v10978_v7, %s7708_s18 }
 0x404   : > { %12695 = vst [vmem:[#allocation52_spill] sm:$0xff] %v11374_v59  ;;  %v3491_v55 = vadd.f32 %v3412_v11, %v3331_v41  ;;  %v11379_v33 = vpop.f32.mrb[143].mxu1 }
 0x405   : > { %v3831_v44 = vld [vmem:[%s7846_s10 + $0x90] sm:$0xff]  ;;  %v3414_v38 = vpop.permute.xlu0 %3413  ;;  %4909 = vrot.lane.b32.xlu1 %v10967_v63, %s7709_s19 }
 0x406   : > { %v3991_v1 = vadd.f32 %v3914_v48, %v3831_v44  ;;  %3524 = vst.msk [vmem:[%s7846_s10 + $0x80] sm:$0xff] %vm3507_vm3, %v3491_v55  ;;  %v3492_v9 = vadd.f32 %v3414_v38, %v3332_v58  ;;  %v3337_v48 = vld [vmem:[%s7846_s10 + $0xb0] sm:$0xff]  ;;  %v3336_v38 = vld [vmem:[%s7846_s10 + $0xa8] sm:$0xff] }
 0x407   : > { %v3910_v2 = vpop.permute.xlu1 %3909  ;;  %4911 = vrot.lane.b32.xlu0 %v10980_v49, %s7709_s19 }
 0x408   : > { %v3832_v59 = vld [vmem:[%s7846_s10 + $0x98] sm:$0xff]  ;;  %4024 = vst.msk [vmem:[%s7846_s10 + $0x90] sm:$0xff] %vm4005_vm8, %v3991_v1 }
 0x409   : > { %v3992_v61 = vadd.f32 %v3916_v29, %v3832_v59  ;;  %3525 = vst.msk [vmem:[%s7846_s10 + $0x88] sm:$0xff] %vm3507_vm3, %v3492_v9  ;;  %v3912_v14 = vpop.permute.xlu0 %3911  ;;  %v3338_v9 = vld [vmem:[%s7846_s10 + $0xb8] sm:$0xff]  ;;  %4407 = vrot.lane.b32.xlu1 %v10969_v46, %s7708_s18 }
 0x40b   : > { %4025 = vst.msk [vmem:[%s7846_s10 + $0x98] sm:$0xff] %vm4005_vm8, %v3992_v61  ;;  %v3424_v41 = vpop.permute.xlu1 %3423  ;;  %4409 = vrot.lane.b32.xlu0 %v10983_v54, %s7708_s18 }
 0x40c   : > { %v3497_v25 = vadd.f32 %v3424_v41, %v3337_v48 }
 0x40d   : > { %v3829_v1 = vld [vmem:[%s7846_s10 + $0x80] sm:$0xff]  ;;  %v3426_v29 = vpop.permute.xlu0 %3425  ;;  %4905 = vrot.lane.b32.xlu1 %v10971_v15, %s7709_s19 }
 0x40e   : > { %v3989_v22 = vadd.f32 %v3910_v2, %v3829_v1  ;;  %3530 = vst.msk [vmem:[%s7846_s10 + $0xb0] sm:$0xff] %vm3507_vm3, %v3497_v25  ;;  %v3498_v59 = vadd.f32 %v3426_v29, %v3338_v9  ;;  %v3335_v2 = vld [vmem:[%s7846_s10 + $0xa0] sm:$0xff]  ;;  %v3341_v25 = vld [vmem:[%s7846_s10 + $0xd0] sm:$0xff]  ;;  %v3342_v29 = vld [vmem:[%s7846_s10 + $0xd8] sm:$0xff] }
 0x40f   : > { %v3922_v55 = vpop.permute.xlu1 %3921  ;;  %4907 = vrot.lane.b32.xlu0 %v10989_v37, %s7709_s19 }
 0x410   : > { %v3830_v11 = vld [vmem:[%s7846_s10 + $0x88] sm:$0xff]  ;;  %4022 = vst.msk [vmem:[%s7846_s10 + $0x80] sm:$0xff] %vm4005_vm8, %v3989_v22 }
 0x411   : > { %v3990_v7 = vadd.f32 %v3912_v14, %v3830_v11  ;;  %3531 = vst.msk [vmem:[%s7846_s10 + $0xb8] sm:$0xff] %vm3507_vm3, %v3498_v59  ;;  %v3924_v63 = vpop.permute.xlu0 %3923  ;;  %4419 = vrot.lane.b32.xlu1 %v10999_v39, %s7708_s18 }
 0x413   : > { %4023 = vst.msk [vmem:[%s7846_s10 + $0x88] sm:$0xff] %vm4005_vm8, %v3990_v7  ;;  %v3420_v44 = vpop.permute.xlu1 %3419  ;;  %4421 = vrot.lane.b32.xlu0 %v11014_v16, %s7708_s18  ;;  %v12696_v7 = vld [vmem:[#allocation8_spill] sm:$0xff] }
 0x414   : > { %v3495_v49 = vadd.f32 %v3420_v44, %v3335_v2  ;;  %v3339_v2 = vld [vmem:[%s7846_s10 + $0xc0] sm:$0xff] }
 0x415   : > { %v3835_v58 = vld [vmem:[%s7846_s10 + $0xb0] sm:$0xff]  ;;  %v3422_v61 = vpop.permute.xlu0 %3421  ;;  %4917 = vrot.lane.b32.xlu1 %v11003_v53, %s7709_s19  ;;  %v12697_v53 = vld [vmem:[#allocation23_spill] sm:$0xff] }
 0x416   : > { %v3995_v46 = vadd.f32 %v3922_v55, %v3835_v58  ;;  %3528 = vst.msk [vmem:[%s7846_s10 + $0xa0] sm:$0xff] %vm3507_vm3, %v3495_v49  ;;  %v3496_v14 = vadd.f32 %v3422_v61, %v3336_v38  ;;  %v12698_v49 = vld [vmem:[#allocation9_spill] sm:$0xff]  ;;  %v12699_v61 = vld [vmem:[#allocation6_spill] sm:$0xff] }
 0x417   : > { %v3918_v41 = vpop.permute.xlu1 %3917  ;;  %4919 = vrot.lane.b32.xlu0 %v12696_v7, %s7709_s19 }
 0x418   : > { %v3836_v48 = vld [vmem:[%s7846_s10 + $0xb8] sm:$0xff]  ;;  %4028 = vst.msk [vmem:[%s7846_s10 + $0xb0] sm:$0xff] %vm4005_vm8, %v3995_v46  ;;  %v3340_v46 = vld [vmem:[%s7846_s10 + $0xc8] sm:$0xff] }
 0x419   : > { %v3996_v54 = vadd.f32 %v3924_v63, %v3836_v48  ;;  %3529 = vst.msk [vmem:[%s7846_s10 + $0xa8] sm:$0xff] %vm3507_vm3, %v3496_v14  ;;  %v3920_v15 = vpop.permute.xlu0 %3919  ;;  %4415 = vrot.lane.b32.xlu1 %v12697_v53, %s7708_s18 }
 0x41b   : > { %4029 = vst.msk [vmem:[%s7846_s10 + $0xb8] sm:$0xff] %vm4005_vm8, %v3996_v54  ;;  %v3432_v1 = vpop.permute.xlu1 %3431  ;;  %4417 = vrot.lane.b32.xlu0 %v12698_v49, %s7708_s18  ;;  %v3344_v49 = vld [vmem:[%s7846_s10 + $0xe8] sm:$0xff] }
 0x41c   : > { %v3501_v37 = vadd.f32 %v3432_v1, %v3341_v25 }
 0x41d   : > { %v3833_v9 = vld [vmem:[%s7846_s10 + $0xa0] sm:$0xff]  ;;  %v3434_v22 = vpop.permute.xlu0 %3433  ;;  %4913 = vrot.lane.b32.xlu1 %v12699_v61, %s7709_s19 }
 0x41e   : > { %v3993_v39 = vadd.f32 %v3918_v41, %v3833_v9  ;;  %3534 = vst.msk [vmem:[%s7846_s10 + $0xd0] sm:$0xff] %vm3507_vm3, %v3501_v37  ;;  %v3502_v59 = vadd.f32 %v3434_v22, %v3342_v29  ;;  %v3345_v37 = vld [vmem:[%s7846_s10 + $0xf0] sm:$0xff]  ;;  %v3346_v22 = vld [vmem:[%s7846_s10 + $0xf8] sm:$0xff] }
 0x41f   : > { %v3930_v55 = vpop.permute.xlu1 %3929  ;;  %4915 = vrot.lane.b32.xlu0 %v11025_v52, %s7709_s19 }
 0x420   : > { %v3834_v11 = vld [vmem:[%s7846_s10 + $0xa8] sm:$0xff]  ;;  %4026 = vst.msk [vmem:[%s7846_s10 + $0xa0] sm:$0xff] %vm4005_vm8, %v3993_v39 }
 0x421   : > { %v3994_v16 = vadd.f32 %v3920_v15, %v3834_v11  ;;  %3535 = vst.msk [vmem:[%s7846_s10 + $0xd8] sm:$0xff] %vm3507_vm3, %v3502_v59  ;;  %v3932_v63 = vpop.permute.xlu0 %3931  ;;  %4427 = vrot.lane.b32.xlu1 %v11035_v42, %s7708_s18 }
 0x423   : > { %4027 = vst.msk [vmem:[%s7846_s10 + $0xa8] sm:$0xff] %vm4005_vm8, %v3994_v16  ;;  %v3428_v44 = vpop.permute.xlu1 %3427  ;;  %4429 = vrot.lane.b32.xlu0 %v11050_v60, %s7708_s18  ;;  %v3343_v16 = vld [vmem:[%s7846_s10 + $0xe0] sm:$0xff] }
 0x424   : > { %v3499_v58 = vadd.f32 %v3428_v44, %v3339_v2  ;;  %v12702_v44 = vld [vmem:[#allocation7_spill] sm:$0xff] }
 0x425   : > { %v3839_v38 = vld [vmem:[%s7846_s10 + $0xd0] sm:$0xff]  ;;  %v3430_v14 = vpop.permute.xlu0 %3429  ;;  %4925 = vrot.lane.b32.xlu1 %v11039_v4, %s7709_s19  ;;  %v12700_v4 = vld [vmem:[#allocation10_spill] sm:$0xff] }
 0x426   : > { %v3999_v48 = vadd.f32 %v3930_v55, %v3839_v38  ;;  %3532 = vst.msk [vmem:[%s7846_s10 + $0xc0] sm:$0xff] %vm3507_vm3, %v3499_v58  ;;  %v3500_v41 = vadd.f32 %v3430_v14, %v3340_v46 }
 0x427   : > { %v3926_v15 = vpop.permute.xlu1 %3925  ;;  %4927 = vrot.lane.b32.xlu0 %v11052_v56, %s7709_s19 }
 0x428   : > { %v3840_v54 = vld [vmem:[%s7846_s10 + $0xd8] sm:$0xff]  ;;  %4032 = vst.msk [vmem:[%s7846_s10 + $0xd0] sm:$0xff] %vm4005_vm8, %v3999_v48  ;;  %v12703_v48 = vld [vmem:[#allocation24_spill] sm:$0xff] }
 0x429   : > { %v4000_v25 = vadd.f32 %v3932_v63, %v3840_v54  ;;  %3533 = vst.msk [vmem:[%s7846_s10 + $0xc8] sm:$0xff] %vm3507_vm3, %v3500_v41  ;;  %v3928_v1 = vpop.permute.xlu0 %3927  ;;  %4423 = vrot.lane.b32.xlu1 %v12700_v4, %s7708_s18  ;;  %v12701_v63 = vld [vmem:[#allocation11_spill] sm:$0xff]  ;;  %v12704_v54 = vld [vmem:[#allocation12_spill] sm:$0xff] }
 0x42b   : > { %4033 = vst.msk [vmem:[%s7846_s10 + $0xd8] sm:$0xff] %vm4005_vm8, %v4000_v25  ;;  %v3440_v9 = vpop.permute.xlu1 %3439  ;;  %4425 = vrot.lane.b32.xlu0 %v12701_v63, %s7708_s18  ;;  %v4313_v25 = vld [vmem:[%s7846_s10 + $0x10] sm:$0xff] }
 0x42c   : > { %v3505_v52 = vadd.f32 %v3440_v9, %v3345_v37  ;;  %v12705_v37 = vld [vmem:[#allocation14_spill] sm:$0xff] }
 0x42d   : > { %v3837_v29 = vld [vmem:[%s7846_s10 + $0xc0] sm:$0xff]  ;;  %v3442_v39 = vpop.permute.xlu0 %3441  ;;  %4921 = vrot.lane.b32.xlu1 %v12702_v44, %s7709_s19  ;;  %v12709_v44 = vld [vmem:[#allocation25_spill] sm:$0xff] }
 0x42e   : > { %v3997_v42 = vadd.f32 %v3926_v15, %v3837_v29  ;;  %3538 = vst.msk [vmem:[%s7846_s10 + $0xf0] sm:$0xff] %vm3507_vm3, %v3505_v52  ;;  %v3506_v59 = vadd.f32 %v3442_v39, %v3346_v22  ;;  %v12706_v29 = vld [vmem:[#allocation20_spill] sm:$0xff]  ;;  %v4314_v22 = vld [vmem:[%s7846_s10 + $0x18] sm:$0xff] }
 0x42f   : > { %v3938_v55 = vpop.permute.xlu1 %3937  ;;  %4923 = vrot.lane.b32.xlu0 %v12703_v48, %s7709_s19  ;;  %v12710_v48 = vld [vmem:[#allocation26_spill] sm:$0xff] }
 0x430   : > { %v3838_v11 = vld [vmem:[%s7846_s10 + $0xc8] sm:$0xff]  ;;  %4030 = vst.msk [vmem:[%s7846_s10 + $0xc0] sm:$0xff] %vm4005_vm8, %v3997_v42 }
 0x431   : > { %v3998_v60 = vadd.f32 %v3928_v1, %v3838_v11  ;;  %3539 = vst.msk [vmem:[%s7846_s10 + $0xf8] sm:$0xff] %vm3507_vm3, %v3506_v59  ;;  %v3940_v7 = vpop.permute.xlu0 %3939  ;;  %4435 = vrot.lane.b32.xlu1 %v12704_v54, %s7708_s18  ;;  %v4317_v54 = vld [vmem:[%s7846_s10 + $0x30] sm:$0xff] }
 0x433   : > { %4031 = vst.msk [vmem:[%s7846_s10 + $0xc8] sm:$0xff] %vm4005_vm8, %v3998_v60  ;;  %v3436_v53 = vpop.permute.xlu1 %3435  ;;  %4437 = vrot.lane.b32.xlu0 %v12705_v37, %s7708_s18  ;;  %v12707_v60 = vld [vmem:[#allocation27_spill] sm:$0xff]  ;;  %v4318_v37 = vld [vmem:[%s7846_s10 + $0x38] sm:$0xff] }
 0x434   : > { %v3503_v56 = vadd.f32 %v3436_v53, %v3343_v16  ;;  %v4311_v53 = vld [vmem:[%s7846_s10] sm:$0xff] }
 0x435   : > { %v3843_v2 = vld [vmem:[%s7846_s10 + $0xf0] sm:$0xff]  ;;  %v3438_v58 = vpop.permute.xlu0 %3437  ;;  %4933 = vrot.lane.b32.xlu1 %v12706_v29, %s7709_s19 }
 0x436   : > { %v4003_v38 = vadd.f32 %v3938_v55, %v3843_v2  ;;  %3536 = vst.msk [vmem:[%s7846_s10 + $0xe0] sm:$0xff] %vm3507_vm3, %v3503_v56  ;;  %v3504_v61 = vadd.f32 %v3438_v58, %v3344_v49  ;;  %v4312_v49 = vld [vmem:[%s7846_s10 + $0x8] sm:$0xff] }
 0x437   : > { %v3934_v14 = vpop.permute.xlu1 %3933  ;;  %4935 = vrot.lane.b32.xlu0 %v12707_v60, %s7709_s19 }
 0x438   : > { %v3844_v46 = vld [vmem:[%s7846_s10 + $0xf8] sm:$0xff]  ;;  %4036 = vst.msk [vmem:[%s7846_s10 + $0xf0] sm:$0xff] %vm4005_vm8, %v4003_v38 }
 0x439   : > { %v4004_v41 = vadd.f32 %v3940_v7, %v3844_v46  ;;  %3537 = vst.msk [vmem:[%s7846_s10 + $0xe8] sm:$0xff] %vm3507_vm3, %v3504_v61  ;;  %v3936_v15 = vpop.permute.xlu0 %3935  ;;  %v12708_v7 = vld [vmem:[#allocation13_spill] sm:$0xff] }
 0x43a   : > { %4431 = vrot.lane.b32.xlu1 %v12708_v7, %s7708_s18  ;;  %v4316_v7 = vld [vmem:[%s7846_s10 + $0x28] sm:$0xff] }
 0x43b   : > { %4037 = vst.msk [vmem:[%s7846_s10 + $0xf8] sm:$0xff] %vm4005_vm8, %v4004_v41  ;;  %v4380_v1 = vpop.permute.xlu1 %4379  ;;  %4433 = vrot.lane.b32.xlu0 %v11091_v57, %s7708_s18 }
 0x43c   : > { %v4473_v9 = vadd.f32 %v4380_v1, %v4313_v25 }
 0x43d   : > { %v3841_v52 = vld [vmem:[%s7846_s10 + $0xe0] sm:$0xff]  ;;  %v4382_v39 = vpop.permute.xlu0 %4381 }
 0x43e   : > { %v4001_v42 = vadd.f32 %v3934_v14, %v3841_v52  ;;  %4506 = vst.msk [vmem:[%s7846_s10 + $0x10] sm:$0xff] %vm4503_vm1, %v4473_v9  ;;  %v4474_v59 = vadd.f32 %v4382_v39, %v4314_v22  ;;  %4929 = vrot.lane.b32.xlu1 %v12709_v44, %s7709_s19  ;;  %v12714_v44 = vld [vmem:[#allocation29_spill] sm:$0xff] }
 0x43f   : > { %v4878_v55 = vpop.permute.xlu1 %4877  ;;  %4931 = vrot.lane.b32.xlu0 %v12710_v48, %s7709_s19 }
 0x440   : > { %v3842_v11 = vld [vmem:[%s7846_s10 + $0xe8] sm:$0xff]  ;;  %4034 = vst.msk [vmem:[%s7846_s10 + $0xe0] sm:$0xff] %vm4005_vm8, %v4001_v42 }
 0x441   : > { %v4002_v4 = vadd.f32 %v3936_v15, %v3842_v11  ;;  %4507 = vst.msk [vmem:[%s7846_s10 + $0x18] sm:$0xff] %vm4503_vm1, %v4474_v59  ;;  %v4880_v16 = vpop.permute.xlu0 %4879  ;;  %v4315_v59 = vld [vmem:[%s7846_s10 + $0x20] sm:$0xff] }
 0x442   : > { %5375 = vrot.lane.b32.xlu1 %v11102_v20, %s7710_s20 }
 0x443   : > { %4035 = vst.msk [vmem:[%s7846_s10 + $0xe8] sm:$0xff] %vm4005_vm8, %v4002_v4  ;;  %v4376_v63 = vpop.permute.xlu1 %4375  ;;  %5377 = vrot.lane.b32.xlu0 %v11118_v51, %s7710_s20  ;;  %v12711_v51 = vld [vmem:[#allocation41_spill] sm:$0xff]  ;;  %v12713_v4 = vld [vmem:[#allocation15_spill] sm:$0xff] }
 0x444   : > { %v4471_v56 = vadd.f32 %v4376_v63, %v4311_v53 }
 0x445   : > { %v4811_v2 = vld [vmem:[%s7846_s10 + $0x10] sm:$0xff]  ;;  %v4378_v58 = vpop.permute.xlu0 %4377 }
 0x446   : > { %v4971_v38 = vadd.f32 %v4878_v55, %v4811_v2  ;;  %4504 = vst.msk [vmem:[%s7846_s10] sm:$0xff] %vm4503_vm1, %v4471_v56  ;;  %v4472_v61 = vadd.f32 %v4378_v58, %v4312_v49  ;;  %5873 = vrot.lane.b32.xlu1 %v11108_v3, %s7711_s23  ;;  %v12712_v3 = vld [vmem:[#allocation28_spill] sm:$0xff] }
 0x447   : > { %v4874_v14 = vpop.permute.xlu1 %4873  ;;  %5875 = vrot.lane.b32.xlu0 %v12711_v51, %s7711_s23  ;;  %v4321_v58 = vld [vmem:[%s7846_s10 + $0x50] sm:$0xff] }
 0x448   : > { %v4812_v46 = vld [vmem:[%s7846_s10 + $0x18] sm:$0xff]  ;;  %5004 = vst.msk [vmem:[%s7846_s10 + $0x10] sm:$0xff] %vm5001_vm13, %v4971_v38 }
 0x449   : > { %v4972_v57 = vadd.f32 %v4880_v16, %v4812_v46  ;;  %4505 = vst.msk [vmem:[%s7846_s10 + $0x8] sm:$0xff] %vm4503_vm1, %v4472_v61  ;;  %v4876_v41 = vpop.permute.xlu0 %4875 }
 0x44a   : > { %5371 = vrot.lane.b32.xlu1 %v12712_v3, %s7710_s20 }
 0x44b   : > { %5005 = vst.msk [vmem:[%s7846_s10 + $0x18] sm:$0xff] %vm5001_vm13, %v4972_v57  ;;  %v4388_v15 = vpop.permute.xlu1 %4387  ;;  %5373 = vrot.lane.b32.xlu0 %v11127_v18, %s7710_s20 }
 0x44c   : > { %v4477_v25 = vadd.f32 %v4388_v15, %v4317_v54  ;;  %v12715_v15 = vld [vmem:[#allocation33_spill] sm:$0xff] }
 0x44d   : > { %v4809_v1 = vld [vmem:[%s7846_s10] sm:$0xff]  ;;  %v4390_v20 = vpop.permute.xlu0 %4389 }
 0x44e   : > { %v4969_v9 = vadd.f32 %v4874_v14, %v4809_v1  ;;  %4510 = vst.msk [vmem:[%s7846_s10 + $0x30] sm:$0xff] %vm4503_vm1, %v4477_v25  ;;  %v4478_v52 = vadd.f32 %v4390_v20, %v4318_v37  ;;  %5869 = vrot.lane.b32.xlu1 %v12713_v4, %s7711_s23  ;;  %v4322_v14 = vld [vmem:[%s7846_s10 + $0x58] sm:$0xff]  ;;  %v4319_v1 = vld [vmem:[%s7846_s10 + $0x40] sm:$0xff] }
 0x44f   : > { %v4886_v22 = vpop.permute.xlu1 %4885  ;;  %5871 = vrot.lane.b32.xlu0 %v12714_v44, %s7711_s23  ;;  %v12719_v44 = vld [vmem:[#allocation37_spill] sm:$0xff] }
 0x450   : > { %v4810_v29 = vld [vmem:[%s7846_s10 + $0x8] sm:$0xff]  ;;  %5002 = vst.msk [vmem:[%s7846_s10] sm:$0xff] %vm5001_vm13, %v4969_v9 }
 0x451   : > { %v4970_v39 = vadd.f32 %v4876_v41, %v4810_v29  ;;  %4511 = vst.msk [vmem:[%s7846_s10 + $0x38] sm:$0xff] %vm4503_vm1, %v4478_v52  ;;  %v4888_v42 = vpop.permute.xlu0 %4887  ;;  %v12717_v52 = vld [vmem:[#allocation31_spill] sm:$0xff] }
 0x452   : > { %5383 = vrot.lane.b32.xlu1 %v11138_v45, %s7710_s20  ;;  %v4320_v29 = vld [vmem:[%s7846_s10 + $0x48] sm:$0xff] }
 0x453   : > { %5003 = vst.msk [vmem:[%s7846_s10 + $0x8] sm:$0xff] %vm5001_vm13, %v4970_v39  ;;  %v4384_v11 = vpop.permute.xlu1 %4383  ;;  %5385 = vrot.lane.b32.xlu0 %v11154_v32, %s7710_s20 }
 0x454   : > { %v4475_v55 = vadd.f32 %v4384_v11, %v4315_v59  ;;  %v12718_v59 = vld [vmem:[#allocation34_spill] sm:$0xff] }
 0x455   : > { %v4815_v60 = vld [vmem:[%s7846_s10 + $0x30] sm:$0xff]  ;;  %v4386_v16 = vpop.permute.xlu0 %4385 }
 0x456   : > { %v4975_v53 = vadd.f32 %v4886_v22, %v4815_v60  ;;  %4508 = vst.msk [vmem:[%s7846_s10 + $0x20] sm:$0xff] %vm4503_vm1, %v4475_v55  ;;  %v4476_v63 = vadd.f32 %v4386_v16, %v4316_v7  ;;  %5881 = vrot.lane.b32.xlu1 %v11144_v34, %s7711_s23  ;;  %v12716_v34 = vld [vmem:[#allocation30_spill] sm:$0xff]  ;;  %v4325_v55 = vld [vmem:[%s7846_s10 + $0x70] sm:$0xff]  ;;  %v4326_v16 = vld [vmem:[%s7846_s10 + $0x78] sm:$0xff] }
 0x457   : > { %v4882_v2 = vpop.permute.xlu1 %4881  ;;  %5883 = vrot.lane.b32.xlu0 %v12715_v15, %s7711_s23  ;;  %v12722_v15 = vld [vmem:[#allocation16_spill] sm:$0xff] }
 0x458   : > { %v4816_v56 = vld [vmem:[%s7846_s10 + $0x38] sm:$0xff]  ;;  %5008 = vst.msk [vmem:[%s7846_s10 + $0x30] sm:$0xff] %vm5001_vm13, %v4975_v53 }
 0x459   : > { %v4976_v18 = vadd.f32 %v4888_v42, %v4816_v56  ;;  %4509 = vst.msk [vmem:[%s7846_s10 + $0x28] sm:$0xff] %vm4503_vm1, %v4476_v63  ;;  %v4884_v49 = vpop.permute.xlu0 %4883 }
 0x45a   : > { %5379 = vrot.lane.b32.xlu1 %v12716_v34, %s7710_s20  ;;  %v4329_v34 = vld [vmem:[%s7846_s10 + $0x90] sm:$0xff] }
 0x45b   : > { %5009 = vst.msk [vmem:[%s7846_s10 + $0x38] sm:$0xff] %vm5001_vm13, %v4976_v18  ;;  %v4396_v38 = vpop.permute.xlu1 %4395  ;;  %5381 = vrot.lane.b32.xlu0 %v11163_v8, %s7710_s20 }
 0x45c   : > { %v4481_v61 = vadd.f32 %v4396_v38, %v4321_v58 }
 0x45d   : > { %v4813_v46 = vld [vmem:[%s7846_s10 + $0x20] sm:$0xff]  ;;  %v4398_v48 = vpop.permute.xlu0 %4397 }
 0x45e   : > { %v4973_v45 = vadd.f32 %v4882_v2, %v4813_v46  ;;  %4514 = vst.msk [vmem:[%s7846_s10 + $0x50] sm:$0xff] %vm4503_vm1, %v4481_v61  ;;  %v4482_v57 = vadd.f32 %v4398_v48, %v4322_v14  ;;  %5877 = vrot.lane.b32.xlu1 %v12717_v52, %s7711_s23  ;;  %v12721_v46 = vld [vmem:[#allocation36_spill] sm:$0xff]  ;;  %v4324_v14 = vld [vmem:[%s7846_s10 + $0x68] sm:$0xff] }
 0x45f   : > { %v4894_v54 = vpop.permute.xlu1 %4893  ;;  %5879 = vrot.lane.b32.xlu0 %v12718_v59, %s7711_s23 }
 0x460   : > { %v4814_v41 = vld [vmem:[%s7846_s10 + $0x28] sm:$0xff]  ;;  %5006 = vst.msk [vmem:[%s7846_s10 + $0x20] sm:$0xff] %vm5001_vm13, %v4973_v45 }
 0x461   : > { %v4974_v32 = vadd.f32 %v4884_v49, %v4814_v41  ;;  %4515 = vst.msk [vmem:[%s7846_s10 + $0x58] sm:$0xff] %vm4503_vm1, %v4482_v57  ;;  %v4896_v25 = vpop.permute.xlu0 %4895  ;;  %v4323_v49 = vld [vmem:[%s7846_s10 + $0x60] sm:$0xff] }
 0x462   : > { %5391 = vrot.lane.b32.xlu1 %v11174_v19, %s7710_s20 }
 0x463   : > { %5007 = vst.msk [vmem:[%s7846_s10 + $0x28] sm:$0xff] %vm5001_vm13, %v4974_v32  ;;  %v4392_v37 = vpop.permute.xlu1 %4391  ;;  %5393 = vrot.lane.b32.xlu0 %v11190_v17, %s7710_s20 }
 0x464   : > { %v4479_v20 = vadd.f32 %v4392_v37, %v4319_v1 }
 0x465   : > { %v4819_v9 = vld [vmem:[%s7846_s10 + $0x50] sm:$0xff]  ;;  %v4394_v22 = vpop.permute.xlu0 %4393 }
 0x466   : > { %v4979_v51 = vadd.f32 %v4894_v54, %v4819_v9  ;;  %4512 = vst.msk [vmem:[%s7846_s10 + $0x40] sm:$0xff] %vm4503_vm1, %v4479_v20  ;;  %v4480_v39 = vadd.f32 %v4394_v22, %v4320_v29  ;;  %5889 = vrot.lane.b32.xlu1 %v11180_v62, %s7711_s23  ;;  %v12720_v62 = vld [vmem:[#allocation21_spill] sm:$0xff] }
 0x467   : > { %v4890_v42 = vpop.permute.xlu1 %4889  ;;  %5891 = vrot.lane.b32.xlu0 %v12719_v44, %s7711_s23  ;;  %v4330_v20 = vld [vmem:[%s7846_s10 + $0x98] sm:$0xff] }
 0x468   : > { %v4820_v3 = vld [vmem:[%s7846_s10 + $0x58] sm:$0xff]  ;;  %5012 = vst.msk [vmem:[%s7846_s10 + $0x50] sm:$0xff] %vm5001_vm13, %v4979_v51  ;;  %v12723_v51 = vld [vmem:[#allocation39_spill] sm:$0xff] }
 0x469   : > { %v4980_v8 = vadd.f32 %v4896_v25, %v4820_v3  ;;  %4513 = vst.msk [vmem:[%s7846_s10 + $0x48] sm:$0xff] %vm4503_vm1, %v4480_v39  ;;  %v4892_v11 = vpop.permute.xlu0 %4891  ;;  %v4327_v3 = vld [vmem:[%s7846_s10 + $0x80] sm:$0xff] }
 0x46a   : > { %5387 = vrot.lane.b32.xlu1 %v12720_v62, %s7710_s20  ;;  %v4334_v62 = vld [vmem:[%s7846_s10 + $0xb8] sm:$0xff] }
 0x46b   : > { %5013 = vst.msk [vmem:[%s7846_s10 + $0x58] sm:$0xff] %vm5001_vm13, %v4980_v8  ;;  %v4404_v60 = vpop.permute.xlu1 %4403  ;;  %5389 = vrot.lane.b32.xlu0 %v11199_v6, %s7710_s20 }
 0x46c   : > { %v4485_v4 = vadd.f32 %v4404_v60, %v4325_v55  ;;  %v4328_v55 = vld [vmem:[%s7846_s10 + $0x88] sm:$0xff] }
 0x46d   : > { %v4817_v7 = vld [vmem:[%s7846_s10 + $0x40] sm:$0xff]  ;;  %v4406_v53 = vpop.permute.xlu0 %4405 }
 0x46e   : > { %v4977_v19 = vadd.f32 %v4890_v42, %v4817_v7  ;;  %4518 = vst.msk [vmem:[%s7846_s10 + $0x70] sm:$0xff] %vm4503_vm1, %v4485_v4  ;;  %v4486_v63 = vadd.f32 %v4406_v53, %v4326_v16  ;;  %5885 = vrot.lane.b32.xlu1 %v12721_v46, %s7711_s23 }
 0x46f   : > { %v4902_v2 = vpop.permute.xlu1 %4901  ;;  %5887 = vrot.lane.b32.xlu0 %v12722_v15, %s7711_s23 }
 0x470   : > { %v4818_v56 = vld [vmem:[%s7846_s10 + $0x48] sm:$0xff]  ;;  %5010 = vst.msk [vmem:[%s7846_s10 + $0x40] sm:$0xff] %vm5001_vm13, %v4977_v19  ;;  %v12726_v19 = vld [vmem:[#allocation40_spill] sm:$0xff] }
 0x471   : > { %v4978_v17 = vadd.f32 %v4892_v11, %v4818_v56  ;;  %4519 = vst.msk [vmem:[%s7846_s10 + $0x78] sm:$0xff] %vm4503_vm1, %v4486_v63  ;;  %v4904_v18 = vpop.permute.xlu0 %4903  ;;  %v12725_v11 = vld [vmem:[#allocation35_spill] sm:$0xff]  ;;  %v4333_v56 = vld [vmem:[%s7846_s10 + $0xb0] sm:$0xff] }
 0x472   : > { %5399 = vrot.lane.b32.xlu1 %v11210_v5, %s7710_s20 }
 0x473   : > { %5011 = vst.msk [vmem:[%s7846_s10 + $0x48] sm:$0xff] %vm5001_vm13, %v4978_v17  ;;  %v4400_v58 = vpop.permute.xlu1 %4399  ;;  %5401 = vrot.lane.b32.xlu0 %v11226_v12, %s7710_s20 }
 0x474   : > { %v4483_v38 = vadd.f32 %v4400_v58, %v4323_v49 }
 0x475   : > { %v4823_v61 = vld [vmem:[%s7846_s10 + $0x70] sm:$0xff]  ;;  %v4402_v48 = vpop.permute.xlu0 %4401 }
 0x476   : > { %v4983_v45 = vadd.f32 %v4902_v2, %v4823_v61  ;;  %4516 = vst.msk [vmem:[%s7846_s10 + $0x60] sm:$0xff] %vm4503_vm1, %v4483_v38  ;;  %v4484_v57 = vadd.f32 %v4402_v48, %v4324_v14  ;;  %5897 = vrot.lane.b32.xlu1 %v11216_v0, %s7711_s23  ;;  %v12724_v0 = vld [vmem:[#allocation38_spill] sm:$0xff]  ;;  %v12727_v61 = vld [vmem:[#allocation32_spill] sm:$0xff] }
 0x477   : > { %v4898_v54 = vpop.permute.xlu1 %4897  ;;  %5899 = vrot.lane.b32.xlu0 %v12723_v51, %s7711_s23  ;;  %v4331_v14 = vld [vmem:[%s7846_s10 + $0xa0] sm:$0xff] }
 0x478   : > { %v4824_v41 = vld [vmem:[%s7846_s10 + $0x78] sm:$0xff]  ;;  %5016 = vst.msk [vmem:[%s7846_s10 + $0x70] sm:$0xff] %vm5001_vm13, %v4983_v45 }
 0x479   : > { %v4984_v6 = vadd.f32 %v4904_v18, %v4824_v41  ;;  %4517 = vst.msk [vmem:[%s7846_s10 + $0x68] sm:$0xff] %vm4503_vm1, %v4484_v57  ;;  %v4900_v32 = vpop.permute.xlu0 %4899  ;;  %v12729_v41 = vld [vmem:[#allocation43_spill] sm:$0xff] }
 0x47a   : > { %5395 = vrot.lane.b32.xlu1 %v12724_v0, %s7710_s20 }
 0x47b   : > { %5017 = vst.msk [vmem:[%s7846_s10 + $0x78] sm:$0xff] %vm5001_vm13, %v4984_v6  ;;  %v4412_v25 = vpop.permute.xlu1 %4411  ;;  %5397 = vrot.lane.b32.xlu0 %v11235_v35, %s7710_s20 }
 0x47c   : > { %v4489_v1 = vadd.f32 %v4412_v25, %v4329_v34 }
 0x47d   : > { %v4821_v37 = vld [vmem:[%s7846_s10 + $0x60] sm:$0xff]  ;;  %v4414_v9 = vpop.permute.xlu0 %4413 }
 0x47e   : > { %v4981_v5 = vadd.f32 %v4898_v54, %v4821_v37  ;;  %4522 = vst.msk [vmem:[%s7846_s10 + $0x90] sm:$0xff] %vm4503_vm1, %v4489_v1  ;;  %v4490_v52 = vadd.f32 %v4414_v9, %v4330_v20  ;;  %5893 = vrot.lane.b32.xlu1 %v12725_v11, %s7711_s23  ;;  %v4332_v54 = vld [vmem:[%s7846_s10 + $0xa8] sm:$0xff]  ;;  %v12730_v1 = vld [vmem:[#allocation44_spill] sm:$0xff] }
 0x47f   : > { %v4910_v22 = vpop.permute.xlu1 %4909  ;;  %5895 = vrot.lane.b32.xlu0 %v12726_v19, %s7711_s23  ;;  %v4337_v20 = vld [vmem:[%s7846_s10 + $0xd0] sm:$0xff] }
 0x480   : > { %v4822_v29 = vld [vmem:[%s7846_s10 + $0x68] sm:$0xff]  ;;  %5014 = vst.msk [vmem:[%s7846_s10 + $0x60] sm:$0xff] %vm5001_vm13, %v4981_v5 }
 0x481   : > { %v4982_v12 = vadd.f32 %v4900_v32, %v4822_v29  ;;  %4523 = vst.msk [vmem:[%s7846_s10 + $0x98] sm:$0xff] %vm4503_vm1, %v4490_v52  ;;  %v4912_v39 = vpop.permute.xlu0 %4911  ;;  %v4338_v29 = vld [vmem:[%s7846_s10 + $0xd8] sm:$0xff] }
 0x482   : > { %5407 = vrot.lane.b32.xlu1 %v11246_v26, %s7710_s20 }
 0x483   : > { %5015 = vst.msk [vmem:[%s7846_s10 + $0x68] sm:$0xff] %vm5001_vm13, %v4982_v12  ;;  %v4408_v42 = vpop.permute.xlu1 %4407  ;;  %5409 = vrot.lane.b32.xlu0 %v11262_v24, %s7710_s20 }
 0x484   : > { %v4487_v59 = vadd.f32 %v4408_v42, %v4327_v3  ;;  %v4335_v42 = vld [vmem:[%s7846_s10 + $0xc0] sm:$0xff] }
 0x485   : > { %v4827_v8 = vld [vmem:[%s7846_s10 + $0x90] sm:$0xff]  ;;  %v4410_v60 = vpop.permute.xlu0 %4409 }
 0x486   : > { %v4987_v4 = vadd.f32 %v4910_v22, %v4827_v8  ;;  %4520 = vst.msk [vmem:[%s7846_s10 + $0x80] sm:$0xff] %vm4503_vm1, %v4487_v59  ;;  %v4488_v7 = vadd.f32 %v4410_v60, %v4328_v55  ;;  %5905 = vrot.lane.b32.xlu1 %v11252_v21, %s7711_s23  ;;  %v12728_v21 = vld [vmem:[#allocation42_spill] sm:$0xff]  ;;  %v4336_v60 = vld [vmem:[%s7846_s10 + $0xc8] sm:$0xff] }
 0x487   : > { %v4906_v53 = vpop.permute.xlu1 %4905  ;;  %5907 = vrot.lane.b32.xlu0 %v12727_v61, %s7711_s23  ;;  %v12733_v55 = vld [vmem:[#allocation18_spill] sm:$0xff] }
 0x488   : > { %v4828_v16 = vld [vmem:[%s7846_s10 + $0x98] sm:$0xff]  ;;  %5020 = vst.msk [vmem:[%s7846_s10 + $0x90] sm:$0xff] %vm5001_vm13, %v4987_v4  ;;  %v4339_v61 = vld [vmem:[%s7846_s10 + $0xe0] sm:$0xff] }
 0x489   : > { %v4988_v35 = vadd.f32 %v4912_v39, %v4828_v16  ;;  %4521 = vst.msk [vmem:[%s7846_s10 + $0x88] sm:$0xff] %vm4503_vm1, %v4488_v7  ;;  %v4908_v63 = vpop.permute.xlu0 %4907  ;;  %v12731_v39 = vld [vmem:[#allocation19_spill] sm:$0xff] }
 0x48a   : > { %5403 = vrot.lane.b32.xlu1 %v12728_v21, %s7710_s20  ;;  %v12736_v21 = vld [vmem:[#allocation48_spill] sm:$0xff] }
 0x48b   : > { %5021 = vst.msk [vmem:[%s7846_s10 + $0x98] sm:$0xff] %vm5001_vm13, %v4988_v35  ;;  %v4420_v2 = vpop.permute.xlu1 %4419  ;;  %5405 = vrot.lane.b32.xlu0 %v11271_v27, %s7710_s20  ;;  %v12734_v35 = vld [vmem:[#allocation22_spill] sm:$0xff] }
 0x48c   : > { %v4493_v44 = vadd.f32 %v4420_v2, %v4333_v56  ;;  %v4341_v56 = vld [vmem:[%s7846_s10 + $0xf0] sm:$0xff] }
 0x48d   : > { %v4825_v17 = vld [vmem:[%s7846_s10 + $0x80] sm:$0xff]  ;;  %v4422_v18 = vpop.permute.xlu0 %4421 }
 0x48e   : > { %v4985_v26 = vadd.f32 %v4906_v53, %v4825_v17  ;;  %4526 = vst.msk [vmem:[%s7846_s10 + $0xb0] sm:$0xff] %vm4503_vm1, %v4493_v44  ;;  %v4494_v49 = vadd.f32 %v4422_v18, %v4334_v62  ;;  %5901 = vrot.lane.b32.xlu1 %v12729_v41, %s7711_s23  ;;  %v4342_v62 = vld [vmem:[%s7846_s10 + $0xf8] sm:$0xff] }
 0x48f   : > { %v4918_v38 = vpop.permute.xlu1 %4917  ;;  %5903 = vrot.lane.b32.xlu0 %v12730_v1, %s7711_s23  ;;  %v5310_v1 = vld [vmem:[%s7846_s10 + $0x18] sm:$0xff] }
 0x490   : > { %v4826_v58 = vld [vmem:[%s7846_s10 + $0x88] sm:$0xff]  ;;  %5018 = vst.msk [vmem:[%s7846_s10 + $0x80] sm:$0xff] %vm5001_vm13, %v4985_v26 }
 0x491   : > { %v4986_v24 = vadd.f32 %v4908_v63, %v4826_v58  ;;  %4527 = vst.msk [vmem:[%s7846_s10 + $0xb8] sm:$0xff] %vm4503_vm1, %v4494_v49  ;;  %v4920_v46 = vpop.permute.xlu0 %4919 }
 0x492   : > { %5415 = vrot.lane.b32.xlu1 %v11282_v23, %s7710_s20 }
 0x493   : > { %5019 = vst.msk [vmem:[%s7846_s10 + $0x88] sm:$0xff] %vm5001_vm13, %v4986_v24  ;;  %v4416_v48 = vpop.permute.xlu1 %4415  ;;  %5417 = vrot.lane.b32.xlu0 %v11298_v43, %s7710_s20 }
 0x494   : > { %v4491_v45 = vadd.f32 %v4416_v48, %v4331_v14  ;;  %v4340_v14 = vld [vmem:[%s7846_s10 + $0xe8] sm:$0xff] }
 0x495   : > { %v4831_v57 = vld [vmem:[%s7846_s10 + $0xb0] sm:$0xff]  ;;  %v4418_v15 = vpop.permute.xlu0 %4417 }
 0x496   : > { %v4991_v6 = vadd.f32 %v4918_v38, %v4831_v57  ;;  %4524 = vst.msk [vmem:[%s7846_s10 + $0xa0] sm:$0xff] %vm4503_vm1, %v4491_v45  ;;  %v4492_v32 = vadd.f32 %v4418_v15, %v4332_v54  ;;  %5913 = vrot.lane.b32.xlu1 %v11288_v50, %s7711_s23  ;;  %v12732_v50 = vld [vmem:[#allocation17_spill] sm:$0xff] }
 0x497   : > { %v4914_v25 = vpop.permute.xlu1 %4913  ;;  %5915 = vrot.lane.b32.xlu0 %v12731_v39, %s7711_s23  ;;  %v12741_v39 = vld [vmem:[#allocation49_spill] sm:$0xff] }
 0x498   : > { %v4832_v34 = vld [vmem:[%s7846_s10 + $0xb8] sm:$0xff]  ;;  %5024 = vst.msk [vmem:[%s7846_s10 + $0xb0] sm:$0xff] %vm5001_vm13, %v4991_v6  ;;  %v5309_v6 = vld [vmem:[%s7846_s10 + $0x10] sm:$0xff] }
 0x499   : > { %v4992_v27 = vadd.f32 %v4920_v46, %v4832_v34  ;;  %4525 = vst.msk [vmem:[%s7846_s10 + $0xa8] sm:$0xff] %vm4503_vm1, %v4492_v32  ;;  %v4916_v37 = vpop.permute.xlu0 %4915 }
 0x49a   : > { %5411 = vrot.lane.b32.xlu1 %v12732_v50, %s7710_s20 }
 0x49b   : > { %5025 = vst.msk [vmem:[%s7846_s10 + $0xb8] sm:$0xff] %vm5001_vm13, %v4992_v27  ;;  %v4428_v9 = vpop.permute.xlu1 %4427  ;;  %5413 = vrot.lane.b32.xlu0 %v11307_v31, %s7710_s20 }
 0x49c   : > { %v4497_v5 = vadd.f32 %v4428_v9, %v4337_v20 }
 0x49d   : > { %v4829_v52 = vld [vmem:[%s7846_s10 + $0xa0] sm:$0xff]  ;;  %v4430_v22 = vpop.permute.xlu0 %4429 }
 0x49e   : > { %v4989_v23 = vadd.f32 %v4914_v25, %v4829_v52  ;;  %4530 = vst.msk [vmem:[%s7846_s10 + $0xd0] sm:$0xff] %vm4503_vm1, %v4497_v5  ;;  %v4498_v51 = vadd.f32 %v4430_v22, %v4338_v29  ;;  %5909 = vrot.lane.b32.xlu1 %v12733_v55, %s7711_s23  ;;  %v12737_v25 = vld [vmem:[#allocation45_spill] sm:$0xff]  ;;  %v12738_v5 = vld [vmem:[#allocation47_spill] sm:$0xff]  ;;  %v12739_v52 = vld [vmem:[#allocation50_spill] sm:$0xff] }
 0x49f   : > { %v4926_v0 = vpop.permute.xlu1 %4925  ;;  %5911 = vrot.lane.b32.xlu0 %v12734_v35, %s7711_s23  ;;  %v5307_v22 = vld [vmem:[%s7846_s10] sm:$0xff] }
 0x4a0   : > { %v4830_v12 = vld [vmem:[%s7846_s10 + $0xa8] sm:$0xff]  ;;  %5022 = vst.msk [vmem:[%s7846_s10 + $0xa0] sm:$0xff] %vm5001_vm13, %v4989_v23 }
 0x4a1   : > { %v4990_v43 = vadd.f32 %v4916_v37, %v4830_v12  ;;  %4531 = vst.msk [vmem:[%s7846_s10 + $0xd8] sm:$0xff] %vm4503_vm1, %v4498_v51  ;;  %v4928_v3 = vpop.permute.xlu0 %4927  ;;  %v12740_v51 = vld [vmem:[#allocation52_spill] sm:$0xff] }
 0x4a2   : > { %5423 = vrot.lane.b32.xlu1 %v11318_v40, %s7710_s20 }
 0x4a3   : > { %5023 = vst.msk [vmem:[%s7846_s10 + $0xa8] sm:$0xff] %vm5001_vm13, %v4990_v43  ;;  %v4424_v59 = vpop.permute.xlu1 %4423  ;;  %5425 = vrot.lane.b32.xlu0 %v11334_v10, %s7710_s20  ;;  %v5308_v43 = vld [vmem:[%s7846_s10 + $0x8] sm:$0xff] }
 0x4a4   : > { %v4495_v8 = vadd.f32 %v4424_v59, %v4335_v42 }
 0x4a5   : > { %v4835_v11 = vld [vmem:[%s7846_s10 + $0xd0] sm:$0xff]  ;;  %v4426_v4 = vpop.permute.xlu0 %4425 }
 0x4a6   : > { %v4995_v7 = vadd.f32 %v4926_v0, %v4835_v11  ;;  %4528 = vst.msk [vmem:[%s7846_s10 + $0xc0] sm:$0xff] %vm4503_vm1, %v4495_v8  ;;  %v4496_v16 = vadd.f32 %v4426_v4, %v4336_v60  ;;  %5419 = vrot.lane.b32.xlu1 %v11326_v13, %s7710_s20  ;;  %v12735_v13 = vld [vmem:[#allocation46_spill] sm:$0xff]  ;;  %v12742_v11 = vld [vmem:[#allocation51_spill] sm:$0xff]  ;;  %v5313_v4 = vld [vmem:[%s7846_s10 + $0x30] sm:$0xff] }
 0x4a7   : > { %v4922_v19 = vpop.permute.xlu1 %4921  ;;  %5421 = vrot.lane.b32.xlu0 %v11343_v47, %s7710_s20 }
 0x4a8   : > { %v4836_v53 = vld [vmem:[%s7846_s10 + $0xd8] sm:$0xff]  ;;  %5028 = vst.msk [vmem:[%s7846_s10 + $0xd0] sm:$0xff] %vm5001_vm13, %v4995_v7 }
 0x4a9   : > { %v4996_v31 = vadd.f32 %v4928_v3, %v4836_v53  ;;  %4529 = vst.msk [vmem:[%s7846_s10 + $0xc8] sm:$0xff] %vm4503_vm1, %v4496_v16  ;;  %v4924_v63 = vpop.permute.xlu0 %4923 }
 0x4aa   : > { %5917 = vrot.lane.b32.xlu1 %v12735_v13, %s7711_s23 }
 0x4ab   : > { %5029 = vst.msk [vmem:[%s7846_s10 + $0xd8] sm:$0xff] %vm5001_vm13, %v4996_v31  ;;  %v4436_v2 = vpop.permute.xlu1 %4435  ;;  %5919 = vrot.lane.b32.xlu0 %v12736_v21, %s7711_s23 }
 0x4ac   : > { %v4501_v44 = vadd.f32 %v4436_v2, %v4341_v56 }
 0x4ad   : > { %v4833_v17 = vld [vmem:[%s7846_s10 + $0xc0] sm:$0xff]  ;;  %v4438_v18 = vpop.permute.xlu0 %4437 }
 0x4ae   : > { %v4993_v40 = vadd.f32 %v4922_v19, %v4833_v17  ;;  %4534 = vst.msk [vmem:[%s7846_s10 + $0xf0] sm:$0xff] %vm4503_vm1, %v4501_v44  ;;  %v4502_v26 = vadd.f32 %v4438_v18, %v4342_v62  ;;  %5431 = vrot.lane.b32.xlu1 %v11354_v30, %s7710_s20  ;;  %v5314_v19 = vld [vmem:[%s7846_s10 + $0x38] sm:$0xff]  ;;  %v5311_v62 = vld [vmem:[%s7846_s10 + $0x20] sm:$0xff] }
 0x4af   : > { %v4934_v58 = vpop.permute.xlu1 %4933  ;;  %5433 = vrot.lane.b32.xlu0 %v11370_v28, %s7710_s20 }
 0x4b0   : > { %v4834_v49 = vld [vmem:[%s7846_s10 + $0xc8] sm:$0xff]  ;;  %5026 = vst.msk [vmem:[%s7846_s10 + $0xc0] sm:$0xff] %vm5001_vm13, %v4993_v40 }
 0x4b1   : > { %v4994_v10 = vadd.f32 %v4924_v63, %v4834_v49  ;;  %4535 = vst.msk [vmem:[%s7846_s10 + $0xf8] sm:$0xff] %vm4503_vm1, %v4502_v26  ;;  %v4936_v38 = vpop.permute.xlu0 %4935  ;;  %v5312_v49 = vld [vmem:[%s7846_s10 + $0x28] sm:$0xff] }
 0x4b2   : > { %5427 = vrot.lane.b32.xlu1 %v11362_v36, %s7710_s20 }
 0x4b3   : > { %5027 = vst.msk [vmem:[%s7846_s10 + $0xc8] sm:$0xff] %vm5001_vm13, %v4994_v10  ;;  %v4432_v24 = vpop.permute.xlu1 %4431  ;;  %5429 = vrot.lane.b32.xlu0 %v11379_v33, %s7710_s20 }
 0x4b4   : > { %v4499_v47 = vadd.f32 %v4432_v24, %v4339_v61 }
 0x4b5   : > { %v4839_v46 = vld [vmem:[%s7846_s10 + $0xf0] sm:$0xff]  ;;  %v4434_v48 = vpop.permute.xlu0 %4433 }
 0x4b6   : > { %v4999_v45 = vadd.f32 %v4934_v58, %v4839_v46  ;;  %4532 = vst.msk [vmem:[%s7846_s10 + $0xe0] sm:$0xff] %vm4503_vm1, %v4499_v47  ;;  %v4500_v57 = vadd.f32 %v4434_v48, %v4340_v14  ;;  %5921 = vrot.lane.b32.xlu1 %v12737_v25, %s7711_s23  ;;  %v5317_v47 = vld [vmem:[%s7846_s10 + $0x50] sm:$0xff] }
 0x4b7   : > { %v4930_v54 = vpop.permute.xlu1 %4929  ;;  %5923 = vrot.lane.b32.xlu0 %v12738_v5, %s7711_s23 }
 0x4b8   : > { %v4840_v41 = vld [vmem:[%s7846_s10 + $0xf8] sm:$0xff]  ;;  %5032 = vst.msk [vmem:[%s7846_s10 + $0xf0] sm:$0xff] %vm5001_vm13, %v4999_v45 }
 0x4b9   : > { %v5000_v15 = vadd.f32 %v4936_v38, %v4840_v41  ;;  %4533 = vst.msk [vmem:[%s7846_s10 + $0xe8] sm:$0xff] %vm4503_vm1, %v4500_v57  ;;  %v4932_v30 = vpop.permute.xlu0 %4931  ;;  %v5318_v45 = vld [vmem:[%s7846_s10 + $0x58] sm:$0xff] }
 0x4ba   : > { %5925 = vrot.lane.b32.xlu1 %v12739_v52, %s7711_s23 }
 0x4bb   : > { %5033 = vst.msk [vmem:[%s7846_s10 + $0xf8] sm:$0xff] %vm5001_vm13, %v5000_v15  ;;  %v5376_v32 = vpop.permute.xlu1 %5375  ;;  %5927 = vrot.lane.b32.xlu0 %v12740_v51, %s7711_s23 }
 0x4bc   : > { %v5469_v28 = vadd.f32 %v5376_v32, %v5309_v6 }
 0x4bd   : > { %v4837_v34 = vld [vmem:[%s7846_s10 + $0xe0] sm:$0xff]  ;;  %v5378_v36 = vpop.permute.xlu0 %5377 }
 0x4be   : > { %v4997_v27 = vadd.f32 %v4930_v54, %v4837_v34  ;;  %5502 = vst.msk [vmem:[%s7846_s10 + $0x10] sm:$0xff] %vm5499_vm5, %v5469_v28  ;;  %v5470_v37 = vadd.f32 %v5378_v36, %v5310_v1  ;;  %5929 = vrot.lane.b32.xlu1 %v12741_v39, %s7711_s23  ;;  %v5315_v28 = vld [vmem:[%s7846_s10 + $0x40] sm:$0xff]  ;;  %v5316_v36 = vld [vmem:[%s7846_s10 + $0x48] sm:$0xff] }
 0x4bf   : > { %v5874_v9 = vpop.permute.xlu1 %5873  ;;  %5931 = vrot.lane.b32.xlu0 %v12742_v11, %s7711_s23 }
 0x4c0   : > { %v4838_v20 = vld [vmem:[%s7846_s10 + $0xe8] sm:$0xff]  ;;  %5030 = vst.msk [vmem:[%s7846_s10 + $0xe0] sm:$0xff] %vm5001_vm13, %v4997_v27 }
 0x4c1   : > { %v4998_v33 = vadd.f32 %v4932_v30, %v4838_v20  ;;  %5503 = vst.msk [vmem:[%s7846_s10 + $0x18] sm:$0xff] %vm5499_vm5, %v5470_v37  ;;  %v5876_v29 = vpop.permute.xlu0 %5875 }
 0x4c3   : > { %5031 = vst.msk [vmem:[%s7846_s10 + $0xe8] sm:$0xff] %vm5001_vm13, %v4998_v33  ;;  %v5372_v23 = vpop.permute.xlu1 %5371 }
 0x4c4   : > { %v5467_v12 = vadd.f32 %v5372_v23, %v5307_v22 }
 0x4c5   : > { %v5807_v0 = vld [vmem:[%s7846_s10 + $0x10] sm:$0xff]  ;;  %v5374_v50 = vpop.permute.xlu0 %5373 }
 0x4c6   : > { %v5967_v3 = vadd.f32 %v5874_v9, %v5807_v0  ;;  %5500 = vst.msk [vmem:[%s7846_s10] sm:$0xff] %vm5499_vm5, %v5467_v12  ;;  %v5468_v42 = vadd.f32 %v5374_v50, %v5308_v43  ;;  %v5322_v12 = vld [vmem:[%s7846_s10 + $0x78] sm:$0xff] }
 0x4c7   : > { %v5870_v8 = vpop.permute.xlu1 %5869 }
 0x4c8   : > { %v5808_v59 = vld [vmem:[%s7846_s10 + $0x18] sm:$0xff]  ;;  %6000 = vst.msk [vmem:[%s7846_s10 + $0x10] sm:$0xff] %vm5997_vm12, %v5967_v3 }
 0x4c9   : > { %v5968_v55 = vadd.f32 %v5876_v29, %v5808_v59  ;;  %5501 = vst.msk [vmem:[%s7846_s10 + $0x8] sm:$0xff] %vm5499_vm5, %v5468_v42  ;;  %v5872_v60 = vpop.permute.xlu0 %5871  ;;  %v5321_v29 = vld [vmem:[%s7846_s10 + $0x70] sm:$0xff] }
 0x4cb   : > { %6001 = vst.msk [vmem:[%s7846_s10 + $0x18] sm:$0xff] %vm5997_vm12, %v5968_v55  ;;  %v5384_v7 = vpop.permute.xlu1 %5383 }
 0x4cc   : > { %v5473_v16 = vadd.f32 %v5384_v7, %v5313_v4  ;;  %v5320_v4 = vld [vmem:[%s7846_s10 + $0x68] sm:$0xff] }
 0x4cd   : > { %v5805_v53 = vld [vmem:[%s7846_s10] sm:$0xff]  ;;  %v5386_v35 = vpop.permute.xlu0 %5385 }
 0x4ce   : > { %v5965_v31 = vadd.f32 %v5870_v8, %v5805_v53  ;;  %5506 = vst.msk [vmem:[%s7846_s10 + $0x30] sm:$0xff] %vm5499_vm5, %v5473_v16  ;;  %v5474_v63 = vadd.f32 %v5386_v35, %v5314_v19  ;;  %v5319_v8 = vld [vmem:[%s7846_s10 + $0x60] sm:$0xff] }
 0x4cf   : > { %v5882_v2 = vpop.permute.xlu1 %5881 }
 0x4d0   : > { %v5806_v56 = vld [vmem:[%s7846_s10 + $0x8] sm:$0xff]  ;;  %5998 = vst.msk [vmem:[%s7846_s10] sm:$0xff] %vm5997_vm12, %v5965_v31 }
 0x4d1   : > { %v5966_v44 = vadd.f32 %v5872_v60, %v5806_v56  ;;  %5507 = vst.msk [vmem:[%s7846_s10 + $0x38] sm:$0xff] %vm5499_vm5, %v5474_v63  ;;  %v5884_v17 = vpop.permute.xlu0 %5883  ;;  %v5325_v56 = vld [vmem:[%s7846_s10 + $0x90] sm:$0xff] }
 0x4d3   : > { %5999 = vst.msk [vmem:[%s7846_s10 + $0x8] sm:$0xff] %vm5997_vm12, %v5966_v44  ;;  %v5380_v18 = vpop.permute.xlu1 %5379 }
 0x4d4   : > { %v5471_v40 = vadd.f32 %v5380_v18, %v5311_v62  ;;  %v5326_v62 = vld [vmem:[%s7846_s10 + $0x98] sm:$0xff] }
 0x4d5   : > { %v5811_v26 = vld [vmem:[%s7846_s10 + $0x30] sm:$0xff]  ;;  %v5382_v58 = vpop.permute.xlu0 %5381 }
 0x4d6   : > { %v5971_v10 = vadd.f32 %v5882_v2, %v5811_v26  ;;  %5504 = vst.msk [vmem:[%s7846_s10 + $0x20] sm:$0xff] %vm5499_vm5, %v5471_v40  ;;  %v5472_v13 = vadd.f32 %v5382_v58, %v5312_v49 }
 0x4d7   : > { %v5878_v61 = vpop.permute.xlu1 %5877 }
 0x4d8   : > { %v5812_v38 = vld [vmem:[%s7846_s10 + $0x38] sm:$0xff]  ;;  %6004 = vst.msk [vmem:[%s7846_s10 + $0x30] sm:$0xff] %vm5997_vm12, %v5971_v10 }
 0x4d9   : > { %v5972_v24 = vadd.f32 %v5884_v17, %v5812_v38  ;;  %5505 = vst.msk [vmem:[%s7846_s10 + $0x28] sm:$0xff] %vm5499_vm5, %v5472_v13  ;;  %v5880_v21 = vpop.permute.xlu0 %5879  ;;  %v5323_v38 = vld [vmem:[%s7846_s10 + $0x80] sm:$0xff] }
 0x4db   : > { %6005 = vst.msk [vmem:[%s7846_s10 + $0x38] sm:$0xff] %vm5997_vm12, %v5972_v24  ;;  %v5392_v46 = vpop.permute.xlu1 %5391 }
 0x4dc   : > { %v5477_v14 = vadd.f32 %v5392_v46, %v5317_v47  ;;  %v5324_v47 = vld [vmem:[%s7846_s10 + $0x88] sm:$0xff] }
 0x4dd   : > { %v5809_v48 = vld [vmem:[%s7846_s10 + $0x20] sm:$0xff]  ;;  %v5394_v57 = vpop.permute.xlu0 %5393 }
 0x4de   : > { %v5969_v41 = vadd.f32 %v5878_v61, %v5809_v48  ;;  %5510 = vst.msk [vmem:[%s7846_s10 + $0x50] sm:$0xff] %vm5499_vm5, %v5477_v14  ;;  %v5478_v54 = vadd.f32 %v5394_v57, %v5318_v45 }
 0x4df   : > { %v5890_v30 = vpop.permute.xlu1 %5889 }
 0x4e0   : > { %v5810_v15 = vld [vmem:[%s7846_s10 + $0x28] sm:$0xff]  ;;  %6002 = vst.msk [vmem:[%s7846_s10 + $0x20] sm:$0xff] %vm5997_vm12, %v5969_v41 }
 0x4e1   : > { %v5970_v6 = vadd.f32 %v5880_v21, %v5810_v15  ;;  %5511 = vst.msk [vmem:[%s7846_s10 + $0x58] sm:$0xff] %vm5499_vm5, %v5478_v54  ;;  %v5892_v32 = vpop.permute.xlu0 %5891  ;;  %v5329_v15 = vld [vmem:[%s7846_s10 + $0xb0] sm:$0xff] }
 0x4e3   : > { %6003 = vst.msk [vmem:[%s7846_s10 + $0x28] sm:$0xff] %vm5997_vm12, %v5970_v6  ;;  %v5388_v34 = vpop.permute.xlu1 %5387 }
 0x4e4   : > { %v5475_v25 = vadd.f32 %v5388_v34, %v5315_v28  ;;  %v5330_v28 = vld [vmem:[%s7846_s10 + $0xb8] sm:$0xff] }
 0x4e5   : > { %v5815_v1 = vld [vmem:[%s7846_s10 + $0x50] sm:$0xff]  ;;  %v5390_v27 = vpop.permute.xlu0 %5389 }
 0x4e6   : > { %v5975_v37 = vadd.f32 %v5890_v30, %v5815_v1  ;;  %5508 = vst.msk [vmem:[%s7846_s10 + $0x40] sm:$0xff] %vm5499_vm5, %v5475_v25  ;;  %v5476_v20 = vadd.f32 %v5390_v27, %v5316_v36 }
 0x4e7   : > { %v5886_v5 = vpop.permute.xlu1 %5885 }
 0x4e8   : > { %v5816_v9 = vld [vmem:[%s7846_s10 + $0x58] sm:$0xff]  ;;  %6008 = vst.msk [vmem:[%s7846_s10 + $0x50] sm:$0xff] %vm5997_vm12, %v5975_v37 }
 0x4e9   : > { %v5976_v33 = vadd.f32 %v5892_v32, %v5816_v9  ;;  %5509 = vst.msk [vmem:[%s7846_s10 + $0x48] sm:$0xff] %vm5499_vm5, %v5476_v20  ;;  %v5888_v52 = vpop.permute.xlu0 %5887  ;;  %v5327_v9 = vld [vmem:[%s7846_s10 + $0xa0] sm:$0xff] }
 0x4eb   : > { %6009 = vst.msk [vmem:[%s7846_s10 + $0x58] sm:$0xff] %vm5997_vm12, %v5976_v33  ;;  %v5400_v22 = vpop.permute.xlu1 %5399 }
 0x4ec   : > { %v5481_v23 = vadd.f32 %v5400_v22, %v5321_v29  ;;  %v5328_v29 = vld [vmem:[%s7846_s10 + $0xa8] sm:$0xff] }
 0x4ed   : > { %v5813_v51 = vld [vmem:[%s7846_s10 + $0x40] sm:$0xff]  ;;  %v5402_v0 = vpop.permute.xlu0 %5401 }
 0x4ee   : > { %v5973_v39 = vadd.f32 %v5886_v5, %v5813_v51  ;;  %5514 = vst.msk [vmem:[%s7846_s10 + $0x70] sm:$0xff] %vm5499_vm5, %v5481_v23  ;;  %v5482_v43 = vadd.f32 %v5402_v0, %v5322_v12 }
 0x4ef   : > { %v5898_v3 = vpop.permute.xlu1 %5897 }
 0x4f0   : > { %v5814_v50 = vld [vmem:[%s7846_s10 + $0x48] sm:$0xff]  ;;  %6006 = vst.msk [vmem:[%s7846_s10 + $0x40] sm:$0xff] %vm5997_vm12, %v5973_v39 }
 0x4f1   : > { %v5974_v42 = vadd.f32 %v5888_v52, %v5814_v50  ;;  %5515 = vst.msk [vmem:[%s7846_s10 + $0x78] sm:$0xff] %vm5499_vm5, %v5482_v43  ;;  %v5900_v59 = vpop.permute.xlu0 %5899  ;;  %v5333_v50 = vld [vmem:[%s7846_s10 + $0xd0] sm:$0xff] }
 0x4f3   : > { %6007 = vst.msk [vmem:[%s7846_s10 + $0x48] sm:$0xff] %vm5997_vm12, %v5974_v42  ;;  %v5396_v11 = vpop.permute.xlu1 %5395 }
 0x4f4   : > { %v5479_v55 = vadd.f32 %v5396_v11, %v5319_v8  ;;  %v5334_v8 = vld [vmem:[%s7846_s10 + $0xd8] sm:$0xff] }
 0x4f5   : > { %v5819_v60 = vld [vmem:[%s7846_s10 + $0x70] sm:$0xff]  ;;  %v5398_v7 = vpop.permute.xlu0 %5397 }
 0x4f6   : > { %v5979_v16 = vadd.f32 %v5898_v3, %v5819_v60  ;;  %5512 = vst.msk [vmem:[%s7846_s10 + $0x60] sm:$0xff] %vm5499_vm5, %v5479_v55  ;;  %v5480_v53 = vadd.f32 %v5398_v7, %v5320_v4  ;;  %v5331_v7 = vld [vmem:[%s7846_s10 + $0xc0] sm:$0xff] }
 0x4f7   : > { %v5894_v35 = vpop.permute.xlu1 %5893 }
 0x4f8   : > { %v5820_v19 = vld [vmem:[%s7846_s10 + $0x78] sm:$0xff]  ;;  %6012 = vst.msk [vmem:[%s7846_s10 + $0x70] sm:$0xff] %vm5997_vm12, %v5979_v16 }
 0x4f9   : > { %v5980_v31 = vadd.f32 %v5900_v59, %v5820_v19  ;;  %5513 = vst.msk [vmem:[%s7846_s10 + $0x68] sm:$0xff] %vm5499_vm5, %v5480_v53  ;;  %v5896_v63 = vpop.permute.xlu0 %5895 }
 0x4fb   : > { %6013 = vst.msk [vmem:[%s7846_s10 + $0x78] sm:$0xff] %vm5997_vm12, %v5980_v31  ;;  %v5408_v2 = vpop.permute.xlu1 %5407 }
 0x4fc   : > { %v5485_v44 = vadd.f32 %v5408_v2, %v5325_v56 }
 0x4fd   : > { %v5817_v17 = vld [vmem:[%s7846_s10 + $0x60] sm:$0xff]  ;;  %v5410_v18 = vpop.permute.xlu0 %5409 }
 0x4fe   : > { %v5977_v40 = vadd.f32 %v5894_v35, %v5817_v17  ;;  %5518 = vst.msk [vmem:[%s7846_s10 + $0x90] sm:$0xff] %vm5499_vm5, %v5485_v44  ;;  %v5486_v26 = vadd.f32 %v5410_v18, %v5326_v62  ;;  %v5332_v35 = vld [vmem:[%s7846_s10 + $0xc8] sm:$0xff]  ;;  %v5337_v44 = vld [vmem:[%s7846_s10 + $0xf0] sm:$0xff] }
 0x4ff   : > { %v5906_v58 = vpop.permute.xlu1 %5905 }
 0x500   : > { %v5818_v49 = vld [vmem:[%s7846_s10 + $0x68] sm:$0xff]  ;;  %6010 = vst.msk [vmem:[%s7846_s10 + $0x60] sm:$0xff] %vm5997_vm12, %v5977_v40  ;;  %v5338_v40 = vld [vmem:[%s7846_s10 + $0xf8] sm:$0xff] }
 0x501   : > { %v5978_v10 = vadd.f32 %v5896_v63, %v5818_v49  ;;  %5519 = vst.msk [vmem:[%s7846_s10 + $0x98] sm:$0xff] %vm5499_vm5, %v5486_v26  ;;  %v5908_v13 = vpop.permute.xlu0 %5907 }
 0x503   : > { %6011 = vst.msk [vmem:[%s7846_s10 + $0x68] sm:$0xff] %vm5997_vm12, %v5978_v10  ;;  %v5404_v61 = vpop.permute.xlu1 %5403 }
 0x504   : > { %v5483_v24 = vadd.f32 %v5404_v61, %v5323_v38 }
 0x505   : > { %v5823_v21 = vld [vmem:[%s7846_s10 + $0x90] sm:$0xff]  ;;  %v5406_v46 = vpop.permute.xlu0 %5405 }
 0x506   : > { %v5983_v14 = vadd.f32 %v5906_v58, %v5823_v21  ;;  %5516 = vst.msk [vmem:[%s7846_s10 + $0x80] sm:$0xff] %vm5499_vm5, %v5483_v24  ;;  %v5484_v48 = vadd.f32 %v5406_v46, %v5324_v47  ;;  %v5336_v21 = vld [vmem:[%s7846_s10 + $0xe8] sm:$0xff] }
 0x507   : > { %v5902_v57 = vpop.permute.xlu1 %5901 }
 0x508   : > { %v5824_v45 = vld [vmem:[%s7846_s10 + $0x98] sm:$0xff]  ;;  %6016 = vst.msk [vmem:[%s7846_s10 + $0x90] sm:$0xff] %vm5997_vm12, %v5983_v14 }
 0x509   : > { %v5984_v41 = vadd.f32 %v5908_v13, %v5824_v45  ;;  %5517 = vst.msk [vmem:[%s7846_s10 + $0x88] sm:$0xff] %vm5499_vm5, %v5484_v48  ;;  %v5904_v54 = vpop.permute.xlu0 %5903  ;;  %v5335_v13 = vld [vmem:[%s7846_s10 + $0xe0] sm:$0xff] }
 0x50b   : > { %6017 = vst.msk [vmem:[%s7846_s10 + $0x98] sm:$0xff] %vm5997_vm12, %v5984_v41  ;;  %v5416_v30 = vpop.permute.xlu1 %5415 }
 0x50c   : > { %v5489_v6 = vadd.f32 %v5416_v30, %v5329_v15 }
 0x50d   : > { %v5821_v32 = vld [vmem:[%s7846_s10 + $0x80] sm:$0xff]  ;;  %v5418_v34 = vpop.permute.xlu0 %5417 }
 0x50e   : > { %v5981_v25 = vadd.f32 %v5902_v57, %v5821_v32  ;;  %5522 = vst.msk [vmem:[%s7846_s10 + $0xb0] sm:$0xff] %vm5499_vm5, %v5489_v6  ;;  %v5490_v1 = vadd.f32 %v5418_v34, %v5330_v28 }
 0x50f   : > { %v5914_v27 = vpop.permute.xlu1 %5913 }
 0x510   : > { %v5822_v36 = vld [vmem:[%s7846_s10 + $0x88] sm:$0xff]  ;;  %6014 = vst.msk [vmem:[%s7846_s10 + $0x80] sm:$0xff] %vm5997_vm12, %v5981_v25 }
 0x511   : > { %v5982_v37 = vadd.f32 %v5904_v54, %v5822_v36  ;;  %5523 = vst.msk [vmem:[%s7846_s10 + $0xb8] sm:$0xff] %vm5499_vm5, %v5490_v1  ;;  %v5916_v20 = vpop.permute.xlu0 %5915 }
 0x513   : > { %6015 = vst.msk [vmem:[%s7846_s10 + $0x88] sm:$0xff] %vm5997_vm12, %v5982_v37  ;;  %v5412_v5 = vpop.permute.xlu1 %5411 }
 0x514   : > { %v5487_v33 = vadd.f32 %v5412_v5, %v5327_v9 }
 0x515   : > { %v5827_v52 = vld [vmem:[%s7846_s10 + $0xb0] sm:$0xff]  ;;  %v5414_v22 = vpop.permute.xlu0 %5413 }
 0x516   : > { %v5987_v23 = vadd.f32 %v5914_v27, %v5827_v52  ;;  %5520 = vst.msk [vmem:[%s7846_s10 + $0xa0] sm:$0xff] %vm5499_vm5, %v5487_v33  ;;  %v5488_v51 = vadd.f32 %v5414_v22, %v5328_v29 }
 0x517   : > { %v5910_v0 = vpop.permute.xlu1 %5909 }
 0x518   : > { %v5828_v12 = vld [vmem:[%s7846_s10 + $0xb8] sm:$0xff]  ;;  %6020 = vst.msk [vmem:[%s7846_s10 + $0xb0] sm:$0xff] %vm5997_vm12, %v5987_v23 }
 0x519   : > { %v5988_v39 = vadd.f32 %v5916_v20, %v5828_v12  ;;  %5521 = vst.msk [vmem:[%s7846_s10 + $0xa8] sm:$0xff] %vm5499_vm5, %v5488_v51  ;;  %v5912_v43 = vpop.permute.xlu0 %5911 }
 0x51b   : > { %6021 = vst.msk [vmem:[%s7846_s10 + $0xb8] sm:$0xff] %vm5997_vm12, %v5988_v39  ;;  %v5424_v3 = vpop.permute.xlu1 %5423 }
 0x51c   : > { %v5493_v42 = vadd.f32 %v5424_v3, %v5333_v50 }
 0x51d   : > { %v5825_v59 = vld [vmem:[%s7846_s10 + $0xa0] sm:$0xff]  ;;  %v5426_v11 = vpop.permute.xlu0 %5425 }
 0x51e   : > { %v5985_v55 = vadd.f32 %v5910_v0, %v5825_v59  ;;  %5526 = vst.msk [vmem:[%s7846_s10 + $0xd0] sm:$0xff] %vm5499_vm5, %v5493_v42  ;;  %v5494_v60 = vadd.f32 %v5426_v11, %v5334_v8 }
 0x51f   : > { %v5420_v16 = vpop.permute.xlu1 %5419 }
 0x520   : > { %v5826_v4 = vld [vmem:[%s7846_s10 + $0xa8] sm:$0xff]  ;;  %6018 = vst.msk [vmem:[%s7846_s10 + $0xa0] sm:$0xff] %vm5997_vm12, %v5985_v55  ;;  %v5491_v19 = vadd.f32 %v5420_v16, %v5331_v7 }
 0x521   : > { %v5986_v53 = vadd.f32 %v5912_v43, %v5826_v4  ;;  %5527 = vst.msk [vmem:[%s7846_s10 + $0xd8] sm:$0xff] %vm5499_vm5, %v5494_v60  ;;  %v5422_v31 = vpop.permute.xlu0 %5421 }
 0x522   : > { %5524 = vst.msk [vmem:[%s7846_s10 + $0xc0] sm:$0xff] %vm5499_vm5, %v5491_v19  ;;  %v5492_v63 = vadd.f32 %v5422_v31, %v5332_v35 }
 0x523   : > { %6019 = vst.msk [vmem:[%s7846_s10 + $0xa8] sm:$0xff] %vm5997_vm12, %v5986_v53  ;;  %v5918_v56 = vpop.permute.xlu1 %5917 }
 0x524   : > { %5525 = vst.msk [vmem:[%s7846_s10 + $0xc8] sm:$0xff] %vm5499_vm5, %v5492_v63 }
 0x525   : > { %v5920_v2 = vpop.permute.xlu0 %5919  ;;  %v5831_v14 = vld [vmem:[%s7846_s10 + $0xd0] sm:$0xff] }
 0x527   : > { %v5432_v17 = vpop.permute.xlu1 %5431 }
 0x528   : > { %v5497_v62 = vadd.f32 %v5432_v17, %v5337_v44  ;;  %v5832_v57 = vld [vmem:[%s7846_s10 + $0xd8] sm:$0xff] }
 0x529   : > { %v5829_v18 = vld [vmem:[%s7846_s10 + $0xc0] sm:$0xff]  ;;  %v5434_v26 = vpop.permute.xlu0 %5433 }
 0x52a   : > { %v5989_v49 = vadd.f32 %v5918_v56, %v5829_v18  ;;  %5530 = vst.msk [vmem:[%s7846_s10 + $0xf0] sm:$0xff] %vm5499_vm5, %v5497_v62  ;;  %v5498_v58 = vadd.f32 %v5434_v26, %v5338_v40 }
 0x52b   : > { %v5830_v10 = vld [vmem:[%s7846_s10 + $0xc8] sm:$0xff]  ;;  %v5428_v38 = vpop.permute.xlu1 %5427 }
 0x52c   : > { %6022 = vst.msk [vmem:[%s7846_s10 + $0xc0] sm:$0xff] %vm5997_vm12, %v5989_v49  ;;  %v5990_v61 = vadd.f32 %v5920_v2, %v5830_v10  ;;  %v5495_v24 = vadd.f32 %v5428_v38, %v5335_v13 }
 0x52d   : > { %5531 = vst.msk [vmem:[%s7846_s10 + $0xf8] sm:$0xff] %vm5499_vm5, %v5498_v58  ;;  %v5430_v47 = vpop.permute.xlu0 %5429 }
 0x52e   : > { %6023 = vst.msk [vmem:[%s7846_s10 + $0xc8] sm:$0xff] %vm5997_vm12, %v5990_v61  ;;  %v5496_v46 = vadd.f32 %v5430_v47, %v5336_v21 }
 0x52f   : > { %5528 = vst.msk [vmem:[%s7846_s10 + $0xe0] sm:$0xff] %vm5499_vm5, %v5495_v24  ;;  %v5922_v48 = vpop.permute.xlu1 %5921 }
 0x530   : > { %5529 = vst.msk [vmem:[%s7846_s10 + $0xe8] sm:$0xff] %vm5499_vm5, %v5496_v46  ;;  %v5991_v45 = vadd.f32 %v5922_v48, %v5831_v14 }
 0x531   : > { %v5924_v41 = vpop.permute.xlu0 %5923  ;;  %v5835_v34 = vld [vmem:[%s7846_s10 + $0xf0] sm:$0xff] }
 0x532   : > { %6024 = vst.msk [vmem:[%s7846_s10 + $0xd0] sm:$0xff] %vm5997_vm12, %v5991_v45  ;;  %v5992_v54 = vadd.f32 %v5924_v41, %v5832_v57 }
 0x533   : > { %v5926_v15 = vpop.permute.xlu1 %5925 }
 0x534   : > { %6025 = vst.msk [vmem:[%s7846_s10 + $0xd8] sm:$0xff] %vm5997_vm12, %v5992_v54  ;;  %v5836_v27 = vld [vmem:[%s7846_s10 + $0xf8] sm:$0xff] }
 0x535   : > { %v5928_v6 = vpop.permute.xlu0 %5927 }
 0x536   : > { %v5833_v30 = vld [vmem:[%s7846_s10 + $0xe0] sm:$0xff] }
 0x537   : > { %v5993_v32 = vadd.f32 %v5926_v15, %v5833_v30  ;;  %v5834_v28 = vld [vmem:[%s7846_s10 + $0xe8] sm:$0xff]  ;;  %v5930_v25 = vpop.permute.xlu1 %5929 }
 0x538   : > { %v5994_v1 = vadd.f32 %v5928_v6, %v5834_v28  ;;  %v5995_v36 = vadd.f32 %v5930_v25, %v5835_v34 }
 0x539   : > { %6026 = vst.msk [vmem:[%s7846_s10 + $0xe0] sm:$0xff] %vm5997_vm12, %v5993_v32  ;;  %v5932_v37 = vpop.permute.xlu0 %5931 }
 0x53a   : > { %6027 = vst.msk [vmem:[%s7846_s10 + $0xe8] sm:$0xff] %vm5997_vm12, %v5994_v1  ;;  %6028 = vst.msk [vmem:[%s7846_s10 + $0xf0] sm:$0xff] %vm5997_vm12, %v5995_v36  ;;  %v5996_v20 = vadd.f32 %v5932_v37, %v5836_v27 }
 0x53c   : > { %6029 = vst.msk [vmem:[%s7846_s10 + $0xf8] sm:$0xff] %vm5997_vm12, %v5996_v20 }
 0x53d PF: > { %s20_s22 = sadd.s32 1, %s7695_s22   ;;  %s12743_s20 = smov %s7691_s21 }
 0x53e   : > { %p17_p11 = scmp.ge.s32.totalorder %s20_s22, 4   ;;  %s12744_s21 = smov %s12746_s0 }
 0x540   :  { %19 = sbr.rel (!%p17_p11) target bundleno = 17 (0x11), region = 76 }

</bundles_post_ra>
